<compile_context>
chip_gen: v7x
topology: tpu7x:2x2x1
jax: 0.10.0
libtpu: 0.0.40
codegen_flags: <defaults>
</compile_context>

<pallas_src>
import functools

import jax
import jax.numpy as jnp
from jax.experimental import pallas as pl
from jax.experimental.pallas import tpu as pltpu


# ----------------------------- Pallas kernel --------------------------------
def _convt_mm_kernel(a_ref, w_ref, b_ref, o_ref, *, act):
    # a_ref: (Cin, BW)        activation tile, spatial dim in lanes (dense)
    # w_ref: (Cout*k*k, Cin)  weight slab (constant index_map -> loaded once)
    # b_ref: (Cout*k*k, 1)    bias column
    # o_ref: (Cout*k*k, BW)   output tile (lane-dense stores)
    y = jnp.dot(w_ref[...], a_ref[...], preferred_element_type=jnp.float32)
    y = y + b_ref[...]
    if act == "relu_sigmoid":            # conv1 path: sigmoid(relu(x))
        y = jax.nn.sigmoid(jnp.maximum(y, 0.0))
    elif act == "relu":
        y = jnp.maximum(y, 0.0)
    elif act == "sigmoid":
        y = jax.nn.sigmoid(y)
    elif act == "tanh":
        y = jnp.tanh(y)
    o_ref[...] = y.astype(o_ref.dtype)


def convt_matmul(a, w, b, act, spatial_tile=None):
    """y = act(w @ a + b); a:(Cin,S) spatial-in-lanes, w:(R,Cin), b:(R,1)."""
    cin, s = a.shape
    r, _ = w.shape
    if spatial_tile is None or spatial_tile >= s:
        bw = s                      # single grid step, whole problem in VMEM
    else:
        bw = spatial_tile           # multiple of 128 -> unmasked lane stores
    grid = (pl.cdiv(s, bw),)
    kern = functools.partial(_convt_mm_kernel, act=act)
    return pl.pallas_call(
        kern,
        out_shape=jax.ShapeDtypeStruct((r, s), jnp.float32),
        grid=grid,
        in_specs=[
            pl.BlockSpec((cin, bw), lambda i: (0, i)),   # activations
            pl.BlockSpec((r, cin), lambda i: (0, 0)),    # weights (resident)
            pl.BlockSpec((r, 1), lambda i: (0, 0)),      # bias (resident)
        ],
        out_specs=pl.BlockSpec((r, bw), lambda i: (0, i)),
        compiler_params=pltpu.CompilerParams(dimension_semantics=("parallel",)),
    )(a, w, b)


# --------------------------- layer wrapper (glue) ----------------------------
def conv_transpose_k_eq_s(a, h, wd, weight, bias, *, stride, padding, act,
                          spatial_tile=None):
    """ConvTranspose2d with kernel_size == stride (non-overlapping scatter).

    a:      (Cin, H*W) activations, spatial flattened h-major, lane-dense
    weight: (Cin, Cout, k, k)  (PyTorch ConvTranspose2d layout)
    bias:   (Cout,)
    Returns (Cout, Ho*Wo), Ho, Wo.
    """
    cin, cout, k, _ = weight.shape
    assert k == stride
    # Weight rows ordered (co, kh, kw); contraction over Cin.
    wm = jnp.transpose(weight, (1, 2, 3, 0)).reshape(cout * k * k, cin)
    bm = jnp.repeat(bias, k * k).reshape(cout * k * k, 1)

    # Hot path: matmul + bias + activation in the Pallas kernel.
    y = convt_matmul(a, wm, bm, act, spatial_tile)        # (Cout*k*k, H*W)

    # Pixel-shuffle + crop glue: one fused XLA transpose/copy per layer.
    y = y.reshape(cout, k, k, h, wd)                      # (co, kh, kw, h, w)
    y = jnp.transpose(y, (0, 3, 1, 4, 2)).reshape(cout, h * k, wd * k)
    ho = h * k - 2 * padding
    wo = wd * k - 2 * padding
    y = y[:, padding:padding + ho, padding:padding + wo]
    return y.reshape(cout, ho * wo), ho, wo


# ------------------------------- full model ----------------------------------
def init_params(key):
    def conv_t_params(key, cin, cout, k):
        k1, k2 = jax.random.split(key)
        bound = 1.0 / jnp.sqrt(cin * k * k)
        w = jax.random.uniform(k1, (cin, cout, k, k), jnp.float32, -bound, bound)
        b = jax.random.uniform(k2, (cout,), jnp.float32, -bound, bound)
        return w, b

    ks = jax.random.split(key, 4)
    return {
        "conv1": conv_t_params(ks[0], 3, 16, 2),
        "conv2": conv_t_params(ks[1], 16, 8, 3),
        "conv3": conv_t_params(ks[2], 8, 4, 4),
        "conv4": conv_t_params(ks[3], 4, 2, 4),
    }


@jax.jit
def model_forward(params, x1):
    n, cin, h, wd = x1.shape
    a = x1[0].reshape(cin, h * wd)                         # (Cin, H*W), free reshape
    w1, b1 = params["conv1"]
    w2, b2 = params["conv2"]
    w3, b3 = params["conv3"]
    w4, b4 = params["conv4"]
    # conv1 -> relu -> sigmoid
    a, h, wd = conv_transpose_k_eq_s(a, h, wd, w1, b1, stride=2, padding=3,
                                     act="relu_sigmoid")
    # conv2 -> relu
    a, h, wd = conv_transpose_k_eq_s(a, h, wd, w2, b2, stride=3, padding=4,
                                     act="relu")
    # conv3 -> sigmoid
    a, h, wd = conv_transpose_k_eq_s(a, h, wd, w3, b3, stride=4, padding=0,
                                     act="sigmoid")
    # conv4 -> tanh   (S = 78400 -> 8 parallel lane tiles of 9984, last masked)
    a, h, wd = conv_transpose_k_eq_s(a, h, wd, w4, b4, stride=4, padding=1,
                                     act="tanh", spatial_tile=9984)
    cout = a.shape[0]
    return a.reshape(1, cout, h, wd)


if __name__ == "__main__":
    key = jax.random.PRNGKey(0)
    pkey, xkey = jax.random.split(key)
    params = init_params(pkey)

    # Small input consistent with the module (PyTorch example uses 1x3x128x128).
    x1 = jax.random.normal(xkey, (1, 3, 16, 16), jnp.float32)

    out = model_forward(params, x1)
    out = jax.block_until_ready(out)

    # Shape check: H=16 -> 26 -> 70 -> 280 -> 1118, channels 3->16->8->4->2.
    assert out.shape == (1, 2, 1118, 1118), out.shape
    assert bool(jnp.all(jnp.isfinite(out)))
    print("KERNEL_OK")
</pallas_src>

<mosaic_0001>
module attributes {stable_mosaic.version = 11 : i64} {
  func.func @_convt_mm_kernel(%arg0: i32, %arg1: memref<3x256xf32, #tpu.memory_space<vmem>>, %arg2: memref<64x3xf32, #tpu.memory_space<vmem>>, %arg3: memref<64x1xf32, #tpu.memory_space<vmem>>, %arg4: memref<64x256xf32, #tpu.memory_space<vmem>>) attributes {dimension_semantics = [#tpu.dimension_semantics<parallel>], iteration_bounds = array<i64: 1>, scalar_prefetch = 0 : i64, scratch_operands = 0 : i64, tpu.core_type = #tpu.core_type<tc>, window_params = [{transform_indices = @transform_0, window_bounds = array<i64: 3, 256>}, {pipeline_mode = #tpu.pipeline_mode<synchronous>, transform_indices = @transform_1, window_bounds = array<i64: 64, 3>}, {pipeline_mode = #tpu.pipeline_mode<synchronous>, transform_indices = @transform_2, window_bounds = array<i64: 64, 1>}, {transform_indices = @transform_3, window_bounds = array<i64: 64, 256>}]} {
    %c0 = arith.constant 0 : index
    %c0_0 = arith.constant 0 : index
    %0 = vector.load %arg2[%c0, %c0_0] : memref<64x3xf32, #tpu.memory_space<vmem>>, vector<64x3xf32>
    %c0_1 = arith.constant 0 : index
    %c0_2 = arith.constant 0 : index
    %1 = vector.load %arg1[%c0_1, %c0_2] : memref<3x256xf32, #tpu.memory_space<vmem>>, vector<3x256xf32>
    %cst = arith.constant dense<0.000000e+00> : vector<64x256xf32>
    %2 = tpu.matmul %0, %1, %cst {dimension_numbers = #tpu.dot_dimension_numbers<[1], [0], [0], [1], [0, 0, 1, 1], [], []>} : vector<64x3xf32>, vector<3x256xf32>, vector<64x256xf32> -> vector<64x256xf32>
    %c0_3 = arith.constant 0 : index
    %c0_4 = arith.constant 0 : index
    %3 = vector.load %arg3[%c0_3, %c0_4] : memref<64x1xf32, #tpu.memory_space<vmem>>, vector<64x1xf32>
    %4 = vector.broadcast %3 : vector<64x1xf32> to vector<64x256xf32>
    %5 = arith.addf %2, %4 : vector<64x256xf32>
    %cst_5 = arith.constant 0.000000e+00 : f32
    %6 = vector.broadcast %cst_5 : f32 to vector<64x256xf32>
    %7 = arith.maximumf %5, %6 : vector<64x256xf32>
    %8 = arith.negf %7 : vector<64x256xf32>
    %9 = math.exp %8 : vector<64x256xf32>
    %cst_6 = arith.constant 1.000000e+00 : f32
    %10 = vector.broadcast %cst_6 : f32 to vector<64x256xf32>
    %11 = arith.addf %10, %9 : vector<64x256xf32>
    %12 = arith.divf %10, %11 : vector<64x256xf32>
    %c0_7 = arith.constant 0 : index
    %c0_8 = arith.constant 0 : index
    %13 = vector.load %arg4[%c0_7, %c0_8] : memref<64x256xf32, #tpu.memory_space<vmem>>, vector<64x256xf32>
    tpu.vector_store %arg4[%c0_7, %c0_8], %12 {strides = array<i32>} : memref<64x256xf32, #tpu.memory_space<vmem>>, vector<64x256xf32>,
    return
  }
  func.func @transform_0(%arg0: i32) -> (i32, i32) {
    %c0_i32 = arith.constant 0 : i32
    %c0_i32_0 = arith.constant 0 : i32
    return %c0_i32, %arg0 : i32, i32
  }
  func.func @transform_1(%arg0: i32) -> (i32, i32) {
    %c0_i32 = arith.constant 0 : i32
    %c0_i32_0 = arith.constant 0 : i32
    %c0_i32_1 = arith.constant 0 : i32
    return %c0_i32, %c0_i32_0 : i32, i32
  }
  func.func @transform_2(%arg0: i32) -> (i32, i32) {
    %c0_i32 = arith.constant 0 : i32
    %c0_i32_0 = arith.constant 0 : i32
    %c0_i32_1 = arith.constant 0 : i32
    return %c0_i32, %c0_i32_0 : i32, i32
  }
  func.func @transform_3(%arg0: i32) -> (i32, i32) {
    %c0_i32 = arith.constant 0 : i32
    %c0_i32_0 = arith.constant 0 : i32
    return %c0_i32, %arg0 : i32, i32
  }
}

module attributes {stable_mosaic.version = 11 : i64} {
  func.func @_convt_mm_kernel(%arg0: i32, %arg1: memref<16x676xf32, #tpu.memory_space<vmem>>, %arg2: memref<72x16xf32, #tpu.memory_space<vmem>>, %arg3: memref<72x1xf32, #tpu.memory_space<vmem>>, %arg4: memref<72x676xf32, #tpu.memory_space<vmem>>) attributes {dimension_semantics = [#tpu.dimension_semantics<parallel>], iteration_bounds = array<i64: 1>, scalar_prefetch = 0 : i64, scratch_operands = 0 : i64, tpu.core_type = #tpu.core_type<tc>, window_params = [{transform_indices = @transform_0, window_bounds = array<i64: 16, 676>}, {pipeline_mode = #tpu.pipeline_mode<synchronous>, transform_indices = @transform_1, window_bounds = array<i64: 72, 16>}, {pipeline_mode = #tpu.pipeline_mode<synchronous>, transform_indices = @transform_2, window_bounds = array<i64: 72, 1>}, {transform_indices = @transform_3, window_bounds = array<i64: 72, 676>}]} {
    %c0 = arith.constant 0 : index
    %c0_0 = arith.constant 0 : index
    %0 = vector.load %arg2[%c0, %c0_0] : memref<72x16xf32, #tpu.memory_space<vmem>>, vector<72x16xf32>
    %c0_1 = arith.constant 0 : index
    %c0_2 = arith.constant 0 : index
    %1 = vector.load %arg1[%c0_1, %c0_2] : memref<16x676xf32, #tpu.memory_space<vmem>>, vector<16x676xf32>
    %cst = arith.constant dense<0.000000e+00> : vector<72x676xf32>
    %2 = tpu.matmul %0, %1, %cst {dimension_numbers = #tpu.dot_dimension_numbers<[1], [0], [0], [1], [0, 0, 1, 1], [], []>} : vector<72x16xf32>, vector<16x676xf32>, vector<72x676xf32> -> vector<72x676xf32>
    %c0_3 = arith.constant 0 : index
    %c0_4 = arith.constant 0 : index
    %3 = vector.load %arg3[%c0_3, %c0_4] : memref<72x1xf32, #tpu.memory_space<vmem>>, vector<72x1xf32>
    %4 = vector.broadcast %3 : vector<72x1xf32> to vector<72x676xf32>
    %5 = arith.addf %2, %4 : vector<72x676xf32>
    %cst_5 = arith.constant 0.000000e+00 : f32
    %6 = vector.broadcast %cst_5 : f32 to vector<72x676xf32>
    %7 = arith.maximumf %5, %6 : vector<72x676xf32>
    %c0_6 = arith.constant 0 : index
    %c0_7 = arith.constant 0 : index
    %8 = vector.load %arg4[%c0_6, %c0_7] : memref<72x676xf32, #tpu.memory_space<vmem>>, vector<72x676xf32>
    tpu.vector_store %arg4[%c0_6, %c0_7], %7 {strides = array<i32>} : memref<72x676xf32, #tpu.memory_space<vmem>>, vector<72x676xf32>,
    return
  }
  func.func @transform_0(%arg0: i32) -> (i32, i32) {
    %c0_i32 = arith.constant 0 : i32
    %c0_i32_0 = arith.constant 0 : i32
    return %c0_i32, %arg0 : i32, i32
  }
  func.func @transform_1(%arg0: i32) -> (i32, i32) {
    %c0_i32 = arith.constant 0 : i32
    %c0_i32_0 = arith.constant 0 : i32
    %c0_i32_1 = arith.constant 0 : i32
    return %c0_i32, %c0_i32_0 : i32, i32
  }
  func.func @transform_2(%arg0: i32) -> (i32, i32) {
    %c0_i32 = arith.constant 0 : i32
    %c0_i32_0 = arith.constant 0 : i32
    %c0_i32_1 = arith.constant 0 : i32
    return %c0_i32, %c0_i32_0 : i32, i32
  }
  func.func @transform_3(%arg0: i32) -> (i32, i32) {
    %c0_i32 = arith.constant 0 : i32
    %c0_i32_0 = arith.constant 0 : i32
    return %c0_i32, %arg0 : i32, i32
  }
}

module attributes {stable_mosaic.version = 11 : i64} {
  func.func @_convt_mm_kernel(%arg0: i32, %arg1: memref<8x4900xf32, #tpu.memory_space<vmem>>, %arg2: memref<64x8xf32, #tpu.memory_space<vmem>>, %arg3: memref<64x1xf32, #tpu.memory_space<vmem>>, %arg4: memref<64x4900xf32, #tpu.memory_space<vmem>>) attributes {dimension_semantics = [#tpu.dimension_semantics<parallel>], iteration_bounds = array<i64: 1>, scalar_prefetch = 0 : i64, scratch_operands = 0 : i64, tpu.core_type = #tpu.core_type<tc>, window_params = [{transform_indices = @transform_0, window_bounds = array<i64: 8, 4900>}, {pipeline_mode = #tpu.pipeline_mode<synchronous>, transform_indices = @transform_1, window_bounds = array<i64: 64, 8>}, {pipeline_mode = #tpu.pipeline_mode<synchronous>, transform_indices = @transform_2, window_bounds = array<i64: 64, 1>}, {transform_indices = @transform_3, window_bounds = array<i64: 64, 4900>}]} {
    %c0 = arith.constant 0 : index
    %c0_0 = arith.constant 0 : index
    %0 = vector.load %arg2[%c0, %c0_0] : memref<64x8xf32, #tpu.memory_space<vmem>>, vector<64x8xf32>
    %c0_1 = arith.constant 0 : index
    %c0_2 = arith.constant 0 : index
    %1 = vector.load %arg1[%c0_1, %c0_2] : memref<8x4900xf32, #tpu.memory_space<vmem>>, vector<8x4900xf32>
    %cst = arith.constant dense<0.000000e+00> : vector<64x4900xf32>
    %2 = tpu.matmul %0, %1, %cst {dimension_numbers = #tpu.dot_dimension_numbers<[1], [0], [0], [1], [0, 0, 1, 1], [], []>} : vector<64x8xf32>, vector<8x4900xf32>, vector<64x4900xf32> -> vector<64x4900xf32>
    %c0_3 = arith.constant 0 : index
    %c0_4 = arith.constant 0 : index
    %3 = vector.load %arg3[%c0_3, %c0_4] : memref<64x1xf32, #tpu.memory_space<vmem>>, vector<64x1xf32>
    %4 = vector.broadcast %3 : vector<64x1xf32> to vector<64x4900xf32>
    %5 = arith.addf %2, %4 : vector<64x4900xf32>
    %6 = arith.negf %5 : vector<64x4900xf32>
    %7 = math.exp %6 : vector<64x4900xf32>
    %cst_5 = arith.constant 1.000000e+00 : f32
    %8 = vector.broadcast %cst_5 : f32 to vector<64x4900xf32>
    %9 = arith.addf %8, %7 : vector<64x4900xf32>
    %10 = arith.divf %8, %9 : vector<64x4900xf32>
    %c0_6 = arith.constant 0 : index
    %c0_7 = arith.constant 0 : index
    %11 = vector.load %arg4[%c0_6, %c0_7] : memref<64x4900xf32, #tpu.memory_space<vmem>>, vector<64x4900xf32>
    tpu.vector_store %arg4[%c0_6, %c0_7], %10 {strides = array<i32>} : memref<64x4900xf32, #tpu.memory_space<vmem>>, vector<64x4900xf32>,
    return
  }
  func.func @transform_0(%arg0: i32) -> (i32, i32) {
    %c0_i32 = arith.constant 0 : i32
    %c0_i32_0 = arith.constant 0 : i32
    return %c0_i32, %arg0 : i32, i32
  }
  func.func @transform_1(%arg0: i32) -> (i32, i32) {
    %c0_i32 = arith.constant 0 : i32
    %c0_i32_0 = arith.constant 0 : i32
    %c0_i32_1 = arith.constant 0 : i32
    return %c0_i32, %c0_i32_0 : i32, i32
  }
  func.func @transform_2(%arg0: i32) -> (i32, i32) {
    %c0_i32 = arith.constant 0 : i32
    %c0_i32_0 = arith.constant 0 : i32
    %c0_i32_1 = arith.constant 0 : i32
    return %c0_i32, %c0_i32_0 : i32, i32
  }
  func.func @transform_3(%arg0: i32) -> (i32, i32) {
    %c0_i32 = arith.constant 0 : i32
    %c0_i32_0 = arith.constant 0 : i32
    return %c0_i32, %arg0 : i32, i32
  }
}

module attributes {stable_mosaic.version = 11 : i64} {
  func.func @_convt_mm_kernel(%arg0: i32, %arg1: memref<4x9984xf32, #tpu.memory_space<vmem>>, %arg2: memref<32x4xf32, #tpu.memory_space<vmem>>, %arg3: memref<32x1xf32, #tpu.memory_space<vmem>>, %arg4: memref<32x9984xf32, #tpu.memory_space<vmem>>) attributes {dimension_semantics = [#tpu.dimension_semantics<parallel>], iteration_bounds = array<i64: 8>, scalar_prefetch = 0 : i64, scratch_operands = 0 : i64, tpu.core_type = #tpu.core_type<tc>, window_params = [{transform_indices = @transform_0, window_bounds = array<i64: 4, 9984>}, {pipeline_mode = #tpu.pipeline_mode<synchronous>, transform_indices = @transform_1, window_bounds = array<i64: 32, 4>}, {pipeline_mode = #tpu.pipeline_mode<synchronous>, transform_indices = @transform_2, window_bounds = array<i64: 32, 1>}, {transform_indices = @transform_3, window_bounds = array<i64: 32, 9984>}]} {
    %c0 = arith.constant 0 : index
    %c0_0 = arith.constant 0 : index
    %0 = vector.load %arg2[%c0, %c0_0] : memref<32x4xf32, #tpu.memory_space<vmem>>, vector<32x4xf32>
    %c0_1 = arith.constant 0 : index
    %c0_2 = arith.constant 0 : index
    %1 = vector.load %arg1[%c0_1, %c0_2] : memref<4x9984xf32, #tpu.memory_space<vmem>>, vector<4x9984xf32>
    %cst = arith.constant dense<0.000000e+00> : vector<32x9984xf32>
    %2 = tpu.matmul %0, %1, %cst {dimension_numbers = #tpu.dot_dimension_numbers<[1], [0], [0], [1], [0, 0, 1, 1], [], []>} : vector<32x4xf32>, vector<4x9984xf32>, vector<32x9984xf32> -> vector<32x9984xf32>
    %c0_3 = arith.constant 0 : index
    %c0_4 = arith.constant 0 : index
    %3 = vector.load %arg3[%c0_3, %c0_4] : memref<32x1xf32, #tpu.memory_space<vmem>>, vector<32x1xf32>
    %4 = vector.broadcast %3 : vector<32x1xf32> to vector<32x9984xf32>
    %5 = arith.addf %2, %4 : vector<32x9984xf32>
    %6 = math.tanh %5 : vector<32x9984xf32>
    %c0_5 = arith.constant 0 : index
    %c0_6 = arith.constant 0 : index
    %7 = vector.load %arg4[%c0_5, %c0_6] : memref<32x9984xf32, #tpu.memory_space<vmem>>, vector<32x9984xf32>
    tpu.vector_store %arg4[%c0_5, %c0_6], %6 {strides = array<i32>} : memref<32x9984xf32, #tpu.memory_space<vmem>>, vector<32x9984xf32>,
    return
  }
  func.func @transform_0(%arg0: i32) -> (i32, i32) {
    %c0_i32 = arith.constant 0 : i32
    %c0_i32_0 = arith.constant 0 : i32
    return %c0_i32, %arg0 : i32, i32
  }
  func.func @transform_1(%arg0: i32) -> (i32, i32) {
    %c0_i32 = arith.constant 0 : i32
    %c0_i32_0 = arith.constant 0 : i32
    %c0_i32_1 = arith.constant 0 : i32
    return %c0_i32, %c0_i32_0 : i32, i32
  }
  func.func @transform_2(%arg0: i32) -> (i32, i32) {
    %c0_i32 = arith.constant 0 : i32
    %c0_i32_0 = arith.constant 0 : i32
    %c0_i32_1 = arith.constant 0 : i32
    return %c0_i32, %c0_i32_0 : i32, i32
  }
  func.func @transform_3(%arg0: i32) -> (i32, i32) {
    %c0_i32 = arith.constant 0 : i32
    %c0_i32_0 = arith.constant 0 : i32
    return %c0_i32, %arg0 : i32, i32
  }
}

</mosaic_0001>

<bundles_post_ra>
// kernel: squeeze.1
= control target key start
LH: loop header
LB: loop body
LE: loop exit
PB: predicated region body
PF: predicated region fallthrough
CT: control target
= control target key end

     0   :  { %2 = vsyncpa [#allocation1], 0  ;;  %s201_s6 = smov [#allocation0]   ;;  %s255_s0 = inlined_call_operand.hbm [shape: f32[1,3,16,16], index: 0, kind: input, shape index: {}]   ;;  %s256_s1 = inlined_call_operand.vmem [shape: f32[3,256], index: 1, kind: output, shape index: {}]  }
   0x1   :  { %s7_s7 = sshll.u32 %s201_s6, 4  ;;  %s177_s10 = scalar_lea.hbm %s255_s0, 768  ;;  %s8_s7 = int_to_ptr.vmem [resolvable:$true] %s7_s7 }
   0x2   :  { %p178_p0 = scmp.ne.s32.totalorder %s255_s0, %s177_s10  ;;  %p181_p1 = scmp.lt.u32.totalorder %s177_s10, %s255_s0 }
   0x4   :  { %p183_p2 = pnand %p181_p1, %p178_p0 }
   0x6   :  { %186 = shalt.err (!%p183_p2)
}
   0x7   :  { %s187_s15 = scalar_lea.vmem %s8_s7, 768  ;;  %p192_p4 = scmp.lt.s32.totalorder %s8_s7, %s8_s7 }
   0x8   :  { %p188_p3 = scmp.ne.s32.totalorder %s8_s7, %s187_s15  ;;  %p193_p5 = scmp.lt.s32.totalorder %s187_s15, %s187_s15 }
   0xa   :  { %p194_p6 = por %p193_p5, %p192_p4 }
   0xc   :  { %p195_p7 = pnand %p194_p6, %p188_p3 }
   0xe   :  { %198 = shalt.err (!%p195_p7)
}
   0xf   :  { %10 = dma.hbm_to_vmem [thread:$0]  %s255_s0, 768, %s8_s7, [#allocation1]  }
  0x10   :  { %199 = dma.done.wait [#allocation1], 768  }
  0x11   :  { %200 = vsyncadd [#allocation1], 4294966528  ;;  %s24_s0 = smov 3  ;;  %s27_s18 = smov 12  ;;  %vm29_vm0 = vcmask 1043458   ;;  %vm15_vm1 = vcmask 1045508  }
  0x12   :  { %s32_s19 = smov 48  ;;  %s62_s20 = smov 3  ;;  %v25_v0 = vld [vmem:[#allocation0 + $0x7] ss:$16 sm:%s24_s0]   ;;  %vm17_vm2 = vcmask 130048   ;;  %vm38_vm3 = vcmask 1048448  }
  0x13   :  { %s65_s21 = smov 12  ;;  %s70_s22 = smov 48  ;;  %v28_v1 = vld [vmem:[#allocation0 + $0x57] ss:$-24 sm:%s27_s18]   ;;  %v63_v4 = vld [vmem:[#allocation0 + $0x5] ss:$16 sm:%s62_s20]  }
  0x14   :  { %s43_s23 = smov 3  ;;  %s46_s24 = smov 12  ;;  %v33_v2 = vld [vmem:[#allocation0 - $0x21] ss:$16 sm:%s32_s19]   ;;  %v30_v3 = vsel %vm29_vm0, %v28_v1, %v25_v0  ;;  %v66_v5 = vld [vmem:[#allocation0 + $0x55] ss:$-24 sm:%s65_s21]  }
  0x15   :  { %s51_s25 = smov 48  ;;  %s81_s26 = smov 3  ;;  %v71_v6 = vld [vmem:[#allocation0 - $0x23] ss:$16 sm:%s70_s22]   ;;  %v35_v7 = vsel %vm15_vm1, %v33_v2, %v30_v3  ;;  %v68_v8 = vsel %vm29_vm0, %v66_v5, %v63_v4  ;;  %v44_v9 = vld [vmem:[#allocation0 + $0x6] ss:$16 sm:%s43_s23]  }
  0x16   :  { %s84_s27 = smov 12  ;;  %v47_v10 = vld [vmem:[#allocation0 + $0x56] ss:$-24 sm:%s46_s24]   ;;  %s202_s28 = smov 112   ;;  %v73_v12 = vsel %vm15_vm1, %v71_v6, %v68_v8  ;;  %v82_v14 = vld [vmem:[#allocation0 + $0x4] ss:$16 sm:%s81_s26]  }
  0x17   :  { %v52_v11 = vld [vmem:[#allocation0 - $0x22] ss:$16 sm:%s51_s25]   ;;  %36 = vrot.lane.b32.xlu0 %v35_v7, %s202_s28  ;;  %v49_v13 = vsel %vm29_vm0, %v47_v10, %v44_v9  ;;  %v85_v15 = vld [vmem:[#allocation0 + $0x54] ss:$-24 sm:%s84_s27]   ;;  %s89_s29 = smov 48  ;;  %s203_s30 = smov 80  }
  0x18   :  { %74 = vrot.lane.b32.xlu1 %v73_v12, %s203_s30  ;;  %v54_v16 = vsel %vm15_vm1, %v52_v11, %v49_v13  ;;  %v87_v17 = vsel %vm29_vm0, %v85_v15, %v82_v14  ;;  %v90_v18 = vld [vmem:[#allocation0 - $0x24] ss:$16 sm:%s89_s29]   ;;  %s100_s2 = smov 3  ;;  %s103_s3 = smov 12  ;;  %vm57_vm4 = vcmask 917248   ;;  %vm76_vm5 = vcmask 786048  }
  0x19   :  { %v92_v19 = vsel %vm15_vm1, %v90_v18, %v87_v17  ;;  %v101_v20 = vld [vmem:[#allocation0 + $0x3] ss:$16 sm:%s100_s2]   ;;  %s108_s4 = smov 48  ;;  %s119_s5 = smov 3  ;;  %vm95_vm6 = vcmask 654848   ;;  %vm114_vm7 = vcmask 523648  }
  0x1a   :  { %v104_v21 = vld [vmem:[#allocation0 + $0x53] ss:$-24 sm:%s103_s3]   ;;  %s122_s6 = smov 12  ;;  %s204_s7 = smov 96   ;;  %v120_v24 = vld [vmem:[#allocation0 + $0x2] ss:$16 sm:%s119_s5]  }
  0x1b   :  { %v106_v22 = vsel %vm29_vm0, %v104_v21, %v101_v20  ;;  %v109_v23 = vld [vmem:[#allocation0 - $0x25] ss:$16 sm:%s108_s4]   ;;  %55 = vrot.lane.b32.xlu0 %v54_v16, %s204_s7  ;;  %v123_v25 = vld [vmem:[#allocation0 + $0x52] ss:$-24 sm:%s122_s6]   ;;  %s127_s8 = smov 48  ;;  %s205_s9 = smov 64  }
  0x1c   :  { %93 = vrot.lane.b32.xlu1 %v92_v19, %s205_s9  ;;  %v111_v26 = vsel %vm15_vm1, %v109_v23, %v106_v22  ;;  %v125_v27 = vsel %vm29_vm0, %v123_v25, %v120_v24  ;;  %v128_v28 = vld [vmem:[#allocation0 - $0x26] ss:$16 sm:%s127_s8]   ;;  %s138_s10 = smov 3  ;;  %s141_s11 = smov 12  ;;  %vm133_vm8 = vcmask 392448   ;;  %vm152_vm9 = vcmask 261248  }
  0x1d   :  { %v130_v29 = vsel %vm15_vm1, %v128_v28, %v125_v27  ;;  %v139_v30 = vld [vmem:[#allocation0 + $0x1] ss:$16 sm:%s138_s10]   ;;  %s146_s12 = smov 48  ;;  %s13_s13 = smov 48 }
  0x1e   :  { %v142_v31 = vld [vmem:[#allocation0 + $0x51] ss:$-24 sm:%s141_s11]   ;;  %v12_v34 = vld [vmem:[#allocation0] ss:$8 sm:$0xf]   ;;  %s206_s14 = smov 48  }
  0x1f   :  { %v144_v32 = vsel %vm29_vm0, %v142_v31, %v139_v30  ;;  %v147_v33 = vld [vmem:[#allocation0 - $0x27] ss:$16 sm:%s146_s12]   ;;  %112 = vrot.lane.b32.xlu0 %v111_v26, %s206_s14  ;;  %v14_v35 = vld [vmem:[#allocation0] ss:$8 sm:%s13_s13]   ;;  %s207_s15 = smov 32   ;;  %s208_s16 = smov 16  }
  0x20   :  { %131 = vrot.lane.b32.xlu1 %v130_v29, %s207_s15  ;;  %v149_v36 = vsel %vm15_vm1, %v147_v33, %v144_v32  ;;  %v16_v37 = vsel %vm15_vm1, %v14_v35, %v12_v34 }
  0x21   :  { %18 = vst.msk [vmem:[#allocation2] ss:$8 sm:$0x3] %vm17_vm2, %v16_v37   ;;  %20 = vst.msk [vmem:[#allocation2 - $0xf] ss:$8 sm:$0xc] %vm17_vm2, %v16_v37  }
  0x22   :  { %22 = vst.msk [vmem:[#allocation2 - $0x1e] ss:$8 sm:$0x30] %vm17_vm2, %v16_v37  }
  0x23   :  { %150 = vrot.lane.b32.xlu0 %v149_v36, %s208_s16 }
  0x89   :  { %v37_v38 = vpop.permute.xlu0 %36  }
  0x8a   :  { %v75_v39 = vpop.permute.xlu1 %74   ;;  %39 = vst.msk [vmem:[#allocation2] sm:$0x7] %vm38_vm3, %v37_v38   ;;  %41 = vst.msk [vmem:[#allocation2 + $0x5] sm:$0x38] %vm38_vm3, %v37_v38  }
  0x8d   :  { %v56_v40 = vpop.permute.xlu0 %55  }
  0x8e   :  { %58 = vst.msk [vmem:[#allocation2] sm:$0x7] %vm57_vm4, %v56_v40   ;;  %60 = vst.msk [vmem:[#allocation2 + $0x5] sm:$0x38] %vm57_vm4, %v56_v40   ;;  %v94_v41 = vpop.permute.xlu1 %93  }
  0x8f   :  { %77 = vst.msk [vmem:[#allocation2] sm:$0x7] %vm76_vm5, %v75_v39   ;;  %79 = vst.msk [vmem:[#allocation2 + $0x5] sm:$0x38] %vm76_vm5, %v75_v39  }
  0x90   :  { %96 = vst.msk [vmem:[#allocation2] sm:$0x7] %vm95_vm6, %v94_v41   ;;  %98 = vst.msk [vmem:[#allocation2 + $0x5] sm:$0x38] %vm95_vm6, %v94_v41  }
  0x91   :  { %v113_v42 = vpop.permute.xlu0 %112  }
  0x92   :  { %115 = vst.msk [vmem:[#allocation2] sm:$0x7] %vm114_vm7, %v113_v42   ;;  %117 = vst.msk [vmem:[#allocation2 + $0x5] sm:$0x38] %vm114_vm7, %v113_v42   ;;  %v132_v43 = vpop.permute.xlu1 %131  }
  0x93   :  { %134 = vst.msk [vmem:[#allocation2] sm:$0x7] %vm133_vm8, %v132_v43   ;;  %136 = vst.msk [vmem:[#allocation2 + $0x5] sm:$0x38] %vm133_vm8, %v132_v43  }
  0x95   :  { %v151_v44 = vpop.permute.xlu0 %150  }
  0x96   :  { %153 = vst.msk [vmem:[#allocation2] sm:$0x7] %vm152_vm9, %v151_v44   ;;  %155 = vst.msk [vmem:[#allocation2 + $0x5] sm:$0x38] %vm152_vm9, %v151_v44  }
  0x9d   :  { %v159_v45 = vld [vmem:[#allocation2] sm:$0xf]  ;;  %v163_v46 = vld [vmem:[#allocation2 + $0x8] sm:$0xf] }
  0x9e   :  { %161 = vst [vmem:[%s256_s1] sm:$0xf] %v159_v45  ;;  %168 = vst [vmem:[%s256_s1 + $0x4] sm:$0xf] %v163_v46 }
  0x9f   :  { %167 = vsyncpa [#allocation1], 1 }

// kernel: model_forward.4
= control target key start
LH: loop header
LB: loop body
LE: loop exit
PB: predicated region body
PF: predicated region fallthrough
CT: control target
= control target key end

     0   :  { %vm98_vm0 = vcmask 1042432   ;;  %v445_v1 = vmov 0.0   ;;  %v446_v3 = vmov 0   ;;  %vm73_vm1 = vcmask 23552   ;;  %s578_s0 = inlined_call_operand.vmem [shape: f32[3,256], index: 0, kind: input, shape index: {}]   ;;  %s579_s1 = inlined_call_operand.vmem [shape: f32[64,3], index: 1, kind: input, shape index: {}]   ;;  %s580_s2 = inlined_call_operand.vmem [shape: f32[64,1], index: 2, kind: input, shape index: {}]   ;;  %s581_s3 = inlined_call_operand.vmem [shape: f32[64,256], index: 3, kind: output, shape index: {}]  }
   0x1   :  { %v22_v0 = vld [vmem:[%s578_s0] sm:$0x77]  ;;  %167 = vmatprep.mubr.f32.mxu0 %v445_v1  ;;  %191 = vmatprep.mubr.f32.mxu1 %v445_v1  ;;  %v25_v6 = vld [vmem:[%s580_s2 + $0x10] sm:$0xff]  ;;  %v15_v8 = vld [vmem:[%s579_s1 + $0x8] sm:$0xff] }
   0x2   :  { %v72_v2 = vcombine.high %v22_v0, %v22_v0  ;;  %379 = vset.pattern.permute.xlu1 %v446_v3  ;;  %378 = vset.pattern.permute.xlu0 %v446_v3  ;;  %v14_v4 = vld [vmem:[%s579_s1] sm:$0xff]  ;;  %v19_v9 = vld [vmem:[%s579_s1 + $0x28] sm:$0xff]  ;;  %v26_v10 = vld [vmem:[%s580_s2 + $0x18] sm:$0xff] }
   0x3   :  { %v18_v5 = vld [vmem:[%s579_s1 + $0x20] sm:$0xff]  ;;  %43 = vperm.xlu1 %379, %v25_v6   ;;  %v24_v11 = vld [vmem:[%s580_s2 + $0x8] sm:$0xff]  ;;  %v16_v12 = vld [vmem:[%s579_s1 + $0x10] sm:$0xff] }
   0x4   :  { %348 = vmatprep.subr.msk.mxu0 %vm98_vm0, %v72_v2  ;;  %374 = vmatprep.subr.msk.mxu1 %vm98_vm0, %v72_v2  ;;  %v23_v7 = vld [vmem:[%s580_s2] sm:$0xff]  ;;  %v20_v13 = vld [vmem:[%s579_s1 + $0x30] sm:$0xff]  ;;  %v28_v14 = vld [vmem:[%s580_s2 + $0x28] sm:$0xff] }
   0x5   :  { %349 = vmatpush1.msk.msra.mxu0 %vm98_vm0, %v22_v0  ;;  %375 = vmatpush1.msk.msra.mxu1 %vm98_vm0, %v22_v0  ;;  %v27_v15 = vld [vmem:[%s580_s2 + $0x20] sm:$0xff]  ;;  %v17_v16 = vld [vmem:[%s579_s1 + $0x18] sm:$0xff]  ;;  %v29_v19 = vld [vmem:[%s580_s2 + $0x30] sm:$0xff] }
   0x6   :  { %350 = vmatmul.mubr.msk.f32.vlgmr.msra.gmra.mrb[0].mxu0 %vm73_vm1, %v14_v4  ;;  %354 = vmatmul.mubr.msk.f32.vlgmr.msra.gmra.mrb[0].mxu1 %vm73_vm1, %v18_v5  ;;  %v21_v17 = vld [vmem:[%s579_s1 + $0x38] sm:$0xff] }
   0x7   :  { %173 = vmatprep.mubr.f32.mxu0 %v445_v1  ;;  %197 = vmatprep.mubr.f32.mxu1 %v445_v1  ;;  %v30_v18 = vld [vmem:[%s580_s2 + $0x38] sm:$0xff] }
   0x8   :  { %33 = vperm.xlu0 %378, %v23_v7   ;;  %48 = vperm.xlu1 %379, %v26_v10  }
   0xa   :  { %351 = vmatmul.mubr.msk.f32.gmra.mrb[2].mxu0 %vm73_vm1, %v15_v8  ;;  %355 = vmatmul.mubr.msk.f32.gmra.mrb[2].mxu1 %vm73_vm1, %v19_v9 }
   0xb   :  { %179 = vmatprep.mubr.f32.mxu0 %v445_v1  ;;  %203 = vmatprep.mubr.f32.mxu1 %v445_v1 }
   0xc   :  { %38 = vperm.xlu0 %378, %v24_v11   ;;  %58 = vperm.xlu1 %379, %v28_v14  }
   0xe   :  { %352 = vmatmul.mubr.msk.f32.gmra.mrb[4].mxu0 %vm73_vm1, %v16_v12  ;;  %356 = vmatmul.mubr.msk.f32.gmra.mrb[4].mxu1 %vm73_vm1, %v20_v13 }
   0xf   :  { %185 = vmatprep.mubr.f32.mxu0 %v445_v1  ;;  %209 = vmatprep.mubr.f32.mxu1 %v445_v1 }
  0x10   :  { %53 = vperm.xlu0 %378, %v27_v15   ;;  %68 = vperm.xlu1 %379, %v30_v18  }
  0x12   :  { %353 = vmatmul.mubr.msk.f32.gmra.mrb[6].mxu0 %vm73_vm1, %v17_v16  ;;  %357 = vmatmul.mubr.msk.f32.gmra.mrb[6].mxu1 %vm73_vm1, %v21_v17 }
  0x14   :  { %63 = vperm.xlu0 %378, %v29_v19  }
  0x82   :  { %v44_v21 = vpop.permute.xlu1 %43 }
  0x87   :  { %v34_v20 = vpop.permute.xlu0 %33  ;;  %v526_v23 = vpop.permute.xlu1 %48 }
  0x8b   :  { %v39_v22 = vpop.permute.xlu0 %38  ;;  %v59_v33 = vpop.permute.xlu1 %58 }
  0x8f   :  { %v54_v24 = vpop.permute.xlu0 %53 }
  0x93   :  { %v64_v50 = vpop.permute.xlu0 %63 }
  0xd9   :  { %v169_v25 = vpop.f32.mrb[0].mxu0  ;;  %v193_v26 = vpop.f32.mrb[0].mxu1 }
  0xda   :  { %v170_v27 = vadd.f32 %v169_v25, %v34_v20  ;;  %v194_v28 = vadd.f32 %v193_v26, %v54_v24  ;;  %v171_v29 = vpop.f32.mrb[1].mxu0  ;;  %v195_v30 = vpop.f32.mrb[1].mxu1 }
  0xdb   :  { %v172_v31 = vadd.f32 %v171_v29, %v34_v20  ;;  %v196_v32 = vadd.f32 %v195_v30, %v54_v24 }
  0xdc   :  { %v216_v34 = vmax.f32 %v170_v27, 0.0  ;;  %v224_v35 = vmax.f32 %v194_v28, 0.0 }
  0xdd   :  { %v217_v36 = vmax.f32 %v172_v31, 0.0  ;;  %v225_v37 = vmax.f32 %v196_v32, 0.0  ;;  %v175_v38 = vpop.f32.mrb[2].mxu0  ;;  %v199_v39 = vpop.f32.mrb[2].mxu1 }
  0xde   :  { %v358_v40 = vmul.f32 -1.442695, %v216_v34  ;;  %v366_v41 = vmul.f32 -1.442695, %v224_v35  ;;  %v176_v42 = vadd.f32 %v175_v38, %v39_v22  ;;  %v200_v43 = vadd.f32 %v199_v39, %v59_v33  ;;  %v177_v44 = vpop.f32.mrb[3].mxu0  ;;  %v201_v45 = vpop.f32.mrb[3].mxu1 }
  0xdf   :  { %v359_v46 = vmul.f32 -1.442695, %v217_v36  ;;  %v367_v47 = vmul.f32 -1.442695, %v225_v37  ;;  %v178_v48 = vadd.f32 %v177_v44, %v39_v22  ;;  %v202_v49 = vadd.f32 %v201_v45, %v59_v33 }
  0xe0   :  { %381 = vpow2.f32 %v358_v40  ;;  %v218_v51 = vmax.f32 %v176_v42, 0.0  ;;  %v226_v52 = vmax.f32 %v200_v43, 0.0 }
  0xe1   :  { %383 = vpow2.f32 %v366_v41  ;;  %v219_v53 = vmax.f32 %v178_v48, 0.0  ;;  %v227_v54 = vmax.f32 %v202_v49, 0.0  ;;  %v181_v55 = vpop.f32.mrb[4].mxu0  ;;  %v205_v56 = vpop.f32.mrb[4].mxu1 }
  0xe2   :  { %385 = vpow2.f32 %v359_v46  ;;  %v360_v57 = vmul.f32 -1.442695, %v218_v51  ;;  %v368_v58 = vmul.f32 -1.442695, %v226_v52  ;;  %v182_v59 = vadd.f32 %v181_v55, %v44_v21  ;;  %v183_v60 = vpop.f32.mrb[5].mxu0  ;;  %v207_v61 = vpop.f32.mrb[5].mxu1 }
  0xe3   :  { %387 = vpow2.f32 %v367_v47  ;;  %v361_v62 = vmul.f32 -1.442695, %v219_v53  ;;  %v369_v63 = vmul.f32 -1.442695, %v227_v54  ;;  %v206_v0 = vadd.f32 %v205_v56, %v64_v50 }
  0xe4   :  { %389 = vpow2.f32 %v360_v57  ;;  %v220_v1 = vmax.f32 %v182_v59, 0.0  ;;  %v184_v2 = vadd.f32 %v183_v60, %v44_v21  ;;  %v208_v3 = vadd.f32 %v207_v61, %v64_v50  ;;  %v69_v21 = vpop.permute.xlu1 %68 }
  0xe5   :  { %391 = vpow2.f32 %v368_v58  ;;  %v228_v4 = vmax.f32 %v206_v0, 0.0  ;;  %v187_v5 = vpop.f32.mrb[6].mxu0  ;;  %v211_v6 = vpop.f32.mrb[6].mxu1 }
  0xe6   :  { %393 = vpow2.f32 %v361_v62  ;;  %v362_v7 = vmul.f32 -1.442695, %v220_v1  ;;  %v221_v8 = vmax.f32 %v184_v2, 0.0  ;;  %v229_v9 = vmax.f32 %v208_v3, 0.0  ;;  %v189_v10 = vpop.f32.mrb[7].mxu0  ;;  %v213_v11 = vpop.f32.mrb[7].mxu1 }
  0xe7   :  { %395 = vpow2.f32 %v369_v63  ;;  %v370_v12 = vmul.f32 -1.442695, %v228_v4  ;;  %v188_v24 = vadd.f32 %v187_v5, %v526_v23  ;;  %v212_v27 = vadd.f32 %v211_v6, %v69_v21 }
  0xe8   :  { %397 = vpow2.f32 %v362_v7  ;;  %v363_v13 = vmul.f32 -1.442695, %v221_v8  ;;  %v371_v14 = vmul.f32 -1.442695, %v229_v9  ;;  %v190_v30 = vadd.f32 %v189_v10, %v526_v23 }
  0xe9   :  { %399 = vpow2.f32 %v370_v12  ;;  %v214_v33 = vadd.f32 %v213_v11, %v69_v21  ;;  %v222_v36 = vmax.f32 %v188_v24, 0.0  ;;  %v230_v39 = vmax.f32 %v212_v27, 0.0 }
  0xea   :  { %v382_v15 = vpop.eup %381  ;;  %401 = vpow2.f32 %v363_v13  ;;  %v223_v42 = vmax.f32 %v190_v30, 0.0 }
  0xeb   :  { %v384_v16 = vpop.eup %383  ;;  %v280_v17 = vadd.f32 1.0, %v382_v15  ;;  %403 = vpow2.f32 %v371_v14  ;;  %v231_v23 = vmax.f32 %v214_v33, 0.0  ;;  %v364_v47 = vmul.f32 -1.442695, %v222_v36 }
  0xec   :  { %v386_v18 = vpop.eup %385  ;;  %v288_v19 = vadd.f32 1.0, %v384_v16  ;;  %v372_v49 = vmul.f32 -1.442695, %v230_v39  ;;  %v365_v51 = vmul.f32 -1.442695, %v223_v42 }
  0xed   :  { %v388_v20 = vpop.eup %387  ;;  %405 = vrcp.f32 %v280_v17  ;;  %v281_v22 = vadd.f32 1.0, %v386_v18  ;;  %v373_v53 = vmul.f32 -1.442695, %v231_v23 }
  0xee   :  { %v390_v25 = vpop.eup %389  ;;  %407 = vrcp.f32 %v288_v19  ;;  %v289_v26 = vadd.f32 1.0, %v388_v20 }
  0xef   :  { %v392_v28 = vpop.eup %391  ;;  %409 = vrcp.f32 %v281_v22  ;;  %v282_v29 = vadd.f32 1.0, %v390_v25 }
  0xf0   :  { %v394_v31 = vpop.eup %393  ;;  %411 = vrcp.f32 %v289_v26  ;;  %v290_v32 = vadd.f32 1.0, %v392_v28 }
  0xf1   :  { %v396_v34 = vpop.eup %395  ;;  %413 = vrcp.f32 %v282_v29  ;;  %v283_v35 = vadd.f32 1.0, %v394_v31 }
  0xf2   :  { %v398_v37 = vpop.eup %397  ;;  %415 = vrcp.f32 %v290_v32  ;;  %v291_v38 = vadd.f32 1.0, %v396_v34 }
  0xf3   :  { %v400_v40 = vpop.eup %399  ;;  %417 = vrcp.f32 %v283_v35  ;;  %v284_v41 = vadd.f32 1.0, %v398_v37 }
  0xf4   :  { %v402_v43 = vpop.eup %401  ;;  %419 = vrcp.f32 %v291_v38  ;;  %v292_v44 = vadd.f32 1.0, %v400_v40 }
  0xf5   :  { %v404_v45 = vpop.eup %403  ;;  %421 = vrcp.f32 %v284_v41  ;;  %v285_v46 = vadd.f32 1.0, %v402_v43 }
  0xf6   :  { %423 = vrcp.f32 %v292_v44  ;;  %v293_v48 = vadd.f32 1.0, %v404_v45 }
  0xf7   :  { %v406_v50 = vpop.eup %405  ;;  %425 = vrcp.f32 %v285_v46 }
  0xf8   :  { %v408_v52 = vpop.eup %407  ;;  %328 = vst [vmem:[%s581_s3] sm:$0xff] %v406_v50  ;;  %427 = vrcp.f32 %v293_v48 }
  0xf9   :  { %v410_v54 = vpop.eup %409  ;;  %336 = vst [vmem:[%s581_s3 + $0x40] sm:$0xff] %v408_v52  ;;  %429 = vpow2.f32 %v364_v47 }
  0xfa   :  { %v412_v55 = vpop.eup %411  ;;  %329 = vst [vmem:[%s581_s3 + $0x8] sm:$0xff] %v410_v54  ;;  %431 = vpow2.f32 %v372_v49 }
  0xfb   :  { %v414_v56 = vpop.eup %413  ;;  %337 = vst [vmem:[%s581_s3 + $0x48] sm:$0xff] %v412_v55  ;;  %433 = vpow2.f32 %v365_v51 }
  0xfc   :  { %v416_v57 = vpop.eup %415  ;;  %330 = vst [vmem:[%s581_s3 + $0x10] sm:$0xff] %v414_v56  ;;  %435 = vpow2.f32 %v373_v53 }
  0xfd   :  { %v418_v58 = vpop.eup %417  ;;  %338 = vst [vmem:[%s581_s3 + $0x50] sm:$0xff] %v416_v57 }
  0xfe   :  { %v420_v59 = vpop.eup %419  ;;  %331 = vst [vmem:[%s581_s3 + $0x18] sm:$0xff] %v418_v58 }
  0xff   :  { %v422_v60 = vpop.eup %421  ;;  %339 = vst [vmem:[%s581_s3 + $0x58] sm:$0xff] %v420_v59 }
 0x100   :  { %v424_v61 = vpop.eup %423  ;;  %332 = vst [vmem:[%s581_s3 + $0x20] sm:$0xff] %v422_v60 }
 0x101   :  { %v426_v62 = vpop.eup %425  ;;  %340 = vst [vmem:[%s581_s3 + $0x60] sm:$0xff] %v424_v61 }
 0x102   :  { %v428_v63 = vpop.eup %427  ;;  %333 = vst [vmem:[%s581_s3 + $0x28] sm:$0xff] %v426_v62 }
 0x103   :  { %v430_v0 = vpop.eup %429  ;;  %341 = vst [vmem:[%s581_s3 + $0x68] sm:$0xff] %v428_v63 }
 0x104   :  { %v432_v1 = vpop.eup %431  ;;  %v286_v2 = vadd.f32 1.0, %v430_v0 }
 0x105   :  { %v434_v3 = vpop.eup %433  ;;  %v294_v4 = vadd.f32 1.0, %v432_v1 }
 0x106   :  { %v436_v5 = vpop.eup %435  ;;  %437 = vrcp.f32 %v286_v2  ;;  %v287_v6 = vadd.f32 1.0, %v434_v3 }
 0x107   :  { %439 = vrcp.f32 %v294_v4  ;;  %v295_v7 = vadd.f32 1.0, %v436_v5 }
 0x108   :  { %441 = vrcp.f32 %v287_v6 }
 0x109   :  { %443 = vrcp.f32 %v295_v7 }
 0x110   :  { %v438_v8 = vpop.eup %437 }
 0x111   :  { %v440_v9 = vpop.eup %439  ;;  %334 = vst [vmem:[%s581_s3 + $0x30] sm:$0xff] %v438_v8 }
 0x112   :  { %v442_v10 = vpop.eup %441  ;;  %342 = vst [vmem:[%s581_s3 + $0x70] sm:$0xff] %v440_v9 }
 0x113   :  { %v444_v11 = vpop.eup %443  ;;  %335 = vst [vmem:[%s581_s3 + $0x38] sm:$0xff] %v442_v10 }
 0x114   :  { %343 = vst [vmem:[%s581_s3 + $0x78] sm:$0xff] %v444_v11 }

// kernel: model_forward.5
= control target key start
LH: loop header
LB: loop body
LE: loop exit
PB: predicated region body
PF: predicated region fallthrough
CT: control target
= control target key end

     0   :  { %v632_v3 = vmov 0.0   ;;  %v633_v6 = vmov 0   ;;  %vm89_vm0 = vcmask 130048   ;;  %vm533_vm1 = vcmask 293888   ;;  %s1056_s0 = inlined_call_operand.vmem [shape: f32[16,676], index: 0, kind: input, shape index: {}]   ;;  %s1057_s1 = inlined_call_operand.vmem [shape: f32[72,16], index: 1, kind: input, shape index: {}]   ;;  %s1058_s2 = inlined_call_operand.vmem [shape: f32[72,1], index: 2, kind: input, shape index: {}]   ;;  %s1059_s3 = inlined_call_operand.vmem [shape: f32[72,676], index: 3, kind: output, shape index: {}]  }
   0x1   :  { %v24_v0 = vld [vmem:[%s1056_s0 + $0x8] sm:$0xff]  ;;  %v30_v1 = vld [vmem:[%s1056_s0 + $0x38] sm:$0xff]  ;;  %v23_v2 = vld [vmem:[%s1056_s0] sm:$0xff]  ;;  %181 = vmatprep.mubr.f32.mxu0 %v632_v3  ;;  %211 = vmatprep.mubr.f32.mxu1 %v632_v3 }
   0x2   :  { %v614_v4 = vpack.c.bf16 %v30_v1, %v24_v0  ;;  %v29_v5 = vld [vmem:[%s1056_s0 + $0x30] sm:$0xff]  ;;  %631 = vset.pattern.permute.xlu1 %v633_v6  ;;  %630 = vset.pattern.permute.xlu0 %v633_v6  ;;  %v28_v8 = vld [vmem:[%s1056_s0 + $0x28] sm:$0xff]  ;;  %v34_v9 = vld [vmem:[%s1056_s0 + $0x58] sm:$0xff] }
   0x3   :  { %v616_v7 = vpack.c.bf16 %v29_v5, %v23_v2  ;;  %v27_v10 = vld [vmem:[%s1056_s0 + $0x20] sm:$0xff]  ;;  %v685_v12 = vld [vmem:[%s1057_s1 + $0x28] sm:$0xff]  ;;  %v622_v13 = vpack.c.bf16 %v34_v9, %v28_v8  ;;  %v33_v14 = vld [vmem:[%s1056_s0 + $0x50] sm:$0xff] }
   0x4   :  { %615 = vmatprep.subr.bf16.mxu0 %v614_v4  ;;  %626 = vmatprep.subr.bf16.mxu1 %v614_v4  ;;  %v680_v11 = vld [vmem:[%s1057_s1] sm:$0xff]  ;;  %v624_v15 = vpack.c.bf16 %v33_v14, %v27_v10  ;;  %v26_v16 = vld [vmem:[%s1056_s0 + $0x18] sm:$0xff]  ;;  %v32_v17 = vld [vmem:[%s1056_s0 + $0x48] sm:$0xff] }
   0x5   :  { %617 = vmatpush1.bf16.msra.mxu0 %v616_v7  ;;  %627 = vmatpush1.bf16.msra.mxu1 %v616_v7  ;;  %v25_v18 = vld [vmem:[%s1056_s0 + $0x10] sm:$0xff]  ;;  %v618_v19 = vpack.c.bf16 %v32_v17, %v26_v16  ;;  %v31_v20 = vld [vmem:[%s1056_s0 + $0x40] sm:$0xff]  ;;  %v15_v23 = vld [vmem:[%s1057_s1 + $0x8] sm:$0xff] }
   0x6   :  { %623 = vmatprep.subr.bf16.mxu0 %v622_v13  ;;  %v620_v21 = vpack.c.bf16 %v31_v20, %v25_v18  ;;  %v37_v22 = vld [vmem:[%s1058_s2 + $0x10] sm:$0xff]  ;;  %v35_v25 = vld [vmem:[%s1058_s2] sm:$0xff]  ;;  %v38_v26 = vld [vmem:[%s1058_s2 + $0x18] sm:$0xff] }
   0x7   :  { %v716_v24 = vld [vmem:[%s1057_s1 + $0x30] sm:$0xff]  ;;  %619 = vmatprep.subr.bf16.mxu1 %v618_v19  ;;  %56 = vperm.xlu1 %631, %v37_v22   ;;  %v21_v28 = vld [vmem:[%s1057_s1 + $0x38] sm:$0xff]  ;;  %v36_v29 = vld [vmem:[%s1058_s2 + $0x8] sm:$0xff] }
   0x8   :  { %587 = vmatmul.mubr.msk.f32.vlgmr.msra.gmra.mrb[0].mxu0 %vm89_vm0, %v680_v11  ;;  %592 = vmatmul.mubr.msk.f32.vlgmr.msra.gmra.mrb[0].mxu1 %vm89_vm0, %v685_v12  ;;  %v16_v27 = vld [vmem:[%s1057_s1 + $0x10] sm:$0xff]  ;;  %v40_v30 = vld [vmem:[%s1058_s2 + $0x28] sm:$0xff]  ;;  %v17_v31 = vld [vmem:[%s1057_s1 + $0x18] sm:$0xff] }
   0x9   :  { %625 = vmatpush1.bf16.msra.mxu0 %v624_v15  ;;  %187 = vmatprep.mubr.f32.mxu0 %v632_v3  ;;  %v22_v32 = vld [vmem:[%s1057_s1 + $0x40] sm:$0xff]  ;;  %v42_v34 = vld [vmem:[%s1058_s2 + $0x38] sm:$0xff]  ;;  %v41_v36 = vld [vmem:[%s1058_s2 + $0x30] sm:$0xff] }
   0xa   :  { %217 = vmatprep.mubr.f32.mxu1 %v632_v3  ;;  %621 = vmatpush1.bf16.msra.mxu1 %v620_v21  ;;  %v39_v33 = vld [vmem:[%s1058_s2 + $0x20] sm:$0xff] }
   0xb   :  { %46 = vperm.xlu0 %630, %v35_v25   ;;  %61 = vperm.xlu1 %631, %v38_v26   ;;  %v18_v35 = vld [vmem:[%s1057_s1 + $0x20] sm:$0xff] }
   0xc   :  { %588 = vmatmul.mubr.msk.f32.gmra.mrb[2].mxu0 %vm89_vm0, %v15_v23  ;;  %593 = vmatmul.mubr.msk.f32.gmra.mrb[2].mxu1 %vm89_vm0, %v716_v24  ;;  %v43_v37 = vld [vmem:[%s1058_s2 + $0x40] sm:$0xff] }
   0xd   :  { %193 = vmatprep.mubr.f32.mxu0 %v632_v3  ;;  %223 = vmatprep.mubr.f32.mxu1 %v632_v3 }
   0xf   :  { %51 = vperm.xlu0 %630, %v36_v29   ;;  %71 = vperm.xlu1 %631, %v40_v30  }
  0x10   :  { %589 = vmatmul.mubr.msk.f32.gmra.mrb[4].mxu0 %vm89_vm0, %v16_v27  ;;  %594 = vmatmul.mubr.msk.f32.gmra.mrb[4].mxu1 %vm89_vm0, %v21_v28 }
  0x11   :  { %199 = vmatprep.mubr.f32.mxu0 %v632_v3  ;;  %229 = vmatprep.mubr.f32.mxu1 %v632_v3 }
  0x13   :  { %66 = vperm.xlu0 %630, %v39_v33   ;;  %81 = vperm.xlu1 %631, %v42_v34  }
  0x14   :  { %590 = vmatmul.mubr.msk.f32.gmra.mrb[6].mxu0 %vm89_vm0, %v17_v31  ;;  %595 = vmatmul.mubr.msk.f32.gmra.mrb[6].mxu1 %vm89_vm0, %v22_v32 }
  0x15   :  { %205 = vmatprep.mubr.f32.mxu0 %v632_v3  ;;  %300 = vmatprep.mubr.f32.mxu1 %v632_v3 }
  0x17   :  { %76 = vperm.xlu0 %630, %v41_v36  }
  0x18   :  { %591 = vmatmul.mubr.msk.f32.gmra.mrb[8].mxu0 %vm89_vm0, %v18_v35  ;;  %596 = vmatmul.mubr.msk.f32.vlgmr.msra.gmra.mrb[8].mxu1 %vm89_vm0, %v680_v11 }
  0x19   :  { %306 = vmatprep.mubr.f32.mxu1 %v632_v3  ;;  %419 = vmatprep.mubr.f32.mxu0 %v632_v3 }
  0x1b   :  { %86 = vperm.xlu0 %630, %v43_v37  }
  0x1c   :  { %597 = vmatmul.mubr.msk.f32.gmra.mrb[10].mxu1 %vm89_vm0, %v15_v23  ;;  %605 = vmatmul.mubr.msk.f32.vlgmr.msra.gmra.mrb[10].mxu0 %vm89_vm0, %v680_v11 }
  0x1d   :  { %312 = vmatprep.mubr.f32.mxu1 %v632_v3  ;;  %425 = vmatprep.mubr.f32.mxu0 %v632_v3 }
  0x20   :  { %598 = vmatmul.mubr.msk.f32.gmra.mrb[12].mxu1 %vm89_vm0, %v16_v27  ;;  %606 = vmatmul.mubr.msk.f32.gmra.mrb[12].mxu0 %vm89_vm0, %v15_v23 }
  0x21   :  { %318 = vmatprep.mubr.f32.mxu1 %v632_v3  ;;  %431 = vmatprep.mubr.f32.mxu0 %v632_v3 }
  0x24   :  { %599 = vmatmul.mubr.msk.f32.gmra.mrb[14].mxu1 %vm89_vm0, %v17_v31  ;;  %607 = vmatmul.mubr.msk.f32.gmra.mrb[14].mxu0 %vm89_vm0, %v16_v27 }
  0x25   :  { %324 = vmatprep.mubr.f32.mxu1 %v632_v3  ;;  %437 = vmatprep.mubr.f32.mxu0 %v632_v3 }
  0x28   :  { %600 = vmatmul.mubr.msk.f32.gmra.mrb[16].mxu1 %vm89_vm0, %v18_v35  ;;  %608 = vmatmul.mubr.msk.f32.gmra.mrb[16].mxu0 %vm89_vm0, %v17_v31 }
  0x29   :  { %330 = vmatprep.mubr.f32.mxu1 %v632_v3  ;;  %443 = vmatprep.mubr.f32.mxu0 %v632_v3 }
  0x2c   :  { %601 = vmatmul.mubr.msk.f32.gmra.mrb[18].mxu1 %vm89_vm0, %v685_v12  ;;  %609 = vmatmul.mubr.msk.f32.gmra.mrb[18].mxu0 %vm89_vm0, %v18_v35 }
  0x2d   :  { %336 = vmatprep.mubr.f32.mxu1 %v632_v3  ;;  %449 = vmatprep.mubr.f32.mxu0 %v632_v3 }
  0x30   :  { %602 = vmatmul.mubr.msk.f32.gmra.mrb[20].mxu1 %vm89_vm0, %v716_v24  ;;  %610 = vmatmul.mubr.msk.f32.gmra.mrb[20].mxu0 %vm89_vm0, %v685_v12 }
  0x31   :  { %342 = vmatprep.mubr.f32.mxu1 %v632_v3  ;;  %455 = vmatprep.mubr.f32.mxu0 %v632_v3 }
  0x34   :  { %603 = vmatmul.mubr.msk.f32.gmra.mrb[22].mxu1 %vm89_vm0, %v21_v28  ;;  %611 = vmatmul.mubr.msk.f32.gmra.mrb[22].mxu0 %vm89_vm0, %v716_v24 }
  0x35   :  { %348 = vmatprep.mubr.f32.mxu1 %v632_v3  ;;  %461 = vmatprep.mubr.f32.mxu0 %v632_v3 }
  0x38   :  { %604 = vmatmul.mubr.msk.f32.gmra.mrb[24].mxu1 %vm89_vm0, %v22_v32  ;;  %612 = vmatmul.mubr.msk.f32.gmra.mrb[24].mxu0 %vm89_vm0, %v21_v28 }
  0x39   :  { %467 = vmatprep.mubr.f32.mxu0 %v632_v3 }
  0x3c   :  { %613 = vmatmul.mubr.msk.f32.gmra.mrb[26].mxu0 %vm89_vm0, %v22_v32 }
  0x86   :  { %v815_v39 = vpop.permute.xlu1 %56 }
  0x8a   :  { %v813_v38 = vpop.permute.xlu0 %46  ;;  %v819_v41 = vpop.permute.xlu1 %61 }
  0x8e   :  { %v817_v40 = vpop.permute.xlu0 %51  ;;  %v823_v43 = vpop.permute.xlu1 %71 }
  0x92   :  { %v821_v42 = vpop.permute.xlu0 %66  ;;  %v847_v1 = vpop.permute.xlu1 %81 }
  0x96   :  { %v829_v52 = vpop.permute.xlu0 %76 }
  0x9a   :  { %v865_v14 = vpop.permute.xlu0 %86 }
  0xdb   :  { %v183_v44 = vpop.f32.mrb[0].mxu0  ;;  %v213_v45 = vpop.f32.mrb[0].mxu1 }
  0xdc   :  { %v184_v46 = vadd.f32 %v183_v44, %v813_v38  ;;  %v185_v47 = vpop.f32.mrb[1].mxu0  ;;  %v214_v48 = vadd.f32 %v213_v45, %v823_v43  ;;  %v215_v49 = vpop.f32.mrb[1].mxu1 }
  0xdd   :  { %v186_v50 = vadd.f32 %v185_v47, %v813_v38  ;;  %v216_v51 = vadd.f32 %v215_v49, %v823_v43 }
  0xde   :  { %v474_v53 = vmax.f32 %v184_v46, 0.0  ;;  %v504_v54 = vmax.f32 %v214_v48, 0.0 }
  0xdf   :  { %v475_v55 = vmax.f32 %v186_v50, 0.0  ;;  %v189_v56 = vpop.f32.mrb[2].mxu0  ;;  %v505_v57 = vmax.f32 %v216_v51, 0.0  ;;  %v219_v58 = vpop.f32.mrb[2].mxu1 }
  0xe0   :  { %528 = vst [vmem:[%s1059_s3] sm:$0xff] %v474_v53  ;;  %v190_v59 = vadd.f32 %v189_v56, %v817_v40  ;;  %559 = vst [vmem:[%s1059_s3 + $0xf0] sm:$0xff] %v504_v54  ;;  %v191_v60 = vpop.f32.mrb[3].mxu0  ;;  %v220_v61 = vadd.f32 %v219_v58, %v829_v52  ;;  %v221_v62 = vpop.f32.mrb[3].mxu1 }
  0xe1   :  { %529 = vst [vmem:[%s1059_s3 + $0x8] sm:$0xff] %v475_v55  ;;  %v192_v63 = vadd.f32 %v191_v60, %v817_v40  ;;  %560 = vst [vmem:[%s1059_s3 + $0xf8] sm:$0xff] %v505_v57  ;;  %v222_v0 = vadd.f32 %v221_v62, %v829_v52 }
  0xe2   :  { %v480_v2 = vmax.f32 %v190_v59, 0.0  ;;  %v510_v3 = vmax.f32 %v220_v61, 0.0 }
  0xe3   :  { %v481_v4 = vmax.f32 %v192_v63, 0.0  ;;  %v195_v5 = vpop.f32.mrb[4].mxu0  ;;  %v511_v6 = vmax.f32 %v222_v0, 0.0  ;;  %v225_v7 = vpop.f32.mrb[4].mxu1 }
  0xe4   :  { %535 = vst [vmem:[%s1059_s3 + $0x30] sm:$0xff] %v480_v2  ;;  %v196_v8 = vadd.f32 %v195_v5, %v815_v39  ;;  %565 = vst [vmem:[%s1059_s3 + $0x120] sm:$0xff] %v510_v3  ;;  %v197_v9 = vpop.f32.mrb[5].mxu0  ;;  %v226_v10 = vadd.f32 %v225_v7, %v847_v1  ;;  %v227_v11 = vpop.f32.mrb[5].mxu1 }
  0xe5   :  { %536 = vst [vmem:[%s1059_s3 + $0x38] sm:$0xff] %v481_v4  ;;  %v198_v12 = vadd.f32 %v197_v9, %v815_v39  ;;  %566 = vst [vmem:[%s1059_s3 + $0x128] sm:$0xff] %v511_v6  ;;  %v228_v13 = vadd.f32 %v227_v11, %v847_v1 }
  0xe6   :  { %v486_v15 = vmax.f32 %v196_v8, 0.0  ;;  %v516_v16 = vmax.f32 %v226_v10, 0.0 }
  0xe7   :  { %v487_v17 = vmax.f32 %v198_v12, 0.0  ;;  %v201_v18 = vpop.f32.mrb[6].mxu0  ;;  %v517_v19 = vmax.f32 %v228_v13, 0.0  ;;  %v231_v20 = vpop.f32.mrb[6].mxu1 }
  0xe8   :  { %541 = vst [vmem:[%s1059_s3 + $0x60] sm:$0xff] %v486_v15  ;;  %v202_v21 = vadd.f32 %v201_v18, %v819_v41  ;;  %571 = vst [vmem:[%s1059_s3 + $0x150] sm:$0xff] %v516_v16  ;;  %v203_v22 = vpop.f32.mrb[7].mxu0  ;;  %v232_v23 = vadd.f32 %v231_v20, %v865_v14  ;;  %v233_v24 = vpop.f32.mrb[7].mxu1 }
  0xe9   :  { %542 = vst [vmem:[%s1059_s3 + $0x68] sm:$0xff] %v487_v17  ;;  %v204_v25 = vadd.f32 %v203_v22, %v819_v41  ;;  %572 = vst [vmem:[%s1059_s3 + $0x158] sm:$0xff] %v517_v19  ;;  %v234_v26 = vadd.f32 %v233_v24, %v865_v14 }
  0xea   :  { %v492_v27 = vmax.f32 %v202_v21, 0.0  ;;  %v522_v28 = vmax.f32 %v232_v23, 0.0 }
  0xeb   :  { %v493_v29 = vmax.f32 %v204_v25, 0.0  ;;  %v207_v30 = vpop.f32.mrb[8].mxu0  ;;  %v523_v31 = vmax.f32 %v234_v26, 0.0  ;;  %v302_v32 = vpop.f32.mrb[8].mxu1 }
  0xec   :  { %547 = vst [vmem:[%s1059_s3 + $0x90] sm:$0xff] %v492_v27  ;;  %v208_v33 = vadd.f32 %v207_v30, %v821_v42  ;;  %577 = vst [vmem:[%s1059_s3 + $0x180] sm:$0xff] %v522_v28  ;;  %v209_v34 = vpop.f32.mrb[9].mxu0  ;;  %v303_v35 = vadd.f32 %v302_v32, %v813_v38  ;;  %v304_v36 = vpop.f32.mrb[9].mxu1 }
  0xed   :  { %548 = vst [vmem:[%s1059_s3 + $0x98] sm:$0xff] %v493_v29  ;;  %v210_v37 = vadd.f32 %v209_v34, %v821_v42  ;;  %578 = vst [vmem:[%s1059_s3 + $0x188] sm:$0xff] %v523_v31  ;;  %v305_v44 = vadd.f32 %v304_v36, %v813_v38 }
  0xee   :  { %v498_v45 = vmax.f32 %v208_v33, 0.0  ;;  %v476_v46 = vmax.f32 %v303_v35, 0.0 }
  0xef   :  { %v499_v47 = vmax.f32 %v210_v37, 0.0  ;;  %v421_v48 = vpop.f32.mrb[10].mxu0  ;;  %v477_v49 = vmax.f32 %v305_v44, 0.0  ;;  %v308_v50 = vpop.f32.mrb[10].mxu1 }
  0xf0   :  { %553 = vst [vmem:[%s1059_s3 + $0xc0] sm:$0xff] %v498_v45  ;;  %530 = vst [vmem:[%s1059_s3 + $0x10] sm:$0xff] %v476_v46  ;;  %v422_v51 = vadd.f32 %v421_v48, %v813_v38  ;;  %v423_v53 = vpop.f32.mrb[11].mxu0  ;;  %v309_v54 = vadd.f32 %v308_v50, %v817_v40  ;;  %v310_v55 = vpop.f32.mrb[11].mxu1 }
  0xf1   :  { %554 = vst [vmem:[%s1059_s3 + $0xc8] sm:$0xff] %v499_v47  ;;  %531 = vst [vmem:[%s1059_s3 + $0x18] sm:$0xff] %v477_v49  ;;  %v424_v56 = vadd.f32 %v423_v53, %v813_v38  ;;  %v311_v57 = vadd.f32 %v310_v55, %v817_v40 }
  0xf2   :  { %v478_v58 = vmax.f32 %v422_v51, 0.0  ;;  %v482_v59 = vmax.f32 %v309_v54, 0.0 }
  0xf3   :  { %v479_v60 = vmax.f32 %v424_v56, 0.0  ;;  %v427_v61 = vpop.f32.mrb[12].mxu0  ;;  %v483_v62 = vmax.f32 %v311_v57, 0.0  ;;  %v314_v63 = vpop.f32.mrb[12].mxu1 }
  0xf4   :  { %532 = vst [vmem:[%s1059_s3 + $0x20] sm:$0xff] %v478_v58  ;;  %537 = vst [vmem:[%s1059_s3 + $0x40] sm:$0xff] %v482_v59  ;;  %v428_v0 = vadd.f32 %v427_v61, %v817_v40  ;;  %v429_v38 = vpop.f32.mrb[13].mxu0  ;;  %v315_v2 = vadd.f32 %v314_v63, %v815_v39  ;;  %v316_v3 = vpop.f32.mrb[13].mxu1 }
  0xf5   :  { %534 = vst.msk [vmem:[%s1059_s3 + $0x28] sm:$0xff] %vm533_vm1, %v479_v60  ;;  %538 = vst [vmem:[%s1059_s3 + $0x48] sm:$0xff] %v483_v62  ;;  %v430_v4 = vadd.f32 %v429_v38, %v817_v40  ;;  %v317_v5 = vadd.f32 %v316_v3, %v815_v39 }
  0xf6   :  { %v484_v6 = vmax.f32 %v428_v0, 0.0  ;;  %v488_v7 = vmax.f32 %v315_v2, 0.0 }
  0xf7   :  { %v485_v8 = vmax.f32 %v430_v4, 0.0  ;;  %v433_v9 = vpop.f32.mrb[14].mxu0  ;;  %v489_v10 = vmax.f32 %v317_v5, 0.0  ;;  %v320_v11 = vpop.f32.mrb[14].mxu1 }
  0xf8   :  { %539 = vst [vmem:[%s1059_s3 + $0x50] sm:$0xff] %v484_v6  ;;  %543 = vst [vmem:[%s1059_s3 + $0x70] sm:$0xff] %v488_v7  ;;  %v434_v12 = vadd.f32 %v433_v9, %v815_v39  ;;  %v435_v13 = vpop.f32.mrb[15].mxu0  ;;  %v321_v40 = vadd.f32 %v320_v11, %v819_v41  ;;  %v322_v15 = vpop.f32.mrb[15].mxu1 }
  0xf9   :  { %540 = vst.msk [vmem:[%s1059_s3 + $0x58] sm:$0xff] %vm533_vm1, %v485_v8  ;;  %544 = vst [vmem:[%s1059_s3 + $0x78] sm:$0xff] %v489_v10  ;;  %v436_v16 = vadd.f32 %v435_v13, %v815_v39  ;;  %v323_v17 = vadd.f32 %v322_v15, %v819_v41 }
  0xfa   :  { %v490_v18 = vmax.f32 %v434_v12, 0.0  ;;  %v494_v19 = vmax.f32 %v321_v40, 0.0 }
  0xfb   :  { %v491_v20 = vmax.f32 %v436_v16, 0.0  ;;  %v439_v21 = vpop.f32.mrb[16].mxu0  ;;  %v495_v22 = vmax.f32 %v323_v17, 0.0  ;;  %v326_v23 = vpop.f32.mrb[16].mxu1 }
  0xfc   :  { %545 = vst [vmem:[%s1059_s3 + $0x80] sm:$0xff] %v490_v18  ;;  %549 = vst [vmem:[%s1059_s3 + $0xa0] sm:$0xff] %v494_v19  ;;  %v440_v24 = vadd.f32 %v439_v21, %v819_v41  ;;  %v441_v25 = vpop.f32.mrb[17].mxu0  ;;  %v327_v39 = vadd.f32 %v326_v23, %v821_v42  ;;  %v328_v26 = vpop.f32.mrb[17].mxu1 }
  0xfd   :  { %546 = vst.msk [vmem:[%s1059_s3 + $0x88] sm:$0xff] %vm533_vm1, %v491_v20  ;;  %550 = vst [vmem:[%s1059_s3 + $0xa8] sm:$0xff] %v495_v22  ;;  %v442_v27 = vadd.f32 %v441_v25, %v819_v41  ;;  %v329_v28 = vadd.f32 %v328_v26, %v821_v42 }
  0xfe   :  { %v496_v29 = vmax.f32 %v440_v24, 0.0  ;;  %v500_v30 = vmax.f32 %v327_v39, 0.0 }
  0xff   :  { %v497_v31 = vmax.f32 %v442_v27, 0.0  ;;  %v445_v32 = vpop.f32.mrb[18].mxu0  ;;  %v501_v33 = vmax.f32 %v329_v28, 0.0  ;;  %v332_v34 = vpop.f32.mrb[18].mxu1 }
 0x100   :  { %551 = vst [vmem:[%s1059_s3 + $0xb0] sm:$0xff] %v496_v29  ;;  %555 = vst [vmem:[%s1059_s3 + $0xd0] sm:$0xff] %v500_v30  ;;  %v446_v35 = vadd.f32 %v445_v32, %v821_v42  ;;  %v447_v36 = vpop.f32.mrb[19].mxu0  ;;  %v333_v41 = vadd.f32 %v332_v34, %v823_v43  ;;  %v334_v37 = vpop.f32.mrb[19].mxu1 }
 0x101   :  { %552 = vst.msk [vmem:[%s1059_s3 + $0xb8] sm:$0xff] %vm533_vm1, %v497_v31  ;;  %556 = vst [vmem:[%s1059_s3 + $0xd8] sm:$0xff] %v501_v33  ;;  %v448_v44 = vadd.f32 %v447_v36, %v821_v42  ;;  %v335_v45 = vadd.f32 %v334_v37, %v823_v43 }
 0x102   :  { %v502_v46 = vmax.f32 %v446_v35, 0.0  ;;  %v506_v47 = vmax.f32 %v333_v41, 0.0 }
 0x103   :  { %v503_v48 = vmax.f32 %v448_v44, 0.0  ;;  %v507_v49 = vmax.f32 %v335_v45, 0.0  ;;  %v338_v50 = vpop.f32.mrb[20].mxu1  ;;  %v451_v51 = vpop.f32.mrb[20].mxu0 }
 0x104   :  { %557 = vst [vmem:[%s1059_s3 + $0xe0] sm:$0xff] %v502_v46  ;;  %561 = vst [vmem:[%s1059_s3 + $0x100] sm:$0xff] %v506_v47  ;;  %v339_v53 = vadd.f32 %v338_v50, %v829_v52  ;;  %v452_v42 = vadd.f32 %v451_v51, %v823_v43  ;;  %v340_v54 = vpop.f32.mrb[21].mxu1  ;;  %v453_v55 = vpop.f32.mrb[21].mxu0 }
 0x105   :  { %558 = vst.msk [vmem:[%s1059_s3 + $0xe8] sm:$0xff] %vm533_vm1, %v503_v48  ;;  %562 = vst [vmem:[%s1059_s3 + $0x108] sm:$0xff] %v507_v49  ;;  %v341_v56 = vadd.f32 %v340_v54, %v829_v52  ;;  %v454_v57 = vadd.f32 %v453_v55, %v823_v43 }
 0x106   :  { %v512_v58 = vmax.f32 %v339_v53, 0.0  ;;  %v508_v59 = vmax.f32 %v452_v42, 0.0 }
 0x107   :  { %v513_v60 = vmax.f32 %v341_v56, 0.0  ;;  %v509_v61 = vmax.f32 %v454_v57, 0.0  ;;  %v344_v62 = vpop.f32.mrb[22].mxu1  ;;  %v457_v63 = vpop.f32.mrb[22].mxu0 }
 0x108   :  { %567 = vst [vmem:[%s1059_s3 + $0x130] sm:$0xff] %v512_v58  ;;  %563 = vst [vmem:[%s1059_s3 + $0x110] sm:$0xff] %v508_v59  ;;  %v345_v0 = vadd.f32 %v344_v62, %v847_v1  ;;  %v458_v38 = vadd.f32 %v457_v63, %v829_v52  ;;  %v346_v2 = vpop.f32.mrb[23].mxu1  ;;  %v459_v43 = vpop.f32.mrb[23].mxu0 }
 0x109   :  { %568 = vst [vmem:[%s1059_s3 + $0x138] sm:$0xff] %v513_v60  ;;  %564 = vst.msk [vmem:[%s1059_s3 + $0x118] sm:$0xff] %vm533_vm1, %v509_v61  ;;  %v347_v3 = vadd.f32 %v346_v2, %v847_v1  ;;  %v460_v4 = vadd.f32 %v459_v43, %v829_v52 }
 0x10a   :  { %v518_v5 = vmax.f32 %v345_v0, 0.0  ;;  %v514_v6 = vmax.f32 %v458_v38, 0.0 }
 0x10b   :  { %v519_v7 = vmax.f32 %v347_v3, 0.0  ;;  %v515_v8 = vmax.f32 %v460_v4, 0.0  ;;  %v350_v9 = vpop.f32.mrb[24].mxu1  ;;  %v463_v10 = vpop.f32.mrb[24].mxu0 }
 0x10c   :  { %573 = vst [vmem:[%s1059_s3 + $0x160] sm:$0xff] %v518_v5  ;;  %569 = vst [vmem:[%s1059_s3 + $0x140] sm:$0xff] %v514_v6  ;;  %v351_v11 = vadd.f32 %v350_v9, %v865_v14  ;;  %v464_v12 = vadd.f32 %v463_v10, %v847_v1  ;;  %v352_v13 = vpop.f32.mrb[25].mxu1  ;;  %v465_v52 = vpop.f32.mrb[25].mxu0 }
 0x10d   :  { %574 = vst [vmem:[%s1059_s3 + $0x168] sm:$0xff] %v519_v7  ;;  %570 = vst.msk [vmem:[%s1059_s3 + $0x148] sm:$0xff] %vm533_vm1, %v515_v8  ;;  %v353_v40 = vadd.f32 %v352_v13, %v865_v14  ;;  %v466_v15 = vadd.f32 %v465_v52, %v847_v1 }
 0x10e   :  { %v524_v16 = vmax.f32 %v351_v11, 0.0  ;;  %v520_v17 = vmax.f32 %v464_v12, 0.0 }
 0x10f   :  { %v525_v18 = vmax.f32 %v353_v40, 0.0  ;;  %v521_v19 = vmax.f32 %v466_v15, 0.0  ;;  %v469_v20 = vpop.f32.mrb[26].mxu0 }
 0x110   :  { %579 = vst [vmem:[%s1059_s3 + $0x190] sm:$0xff] %v524_v16  ;;  %575 = vst [vmem:[%s1059_s3 + $0x170] sm:$0xff] %v520_v17  ;;  %v470_v21 = vadd.f32 %v469_v20, %v865_v14  ;;  %v471_v22 = vpop.f32.mrb[27].mxu0 }
 0x111   :  { %580 = vst [vmem:[%s1059_s3 + $0x198] sm:$0xff] %v525_v18  ;;  %576 = vst.msk [vmem:[%s1059_s3 + $0x178] sm:$0xff] %vm533_vm1, %v521_v19  ;;  %v472_v1 = vadd.f32 %v471_v22, %v865_v14 }
 0x112   :  { %v526_v23 = vmax.f32 %v470_v21, 0.0 }
 0x113   :  { %v527_v24 = vmax.f32 %v472_v1, 0.0 }
 0x114   :  { %581 = vst [vmem:[%s1059_s3 + $0x1a0] sm:$0xff] %v526_v23 }
 0x115   :  { %582 = vst.msk [vmem:[%s1059_s3 + $0x1a8] sm:$0xff] %vm533_vm1, %v527_v24 }

// kernel: model_forward.6
= control target key start
LH: loop header
LB: loop body
LE: loop exit
PB: predicated region body
PF: predicated region fallthrough
CT: control target
= control target key end

     0   :  { %v9212_v2 = vmov 0.0   ;;  %vm109_vm0 = vcmask 64512   ;;  %v6333_v16 = vmov 0   ;;  %vm4296_vm1 = vcmask 293888   ;;  %s9208_s0 = inlined_call_operand.vmem [shape: f32[8,4900], index: 0, kind: input, shape index: {}]   ;;  %s9209_s1 = inlined_call_operand.vmem [shape: f32[64,8], index: 1, kind: input, shape index: {}]   ;;  %s9210_s2 = inlined_call_operand.vmem [shape: f32[64,1], index: 2, kind: input, shape index: {}]   ;;  %s9211_s3 = inlined_call_operand.vmem [shape: f32[64,4900], index: 3, kind: output, shape index: {}]  }
   0x1   :  { %v23_v0 = vld [vmem:[%s9208_s0 + $0x8] sm:$0xff]  ;;  %v22_v1 = vld [vmem:[%s9208_s0] sm:$0xff]  ;;  %198 = vmatprep.mubr.f32.mxu0 %v9212_v2  ;;  %234 = vmatprep.mubr.f32.mxu1 %v9212_v2  ;;  %v6370_v4 = vld [vmem:[%s9209_s1 + $0x30] sm:$0xff] }
   0x2   :  { %v6365_v3 = vld [vmem:[%s9209_s1] sm:$0xff]  ;;  %134 = vmatprep.subr.mxu0 %v23_v0  ;;  %5070 = vmatprep.subr.mxu1 %v23_v0  ;;  %v25_v5 = vld [vmem:[%s9208_s0 + $0x18] sm:$0xff]  ;;  %v27_v6 = vld [vmem:[%s9208_s0 + $0x28] sm:$0xff] }
   0x3   :  { %135 = vmatpush1.msra.mxu0 %v22_v1  ;;  %5071 = vmatpush1.msra.mxu1 %v22_v1  ;;  %v24_v7 = vld [vmem:[%s9208_s0 + $0x10] sm:$0xff]  ;;  %v26_v8 = vld [vmem:[%s9208_s0 + $0x20] sm:$0xff]  ;;  %v6391_v9 = vld [vmem:[%s9209_s1 + $0x8] sm:$0xff] }
   0x4   :  { %4575 = vmatmul.mubr.msk.f32.vlgmr.msra.gmra.mrb[0].mxu0 %vm109_vm0, %v6365_v3  ;;  %4581 = vmatmul.mubr.msk.f32.vlgmr.msra.gmra.mrb[0].mxu1 %vm109_vm0, %v6370_v4  ;;  %v6396_v10 = vld [vmem:[%s9209_s1 + $0x38] sm:$0xff]  ;;  %v31_v12 = vld [vmem:[%s9208_s0 + $0x48] sm:$0xff]  ;;  %v6415_v13 = vld [vmem:[%s9209_s1 + $0x10] sm:$0xff] }
   0x5   :  { %247 = vmatprep.subr.mxu1 %v25_v5  ;;  %360 = vmatprep.subr.mxu0 %v27_v6  ;;  %v29_v11 = vld [vmem:[%s9208_s0 + $0x38] sm:$0xff]  ;;  %v28_v14 = vld [vmem:[%s9208_s0 + $0x30] sm:$0xff]  ;;  %v61_v17 = vld [vmem:[%s9210_s2] sm:$0xff] }
   0x6   :  { %248 = vmatpush1.msra.mxu1 %v24_v7  ;;  %361 = vmatpush1.msra.mxu0 %v26_v8  ;;  %v33_v15 = vld [vmem:[%s9208_s0 + $0x58] sm:$0xff]  ;;  %v63_v18 = vld [vmem:[%s9210_s2 + $0x10] sm:$0xff]  ;;  %v62_v20 = vld [vmem:[%s9210_s2 + $0x8] sm:$0xff] }
   0x7   :  { %204 = vmatprep.mubr.f32.mxu0 %v9212_v2  ;;  %240 = vmatprep.mubr.f32.mxu1 %v9212_v2  ;;  %v6437_v19 = vld [vmem:[%s9209_s1 + $0x18] sm:$0xff]  ;;  %v6455_v22 = vld [vmem:[%s9209_s1 + $0x20] sm:$0xff]  ;;  %v66_v24 = vld [vmem:[%s9210_s2 + $0x28] sm:$0xff] }
   0x8   :  { %4576 = vmatmul.mubr.msk.f32.gmra.mrb[2].mxu0 %vm109_vm0, %v6391_v9  ;;  %4582 = vmatmul.mubr.msk.f32.gmra.mrb[2].mxu1 %vm109_vm0, %v6396_v10  ;;  %v64_v21 = vld [vmem:[%s9210_s2 + $0x18] sm:$0xff]  ;;  %v65_v23 = vld [vmem:[%s9210_s2 + $0x20] sm:$0xff]  ;;  %v6472_v25 = vld [vmem:[%s9209_s1 + $0x28] sm:$0xff] }
   0x9   :  { %210 = vmatprep.mubr.f32.mxu0 %v9212_v2  ;;  %311 = vmatprep.mubr.f32.mxu1 %v9212_v2  ;;  %v67_v26 = vld [vmem:[%s9210_s2 + $0x30] sm:$0xff]  ;;  %v68_v27 = vld [vmem:[%s9210_s2 + $0x38] sm:$0xff]  ;;  %v30_v28 = vld [vmem:[%s9208_s0 + $0x40] sm:$0xff] }
   0xa   :  { %473 = vmatprep.subr.mxu1 %v29_v11  ;;  %586 = vmatprep.subr.mxu0 %v31_v12  ;;  %v35_v29 = vld [vmem:[%s9208_s0 + $0x68] sm:$0xff]  ;;  %v32_v30 = vld [vmem:[%s9208_s0 + $0x50] sm:$0xff]  ;;  %v37_v31 = vld [vmem:[%s9208_s0 + $0x78] sm:$0xff] }
   0xb   :  { %5074 = vset.pattern.permute.xlu0 %v6333_v16  ;;  %5075 = vset.pattern.permute.xlu1 %v6333_v16  ;;  %v34_v32 = vld [vmem:[%s9208_s0 + $0x60] sm:$0xff]  ;;  %v39_v33 = vld [vmem:[%s9208_s0 + $0x88] sm:$0xff]  ;;  %v36_v34 = vld [vmem:[%s9208_s0 + $0x70] sm:$0xff] }
   0xc   :  { %4577 = vmatmul.mubr.msk.f32.gmra.mrb[4].mxu0 %vm109_vm0, %v6415_v13  ;;  %4583 = vmatmul.mubr.msk.f32.vlgmr.msra.gmra.mrb[4].mxu1 %vm109_vm0, %v6365_v3  ;;  %v41_v35 = vld [vmem:[%s9208_s0 + $0x98] sm:$0xff]  ;;  %v38_v36 = vld [vmem:[%s9208_s0 + $0x80] sm:$0xff]  ;;  %v43_v37 = vld [vmem:[%s9208_s0 + $0xa8] sm:$0xff] }
   0xd   :  { %474 = vmatpush1.msra.mxu1 %v28_v14  ;;  %216 = vmatprep.mubr.f32.mxu0 %v9212_v2  ;;  %v40_v38 = vld [vmem:[%s9208_s0 + $0x90] sm:$0xff]  ;;  %v45_v39 = vld [vmem:[%s9208_s0 + $0xb8] sm:$0xff]  ;;  %v42_v40 = vld [vmem:[%s9208_s0 + $0xa0] sm:$0xff] }
   0xe   :  { %317 = vmatprep.mubr.f32.mxu1 %v9212_v2  ;;  %699 = vmatprep.subr.mxu1 %v33_v15  ;;  %v47_v41 = vld [vmem:[%s9208_s0 + $0xc8] sm:$0xff]  ;;  %v44_v42 = vld [vmem:[%s9208_s0 + $0xb0] sm:$0xff]  ;;  %v49_v43 = vld [vmem:[%s9208_s0 + $0xd8] sm:$0xff] }
   0xf   :  { %71 = vperm.xlu0 %5074, %v61_v17   ;;  %81 = vperm.xlu1 %5075, %v63_v18   ;;  %v46_v44 = vld [vmem:[%s9208_s0 + $0xc0] sm:$0xff]  ;;  %v51_v45 = vld [vmem:[%s9208_s0 + $0xe8] sm:$0xff]  ;;  %v48_v46 = vld [vmem:[%s9208_s0 + $0xd0] sm:$0xff] }
  0x10   :  { %4578 = vmatmul.mubr.msk.f32.gmra.mrb[6].mxu0 %vm109_vm0, %v6437_v19  ;;  %4584 = vmatmul.mubr.msk.f32.gmra.mrb[6].mxu1 %vm109_vm0, %v6391_v9  ;;  %v53_v47 = vld [vmem:[%s9208_s0 + $0xf8] sm:$0xff]  ;;  %v50_v48 = vld [vmem:[%s9208_s0 + $0xe0] sm:$0xff]  ;;  %v55_v49 = vld [vmem:[%s9208_s0 + $0x108] sm:$0xff] }
  0x11   :  { %222 = vmatprep.mubr.f32.mxu0 %v9212_v2  ;;  %323 = vmatprep.mubr.f32.mxu1 %v9212_v2  ;;  %v52_v53 = vld [vmem:[%s9208_s0 + $0xf0] sm:$0xff]  ;;  %v57_v54 = vld [vmem:[%s9208_s0 + $0x118] sm:$0xff]  ;;  %v54_v11 = vld [vmem:[%s9208_s0 + $0x100] sm:$0xff] }
  0x12   :  { %v59_v12 = vld [vmem:[%s9208_s0 + $0x128] sm:$0xff] }
  0x13   :  { %76 = vperm.xlu0 %5074, %v62_v20   ;;  %86 = vperm.xlu1 %5075, %v64_v21  }
  0x14   :  { %4579 = vmatmul.mubr.msk.f32.gmra.mrb[8].mxu0 %vm109_vm0, %v6455_v22  ;;  %4585 = vmatmul.mubr.msk.f32.gmra.mrb[8].mxu1 %vm109_vm0, %v6415_v13 }
  0x15   :  { %228 = vmatprep.mubr.f32.mxu0 %v9212_v2  ;;  %329 = vmatprep.mubr.f32.mxu1 %v9212_v2 }
  0x17   :  { %91 = vperm.xlu0 %5074, %v65_v23   ;;  %96 = vperm.xlu1 %5075, %v66_v24  }
  0x18   :  { %4580 = vmatmul.mubr.msk.f32.gmra.mrb[10].mxu0 %vm109_vm0, %v6472_v25  ;;  %4586 = vmatmul.mubr.msk.f32.gmra.mrb[10].mxu1 %vm109_vm0, %v6437_v19 }
  0x19   :  { %335 = vmatprep.mubr.f32.mxu1 %v9212_v2  ;;  %424 = vmatprep.mubr.f32.mxu0 %v9212_v2 }
  0x1b   :  { %101 = vperm.xlu0 %5074, %v67_v26   ;;  %106 = vperm.xlu1 %5075, %v68_v27  }
  0x1c   :  { %4587 = vmatmul.mubr.msk.f32.gmra.mrb[12].mxu1 %vm109_vm0, %v6455_v22  ;;  %4591 = vmatmul.mubr.msk.f32.vlgmr.msra.gmra.mrb[12].mxu0 %vm109_vm0, %v6365_v3 }
  0x1d   :  { %587 = vmatpush1.msra.mxu0 %v30_v28  ;;  %341 = vmatprep.mubr.f32.mxu1 %v9212_v2 }
  0x1e   :  { %430 = vmatprep.mubr.f32.mxu0 %v9212_v2  ;;  %812 = vmatprep.subr.mxu0 %v35_v29 }
  0x20   :  { %4588 = vmatmul.mubr.msk.f32.gmra.mrb[14].mxu1 %vm109_vm0, %v6472_v25  ;;  %4592 = vmatmul.mubr.msk.f32.gmra.mrb[14].mxu0 %vm109_vm0, %v6391_v9 }
  0x21   :  { %347 = vmatprep.mubr.f32.mxu1 %v9212_v2  ;;  %436 = vmatprep.mubr.f32.mxu0 %v9212_v2 }
  0x24   :  { %4589 = vmatmul.mubr.msk.f32.gmra.mrb[16].mxu1 %vm109_vm0, %v6370_v4  ;;  %4593 = vmatmul.mubr.msk.f32.gmra.mrb[16].mxu0 %vm109_vm0, %v6415_v13 }
  0x25   :  { %353 = vmatprep.mubr.f32.mxu1 %v9212_v2  ;;  %442 = vmatprep.mubr.f32.mxu0 %v9212_v2 }
  0x28   :  { %4590 = vmatmul.mubr.msk.f32.gmra.mrb[18].mxu1 %vm109_vm0, %v6396_v10  ;;  %4594 = vmatmul.mubr.msk.f32.gmra.mrb[18].mxu0 %vm109_vm0, %v6437_v19 }
  0x29   :  { %448 = vmatprep.mubr.f32.mxu0 %v9212_v2  ;;  %537 = vmatprep.mubr.f32.mxu1 %v9212_v2 }
  0x2c   :  { %4595 = vmatmul.mubr.msk.f32.gmra.mrb[20].mxu0 %vm109_vm0, %v6455_v22  ;;  %4599 = vmatmul.mubr.msk.f32.vlgmr.msra.gmra.mrb[20].mxu1 %vm109_vm0, %v6365_v3 }
  0x2d   :  { %700 = vmatpush1.msra.mxu1 %v32_v30  ;;  %454 = vmatprep.mubr.f32.mxu0 %v9212_v2 }
  0x2e   :  { %543 = vmatprep.mubr.f32.mxu1 %v9212_v2  ;;  %925 = vmatprep.subr.mxu1 %v37_v31 }
  0x30   :  { %4596 = vmatmul.mubr.msk.f32.gmra.mrb[22].mxu0 %vm109_vm0, %v6472_v25  ;;  %4600 = vmatmul.mubr.msk.f32.gmra.mrb[22].mxu1 %vm109_vm0, %v6391_v9 }
  0x31   :  { %460 = vmatprep.mubr.f32.mxu0 %v9212_v2  ;;  %549 = vmatprep.mubr.f32.mxu1 %v9212_v2 }
  0x34   :  { %4597 = vmatmul.mubr.msk.f32.gmra.mrb[24].mxu0 %vm109_vm0, %v6370_v4  ;;  %4601 = vmatmul.mubr.msk.f32.gmra.mrb[24].mxu1 %vm109_vm0, %v6415_v13 }
  0x35   :  { %466 = vmatprep.mubr.f32.mxu0 %v9212_v2  ;;  %555 = vmatprep.mubr.f32.mxu1 %v9212_v2 }
  0x38   :  { %4598 = vmatmul.mubr.msk.f32.gmra.mrb[26].mxu0 %vm109_vm0, %v6396_v10  ;;  %4602 = vmatmul.mubr.msk.f32.gmra.mrb[26].mxu1 %vm109_vm0, %v6437_v19 }
  0x39   :  { %561 = vmatprep.mubr.f32.mxu1 %v9212_v2  ;;  %650 = vmatprep.mubr.f32.mxu0 %v9212_v2 }
  0x3c   :  { %4603 = vmatmul.mubr.msk.f32.gmra.mrb[28].mxu1 %vm109_vm0, %v6455_v22  ;;  %4607 = vmatmul.mubr.msk.f32.vlgmr.msra.gmra.mrb[28].mxu0 %vm109_vm0, %v6365_v3 }
  0x3d   :  { %813 = vmatpush1.msra.mxu0 %v34_v32  ;;  %567 = vmatprep.mubr.f32.mxu1 %v9212_v2 }
  0x3e   :  { %656 = vmatprep.mubr.f32.mxu0 %v9212_v2  ;;  %1038 = vmatprep.subr.mxu0 %v39_v33 }
  0x40   :  { %4604 = vmatmul.mubr.msk.f32.gmra.mrb[30].mxu1 %vm109_vm0, %v6472_v25  ;;  %4608 = vmatmul.mubr.msk.f32.gmra.mrb[30].mxu0 %vm109_vm0, %v6391_v9 }
  0x41   :  { %573 = vmatprep.mubr.f32.mxu1 %v9212_v2  ;;  %662 = vmatprep.mubr.f32.mxu0 %v9212_v2 }
  0x44   :  { %4605 = vmatmul.mubr.msk.f32.gmra.mrb[32].mxu1 %vm109_vm0, %v6370_v4  ;;  %4609 = vmatmul.mubr.msk.f32.gmra.mrb[32].mxu0 %vm109_vm0, %v6415_v13 }
  0x45   :  { %579 = vmatprep.mubr.f32.mxu1 %v9212_v2  ;;  %668 = vmatprep.mubr.f32.mxu0 %v9212_v2 }
  0x48   :  { %4606 = vmatmul.mubr.msk.f32.gmra.mrb[34].mxu1 %vm109_vm0, %v6396_v10  ;;  %4610 = vmatmul.mubr.msk.f32.gmra.mrb[34].mxu0 %vm109_vm0, %v6437_v19 }
  0x49   :  { %674 = vmatprep.mubr.f32.mxu0 %v9212_v2  ;;  %763 = vmatprep.mubr.f32.mxu1 %v9212_v2 }
  0x4c   :  { %4611 = vmatmul.mubr.msk.f32.gmra.mrb[36].mxu0 %vm109_vm0, %v6455_v22  ;;  %4615 = vmatmul.mubr.msk.f32.vlgmr.msra.gmra.mrb[36].mxu1 %vm109_vm0, %v6365_v3 }
  0x4d   :  { %926 = vmatpush1.msra.mxu1 %v36_v34  ;;  %680 = vmatprep.mubr.f32.mxu0 %v9212_v2 }
  0x4e   :  { %769 = vmatprep.mubr.f32.mxu1 %v9212_v2  ;;  %1151 = vmatprep.subr.mxu1 %v41_v35 }
  0x50   :  { %4612 = vmatmul.mubr.msk.f32.gmra.mrb[38].mxu0 %vm109_vm0, %v6472_v25  ;;  %4616 = vmatmul.mubr.msk.f32.gmra.mrb[38].mxu1 %vm109_vm0, %v6391_v9 }
  0x51   :  { %686 = vmatprep.mubr.f32.mxu0 %v9212_v2  ;;  %775 = vmatprep.mubr.f32.mxu1 %v9212_v2 }
  0x54   :  { %4613 = vmatmul.mubr.msk.f32.gmra.mrb[40].mxu0 %vm109_vm0, %v6370_v4  ;;  %4617 = vmatmul.mubr.msk.f32.gmra.mrb[40].mxu1 %vm109_vm0, %v6415_v13 }
  0x55   :  { %692 = vmatprep.mubr.f32.mxu0 %v9212_v2  ;;  %781 = vmatprep.mubr.f32.mxu1 %v9212_v2 }
  0x58   :  { %4614 = vmatmul.mubr.msk.f32.gmra.mrb[42].mxu0 %vm109_vm0, %v6396_v10  ;;  %4618 = vmatmul.mubr.msk.f32.gmra.mrb[42].mxu1 %vm109_vm0, %v6437_v19 }
  0x59   :  { %787 = vmatprep.mubr.f32.mxu1 %v9212_v2  ;;  %876 = vmatprep.mubr.f32.mxu0 %v9212_v2 }
  0x5c   :  { %4619 = vmatmul.mubr.msk.f32.gmra.mrb[44].mxu1 %vm109_vm0, %v6455_v22  ;;  %4623 = vmatmul.mubr.msk.f32.vlgmr.msra.gmra.mrb[44].mxu0 %vm109_vm0, %v6365_v3 }
  0x5d   :  { %1039 = vmatpush1.msra.mxu0 %v38_v36  ;;  %793 = vmatprep.mubr.f32.mxu1 %v9212_v2 }
  0x5e   :  { %882 = vmatprep.mubr.f32.mxu0 %v9212_v2  ;;  %1264 = vmatprep.subr.mxu0 %v43_v37 }
  0x60   :  { %4620 = vmatmul.mubr.msk.f32.gmra.mrb[46].mxu1 %vm109_vm0, %v6472_v25  ;;  %4624 = vmatmul.mubr.msk.f32.gmra.mrb[46].mxu0 %vm109_vm0, %v6391_v9 }
  0x61   :  { %799 = vmatprep.mubr.f32.mxu1 %v9212_v2  ;;  %888 = vmatprep.mubr.f32.mxu0 %v9212_v2 }
  0x64   :  { %4621 = vmatmul.mubr.msk.f32.gmra.mrb[48].mxu1 %vm109_vm0, %v6370_v4  ;;  %4625 = vmatmul.mubr.msk.f32.gmra.mrb[48].mxu0 %vm109_vm0, %v6415_v13 }
  0x65   :  { %805 = vmatprep.mubr.f32.mxu1 %v9212_v2  ;;  %894 = vmatprep.mubr.f32.mxu0 %v9212_v2 }
  0x68   :  { %4622 = vmatmul.mubr.msk.f32.gmra.mrb[50].mxu1 %vm109_vm0, %v6396_v10  ;;  %4626 = vmatmul.mubr.msk.f32.gmra.mrb[50].mxu0 %vm109_vm0, %v6437_v19 }
  0x69   :  { %900 = vmatprep.mubr.f32.mxu0 %v9212_v2  ;;  %989 = vmatprep.mubr.f32.mxu1 %v9212_v2 }
  0x6c   :  { %4627 = vmatmul.mubr.msk.f32.gmra.mrb[52].mxu0 %vm109_vm0, %v6455_v22  ;;  %4631 = vmatmul.mubr.msk.f32.vlgmr.msra.gmra.mrb[52].mxu1 %vm109_vm0, %v6365_v3 }
  0x6d   :  { %1152 = vmatpush1.msra.mxu1 %v40_v38  ;;  %906 = vmatprep.mubr.f32.mxu0 %v9212_v2 }
  0x6e   :  { %995 = vmatprep.mubr.f32.mxu1 %v9212_v2  ;;  %1377 = vmatprep.subr.mxu1 %v45_v39 }
  0x70   :  { %4628 = vmatmul.mubr.msk.f32.gmra.mrb[54].mxu0 %vm109_vm0, %v6472_v25  ;;  %4632 = vmatmul.mubr.msk.f32.gmra.mrb[54].mxu1 %vm109_vm0, %v6391_v9 }
  0x71   :  { %912 = vmatprep.mubr.f32.mxu0 %v9212_v2  ;;  %1001 = vmatprep.mubr.f32.mxu1 %v9212_v2 }
  0x74   :  { %4629 = vmatmul.mubr.msk.f32.gmra.mrb[56].mxu0 %vm109_vm0, %v6370_v4  ;;  %4633 = vmatmul.mubr.msk.f32.gmra.mrb[56].mxu1 %vm109_vm0, %v6415_v13 }
  0x75   :  { %918 = vmatprep.mubr.f32.mxu0 %v9212_v2  ;;  %1007 = vmatprep.mubr.f32.mxu1 %v9212_v2 }
  0x78   :  { %4630 = vmatmul.mubr.msk.f32.gmra.mrb[58].mxu0 %vm109_vm0, %v6396_v10  ;;  %4634 = vmatmul.mubr.msk.f32.gmra.mrb[58].mxu1 %vm109_vm0, %v6437_v19 }
  0x79   :  { %1013 = vmatprep.mubr.f32.mxu1 %v9212_v2  ;;  %1102 = vmatprep.mubr.f32.mxu0 %v9212_v2 }
  0x7c   :  { %4635 = vmatmul.mubr.msk.f32.gmra.mrb[60].mxu1 %vm109_vm0, %v6455_v22  ;;  %4639 = vmatmul.mubr.msk.f32.vlgmr.msra.gmra.mrb[60].mxu0 %vm109_vm0, %v6365_v3 }
  0x7d   :  { %1265 = vmatpush1.msra.mxu0 %v42_v40  ;;  %1019 = vmatprep.mubr.f32.mxu1 %v9212_v2 }
  0x7e   :  { %1108 = vmatprep.mubr.f32.mxu0 %v9212_v2  ;;  %1490 = vmatprep.subr.mxu0 %v47_v41 }
  0x80   :  { %4636 = vmatmul.mubr.msk.f32.gmra.mrb[62].mxu1 %vm109_vm0, %v6472_v25  ;;  %4640 = vmatmul.mubr.msk.f32.gmra.mrb[62].mxu0 %vm109_vm0, %v6391_v9 }
  0x81   :  { %1025 = vmatprep.mubr.f32.mxu1 %v9212_v2  ;;  %1114 = vmatprep.mubr.f32.mxu0 %v9212_v2 }
  0x84   :  { %4637 = vmatmul.mubr.msk.f32.gmra.mrb[64].mxu1 %vm109_vm0, %v6370_v4  ;;  %4641 = vmatmul.mubr.msk.f32.gmra.mrb[64].mxu0 %vm109_vm0, %v6415_v13 }
  0x85   :  { %1031 = vmatprep.mubr.f32.mxu1 %v9212_v2  ;;  %1120 = vmatprep.mubr.f32.mxu0 %v9212_v2 }
  0x88   :  { %4638 = vmatmul.mubr.msk.f32.gmra.mrb[66].mxu1 %vm109_vm0, %v6396_v10  ;;  %4642 = vmatmul.mubr.msk.f32.gmra.mrb[66].mxu0 %vm109_vm0, %v6437_v19 }
  0x89   :  { %1126 = vmatprep.mubr.f32.mxu0 %v9212_v2  ;;  %1215 = vmatprep.mubr.f32.mxu1 %v9212_v2 }
  0x8c   :  { %4643 = vmatmul.mubr.msk.f32.gmra.mrb[68].mxu0 %vm109_vm0, %v6455_v22  ;;  %4647 = vmatmul.mubr.msk.f32.vlgmr.msra.gmra.mrb[68].mxu1 %vm109_vm0, %v6365_v3 }
  0x8d   :  { %1378 = vmatpush1.msra.mxu1 %v44_v42  ;;  %1132 = vmatprep.mubr.f32.mxu0 %v9212_v2 }
  0x8e   :  { %1221 = vmatprep.mubr.f32.mxu1 %v9212_v2  ;;  %1603 = vmatprep.subr.mxu1 %v49_v43  ;;  %v6804_v50 = vpop.permute.xlu0 %71  ;;  %v6812_v51 = vpop.permute.xlu1 %81 }
  0x90   :  { %4644 = vmatmul.mubr.msk.f32.gmra.mrb[70].mxu0 %vm109_vm0, %v6472_v25  ;;  %4648 = vmatmul.mubr.msk.f32.gmra.mrb[70].mxu1 %vm109_vm0, %v6391_v9 }
  0x91   :  { %1138 = vmatprep.mubr.f32.mxu0 %v9212_v2  ;;  %1227 = vmatprep.mubr.f32.mxu1 %v9212_v2 }
  0x92   :  { %v6820_v52 = vpop.permute.xlu0 %76  ;;  %v6833_v55 = vpop.permute.xlu1 %86 }
  0x94   :  { %4645 = vmatmul.mubr.msk.f32.gmra.mrb[72].mxu0 %vm109_vm0, %v6370_v4  ;;  %4649 = vmatmul.mubr.msk.f32.gmra.mrb[72].mxu1 %vm109_vm0, %v6415_v13 }
  0x95   :  { %1144 = vmatprep.mubr.f32.mxu0 %v9212_v2  ;;  %1233 = vmatprep.mubr.f32.mxu1 %v9212_v2 }
  0x96   :  { %v6836_v56 = vpop.permute.xlu0 %91  ;;  %v6844_v57 = vpop.permute.xlu1 %96 }
  0x98   :  { %4646 = vmatmul.mubr.msk.f32.gmra.mrb[74].mxu0 %vm109_vm0, %v6396_v10  ;;  %4650 = vmatmul.mubr.msk.f32.gmra.mrb[74].mxu1 %vm109_vm0, %v6437_v19 }
  0x99   :  { %1239 = vmatprep.mubr.f32.mxu1 %v9212_v2  ;;  %1328 = vmatprep.mubr.f32.mxu0 %v9212_v2 }
  0x9a   :  { %v6852_v58 = vpop.permute.xlu0 %101  ;;  %v6864_v6 = vpop.permute.xlu1 %106 }
  0x9c   :  { %4651 = vmatmul.mubr.msk.f32.gmra.mrb[76].mxu1 %vm109_vm0, %v6455_v22  ;;  %4655 = vmatmul.mubr.msk.f32.vlgmr.msra.gmra.mrb[76].mxu0 %vm109_vm0, %v6365_v3 }
  0x9d   :  { %1491 = vmatpush1.msra.mxu0 %v46_v44  ;;  %1245 = vmatprep.mubr.f32.mxu1 %v9212_v2 }
  0x9e   :  { %1334 = vmatprep.mubr.f32.mxu0 %v9212_v2  ;;  %1716 = vmatprep.subr.mxu0 %v51_v45 }
  0xa0   :  { %4652 = vmatmul.mubr.msk.f32.gmra.mrb[78].mxu1 %vm109_vm0, %v6472_v25  ;;  %4656 = vmatmul.mubr.msk.f32.gmra.mrb[78].mxu0 %vm109_vm0, %v6391_v9 }
  0xa1   :  { %1251 = vmatprep.mubr.f32.mxu1 %v9212_v2  ;;  %1340 = vmatprep.mubr.f32.mxu0 %v9212_v2 }
  0xa4   :  { %4653 = vmatmul.mubr.msk.f32.gmra.mrb[80].mxu1 %vm109_vm0, %v6370_v4  ;;  %4657 = vmatmul.mubr.msk.f32.gmra.mrb[80].mxu0 %vm109_vm0, %v6415_v13 }
  0xa5   :  { %1257 = vmatprep.mubr.f32.mxu1 %v9212_v2  ;;  %1346 = vmatprep.mubr.f32.mxu0 %v9212_v2 }
  0xa8   :  { %4654 = vmatmul.mubr.msk.f32.gmra.mrb[82].mxu1 %vm109_vm0, %v6396_v10  ;;  %4658 = vmatmul.mubr.msk.f32.gmra.mrb[82].mxu0 %vm109_vm0, %v6437_v19 }
  0xa9   :  { %1352 = vmatprep.mubr.f32.mxu0 %v9212_v2  ;;  %1441 = vmatprep.mubr.f32.mxu1 %v9212_v2 }
  0xac   :  { %4659 = vmatmul.mubr.msk.f32.gmra.mrb[84].mxu0 %vm109_vm0, %v6455_v22  ;;  %4663 = vmatmul.mubr.msk.f32.vlgmr.msra.gmra.mrb[84].mxu1 %vm109_vm0, %v6365_v3 }
  0xad   :  { %1604 = vmatpush1.msra.mxu1 %v48_v46  ;;  %1358 = vmatprep.mubr.f32.mxu0 %v9212_v2 }
  0xae   :  { %1447 = vmatprep.mubr.f32.mxu1 %v9212_v2  ;;  %1829 = vmatprep.subr.mxu1 %v53_v47 }
  0xb0   :  { %4660 = vmatmul.mubr.msk.f32.gmra.mrb[86].mxu0 %vm109_vm0, %v6472_v25  ;;  %4664 = vmatmul.mubr.msk.f32.gmra.mrb[86].mxu1 %vm109_vm0, %v6391_v9 }
  0xb1   :  { %1364 = vmatprep.mubr.f32.mxu0 %v9212_v2  ;;  %1453 = vmatprep.mubr.f32.mxu1 %v9212_v2 }
  0xb4   :  { %4661 = vmatmul.mubr.msk.f32.gmra.mrb[88].mxu0 %vm109_vm0, %v6370_v4  ;;  %4665 = vmatmul.mubr.msk.f32.gmra.mrb[88].mxu1 %vm109_vm0, %v6415_v13 }
  0xb5   :  { %1370 = vmatprep.mubr.f32.mxu0 %v9212_v2  ;;  %1459 = vmatprep.mubr.f32.mxu1 %v9212_v2 }
  0xb8   :  { %4662 = vmatmul.mubr.msk.f32.gmra.mrb[90].mxu0 %vm109_vm0, %v6396_v10  ;;  %4666 = vmatmul.mubr.msk.f32.gmra.mrb[90].mxu1 %vm109_vm0, %v6437_v19 }
  0xb9   :  { %1465 = vmatprep.mubr.f32.mxu1 %v9212_v2  ;;  %1554 = vmatprep.mubr.f32.mxu0 %v9212_v2 }
  0xbc   :  { %4667 = vmatmul.mubr.msk.f32.gmra.mrb[92].mxu1 %vm109_vm0, %v6455_v22  ;;  %4671 = vmatmul.mubr.msk.f32.vlgmr.msra.gmra.mrb[92].mxu0 %vm109_vm0, %v6365_v3 }
  0xbd   :  { %1717 = vmatpush1.msra.mxu0 %v50_v48  ;;  %1471 = vmatprep.mubr.f32.mxu1 %v9212_v2 }
  0xbe   :  { %1560 = vmatprep.mubr.f32.mxu0 %v9212_v2  ;;  %1942 = vmatprep.subr.mxu0 %v55_v49 }
  0xc0   :  { %4668 = vmatmul.mubr.msk.f32.gmra.mrb[94].mxu1 %vm109_vm0, %v6472_v25  ;;  %4672 = vmatmul.mubr.msk.f32.gmra.mrb[94].mxu0 %vm109_vm0, %v6391_v9 }
  0xc1   :  { %1477 = vmatprep.mubr.f32.mxu1 %v9212_v2  ;;  %1566 = vmatprep.mubr.f32.mxu0 %v9212_v2 }
  0xc4   :  { %4669 = vmatmul.mubr.msk.f32.gmra.mrb[96].mxu1 %vm109_vm0, %v6370_v4  ;;  %4673 = vmatmul.mubr.msk.f32.gmra.mrb[96].mxu0 %vm109_vm0, %v6415_v13 }
  0xc5   :  { %1483 = vmatprep.mubr.f32.mxu1 %v9212_v2  ;;  %1572 = vmatprep.mubr.f32.mxu0 %v9212_v2 }
  0xc8   :  { %4670 = vmatmul.mubr.msk.f32.gmra.mrb[98].mxu1 %vm109_vm0, %v6396_v10  ;;  %4674 = vmatmul.mubr.msk.f32.gmra.mrb[98].mxu0 %vm109_vm0, %v6437_v19 }
  0xc9   :  { %1578 = vmatprep.mubr.f32.mxu0 %v9212_v2  ;;  %1667 = vmatprep.mubr.f32.mxu1 %v9212_v2 }
  0xcc   :  { %4675 = vmatmul.mubr.msk.f32.gmra.mrb[100].mxu0 %vm109_vm0, %v6455_v22  ;;  %4679 = vmatmul.mubr.msk.f32.vlgmr.msra.gmra.mrb[100].mxu1 %vm109_vm0, %v6365_v3 }
  0xcd   :  { %1830 = vmatpush1.msra.mxu1 %v52_v53  ;;  %1584 = vmatprep.mubr.f32.mxu0 %v9212_v2 }
  0xce   :  { %1673 = vmatprep.mubr.f32.mxu1 %v9212_v2  ;;  %2055 = vmatprep.subr.mxu1 %v57_v54 }
  0xd0   :  { %4676 = vmatmul.mubr.msk.f32.gmra.mrb[102].mxu0 %vm109_vm0, %v6472_v25  ;;  %4680 = vmatmul.mubr.msk.f32.gmra.mrb[102].mxu1 %vm109_vm0, %v6391_v9 }
  0xd1   :  { %1590 = vmatprep.mubr.f32.mxu0 %v9212_v2  ;;  %1679 = vmatprep.mubr.f32.mxu1 %v9212_v2 }
  0xd4   :  { %4677 = vmatmul.mubr.msk.f32.gmra.mrb[104].mxu0 %vm109_vm0, %v6370_v4  ;;  %4681 = vmatmul.mubr.msk.f32.gmra.mrb[104].mxu1 %vm109_vm0, %v6415_v13 }
  0xd5   :  { %1596 = vmatprep.mubr.f32.mxu0 %v9212_v2  ;;  %1685 = vmatprep.mubr.f32.mxu1 %v9212_v2 }
  0xd7   :  { %v200_v59 = vpop.f32.mrb[0].mxu0  ;;  %v236_v60 = vpop.f32.mrb[0].mxu1 }
  0xd8   :  { %v201_v61 = vadd.f32 %v200_v59, %v6804_v50  ;;  %v237_v62 = vadd.f32 %v236_v60, %v6852_v58  ;;  %v202_v63 = vpop.f32.mrb[1].mxu0  ;;  %v238_v0 = vpop.f32.mrb[1].mxu1  ;;  %4678 = vmatmul.mubr.msk.f32.gmra.mrb[106].mxu0 %vm109_vm0, %v6396_v10  ;;  %4682 = vmatmul.mubr.msk.f32.gmra.mrb[106].mxu1 %vm109_vm0, %v6437_v19 }
  0xd9   :  { %v203_v1 = vadd.f32 %v202_v63, %v6804_v50  ;;  %v239_v5 = vadd.f32 %v238_v0, %v6852_v58  ;;  %1691 = vmatprep.mubr.f32.mxu1 %v9212_v2  ;;  %1780 = vmatprep.mubr.f32.mxu0 %v9212_v2 }
  0xda   :  { %v4735_v7 = vmul.f32 -1.442695, %v201_v61  ;;  %v4969_v8 = vmul.f32 -1.442695, %v237_v62 }
  0xdb   :  { %v4736_v14 = vmul.f32 -1.442695, %v203_v1  ;;  %v4970_v15 = vmul.f32 -1.442695, %v239_v5  ;;  %v206_v16 = vpop.f32.mrb[2].mxu0  ;;  %v242_v17 = vpop.f32.mrb[2].mxu1 }
  0xdc   :  { %5076 = vpow2.f32 %v4735_v7  ;;  %v207_v18 = vadd.f32 %v206_v16, %v6820_v52  ;;  %v243_v20 = vadd.f32 %v242_v17, %v6864_v6  ;;  %v208_v21 = vpop.f32.mrb[3].mxu0  ;;  %v244_v23 = vpop.f32.mrb[3].mxu1  ;;  %4683 = vmatmul.mubr.msk.f32.gmra.mrb[108].mxu1 %vm109_vm0, %v6455_v22  ;;  %4687 = vmatmul.mubr.msk.f32.vlgmr.msra.gmra.mrb[108].mxu0 %vm109_vm0, %v6365_v3  ;;  %v6919_v16 = vld [vmem:[%s9208_s0 + $0x130] sm:$0xff] }
  0xdd   :  { %5078 = vpow2.f32 %v4969_v8  ;;  %v209_v24 = vadd.f32 %v208_v21, %v6820_v52  ;;  %v245_v26 = vadd.f32 %v244_v23, %v6864_v6  ;;  %1943 = vmatpush1.msra.mxu0 %v54_v11  ;;  %1697 = vmatprep.mubr.f32.mxu1 %v9212_v2  ;;  %v56_v11 = vld [vmem:[%s9208_s0 + $0x110] sm:$0xff] }
  0xde   :  { %5080 = vpow2.f32 %v4736_v14  ;;  %v4774_v27 = vmul.f32 -1.442695, %v207_v18  ;;  %v5008_v28 = vmul.f32 -1.442695, %v243_v20  ;;  %1786 = vmatprep.mubr.f32.mxu0 %v9212_v2  ;;  %2168 = vmatprep.subr.mxu0 %v59_v12 }
  0xdf   :  { %5082 = vpow2.f32 %v4970_v15  ;;  %v4775_v29 = vmul.f32 -1.442695, %v209_v24  ;;  %v5009_v30 = vmul.f32 -1.442695, %v245_v26  ;;  %v212_v31 = vpop.f32.mrb[4].mxu0  ;;  %v313_v32 = vpop.f32.mrb[4].mxu1 }
  0xe0   :  { %5084 = vpow2.f32 %v4774_v27  ;;  %v213_v33 = vadd.f32 %v212_v31, %v6812_v51  ;;  %v314_v34 = vadd.f32 %v313_v32, %v6804_v50  ;;  %v214_v35 = vpop.f32.mrb[5].mxu0  ;;  %v315_v36 = vpop.f32.mrb[5].mxu1  ;;  %4684 = vmatmul.mubr.msk.f32.gmra.mrb[110].mxu1 %vm109_vm0, %v6472_v25  ;;  %4688 = vmatmul.mubr.msk.f32.gmra.mrb[110].mxu0 %vm109_vm0, %v6391_v9 }
  0xe1   :  { %5086 = vpow2.f32 %v5008_v28  ;;  %v215_v37 = vadd.f32 %v214_v35, %v6812_v51  ;;  %v316_v38 = vadd.f32 %v315_v36, %v6804_v50  ;;  %1703 = vmatprep.mubr.f32.mxu1 %v9212_v2  ;;  %1792 = vmatprep.mubr.f32.mxu0 %v9212_v2 }
  0xe2   :  { %5088 = vpow2.f32 %v4775_v29  ;;  %v4813_v39 = vmul.f32 -1.442695, %v213_v33  ;;  %v4737_v40 = vmul.f32 -1.442695, %v314_v34 }
  0xe3   :  { %5090 = vpow2.f32 %v5009_v30  ;;  %v4814_v41 = vmul.f32 -1.442695, %v215_v37  ;;  %v4738_v42 = vmul.f32 -1.442695, %v316_v38  ;;  %v218_v43 = vpop.f32.mrb[6].mxu0  ;;  %v319_v44 = vpop.f32.mrb[6].mxu1 }
  0xe4   :  { %5092 = vpow2.f32 %v4813_v39  ;;  %v219_v45 = vadd.f32 %v218_v43, %v6833_v55  ;;  %v220_v46 = vpop.f32.mrb[7].mxu0  ;;  %v321_v47 = vpop.f32.mrb[7].mxu1  ;;  %4685 = vmatmul.mubr.msk.f32.gmra.mrb[112].mxu1 %vm109_vm0, %v6370_v4  ;;  %4689 = vmatmul.mubr.msk.f32.gmra.mrb[112].mxu0 %vm109_vm0, %v6415_v13  ;;  %v320_v29 = vadd.f32 %v319_v44, %v6820_v52 }
  0xe5   :  { %5094 = vpow2.f32 %v4737_v40  ;;  %1709 = vmatprep.mubr.f32.mxu1 %v9212_v2  ;;  %1798 = vmatprep.mubr.f32.mxu0 %v9212_v2  ;;  %v221_v31 = vadd.f32 %v220_v46, %v6833_v55  ;;  %v322_v35 = vadd.f32 %v321_v47, %v6820_v52 }
  0xe6   :  { %v5077_v48 = vpop.eup %5076  ;;  %5096 = vpow2.f32 %v4814_v41  ;;  %v4852_v49 = vmul.f32 -1.442695, %v219_v45  ;;  %v4776_v44 = vmul.f32 -1.442695, %v320_v29 }
  0xe7   :  { %v5079_v53 = vpop.eup %5078  ;;  %v3322_v54 = vadd.f32 1.0, %v5077_v48  ;;  %5098 = vpow2.f32 %v4738_v42  ;;  %v224_v59 = vpop.f32.mrb[8].mxu0  ;;  %v4853_v47 = vmul.f32 -1.442695, %v221_v31 }
  0xe8   :  { %v5081_v60 = vpop.eup %5080  ;;  %v3556_v61 = vadd.f32 1.0, %v5079_v53  ;;  %5100 = vpow2.f32 %v4852_v49  ;;  %v6899_v62 = vpop.f32.mrb[8].mxu1  ;;  %4686 = vmatmul.mubr.msk.f32.gmra.mrb[114].mxu1 %vm109_vm0, %v6396_v10  ;;  %4690 = vmatmul.mubr.msk.f32.gmra.mrb[114].mxu0 %vm109_vm0, %v6437_v19  ;;  %v225_v40 = vadd.f32 %v224_v59, %v6836_v56 }
  0xe9   :  { %v6901_v63 = vpop.f32.mrb[9].mxu0  ;;  %v5083_v0 = vpop.eup %5082  ;;  %5102 = vrcp.f32 %v3322_v54  ;;  %v3323_v1 = vadd.f32 1.0, %v5081_v60  ;;  %1804 = vmatprep.mubr.f32.mxu0 %v9212_v2  ;;  %1893 = vmatprep.mubr.f32.mxu1 %v9212_v2  ;;  %v326_v45 = vadd.f32 %v6899_v62, %v6812_v51  ;;  %v4777_v54 = vmul.f32 -1.442695, %v322_v35 }
  0xea   :  { %v6907_v5 = vpop.f32.mrb[9].mxu1  ;;  %v5085_v7 = vpop.eup %5084  ;;  %5104 = vrcp.f32 %v3556_v61  ;;  %v3557_v8 = vadd.f32 1.0, %v5083_v0  ;;  %v227_v48 = vadd.f32 %v6901_v63, %v6836_v56  ;;  %v4891_v63 = vmul.f32 -1.442695, %v225_v40 }
  0xeb   :  { %v5087_v12 = vpop.eup %5086  ;;  %5106 = vrcp.f32 %v3323_v1  ;;  %v3361_v14 = vadd.f32 1.0, %v5085_v7  ;;  %v6914_v15 = vpop.f32.mrb[10].mxu0  ;;  %v328_v59 = vadd.f32 %v6907_v5, %v6812_v51 }
  0xec   :  { %v5089_v17 = vpop.eup %5088  ;;  %5108 = vrcp.f32 %v3557_v8  ;;  %v3595_v18 = vadd.f32 1.0, %v5087_v12  ;;  %v6921_v20 = vpop.f32.mrb[10].mxu1  ;;  %4691 = vmatmul.mubr.msk.f32.gmra.mrb[116].mxu0 %vm109_vm0, %v6455_v22  ;;  %4695 = vmatmul.mubr.msk.f32.vlgmr.msra.gmra.mrb[116].mxu1 %vm109_vm0, %v6365_v3  ;;  %v231_v0 = vadd.f32 %v6914_v15, %v6844_v57  ;;  %v4892_v8 = vmul.f32 -1.442695, %v227_v48 }
  0xed   :  { %v6923_v21 = vpop.f32.mrb[11].mxu0  ;;  %v5091_v23 = vpop.eup %5090  ;;  %5110 = vrcp.f32 %v3361_v14  ;;  %v3362_v24 = vadd.f32 1.0, %v5089_v17  ;;  %2056 = vmatpush1.msra.mxu1 %v56_v11  ;;  %1810 = vmatprep.mubr.f32.mxu0 %v9212_v2  ;;  %v332_v5 = vadd.f32 %v6921_v20, %v6833_v55  ;;  %v4816_v17 = vmul.f32 -1.442695, %v328_v59 }
  0xee   :  { %v6929_v26 = vpop.f32.mrb[11].mxu1  ;;  %v5093_v27 = vpop.eup %5092  ;;  %5112 = vrcp.f32 %v3595_v18  ;;  %v3596_v28 = vadd.f32 1.0, %v5091_v23  ;;  %1899 = vmatprep.mubr.f32.mxu1 %v9212_v2  ;;  %5056 = vmatprep.subr.mxu1 %v6919_v16  ;;  %v233_v11 = vadd.f32 %v6923_v21, %v6844_v57 }
  0xef   :  { %v5095_v30 = vpop.eup %5094  ;;  %5114 = vrcp.f32 %v3362_v24  ;;  %v3400_v3 = vadd.f32 1.0, %v5093_v27  ;;  %v6936_v32 = vpop.f32.mrb[12].mxu1  ;;  %v334_v18 = vadd.f32 %v6929_v26, %v6833_v55  ;;  %v4930_v24 = vmul.f32 -1.442695, %v231_v0 }
  0xf0   :  { %v5097_v33 = vpop.eup %5096  ;;  %5116 = vrcp.f32 %v3596_v28  ;;  %v3324_v34 = vadd.f32 1.0, %v5095_v30  ;;  %v6939_v36 = vpop.f32.mrb[12].mxu0  ;;  %4692 = vmatmul.mubr.msk.f32.gmra.mrb[118].mxu0 %vm109_vm0, %v6472_v25  ;;  %4696 = vmatmul.mubr.msk.f32.gmra.mrb[118].mxu1 %vm109_vm0, %v6391_v9  ;;  %v338_v26 = vadd.f32 %v6936_v32, %v6836_v56  ;;  %v58_v28 = vld [vmem:[%s9208_s0 + $0x120] sm:$0xff]  ;;  %v4931_v30 = vmul.f32 -1.442695, %v233_v11 }
  0xf1   :  { %v6941_v37 = vpop.f32.mrb[13].mxu1  ;;  %v5099_v38 = vpop.eup %5098  ;;  %5118 = vrcp.f32 %v3400_v3  ;;  %v3401_v39 = vadd.f32 1.0, %v5097_v33  ;;  %1816 = vmatprep.mubr.f32.mxu0 %v9212_v2  ;;  %1905 = vmatprep.mubr.f32.mxu1 %v9212_v2  ;;  %v4855_v33 = vmul.f32 -1.442695, %v334_v18 }
  0xf2   :  { %v6948_v41 = vpop.f32.mrb[13].mxu0  ;;  %v5101_v42 = vpop.eup %5100  ;;  %5120 = vrcp.f32 %v3324_v34  ;;  %v3325_v43 = vadd.f32 1.0, %v5099_v38 }
  0xf3   :  { %v5103_v46 = vpop.eup %5102  ;;  %5122 = vrcp.f32 %v3401_v39  ;;  %v3439_v9 = vadd.f32 1.0, %v5101_v42  ;;  %v6956_v49 = vpop.f32.mrb[14].mxu1  ;;  %v4893_v39 = vmul.f32 -1.442695, %v338_v26 }
  0xf4   :  { %v5105_v53 = vpop.eup %5104  ;;  %4258 = vst [vmem:[%s9211_s3] sm:$0xff] %v5103_v46  ;;  %5124 = vrcp.f32 %v3325_v43  ;;  %v6963_v60 = vpop.f32.mrb[14].mxu0  ;;  %4693 = vmatmul.mubr.msk.f32.gmra.mrb[120].mxu0 %vm109_vm0, %v6370_v4  ;;  %4697 = vmatmul.mubr.msk.f32.gmra.mrb[120].mxu1 %vm109_vm0, %v6415_v13  ;;  %v4815_v13 = vmul.f32 -1.442695, %v326_v45 }
  0xf5   :  { %v6965_v61 = vpop.f32.mrb[15].mxu1  ;;  %v5107_v62 = vpop.eup %5106  ;;  %4493 = vst [vmem:[%s9211_s3 + $0x750] sm:$0xff] %v5105_v53  ;;  %5126 = vrcp.f32 %v3439_v9  ;;  %1822 = vmatprep.mubr.f32.mxu0 %v9212_v2  ;;  %1911 = vmatprep.mubr.f32.mxu1 %v9212_v2 }
  0xf6   :  { %v6976_v1 = vpop.f32.mrb[15].mxu0  ;;  %v5109_v4 = vpop.eup %5108  ;;  %4259 = vst [vmem:[%s9211_s3 + $0x8] sm:$0xff] %v5107_v62  ;;  %5128 = vpow2.f32 %v4776_v44 }
  0xf7   :  { %v5111_v7 = vpop.eup %5110  ;;  %4494 = vst [vmem:[%s9211_s3 + $0x758] sm:$0xff] %v5109_v4  ;;  %5130 = vpow2.f32 %v4853_v47  ;;  %v6990_v12 = vpop.f32.mrb[16].mxu1  ;;  %v7072_v47 = vld [vmem:[%s9209_s1 + $0x8] sm:$0xff] }
  0xf8   :  { %v6992_v14 = vpop.f32.mrb[16].mxu0  ;;  %v5113_v15 = vpop.eup %5112  ;;  %4298 = vst [vmem:[%s9211_s3 + $0x138] sm:$0xff] %v5111_v7  ;;  %5132 = vpow2.f32 %v4777_v54  ;;  %4694 = vmatmul.mubr.msk.f32.gmra.mrb[122].mxu0 %vm109_vm0, %v6396_v10  ;;  %4698 = vmatmul.mubr.msk.f32.gmra.mrb[122].mxu1 %vm109_vm0, %v6437_v19  ;;  %v4854_v10 = vmul.f32 -1.442695, %v332_v5  ;;  %v427_v19 = vadd.f32 %v6939_v36, %v6804_v50  ;;  %v7041_v36 = vld [vmem:[%s9209_s1] sm:$0xff]  ;;  %v7087_v7 = vld [vmem:[%s9209_s1 + $0x30] sm:$0xff] }
  0xf9   :  { %v6999_v20 = vpop.f32.mrb[17].mxu1  ;;  %v7001_v23 = vpop.f32.mrb[17].mxu0  ;;  %4532 = vst [vmem:[%s9211_s3 + $0x888] sm:$0xff] %v5113_v15  ;;  %5134 = vpow2.f32 %v4891_v63  ;;  %1917 = vmatprep.mubr.f32.mxu1 %v9212_v2  ;;  %2006 = vmatprep.mubr.f32.mxu0 %v9212_v2 }
  0xfa   :  { %v5115_v21 = vpop.eup %5114  ;;  %5136 = vpow2.f32 %v4815_v13 }
  0xfb   :  { %v5117_v27 = vpop.eup %5116  ;;  %4299 = vst [vmem:[%s9211_s3 + $0x140] sm:$0xff] %v5115_v21  ;;  %5138 = vpow2.f32 %v4892_v8  ;;  %v7025_v3 = vpop.f32.mrb[18].mxu1  ;;  %v7094_v8 = vld [vmem:[%s9209_s1 + $0x10] sm:$0xff] }
  0xfc   :  { %v5119_v29 = vpop.eup %5118  ;;  %4533 = vst [vmem:[%s9211_s3 + $0x890] sm:$0xff] %v5117_v27  ;;  %v7027_v31 = vpop.f32.mrb[18].mxu0  ;;  %5140 = vpow2.f32 %v4816_v17  ;;  %4699 = vmatmul.mubr.msk.f32.gmra.mrb[124].mxu1 %vm109_vm0, %v6455_v22  ;;  %4703 = vmatmul.mubr.msk.f32.vlgmr.msra.gmra.mrb[124].mxu0 %vm109_vm0, %v7041_v36  ;;  %v4739_v22 = vmul.f32 -1.442695, %v427_v19 }
  0xfd   :  { %v5121_v32 = vpop.eup %5120  ;;  %4337 = vst [vmem:[%s9211_s3 + $0x270] sm:$0xff] %v5119_v29  ;;  %v7032_v34 = vpop.f32.mrb[19].mxu1  ;;  %5142 = vpow2.f32 %v4930_v24  ;;  %2169 = vmatpush1.msra.mxu0 %v58_v28  ;;  %1923 = vmatprep.mubr.f32.mxu1 %v9212_v2  ;;  %v340_v28 = vadd.f32 %v6941_v37, %v6836_v56 }
  0xfe   :  { %v7034_v35 = vpop.f32.mrb[19].mxu0  ;;  %v5123_v38 = vpop.eup %5122  ;;  %4260 = vst [vmem:[%s9211_s3 + $0x10] sm:$0xff] %v5121_v32  ;;  %5144 = vpow2.f32 %v4854_v10  ;;  %2012 = vmatprep.mubr.f32.mxu0 %v9212_v2  ;;  %v7113_v32 = vld [vmem:[%s9209_s1 + $0x38] sm:$0xff] }
  0xff   :  { %v5125_v40 = vpop.eup %5124  ;;  %4338 = vst [vmem:[%s9211_s3 + $0x278] sm:$0xff] %v5123_v38  ;;  %5146 = vpow2.f32 %v4931_v30  ;;  %v7056_v43 = vpop.f32.mrb[20].mxu0 }
 0x100   :  { %v5127_v42 = vpop.eup %5126  ;;  %4261 = vst [vmem:[%s9211_s3 + $0x18] sm:$0xff] %v5125_v40  ;;  %v7058_v44 = vpop.f32.mrb[20].mxu1  ;;  %5148 = vpow2.f32 %v4855_v33  ;;  %4700 = vmatmul.mubr.msk.f32.gmra.mrb[126].mxu1 %vm109_vm0, %v6472_v25  ;;  %4704 = vmatmul.mubr.msk.f32.gmra.mrb[126].mxu0 %vm109_vm0, %v7072_v47  ;;  %v7120_v33 = vld [vmem:[%s9209_s1 + $0x18] sm:$0xff] }
 0x101   :  { %v5129_v45 = vpop.eup %5128  ;;  %4376 = vst [vmem:[%s9211_s3 + $0x3a8] sm:$0xff] %v5127_v42  ;;  %v7063_v46 = vpop.f32.mrb[21].mxu0  ;;  %5150 = vpow2.f32 %v4893_v39  ;;  %1929 = vmatprep.mubr.f32.mxu1 %v9212_v2  ;;  %2018 = vmatprep.mubr.f32.mxu0 %v9212_v2  ;;  %v429_v39 = vadd.f32 %v6948_v41, %v6804_v50 }
 0x102   :  { %v7065_v9 = vpop.f32.mrb[21].mxu1  ;;  %v5131_v48 = vpop.eup %5130  ;;  %v3363_v53 = vadd.f32 1.0, %v5129_v45  ;;  %5152 = vpow2.f32 %v4739_v22  ;;  %v344_v45 = vadd.f32 %v6956_v49, %v6844_v57  ;;  %v7145_v49 = vld [vmem:[%s9209_s1 + $0x20] sm:$0xff] }
 0x103   :  { %v5133_v54 = vpop.eup %5132  ;;  %v3440_v59 = vadd.f32 1.0, %v5131_v48  ;;  %v7078_v63 = vpop.f32.mrb[22].mxu0 }
 0x104   :  { %v5135_v62 = vpop.eup %5134  ;;  %5154 = vrcp.f32 %v3363_v53  ;;  %v3364_v25 = vadd.f32 1.0, %v5133_v54  ;;  %v7080_v13 = vpop.f32.mrb[22].mxu1  ;;  %4701 = vmatmul.mubr.msk.f32.gmra.mrb[128].mxu1 %vm109_vm0, %v7087_v7  ;;  %4705 = vmatmul.mubr.msk.f32.gmra.mrb[128].mxu0 %vm109_vm0, %v7094_v8  ;;  %v433_v54 = vadd.f32 %v6963_v60, %v6820_v52 }
 0x105   :  { %v5137_v0 = vpop.eup %5136  ;;  %5156 = vrcp.f32 %v3440_v59  ;;  %v3478_v4 = vadd.f32 1.0, %v5135_v62  ;;  %v7082_v5 = vpop.f32.mrb[23].mxu0  ;;  %1935 = vmatprep.mubr.f32.mxu1 %v9212_v2  ;;  %2024 = vmatprep.mubr.f32.mxu0 %v9212_v2 }
 0x106   :  { %v5139_v11 = vpop.eup %5138  ;;  %5158 = vrcp.f32 %v3364_v25  ;;  %v3402_v15 = vadd.f32 1.0, %v5137_v0  ;;  %v7098_v17 = vpop.f32.mrb[23].mxu1  ;;  %v4894_v25 = vmul.f32 -1.442695, %v340_v28  ;;  %v346_v0 = vadd.f32 %v6965_v61, %v6844_v57 }
 0x107   :  { %v5141_v18 = vpop.eup %5140  ;;  %5160 = vrcp.f32 %v3478_v4  ;;  %v3479_v21 = vadd.f32 1.0, %v5139_v11  ;;  %v7102_v27 = vpop.f32.mrb[24].mxu0  ;;  %v435_v61 = vadd.f32 %v6976_v1, %v6820_v52  ;;  %v439_v1 = vadd.f32 %v6992_v14, %v6812_v51  ;;  %v7184_v14 = vld [vmem:[%s9209_s1 + $0x28] sm:$0xff] }
 0x108   :  { %v5143_v24 = vpop.eup %5142  ;;  %5162 = vrcp.f32 %v3402_v15  ;;  %v3403_v26 = vadd.f32 1.0, %v5141_v18  ;;  %v7106_v29 = vpop.f32.mrb[24].mxu1  ;;  %4702 = vmatmul.mubr.msk.f32.gmra.mrb[130].mxu1 %vm109_vm0, %v7113_v32  ;;  %4706 = vmatmul.mubr.msk.f32.gmra.mrb[130].mxu0 %vm109_vm0, %v7120_v33  ;;  %v4740_v18 = vmul.f32 -1.442695, %v429_v39  ;;  %v352_v39 = vadd.f32 %v6999_v20, %v6852_v58 }
 0x109   :  { %v5145_v10 = vpop.eup %5144  ;;  %5164 = vrcp.f32 %v3479_v21  ;;  %v3517_v19 = vadd.f32 1.0, %v5143_v24  ;;  %v7108_v30 = vpop.f32.mrb[25].mxu0  ;;  %2030 = vmatprep.mubr.f32.mxu0 %v9212_v2  ;;  %2119 = vmatprep.mubr.f32.mxu1 %v9212_v2  ;;  %v4779_v20 = vmul.f32 -1.442695, %v435_v61 }
 0x10a   :  { %v5147_v37 = vpop.eup %5146  ;;  %5166 = vrcp.f32 %v3403_v26  ;;  %v3441_v38 = vadd.f32 1.0, %v5145_v10  ;;  %v7126_v40 = vpop.f32.mrb[25].mxu1  ;;  %v4932_v26 = vmul.f32 -1.442695, %v344_v45  ;;  %v350_v10 = vadd.f32 %v6990_v12, %v6852_v58 }
 0x10b   :  { %v5149_v22 = vpop.eup %5148  ;;  %5168 = vrcp.f32 %v3517_v19  ;;  %v3518_v42 = vadd.f32 1.0, %v5147_v37  ;;  %v7134_v59 = vpop.f32.mrb[26].mxu0  ;;  %v4933_v12 = vmul.f32 -1.442695, %v346_v0 }
 0x10c   :  { %v5151_v48 = vpop.eup %5150  ;;  %5170 = vrcp.f32 %v3441_v38  ;;  %v3442_v53 = vadd.f32 1.0, %v5149_v22  ;;  %v7138_v4 = vpop.f32.mrb[26].mxu1  ;;  %4707 = vmatmul.mubr.msk.f32.gmra.mrb[132].mxu0 %vm109_vm0, %v7145_v49  ;;  %4711 = vmatmul.mubr.msk.f32.vlgmr.msra.gmra.mrb[132].mxu1 %vm109_vm0, %v7041_v36 }
 0x10d   :  { %v5153_v41 = vpop.eup %5152  ;;  %5172 = vrcp.f32 %v3518_v42  ;;  %v3480_v62 = vadd.f32 1.0, %v5151_v48  ;;  %v7140_v11 = vpop.f32.mrb[27].mxu0  ;;  %5057 = vmatpush3.msra.mxu1 %v6919_v16  ;;  %2036 = vmatprep.mubr.f32.mxu0 %v9212_v2  ;;  %v4778_v16 = vmul.f32 -1.442695, %v433_v54  ;;  %v441_v48 = vadd.f32 %v7001_v23, %v6812_v51 }
 0x10e   :  { %v5155_v60 = vpop.eup %5154  ;;  %5174 = vrcp.f32 %v3442_v53  ;;  %v3326_v15 = vadd.f32 1.0, %v5153_v41  ;;  %v7153_v21 = vpop.f32.mrb[27].mxu1  ;;  %2125 = vmatprep.mubr.f32.mxu1 %v9212_v2  ;;  %v4971_v54 = vmul.f32 -1.442695, %v350_v10  ;;  %v356_v41 = vadd.f32 %v7025_v3, %v6864_v6 }
 0x10f   :  { %v5157_v24 = vpop.eup %5156  ;;  %4300 = vst [vmem:[%s9211_s3 + $0x148] sm:$0xff] %v5155_v60  ;;  %5176 = vrcp.f32 %v3480_v62  ;;  %v7168_v28 = vpop.f32.mrb[28].mxu1  ;;  %v4817_v23 = vmul.f32 -1.442695, %v439_v1  ;;  %v4972_v3 = vmul.f32 -1.442695, %v352_v39 }
 0x110   :  { %v5159_v19 = vpop.eup %5158  ;;  %4377 = vst [vmem:[%s9211_s3 + $0x3b0] sm:$0xff] %v5157_v24  ;;  %5178 = vrcp.f32 %v3326_v15  ;;  %v7170_v37 = vpop.f32.mrb[28].mxu0  ;;  %4708 = vmatmul.mubr.msk.f32.gmra.mrb[134].mxu0 %vm109_vm0, %v7184_v14  ;;  %4712 = vmatmul.mubr.msk.f32.gmra.mrb[134].mxu1 %vm109_vm0, %v7072_v47  ;;  %v5010_v10 = vmul.f32 -1.442695, %v356_v41 }
 0x111   :  { %v5161_v38 = vpop.eup %5160  ;;  %4301 = vst [vmem:[%s9211_s3 + $0x150] sm:$0xff] %v5159_v19  ;;  %5180 = vpow2.f32 %v4894_v25  ;;  %v7177_v22 = vpop.f32.mrb[29].mxu1  ;;  %2042 = vmatprep.mubr.f32.mxu0 %v9212_v2  ;;  %2131 = vmatprep.mubr.f32.mxu1 %v9212_v2  ;;  %v445_v25 = vadd.f32 %v7027_v31, %v6833_v55 }
 0x112   :  { %v7179_v42 = vpop.f32.mrb[29].mxu0  ;;  %v5163_v45 = vpop.eup %5162  ;;  %4415 = vst [vmem:[%s9211_s3 + $0x4e0] sm:$0xff] %v5161_v38  ;;  %5182 = vpow2.f32 %v4740_v18  ;;  %v358_v18 = vadd.f32 %v7032_v34, %v6864_v6 }
 0x113   :  { %v5165_v53 = vpop.eup %5164  ;;  %4339 = vst [vmem:[%s9211_s3 + $0x280] sm:$0xff] %v5163_v45  ;;  %5184 = vpow2.f32 %v4932_v26  ;;  %v7207_v0 = vpop.f32.mrb[30].mxu1  ;;  %v4818_v26 = vmul.f32 -1.442695, %v441_v48 }
 0x114   :  { %v5167_v62 = vpop.eup %5166  ;;  %4416 = vst [vmem:[%s9211_s3 + $0x4e8] sm:$0xff] %v5165_v53  ;;  %5186 = vpow2.f32 %v4778_v16  ;;  %v7209_v60 = vpop.f32.mrb[30].mxu0  ;;  %4709 = vmatmul.mubr.msk.f32.gmra.mrb[136].mxu0 %vm109_vm0, %v7087_v7  ;;  %4713 = vmatmul.mubr.msk.f32.gmra.mrb[136].mxu1 %vm109_vm0, %v7094_v8  ;;  %v4856_v16 = vmul.f32 -1.442695, %v445_v25  ;;  %v5011_v39 = vmul.f32 -1.442695, %v358_v18 }
 0x115   :  { %v5169_v15 = vpop.eup %5168  ;;  %4340 = vst [vmem:[%s9211_s3 + $0x288] sm:$0xff] %v5167_v62  ;;  %5188 = vpow2.f32 %v4933_v12  ;;  %v7216_v61 = vpop.f32.mrb[31].mxu1  ;;  %2048 = vmatprep.mubr.f32.mxu0 %v9212_v2  ;;  %2137 = vmatprep.mubr.f32.mxu1 %v9212_v2 }
 0x116   :  { %v7218_v24 = vpop.f32.mrb[31].mxu0  ;;  %v5171_v31 = vpop.eup %5170  ;;  %4454 = vst [vmem:[%s9211_s3 + $0x618] sm:$0xff] %v5169_v15  ;;  %5190 = vpow2.f32 %v4779_v20 }
 0x117   :  { %v5173_v34 = vpop.eup %5172  ;;  %4378 = vst [vmem:[%s9211_s3 + $0x3b8] sm:$0xff] %v5171_v31  ;;  %5192 = vpow2.f32 %v4971_v54  ;;  %v7235_v1 = vpop.f32.mrb[32].mxu1 }
 0x118   :  { %v5175_v19 = vpop.eup %5174  ;;  %4455 = vst [vmem:[%s9211_s3 + $0x620] sm:$0xff] %v5173_v34  ;;  %5194 = vpow2.f32 %v4817_v23  ;;  %v7237_v38 = vpop.f32.mrb[32].mxu0  ;;  %4710 = vmatmul.mubr.msk.f32.gmra.mrb[138].mxu0 %vm109_vm0, %v7113_v32  ;;  %4714 = vmatmul.mubr.msk.f32.gmra.mrb[138].mxu1 %vm109_vm0, %v7120_v33 }
 0x119   :  { %v5177_v12 = vpop.eup %5176  ;;  %4379 = vst [vmem:[%s9211_s3 + $0x3c0] sm:$0xff] %v5175_v19  ;;  %5196 = vpow2.f32 %v4972_v3  ;;  %v7242_v45 = vpop.f32.mrb[33].mxu1  ;;  %2143 = vmatprep.mubr.f32.mxu1 %v9212_v2  ;;  %2232 = vmatprep.mubr.f32.mxu0 %v9212_v2 }
 0x11a   :  { %v7244_v20 = vpop.f32.mrb[33].mxu0  ;;  %v5179_v48 = vpop.eup %5178  ;;  %4417 = vst [vmem:[%s9211_s3 + $0x4f0] sm:$0xff] %v5177_v12  ;;  %5198 = vpow2.f32 %v4818_v26 }
 0x11b   :  { %v5181_v53 = vpop.eup %5180  ;;  %4262 = vst [vmem:[%s9211_s3 + $0x20] sm:$0xff] %v5179_v48  ;;  %5200 = vpow2.f32 %v5010_v10  ;;  %v7258_v62 = vpop.f32.mrb[34].mxu1 }
 0x11c   :  { %v5183_v54 = vpop.eup %5182  ;;  %v3481_v41 = vadd.f32 1.0, %v5181_v53  ;;  %5202 = vpow2.f32 %v4856_v16  ;;  %v7260_v15 = vpop.f32.mrb[34].mxu0  ;;  %4715 = vmatmul.mubr.msk.f32.gmra.mrb[140].mxu1 %vm109_vm0, %v7145_v49  ;;  %4719 = vmatmul.mubr.msk.f32.vlgmr.msra.gmra.mrb[140].mxu0 %vm109_vm0, %v7041_v36 }
 0x11d   :  { %v5185_v23 = vpop.eup %5184  ;;  %v3327_v25 = vadd.f32 1.0, %v5183_v54  ;;  %5204 = vpow2.f32 %v5011_v39  ;;  %v7262_v3 = vpop.f32.mrb[35].mxu1  ;;  %2149 = vmatprep.mubr.f32.mxu1 %v9212_v2  ;;  %2238 = vmatprep.mubr.f32.mxu0 %v9212_v2 }
 0x11e   :  { %v5187_v18 = vpop.eup %5186  ;;  %5206 = vrcp.f32 %v3481_v41  ;;  %v3519_v31 = vadd.f32 1.0, %v5185_v23  ;;  %v7268_v26 = vpop.f32.mrb[35].mxu0 }
 0x11f   :  { %v5189_v34 = vpop.eup %5188  ;;  %5208 = vrcp.f32 %v3327_v25  ;;  %v3365_v10 = vadd.f32 1.0, %v5187_v18  ;;  %v7272_v12 = vpop.f32.mrb[36].mxu0 }
 0x120   :  { %v5191_v19 = vpop.eup %5190  ;;  %5210 = vrcp.f32 %v3519_v31  ;;  %v3520_v16 = vadd.f32 1.0, %v5189_v34  ;;  %v7274_v53 = vpop.f32.mrb[36].mxu1  ;;  %4716 = vmatmul.mubr.msk.f32.gmra.mrb[142].mxu1 %vm109_vm0, %v7184_v14  ;;  %4720 = vmatmul.mubr.msk.f32.gmra.mrb[142].mxu0 %vm109_vm0, %v7072_v47  ;;  %v447_v34 = vadd.f32 %v7034_v35, %v6833_v55 }
 0x121   :  { %v5193_v39 = vpop.eup %5192  ;;  %5212 = vrcp.f32 %v3365_v10  ;;  %v3366_v48 = vadd.f32 1.0, %v5191_v19  ;;  %9214 = vst [vmem:[#allocation2_spill] sm:$0xff] %v7274_v53  ;;  %v7276_v54 = vpop.f32.mrb[37].mxu0  ;;  %2155 = vmatprep.mubr.f32.mxu1 %v9212_v2  ;;  %2244 = vmatprep.mubr.f32.mxu0 %v9212_v2  ;;  %v540_v2 = vadd.f32 %v7058_v44, %v6804_v50 }
 0x122   :  { %9215 = vst [vmem:[#allocation3_spill] sm:$0xff] %v7276_v54  ;;  %v5195_v41 = vpop.eup %5194  ;;  %5214 = vrcp.f32 %v3520_v16  ;;  %v3558_v23 = vadd.f32 1.0, %v5193_v39  ;;  %v7282_v25 = vpop.f32.mrb[37].mxu1  ;;  %v451_v54 = vadd.f32 %v7056_v43, %v6836_v56 }
 0x123   :  { %9216 = vst [vmem:[#allocation4_spill] sm:$0xff] %v7282_v25  ;;  %v5197_v18 = vpop.eup %5196  ;;  %5216 = vrcp.f32 %v3366_v48  ;;  %v3404_v31 = vadd.f32 1.0, %v5195_v41  ;;  %v7290_v16 = vpop.f32.mrb[38].mxu0  ;;  %v453_v41 = vadd.f32 %v7063_v46, %v6836_v56  ;;  %v457_v46 = vadd.f32 %v7078_v63, %v6844_v57 }
 0x124   :  { %v5199_v10 = vpop.eup %5198  ;;  %5218 = vrcp.f32 %v3558_v23  ;;  %v3559_v19 = vadd.f32 1.0, %v5197_v18  ;;  %9217 = vst [vmem:[#allocation5_spill] sm:$0xff] %v7290_v16  ;;  %v7294_v53 = vpop.f32.mrb[38].mxu1  ;;  %4717 = vmatmul.mubr.msk.f32.gmra.mrb[144].mxu1 %vm109_vm0, %v7087_v7  ;;  %4721 = vmatmul.mubr.msk.f32.gmra.mrb[144].mxu0 %vm109_vm0, %v7094_v8  ;;  %v9221_v18 = vmov 0.0  }
 0x125   :  { %v5201_v39 = vpop.eup %5200  ;;  %5220 = vrcp.f32 %v3404_v31  ;;  %v3405_v25 = vadd.f32 1.0, %v5199_v10  ;;  %9218 = vst [vmem:[#allocation6_spill] sm:$0xff] %v7294_v53  ;;  %v7296_v48 = vpop.f32.mrb[39].mxu0  ;;  %2161 = vmatprep.mubr.f32.mxu1 %v9221_v18  ;;  %2250 = vmatprep.mubr.f32.mxu0 %v9221_v18  ;;  %v4857_v10 = vmul.f32 -1.442695, %v447_v34  ;;  %v546_v34 = vadd.f32 %v7080_v13, %v6820_v52 }
 0x126   :  { %9219 = vst [vmem:[#allocation7_spill] sm:$0xff] %v7296_v48  ;;  %v5203_v35 = vpop.eup %5202  ;;  %5222 = vrcp.f32 %v3559_v19  ;;  %v3597_v43 = vadd.f32 1.0, %v5201_v39  ;;  %v7304_v23 = vpop.f32.mrb[39].mxu1  ;;  %v542_v48 = vadd.f32 %v7065_v9, %v6804_v50  ;;  %v4895_v39 = vmul.f32 -1.442695, %v451_v54 }
 0x127   :  { %9220 = vst [vmem:[#allocation8_spill] sm:$0xff] %v7304_v23  ;;  %v5205_v44 = vpop.eup %5204  ;;  %5224 = vrcp.f32 %v3405_v25  ;;  %v3443_v31 = vadd.f32 1.0, %v5203_v35  ;;  %v7312_v16 = vpop.f32.mrb[40].mxu0  ;;  %v4741_v25 = vmul.f32 -1.442695, %v540_v2  ;;  %v459_v13 = vadd.f32 %v7082_v5, %v6844_v57 }
 0x128   :  { %v5207_v53 = vpop.eup %5206  ;;  %5226 = vrcp.f32 %v3597_v43  ;;  %v3598_v19 = vadd.f32 1.0, %v5205_v44  ;;  %v7319_v9 = vpop.f32.mrb[40].mxu1  ;;  %4718 = vmatmul.mubr.msk.f32.gmra.mrb[146].mxu1 %vm109_vm0, %v7113_v32  ;;  %4722 = vmatmul.mubr.msk.f32.gmra.mrb[146].mxu0 %vm109_vm0, %v7120_v33  ;;  %v4896_v2 = vmul.f32 -1.442695, %v453_v41  ;;  %v4742_v43 = vmul.f32 -1.442695, %v542_v48 }
 0x129   :  { %v5209_v23 = vpop.eup %5208  ;;  %4418 = vst [vmem:[%s9211_s3 + $0x4f8] sm:$0xff] %v5207_v53  ;;  %5228 = vrcp.f32 %v3443_v31  ;;  %v7321_v35 = vpop.f32.mrb[41].mxu0  ;;  %2256 = vmatprep.mubr.f32.mxu0 %v9221_v18  ;;  %5058 = vmatprep.mubr.msk.f32.mxu1 %vm109_vm0, %v7041_v36  ;;  %v548_v41 = vadd.f32 %v7098_v17, %v6820_v52  ;;  %v4934_v5 = vmul.f32 -1.442695, %v457_v46  ;;  %v463_v36 = vadd.f32 %v7102_v27, %v6852_v58 }
 0x12a   :  { %v5211_v63 = vpop.eup %5210  ;;  %4263 = vst [vmem:[%s9211_s3 + $0x28] sm:$0xff] %v5209_v23  ;;  %5230 = vrcp.f32 %v3598_v19  ;;  %v7332_v53 = vpop.f32.mrb[41].mxu1  ;;  %v4780_v17 = vmul.f32 -1.442695, %v546_v34  ;;  %v552_v48 = vadd.f32 %v7106_v29, %v6812_v51  ;;  %v4935_v46 = vmul.f32 -1.442695, %v459_v13 }
 0x12b   :  { %v5213_v54 = vpop.eup %5212  ;;  %4456 = vst [vmem:[%s9211_s3 + $0x628] sm:$0xff] %v5211_v63  ;;  %5232 = vpow2.f32 %v4857_v10  ;;  %v7347_v44 = vpop.f32.mrb[42].mxu0  ;;  %v465_v29 = vadd.f32 %v7108_v30, %v6852_v58  ;;  %v554_v34 = vadd.f32 %v7126_v40, %v6812_v51  ;;  %v4973_v30 = vmul.f32 -1.442695, %v463_v36 }
 0x12c   :  { %v5215_v23 = vpop.eup %5214  ;;  %4302 = vst [vmem:[%s9211_s3 + $0x158] sm:$0xff] %v5213_v54  ;;  %5234 = vpow2.f32 %v4895_v39  ;;  %v7349_v31 = vpop.f32.mrb[42].mxu1  ;;  %4723 = vmatmul.mubr.msk.f32.gmra.mrb[148].mxu0 %vm109_vm0, %v7145_v49  ;;  %5059 = vmatmul.mubr.msk.f32.vlgmr.msra.gmra.mrb[148].mxu1 %vm109_vm0, %v7072_v47  ;;  %v4781_v47 = vmul.f32 -1.442695, %v548_v41  ;;  %v4819_v54 = vmul.f32 -1.442695, %v552_v48 }
 0x12d   :  { %v5217_v19 = vpop.eup %5216  ;;  %4457 = vst [vmem:[%s9211_s3 + $0x630] sm:$0xff] %v5215_v23  ;;  %5236 = vpow2.f32 %v4741_v25  ;;  %v7356_v10 = vpop.f32.mrb[43].mxu0  ;;  %2262 = vmatprep.mubr.f32.mxu0 %v9221_v18  ;;  %5061 = vmatprep.mubr.msk.f32.mxu1 %vm109_vm0, %v7094_v8  ;;  %v4974_v23 = vmul.f32 -1.442695, %v465_v29  ;;  %v4820_v36 = vmul.f32 -1.442695, %v554_v34 }
 0x12e   :  { %v7358_v39 = vpop.f32.mrb[43].mxu1  ;;  %v5219_v27 = vpop.eup %5218  ;;  %4303 = vst [vmem:[%s9211_s3 + $0x160] sm:$0xff] %v5217_v19  ;;  %5238 = vpow2.f32 %v4896_v2 }
 0x12f   :  { %v5221_v25 = vpop.eup %5220  ;;  %4495 = vst [vmem:[%s9211_s3 + $0x760] sm:$0xff] %v5219_v27  ;;  %5240 = vpow2.f32 %v4742_v43  ;;  %v7380_v2 = vpop.f32.mrb[44].mxu1 }
 0x130   :  { %v5223_v63 = vpop.eup %5222  ;;  %4341 = vst [vmem:[%s9211_s3 + $0x290] sm:$0xff] %v5221_v25  ;;  %5242 = vpow2.f32 %v4934_v5  ;;  %v7382_v8 = vpop.f32.mrb[44].mxu0  ;;  %4724 = vmatmul.mubr.msk.f32.gmra.mrb[150].mxu0 %vm109_vm0, %v7184_v14  ;;  %5062 = vmatmul.mubr.msk.f32.gmra.mrb[150].mxu1 %vm109_vm0, %v7120_v33 }
 0x131   :  { %v5225_v13 = vpop.eup %5224  ;;  %4496 = vst [vmem:[%s9211_s3 + $0x768] sm:$0xff] %v5223_v63  ;;  %5244 = vpow2.f32 %v4780_v17  ;;  %v7387_v43 = vpop.f32.mrb[45].mxu1  ;;  %2268 = vmatprep.mubr.f32.mxu0 %v9221_v18  ;;  %5064 = vmatprep.mubr.msk.f32.mxu1 %vm109_vm0, %v7145_v49 }
 0x132   :  { %v7389_v40 = vpop.f32.mrb[45].mxu0  ;;  %v5227_v41 = vpop.eup %5226  ;;  %4342 = vst [vmem:[%s9211_s3 + $0x298] sm:$0xff] %v5225_v13  ;;  %5246 = vpow2.f32 %v4935_v46 }
 0x133   :  { %v5229_v5 = vpop.eup %5228  ;;  %4534 = vst [vmem:[%s9211_s3 + $0x898] sm:$0xff] %v5227_v41  ;;  %5248 = vpow2.f32 %v4781_v47  ;;  %v7407_v19 = vpop.f32.mrb[46].mxu1 }
 0x134   :  { %v5231_v33 = vpop.eup %5230  ;;  %4380 = vst [vmem:[%s9211_s3 + $0x3c8] sm:$0xff] %v5229_v5  ;;  %5250 = vpow2.f32 %v4973_v30  ;;  %v7409_v17 = vpop.f32.mrb[46].mxu0  ;;  %4725 = vmatmul.mubr.msk.f32.gmra.mrb[152].mxu0 %vm109_vm0, %v7087_v7  ;;  %5065 = vmatmul.mubr.msk.f32.gmra.mrb[152].mxu1 %vm109_vm0, %v7184_v14 }
 0x135   :  { %v5233_v48 = vpop.eup %5232  ;;  %4535 = vst [vmem:[%s9211_s3 + $0x8a0] sm:$0xff] %v5231_v33  ;;  %5252 = vpow2.f32 %v4819_v54  ;;  %v7414_v49 = vpop.f32.mrb[47].mxu1  ;;  %2274 = vmatprep.mubr.f32.mxu0 %v9221_v18  ;;  %5067 = vmatprep.mubr.msk.f32.mxu1 %vm109_vm0, %v7087_v7 }
 0x136   :  { %v7416_v27 = vpop.f32.mrb[47].mxu0  ;;  %v5235_v46 = vpop.eup %5234  ;;  %v3444_v29 = vadd.f32 1.0, %v5233_v48  ;;  %5254 = vpow2.f32 %v4974_v23 }
 0x137   :  { %v5237_v25 = vpop.eup %5236  ;;  %v3482_v47 = vadd.f32 1.0, %v5235_v46  ;;  %5256 = vpow2.f32 %v4820_v36  ;;  %v7425_v30 = vpop.f32.mrb[48].mxu1 }
 0x138   :  { %v5239_v34 = vpop.eup %5238  ;;  %5258 = vrcp.f32 %v3444_v29  ;;  %v3328_v63 = vadd.f32 1.0, %v5237_v25  ;;  %v7427_v14 = vpop.f32.mrb[48].mxu0  ;;  %4726 = vmatmul.mubr.msk.f32.gmra.mrb[154].mxu0 %vm109_vm0, %v7113_v32  ;;  %5068 = vmatmul.mubr.msk.f32.gmra.mrb[154].mxu1 %vm109_vm0, %v7113_v32 }
 0x139   :  { %v5241_v13 = vpop.eup %5240  ;;  %5260 = vrcp.f32 %v3482_v47  ;;  %v3483_v54 = vadd.f32 1.0, %v5239_v34  ;;  %v7429_v41 = vpop.f32.mrb[49].mxu1  ;;  %v469_v47 = vadd.f32 %v7134_v59, %v6864_v6 }
 0x13a   :  { %v5243_v7 = vpop.eup %5242  ;;  %5262 = vrcp.f32 %v3328_v63  ;;  %v3329_v18 = vadd.f32 1.0, %v5241_v13  ;;  %v7435_v23 = vpop.f32.mrb[49].mxu0 }
 0x13b   :  { %v5245_v5 = vpop.eup %5244  ;;  %5264 = vrcp.f32 %v3483_v54  ;;  %v3521_v36 = vadd.f32 1.0, %v5243_v7  ;;  %v7437_v46 = vpop.f32.mrb[50].mxu1  ;;  %v558_v54 = vadd.f32 %v7138_v4, %v6833_v55  ;;  %v5012_v4 = vmul.f32 -1.442695, %v469_v47 }
 0x13c   :  { %v5247_v33 = vpop.eup %5246  ;;  %5266 = vrcp.f32 %v3329_v18  ;;  %v3367_v48 = vadd.f32 1.0, %v5245_v5  ;;  %9222 = vst [vmem:[#allocation9_spill] sm:$0xff] %v7437_v46  ;;  %v7441_v32 = vpop.f32.mrb[50].mxu0  ;;  %v566_v47 = vadd.f32 %v7177_v22, %v6836_v56 }
 0x13d   :  { %v5249_v29 = vpop.eup %5248  ;;  %5268 = vrcp.f32 %v3521_v36  ;;  %v3522_v25 = vadd.f32 1.0, %v5247_v33  ;;  %9223 = vst [vmem:[#allocation10_spill] sm:$0xff] %v7441_v32  ;;  %v7443_v34 = vpop.f32.mrb[51].mxu1  ;;  %v471_v36 = vadd.f32 %v7140_v11, %v6864_v6 }
 0x13e   :  { %9224 = vst [vmem:[#allocation11_spill] sm:$0xff] %v7443_v34  ;;  %v5251_v63 = vpop.eup %5250  ;;  %5270 = vrcp.f32 %v3367_v48  ;;  %v3368_v13 = vadd.f32 1.0, %v5249_v29  ;;  %v7447_v7 = vpop.f32.mrb[51].mxu0  ;;  %v560_v34 = vadd.f32 %v7153_v21, %v6833_v55  ;;  %v653_v21 = vadd.f32 %v7170_v37, %v6804_v50 }
 0x13f   :  { %9225 = vst [vmem:[#allocation12_spill] sm:$0xff] %v7447_v7  ;;  %v5253_v18 = vpop.eup %5252  ;;  %5272 = vrcp.f32 %v3522_v25  ;;  %v3560_v5 = vadd.f32 1.0, %v5251_v63  ;;  %v7453_v32 = vpop.f32.mrb[52].mxu0  ;;  %v564_v7 = vadd.f32 %v7168_v28, %v6836_v56  ;;  %v5013_v28 = vmul.f32 -1.442695, %v471_v36 }
 0x140   :  { %v5255_v33 = vpop.eup %5254  ;;  %5274 = vrcp.f32 %v3368_v13  ;;  %v3406_v59 = vadd.f32 1.0, %v5253_v18  ;;  %9226 = vst [vmem:[#allocation13_spill] sm:$0xff] %v7453_v32  ;;  %v7457_v25 = vpop.f32.mrb[52].mxu1  ;;  %v4858_v18 = vmul.f32 -1.442695, %v558_v54  ;;  %v655_v37 = vadd.f32 %v7179_v42, %v6804_v50 }
 0x141   :  { %v5257_v48 = vpop.eup %5256  ;;  %5276 = vrcp.f32 %v3560_v5  ;;  %v3561_v29 = vadd.f32 1.0, %v5255_v33  ;;  %v7459_v63 = vpop.f32.mrb[53].mxu0  ;;  %v4859_v54 = vmul.f32 -1.442695, %v560_v34  ;;  %v4897_v22 = vmul.f32 -1.442695, %v564_v7 }
 0x142   :  { %v5259_v11 = vpop.eup %5258  ;;  %5278 = vrcp.f32 %v3406_v59  ;;  %v3407_v13 = vadd.f32 1.0, %v5257_v48  ;;  %v7463_v46 = vpop.f32.mrb[53].mxu1  ;;  %v570_v36 = vadd.f32 %v7207_v0, %v6844_v57  ;;  %v4743_v42 = vmul.f32 -1.442695, %v653_v21 }
 0x143   :  { %v5261_v32 = vpop.eup %5260  ;;  %4381 = vst [vmem:[%s9211_s3 + $0x3d0] sm:$0xff] %v5259_v11  ;;  %5280 = vrcp.f32 %v3561_v29  ;;  %v7475_v33 = vpop.f32.mrb[54].mxu0  ;;  %v659_v11 = vadd.f32 %v7209_v60, %v6820_v52  ;;  %v4898_v0 = vmul.f32 -1.442695, %v566_v47  ;;  %v572_v7 = vadd.f32 %v7216_v61, %v6844_v57 }
 0x144   :  { %v5263_v5 = vpop.eup %5262  ;;  %4419 = vst [vmem:[%s9211_s3 + $0x500] sm:$0xff] %v5261_v32  ;;  %5282 = vrcp.f32 %v3407_v13  ;;  %v7477_v59 = vpop.f32.mrb[54].mxu1  ;;  %v661_v60 = vadd.f32 %v7218_v24, %v6820_v52  ;;  %v4936_v61 = vmul.f32 -1.442695, %v570_v36 }
 0x145   :  { %v5265_v48 = vpop.eup %5264  ;;  %4264 = vst [vmem:[%s9211_s3 + $0x30] sm:$0xff] %v5263_v5  ;;  %5284 = vpow2.f32 %v5012_v4  ;;  %v7484_v32 = vpop.f32.mrb[55].mxu0  ;;  %v4782_v24 = vmul.f32 -1.442695, %v659_v11 }
 0x146   :  { %v7486_v34 = vpop.f32.mrb[55].mxu1  ;;  %v5267_v29 = vpop.eup %5266  ;;  %4420 = vst [vmem:[%s9211_s3 + $0x508] sm:$0xff] %v5265_v48  ;;  %5286 = vpow2.f32 %v4858_v18  ;;  %v4744_v18 = vmul.f32 -1.442695, %v655_v37 }
 0x147   :  { %v5269_v13 = vpop.eup %5268  ;;  %4265 = vst [vmem:[%s9211_s3 + $0x38] sm:$0xff] %v5267_v29  ;;  %5288 = vpow2.f32 %v5013_v28  ;;  %v7503_v21 = vpop.f32.mrb[56].mxu0  ;;  %v576_v28 = vadd.f32 %v7235_v1, %v6852_v58  ;;  %v4783_v1 = vmul.f32 -1.442695, %v661_v60 }
 0x148   :  { %v5271_v4 = vpop.eup %5270  ;;  %4458 = vst [vmem:[%s9211_s3 + $0x638] sm:$0xff] %v5269_v13  ;;  %5290 = vpow2.f32 %v4859_v54  ;;  %v7505_v5 = vpop.f32.mrb[56].mxu1 }
 0x149   :  { %v5273_v48 = vpop.eup %5272  ;;  %4304 = vst [vmem:[%s9211_s3 + $0x168] sm:$0xff] %v5271_v4  ;;  %5292 = vpow2.f32 %v4897_v22  ;;  %v7512_v47 = vpop.f32.mrb[57].mxu0  ;;  %v4937_v22 = vmul.f32 -1.442695, %v572_v7  ;;  %v4975_v11 = vmul.f32 -1.442695, %v576_v28 }
 0x14a   :  { %v7514_v54 = vpop.f32.mrb[57].mxu1  ;;  %v5275_v37 = vpop.eup %5274  ;;  %4459 = vst [vmem:[%s9211_s3 + $0x640] sm:$0xff] %v5273_v48  ;;  %5294 = vpow2.f32 %v4743_v42 }
 0x14b   :  { %v5277_v29 = vpop.eup %5276  ;;  %4305 = vst [vmem:[%s9211_s3 + $0x170] sm:$0xff] %v5275_v37  ;;  %5296 = vpow2.f32 %v4898_v0  ;;  %v7525_v13 = vpop.f32.mrb[58].mxu0 }
 0x14c   :  { %v5279_v36 = vpop.eup %5278  ;;  %4497 = vst [vmem:[%s9211_s3 + $0x770] sm:$0xff] %v5277_v29  ;;  %5298 = vpow2.f32 %v4744_v18  ;;  %v7527_v4 = vpop.f32.mrb[58].mxu1 }
 0x14d   :  { %9227 = vst [vmem:[#allocation14_spill] sm:$0xff] %v7527_v4  ;;  %v5281_v42 = vpop.eup %5280  ;;  %4343 = vst [vmem:[%s9211_s3 + $0x2a0] sm:$0xff] %v5279_v36  ;;  %5300 = vpow2.f32 %v4936_v61  ;;  %v7532_v0 = vpop.f32.mrb[59].mxu0 }
 0x14e   :  { %9228 = vst [vmem:[#allocation15_spill] sm:$0xff] %v7532_v0  ;;  %v7534_v7 = vpop.f32.mrb[59].mxu1  ;;  %v5283_v48 = vpop.eup %5282  ;;  %4498 = vst [vmem:[%s9211_s3 + $0x778] sm:$0xff] %v5281_v42  ;;  %5302 = vpow2.f32 %v4782_v24 }
 0x14f   :  { %9229 = vst [vmem:[#allocation16_spill] sm:$0xff] %v7534_v7  ;;  %v5285_v18 = vpop.eup %5284  ;;  %4344 = vst [vmem:[%s9211_s3 + $0x2a8] sm:$0xff] %v5283_v48  ;;  %5304 = vpow2.f32 %v4937_v22  ;;  %v7542_v61 = vpop.f32.mrb[60].mxu1 }
 0x150   :  { %v5287_v60 = vpop.eup %5286  ;;  %v3599_v37 = vadd.f32 1.0, %v5285_v18  ;;  %5306 = vpow2.f32 %v4783_v1  ;;  %9230 = vst [vmem:[#allocation17_spill] sm:$0xff] %v7542_v61  ;;  %v7544_v36 = vpop.f32.mrb[60].mxu0 }
 0x151   :  { %v5289_v28 = vpop.eup %5288  ;;  %v3445_v29 = vadd.f32 1.0, %v5287_v60  ;;  %5308 = vpow2.f32 %v4975_v11  ;;  %9231 = vst [vmem:[#allocation18_spill] sm:$0xff] %v7544_v36  ;;  %v7546_v7 = vpop.f32.mrb[61].mxu1 }
 0x152   :  { %9232 = vst [vmem:[#allocation19_spill] sm:$0xff] %v7546_v7  ;;  %v5291_v42 = vpop.eup %5290  ;;  %5310 = vrcp.f32 %v3599_v37  ;;  %v3600_v24 = vadd.f32 1.0, %v5289_v28  ;;  %v7548_v0 = vpop.f32.mrb[61].mxu0 }
 0x153   :  { %9233 = vst [vmem:[#allocation20_spill] sm:$0xff] %v7548_v0  ;;  %v5293_v4 = vpop.eup %5292  ;;  %5312 = vrcp.f32 %v3445_v29  ;;  %v3446_v22 = vadd.f32 1.0, %v5291_v42  ;;  %v7550_v18 = vpop.f32.mrb[62].mxu1 }
 0x154   :  { %v5295_v48 = vpop.eup %5294  ;;  %5314 = vrcp.f32 %v3600_v24  ;;  %v3484_v1 = vadd.f32 1.0, %v5293_v4  ;;  %v7552_v60 = vpop.f32.mrb[62].mxu0  ;;  %v665_v4 = vadd.f32 %v7237_v38, %v6812_v51 }
 0x155   :  { %v5297_v61 = vpop.eup %5296  ;;  %5316 = vrcp.f32 %v3446_v22  ;;  %v3330_v11 = vadd.f32 1.0, %v5295_v48  ;;  %9234 = vst [vmem:[#allocation21_spill] sm:$0xff] %v7552_v60  ;;  %v7554_v36 = vpop.f32.mrb[63].mxu1  ;;  %v578_v22 = vadd.f32 %v7242_v45, %v6852_v58 }
 0x156   :  { %9235 = vst [vmem:[#allocation22_spill] sm:$0xff] %v7554_v36  ;;  %v5299_v7 = vpop.eup %5298  ;;  %5318 = vrcp.f32 %v3484_v1  ;;  %v3485_v37 = vadd.f32 1.0, %v5297_v61  ;;  %v7556_v28 = vpop.f32.mrb[63].mxu0  ;;  %v667_v61 = vadd.f32 %v7244_v20, %v6812_v51 }
 0x157   :  { %9236 = vst [vmem:[#allocation23_spill] sm:$0xff] %v7556_v28  ;;  %v5301_v0 = vpop.eup %5300  ;;  %5320 = vrcp.f32 %v3330_v11  ;;  %v3331_v29 = vadd.f32 1.0, %v5299_v7  ;;  %v7562_v48 = vpop.f32.mrb[64].mxu1  ;;  %v4976_v60 = vmul.f32 -1.442695, %v578_v22 }
 0x158   :  { %v5303_v42 = vpop.eup %5302  ;;  %5322 = vrcp.f32 %v3485_v37  ;;  %v3523_v24 = vadd.f32 1.0, %v5301_v0  ;;  %9237 = vst [vmem:[#allocation24_spill] sm:$0xff] %v7562_v48  ;;  %v7566_v28 = vpop.f32.mrb[64].mxu0  ;;  %v582_v0 = vadd.f32 %v7258_v62, %v6864_v6  ;;  %v4821_v48 = vmul.f32 -1.442695, %v665_v4 }
 0x159   :  { %v5305_v36 = vpop.eup %5304  ;;  %5324 = vrcp.f32 %v3331_v29  ;;  %v3369_v1 = vadd.f32 1.0, %v5303_v42  ;;  %9238 = vst [vmem:[#allocation25_spill] sm:$0xff] %v7566_v28  ;;  %v7568_v7 = vpop.f32.mrb[65].mxu1  ;;  %v671_v29 = vadd.f32 %v7260_v15, %v6833_v55  ;;  %v4822_v62 = vmul.f32 -1.442695, %v667_v61  ;;  %v9240_v61 = vld [vmem:[#allocation2_spill] sm:$0xff] }
 0x15a   :  { %9239 = vst [vmem:[#allocation26_spill] sm:$0xff] %v7568_v7  ;;  %v5307_v11 = vpop.eup %5306  ;;  %5326 = vrcp.f32 %v3523_v24  ;;  %v3524_v38 = vadd.f32 1.0, %v5305_v36  ;;  %v584_v7 = vadd.f32 %v7262_v3, %v6864_v6  ;;  %v7576_v28 = vpop.f32.mrb[65].mxu0  ;;  %v673_v4 = vadd.f32 %v7268_v26, %v6833_v55 }
 0x15b   :  { %v5309_v37 = vpop.eup %5308  ;;  %5328 = vrcp.f32 %v3369_v1  ;;  %v3370_v45 = vadd.f32 1.0, %v5307_v11  ;;  %v5014_v24 = vmul.f32 -1.442695, %v582_v0  ;;  %v677_v3 = vadd.f32 %v7272_v12, %v6836_v56  ;;  %v9241_v0 = vld [vmem:[#allocation3_spill] sm:$0xff] }
 0x15c   :  { %v5311_v42 = vpop.eup %5310  ;;  %5330 = vrcp.f32 %v3524_v38  ;;  %v3562_v20 = vadd.f32 1.0, %v5309_v37  ;;  %v4860_v1 = vmul.f32 -1.442695, %v671_v29  ;;  %v766_v26 = vadd.f32 %v9240_v61, %v6804_v50  ;;  %v7598_v37 = vpop.f32.mrb[66].mxu1  ;;  %v9242_v29 = vld [vmem:[#allocation4_spill] sm:$0xff] }
 0x15d   :  { %v5313_v36 = vpop.eup %5312  ;;  %4536 = vst [vmem:[%s9211_s3 + $0x8a8] sm:$0xff] %v5311_v42  ;;  %5332 = vrcp.f32 %v3370_v45  ;;  %v5015_v38 = vmul.f32 -1.442695, %v584_v7  ;;  %v679_v12 = vadd.f32 %v9241_v0, %v6836_v56  ;;  %v7600_v45 = vpop.f32.mrb[66].mxu0 }
 0x15e   :  { %v5315_v15 = vpop.eup %5314  ;;  %4382 = vst [vmem:[%s9211_s3 + $0x3d8] sm:$0xff] %v5313_v36  ;;  %5334 = vrcp.f32 %v3562_v20  ;;  %v768_v20 = vadd.f32 %v9242_v29, %v6804_v50  ;;  %v7607_v36 = vpop.f32.mrb[67].mxu1 }
 0x15f   :  { %v5317_v22 = vpop.eup %5316  ;;  %4537 = vst [vmem:[%s9211_s3 + $0x8b0] sm:$0xff] %v5315_v15  ;;  %5336 = vpow2.f32 %v4821_v48  ;;  %v4861_v48 = vmul.f32 -1.442695, %v673_v4  ;;  %v4899_v15 = vmul.f32 -1.442695, %v677_v3  ;;  %v9244_v4 = vld [vmem:[#allocation6_spill] sm:$0xff] }
 0x160   :  { %v5319_v11 = vpop.eup %5318  ;;  %4383 = vst [vmem:[%s9211_s3 + $0x3e0] sm:$0xff] %v5317_v22  ;;  %5338 = vpow2.f32 %v4976_v60  ;;  %v7609_v60 = vpop.f32.mrb[67].mxu0  ;;  %v9243_v22 = vld [vmem:[#allocation5_spill] sm:$0xff]  ;;  %v772_v0 = vadd.f32 %v9244_v4, %v6820_v52 }
 0x161   :  { %v5321_v42 = vpop.eup %5320  ;;  %4421 = vst [vmem:[%s9211_s3 + $0x510] sm:$0xff] %v5319_v11  ;;  %5340 = vpow2.f32 %v4822_v62  ;;  %v683_v61 = vadd.f32 %v9243_v22, %v6844_v57  ;;  %v4745_v62 = vmul.f32 -1.442695, %v766_v26  ;;  %v7624_v3 = vpop.f32.mrb[68].mxu0 }
 0x162   :  { %v5323_v7 = vpop.eup %5322  ;;  %4266 = vst [vmem:[%s9211_s3 + $0x40] sm:$0xff] %v5321_v42  ;;  %5342 = vpow2.f32 %v5014_v24  ;;  %v4900_v24 = vmul.f32 -1.442695, %v679_v12  ;;  %v7626_v42 = vpop.f32.mrb[68].mxu1 }
 0x163   :  { %v5325_v11 = vpop.eup %5324  ;;  %4422 = vst [vmem:[%s9211_s3 + $0x518] sm:$0xff] %v5323_v7  ;;  %5344 = vpow2.f32 %v4860_v1  ;;  %9245 = vst [vmem:[#allocation2_spill] sm:$0xff] %v7626_v42  ;;  %v4746_v1 = vmul.f32 -1.442695, %v768_v20  ;;  %v7631_v26 = vpop.f32.mrb[69].mxu0 }
 0x164   :  { %v5327_v29 = vpop.eup %5326  ;;  %4267 = vst [vmem:[%s9211_s3 + $0x48] sm:$0xff] %v5325_v11  ;;  %5346 = vpow2.f32 %v5015_v38  ;;  %9246 = vst [vmem:[#allocation3_spill] sm:$0xff] %v7631_v26  ;;  %v7633_v7 = vpop.f32.mrb[69].mxu1  ;;  %v4938_v38 = vmul.f32 -1.442695, %v683_v61 }
 0x165   :  { %v5329_v22 = vpop.eup %5328  ;;  %4460 = vst [vmem:[%s9211_s3 + $0x648] sm:$0xff] %v5327_v29  ;;  %5348 = vpow2.f32 %v4861_v48  ;;  %9247 = vst [vmem:[#allocation4_spill] sm:$0xff] %v7633_v7  ;;  %v4784_v11 = vmul.f32 -1.442695, %v772_v0  ;;  %v7644_v20 = vpop.f32.mrb[70].mxu0 }
 0x166   :  { %v5331_v4 = vpop.eup %5330  ;;  %4306 = vst [vmem:[%s9211_s3 + $0x178] sm:$0xff] %v5329_v22  ;;  %5350 = vpow2.f32 %v4899_v15  ;;  %9248 = vst [vmem:[#allocation5_spill] sm:$0xff] %v7644_v20  ;;  %v7646_v29 = vpop.f32.mrb[70].mxu1 }
 0x167   :  { %v5333_v12 = vpop.eup %5332  ;;  %4461 = vst [vmem:[%s9211_s3 + $0x650] sm:$0xff] %v5331_v4  ;;  %5352 = vpow2.f32 %v4745_v62  ;;  %9249 = vst [vmem:[#allocation6_spill] sm:$0xff] %v7646_v29  ;;  %v7651_v15 = vpop.f32.mrb[71].mxu0 }
 0x168   :  { %v5335_v48 = vpop.eup %5334  ;;  %4307 = vst [vmem:[%s9211_s3 + $0x180] sm:$0xff] %v5333_v12  ;;  %5354 = vpow2.f32 %v4900_v24  ;;  %9250 = vst [vmem:[#allocation27_spill] sm:$0xff] %v7651_v15  ;;  %v7653_v61 = vpop.f32.mrb[71].mxu1 }
 0x169   :  { %v5337_v22 = vpop.eup %5336  ;;  %4499 = vst [vmem:[%s9211_s3 + $0x780] sm:$0xff] %v5335_v48  ;;  %5356 = vpow2.f32 %v4746_v1  ;;  %9251 = vst [vmem:[#allocation28_spill] sm:$0xff] %v7653_v61 }
 0x16a   :  { %v5339_v62 = vpop.eup %5338  ;;  %v3408_v0 = vadd.f32 1.0, %v5337_v22  ;;  %5358 = vpow2.f32 %v4938_v38 }
 0x16b   :  { %v5341_v4 = vpop.eup %5340  ;;  %v3563_v12 = vadd.f32 1.0, %v5339_v62  ;;  %5360 = vpow2.f32 %v4784_v11  ;;  %v9252_v11 = vld [vmem:[#allocation7_spill] sm:$0xff] }
 0x16c   :  { %v5343_v24 = vpop.eup %5342  ;;  %5362 = vrcp.f32 %v3408_v0  ;;  %v3409_v20 = vadd.f32 1.0, %v5341_v4  ;;  %v685_v62 = vadd.f32 %v9252_v11, %v6844_v57 }
 0x16d   :  { %v5345_v29 = vpop.eup %5344  ;;  %5364 = vrcp.f32 %v3563_v12  ;;  %v3601_v7 = vadd.f32 1.0, %v5343_v24  ;;  %v9253_v12 = vld [vmem:[#allocation8_spill] sm:$0xff] }
 0x16e   :  { %v5347_v26 = vpop.eup %5346  ;;  %5366 = vrcp.f32 %v3409_v20  ;;  %v3447_v48 = vadd.f32 1.0, %v5345_v29  ;;  %v774_v24 = vadd.f32 %v9253_v12, %v6820_v52 }
 0x16f   :  { %v5349_v1 = vpop.eup %5348  ;;  %5368 = vrcp.f32 %v3601_v7  ;;  %v3602_v15 = vadd.f32 1.0, %v5347_v26  ;;  %v689_v26 = vadd.f32 %v7312_v16, %v6852_v58  ;;  %v780_v16 = vadd.f32 %v7332_v53, %v6812_v51 }
 0x170   :  { %v5351_v42 = vpop.eup %5350  ;;  %5370 = vrcp.f32 %v3447_v48  ;;  %v3448_v61 = vadd.f32 1.0, %v5349_v1  ;;  %v784_v53 = vadd.f32 %v7349_v31, %v6833_v55 }
 0x171   :  { %v5353_v22 = vpop.eup %5352  ;;  %5372 = vrcp.f32 %v3602_v15  ;;  %v3486_v38 = vadd.f32 1.0, %v5351_v42  ;;  %v778_v42 = vadd.f32 %v7319_v9, %v6812_v51  ;;  %v4977_v9 = vmul.f32 -1.442695, %v689_v26  ;;  %v7684_v26 = vpop.f32.mrb[72].mxu1 }
 0x172   :  { %v5355_v0 = vpop.eup %5354  ;;  %5374 = vrcp.f32 %v3448_v61  ;;  %v3332_v4 = vadd.f32 1.0, %v5353_v22  ;;  %v4939_v61 = vmul.f32 -1.442695, %v685_v62  ;;  %v691_v22 = vadd.f32 %v7321_v35, %v6852_v58 }
 0x173   :  { %v5357_v20 = vpop.eup %5356  ;;  %5376 = vrcp.f32 %v3486_v38  ;;  %v3487_v29 = vadd.f32 1.0, %v5355_v0  ;;  %v4785_v0 = vmul.f32 -1.442695, %v774_v24  ;;  %v695_v62 = vadd.f32 %v7347_v44, %v6864_v6 }
 0x174   :  { %v5359_v7 = vpop.eup %5358  ;;  %5378 = vrcp.f32 %v3332_v4  ;;  %v3333_v48 = vadd.f32 1.0, %v5357_v20  ;;  %v4823_v35 = vmul.f32 -1.442695, %v778_v42  ;;  %v4978_v20 = vmul.f32 -1.442695, %v691_v22 }
 0x175   :  { %v5361_v15 = vpop.eup %5360  ;;  %5380 = vrcp.f32 %v3487_v29  ;;  %v3525_v1 = vadd.f32 1.0, %v5359_v7  ;;  %v697_v44 = vadd.f32 %v7356_v10, %v6864_v6  ;;  %v7682_v29 = vpop.f32.mrb[72].mxu0  ;;  %v4824_v31 = vmul.f32 -1.442695, %v780_v16 }
 0x176   :  { %v5363_v11 = vpop.eup %5362  ;;  %5382 = vrcp.f32 %v3333_v48  ;;  %v3371_v38 = vadd.f32 1.0, %v5361_v15  ;;  %v786_v48 = vadd.f32 %v7358_v39, %v6833_v55  ;;  %v7691_v42 = vpop.f32.mrb[73].mxu0  ;;  %v5016_v10 = vmul.f32 -1.442695, %v695_v62 }
 0x177   :  { %v5365_v12 = vpop.eup %5364  ;;  %4345 = vst [vmem:[%s9211_s3 + $0x2b0] sm:$0xff] %v5363_v11  ;;  %5384 = vrcp.f32 %v3525_v1  ;;  %v7693_v15 = vpop.f32.mrb[73].mxu1  ;;  %v4862_v39 = vmul.f32 -1.442695, %v784_v53  ;;  %v879_v11 = vadd.f32 %v7382_v8, %v6804_v50 }
 0x178   :  { %v5367_v4 = vpop.eup %5366  ;;  %4500 = vst [vmem:[%s9211_s3 + $0x788] sm:$0xff] %v5365_v12  ;;  %5386 = vrcp.f32 %v3371_v38  ;;  %v7710_v16 = vpop.f32.mrb[74].mxu0  ;;  %v4863_v8 = vmul.f32 -1.442695, %v786_v48 }
 0x179   :  { %v5369_v24 = vpop.eup %5368  ;;  %4346 = vst [vmem:[%s9211_s3 + $0x2b8] sm:$0xff] %v5367_v4  ;;  %5388 = vpow2.f32 %v4939_v61  ;;  %v790_v61 = vadd.f32 %v7380_v2, %v6836_v56  ;;  %v792_v2 = vadd.f32 %v7387_v43, %v6836_v56  ;;  %v7712_v12 = vpop.f32.mrb[74].mxu1 }
 0x17a   :  { %v5371_v7 = vpop.eup %5370  ;;  %4538 = vst [vmem:[%s9211_s3 + $0x8b8] sm:$0xff] %v5369_v24  ;;  %5390 = vpow2.f32 %v4785_v0  ;;  %v5017_v0 = vmul.f32 -1.442695, %v697_v44  ;;  %v7717_v62 = vpop.f32.mrb[75].mxu0  ;;  %v4747_v24 = vmul.f32 -1.442695, %v879_v11 }
 0x17b   :  { %v5373_v1 = vpop.eup %5372  ;;  %4384 = vst [vmem:[%s9211_s3 + $0x3e8] sm:$0xff] %v5371_v7  ;;  %5392 = vpow2.f32 %v4977_v9  ;;  %v7719_v4 = vpop.f32.mrb[75].mxu1  ;;  %v4901_v43 = vmul.f32 -1.442695, %v790_v61  ;;  %v4902_v44 = vmul.f32 -1.442695, %v792_v2 }
 0x17c   :  { %v5375_v22 = vpop.eup %5374  ;;  %4539 = vst [vmem:[%s9211_s3 + $0x8c0] sm:$0xff] %v5373_v1  ;;  %5394 = vpow2.f32 %v4823_v35  ;;  %v7730_v7 = vpop.f32.mrb[76].mxu1 }
 0x17d   :  { %v5377_v38 = vpop.eup %5376  ;;  %4385 = vst [vmem:[%s9211_s3 + $0x3f0] sm:$0xff] %v5375_v22  ;;  %5396 = vpow2.f32 %v4978_v20  ;;  %v7737_v1 = vpop.f32.mrb[77].mxu1 }
 0x17e   :  { %v5379_v9 = vpop.eup %5378  ;;  %4423 = vst [vmem:[%s9211_s3 + $0x520] sm:$0xff] %v5377_v38  ;;  %5398 = vpow2.f32 %v4824_v31  ;;  %v7732_v31 = vpop.f32.mrb[76].mxu0 }
 0x17f   :  { %v5381_v35 = vpop.eup %5380  ;;  %4268 = vst [vmem:[%s9211_s3 + $0x50] sm:$0xff] %v5379_v9  ;;  %5400 = vpow2.f32 %v5016_v10  ;;  %v7739_v10 = vpop.f32.mrb[77].mxu0 }
 0x180   :  { %v5383_v53 = vpop.eup %5382  ;;  %4424 = vst [vmem:[%s9211_s3 + $0x528] sm:$0xff] %v5381_v35  ;;  %5402 = vpow2.f32 %v4862_v39  ;;  %9254 = vst [vmem:[#allocation7_spill] sm:$0xff] %v7739_v10 }
 0x181   :  { %v5385_v20 = vpop.eup %5384  ;;  %4269 = vst [vmem:[%s9211_s3 + $0x58] sm:$0xff] %v5383_v53  ;;  %5404 = vpow2.f32 %v5017_v0  ;;  %v7744_v0 = vpop.f32.mrb[78].mxu1 }
 0x182   :  { %v5387_v48 = vpop.eup %5386  ;;  %4462 = vst [vmem:[%s9211_s3 + $0x658] sm:$0xff] %v5385_v20  ;;  %5406 = vpow2.f32 %v4863_v8 }
 0x183   :  { %v5389_v61 = vpop.eup %5388  ;;  %4308 = vst [vmem:[%s9211_s3 + $0x188] sm:$0xff] %v5387_v48  ;;  %5408 = vpow2.f32 %v4901_v43 }
 0x184   :  { %v5391_v22 = vpop.eup %5390  ;;  %v3526_v39 = vadd.f32 1.0, %v5389_v61  ;;  %5410 = vpow2.f32 %v4747_v24 }
 0x185   :  { %v5393_v11 = vpop.eup %5392  ;;  %v3372_v38 = vadd.f32 1.0, %v5391_v22  ;;  %5412 = vpow2.f32 %v4902_v44  ;;  %v881_v22 = vadd.f32 %v7389_v40, %v6804_v50 }
 0x186   :  { %v5395_v2 = vpop.eup %5394  ;;  %5414 = vrcp.f32 %v3526_v39  ;;  %v3564_v9 = vadd.f32 1.0, %v5393_v11 }
 0x187   :  { %v5397_v8 = vpop.eup %5396  ;;  %5416 = vrcp.f32 %v3372_v38  ;;  %v3410_v35 = vadd.f32 1.0, %v5395_v2  ;;  %v796_v38 = vadd.f32 %v7407_v19, %v6844_v57 }
 0x188   :  { %v5399_v53 = vpop.eup %5398  ;;  %5418 = vrcp.f32 %v3564_v9  ;;  %v3565_v20 = vadd.f32 1.0, %v5397_v8  ;;  %v885_v8 = vadd.f32 %v7409_v17, %v6820_v52  ;;  %v802_v17 = vadd.f32 %v7425_v30, %v6852_v58 }
 0x189   :  { %v5401_v10 = vpop.eup %5400  ;;  %5420 = vrcp.f32 %v3410_v35  ;;  %v3411_v43 = vadd.f32 1.0, %v5399_v53  ;;  %v798_v53 = vadd.f32 %v7414_v49, %v6844_v57  ;;  %v804_v30 = vadd.f32 %v7429_v41, %v6852_v58 }
 0x18a   :  { %v5403_v48 = vpop.eup %5402  ;;  %5422 = vrcp.f32 %v3565_v20  ;;  %v3603_v24 = vadd.f32 1.0, %v5401_v10  ;;  %v4786_v49 = vmul.f32 -1.442695, %v885_v8  ;;  %v893_v8 = vadd.f32 %v7435_v23, %v6812_v51 }
 0x18b   :  { %v5405_v61 = vpop.eup %5404  ;;  %5424 = vrcp.f32 %v3411_v43  ;;  %v3449_v44 = vadd.f32 1.0, %v5403_v48  ;;  %v4748_v43 = vmul.f32 -1.442695, %v881_v22  ;;  %v887_v48 = vadd.f32 %v7416_v27, %v6820_v52 }
 0x18c   :  { %v5407_v39 = vpop.eup %5406  ;;  %5426 = vrcp.f32 %v3603_v24  ;;  %v3604_v11 = vadd.f32 1.0, %v5405_v61  ;;  %v4940_v61 = vmul.f32 -1.442695, %v796_v38  ;;  %v891_v22 = vadd.f32 %v7427_v14, %v6812_v51  ;;  %v7770_v38 = vpop.f32.mrb[79].mxu1 }
 0x18d   :  { %v5409_v2 = vpop.eup %5408  ;;  %5428 = vrcp.f32 %v3449_v44  ;;  %v3450_v9 = vadd.f32 1.0, %v5407_v39  ;;  %v7758_v44 = vpop.f32.mrb[78].mxu0  ;;  %v4787_v14 = vmul.f32 -1.442695, %v887_v48  ;;  %v4979_v41 = vmul.f32 -1.442695, %v802_v17 }
 0x18e   :  { %v5411_v35 = vpop.eup %5410  ;;  %5430 = vrcp.f32 %v3604_v11  ;;  %v3488_v10 = vadd.f32 1.0, %v5409_v2  ;;  %v4941_v11 = vmul.f32 -1.442695, %v798_v53  ;;  %v7772_v2 = vpop.f32.mrb[79].mxu0 }
 0x18f   :  { %v5413_v20 = vpop.eup %5412  ;;  %5432 = vrcp.f32 %v3450_v9  ;;  %v3334_v40 = vadd.f32 1.0, %v5411_v35  ;;  %v7794_v17 = vpop.f32.mrb[80].mxu1 }
 0x190   :  { %v5415_v19 = vpop.eup %5414  ;;  %5434 = vrcp.f32 %v3488_v10  ;;  %v3489_v24 = vadd.f32 1.0, %v5413_v20  ;;  %v9255_v10 = vld [vmem:[#allocation9_spill] sm:$0xff] }
 0x191   :  { %v5417_v39 = vpop.eup %5416  ;;  %4463 = vst [vmem:[%s9211_s3 + $0x660] sm:$0xff] %v5415_v19  ;;  %5436 = vrcp.f32 %v3334_v40  ;;  %v808_v53 = vadd.f32 %v9255_v10, %v6864_v6  ;;  %v4825_v40 = vmul.f32 -1.442695, %v891_v22  ;;  %v4980_v19 = vmul.f32 -1.442695, %v804_v30  ;;  %v9258_v22 = vld [vmem:[#allocation12_spill] sm:$0xff] }
 0x192   :  { %v5419_v27 = vpop.eup %5418  ;;  %4309 = vst [vmem:[%s9211_s3 + $0x190] sm:$0xff] %v5417_v39  ;;  %5438 = vrcp.f32 %v3489_v24  ;;  %v9257_v24 = vld [vmem:[#allocation11_spill] sm:$0xff]  ;;  %v7796_v39 = vpop.f32.mrb[80].mxu0 }
 0x193   :  { %v5421_v9 = vpop.eup %5420  ;;  %4501 = vst [vmem:[%s9211_s3 + $0x790] sm:$0xff] %v5419_v27  ;;  %5440 = vpow2.f32 %v4748_v43  ;;  %v9256_v43 = vld [vmem:[#allocation10_spill] sm:$0xff]  ;;  %v5018_v10 = vmul.f32 -1.442695, %v808_v53 }
 0x194   :  { %v5423_v35 = vpop.eup %5422  ;;  %4347 = vst [vmem:[%s9211_s3 + $0x2c0] sm:$0xff] %v5421_v9  ;;  %5442 = vpow2.f32 %v4940_v61  ;;  %v897_v23 = vadd.f32 %v9256_v43, %v6833_v55  ;;  %v810_v61 = vadd.f32 %v9257_v24, %v6864_v6  ;;  %v899_v9 = vadd.f32 %v9258_v22, %v6833_v55 }
 0x195   :  { %v5425_v20 = vpop.eup %5424  ;;  %4502 = vst [vmem:[%s9211_s3 + $0x798] sm:$0xff] %v5423_v35  ;;  %5444 = vpow2.f32 %v4786_v49  ;;  %v4826_v49 = vmul.f32 -1.442695, %v893_v8  ;;  %v7803_v35 = vpop.f32.mrb[81].mxu1 }
 0x196   :  { %v5427_v48 = vpop.eup %5426  ;;  %4348 = vst [vmem:[%s9211_s3 + $0x2c8] sm:$0xff] %v5425_v20  ;;  %5446 = vpow2.f32 %v4941_v11  ;;  %v7805_v11 = vpop.f32.mrb[81].mxu0  ;;  %v5019_v43 = vmul.f32 -1.442695, %v810_v61  ;;  %v4865_v53 = vmul.f32 -1.442695, %v899_v9 }
 0x197   :  { %v5429_v27 = vpop.eup %5428  ;;  %4540 = vst [vmem:[%s9211_s3 + $0x8c8] sm:$0xff] %v5427_v48  ;;  %5448 = vpow2.f32 %v4787_v14  ;;  %v4864_v14 = vmul.f32 -1.442695, %v897_v23  ;;  %v7816_v48 = vpop.f32.mrb[82].mxu1 }
 0x198   :  { %v5431_v30 = vpop.eup %5430  ;;  %4386 = vst [vmem:[%s9211_s3 + $0x3f8] sm:$0xff] %v5429_v27  ;;  %5450 = vpow2.f32 %v4979_v41  ;;  %v7818_v24 = vpop.f32.mrb[82].mxu0 }
 0x199   :  { %v5433_v20 = vpop.eup %5432  ;;  %4541 = vst [vmem:[%s9211_s3 + $0x8d0] sm:$0xff] %v5431_v30  ;;  %5452 = vpow2.f32 %v4825_v40  ;;  %9259 = vst [vmem:[#allocation8_spill] sm:$0xff] %v7818_v24  ;;  %v7823_v40 = vpop.f32.mrb[83].mxu1 }
 0x19a   :  { %v5435_v8 = vpop.eup %5434  ;;  %4387 = vst [vmem:[%s9211_s3 + $0x400] sm:$0xff] %v5433_v20  ;;  %5454 = vpow2.f32 %v4980_v19  ;;  %9260 = vst [vmem:[#allocation9_spill] sm:$0xff] %v7823_v40  ;;  %v7825_v23 = vpop.f32.mrb[83].mxu0 }
 0x19b   :  { %v5437_v41 = vpop.eup %5436  ;;  %4425 = vst [vmem:[%s9211_s3 + $0x530] sm:$0xff] %v5435_v8  ;;  %5456 = vpow2.f32 %v4826_v49  ;;  %9261 = vst [vmem:[#allocation10_spill] sm:$0xff] %v7825_v23  ;;  %v7833_v49 = vpop.f32.mrb[84].mxu0 }
 0x19c   :  { %v5439_v27 = vpop.eup %5438  ;;  %4270 = vst [vmem:[%s9211_s3 + $0x60] sm:$0xff] %v5437_v41  ;;  %5458 = vpow2.f32 %v5018_v10  ;;  %9262 = vst [vmem:[#allocation11_spill] sm:$0xff] %v7833_v49  ;;  %v7835_v20 = vpop.f32.mrb[84].mxu1 }
 0x19d   :  { %v5441_v19 = vpop.eup %5440  ;;  %4426 = vst [vmem:[%s9211_s3 + $0x538] sm:$0xff] %v5439_v27  ;;  %5460 = vpow2.f32 %v4864_v14  ;;  %9263 = vst [vmem:[#allocation12_spill] sm:$0xff] %v7835_v20 }
 0x19e   :  { %v5443_v61 = vpop.eup %5442  ;;  %v3335_v22 = vadd.f32 1.0, %v5441_v19  ;;  %5462 = vpow2.f32 %v5019_v43 }
 0x19f   :  { %v5445_v9 = vpop.eup %5444  ;;  %v3527_v30 = vadd.f32 1.0, %v5443_v61  ;;  %5464 = vpow2.f32 %v4865_v53  ;;  %v9264_v61 = vld [vmem:[#allocation13_spill] sm:$0xff] }
 0x1a0   :  { %v5447_v8 = vpop.eup %5446  ;;  %5466 = vrcp.f32 %v3335_v22  ;;  %v3373_v41 = vadd.f32 1.0, %v5445_v9  ;;  %v903_v20 = vadd.f32 %v9264_v61, %v6836_v56 }
 0x1a1   :  { %v5449_v10 = vpop.eup %5448  ;;  %5468 = vrcp.f32 %v3527_v30  ;;  %v3528_v23 = vadd.f32 1.0, %v5447_v8  ;;  %v992_v30 = vadd.f32 %v7457_v25, %v6804_v50 }
 0x1a2   :  { %v5451_v40 = vpop.eup %5450  ;;  %5470 = vrcp.f32 %v3373_v41  ;;  %v3374_v27 = vadd.f32 1.0, %v5449_v10 }
 0x1a3   :  { %v5453_v14 = vpop.eup %5452  ;;  %5472 = vrcp.f32 %v3528_v23  ;;  %v3566_v19 = vadd.f32 1.0, %v5451_v40  ;;  %v905_v40 = vadd.f32 %v7459_v63, %v6836_v56  ;;  %v998_v63 = vadd.f32 %v7477_v59, %v6820_v52 }
 0x1a4   :  { %v5455_v43 = vpop.eup %5454  ;;  %5474 = vrcp.f32 %v3374_v27  ;;  %v3412_v49 = vadd.f32 1.0, %v5453_v14  ;;  %v994_v27 = vadd.f32 %v7463_v46, %v6804_v50 }
 0x1a5   :  { %v5457_v24 = vpop.eup %5456  ;;  %5476 = vrcp.f32 %v3566_v19  ;;  %v3567_v53 = vadd.f32 1.0, %v5455_v43  ;;  %v4904_v46 = vmul.f32 -1.442695, %v905_v40 }
 0x1a6   :  { %v5459_v22 = vpop.eup %5458  ;;  %5478 = vrcp.f32 %v3412_v49  ;;  %v3413_v9 = vadd.f32 1.0, %v5457_v24  ;;  %v4903_v49 = vmul.f32 -1.442695, %v903_v20  ;;  %v909_v24 = vadd.f32 %v7475_v33, %v6844_v57  ;;  %v7856_v33 = vpop.f32.mrb[85].mxu1 }
 0x1a7   :  { %v5461_v8 = vpop.eup %5460  ;;  %5480 = vrcp.f32 %v3567_v53  ;;  %v3605_v41 = vadd.f32 1.0, %v5459_v22  ;;  %v4749_v53 = vmul.f32 -1.442695, %v992_v30  ;;  %v911_v20 = vadd.f32 %v7484_v32, %v6844_v57  ;;  %v7854_v22 = vpop.f32.mrb[85].mxu0 }
 0x1a8   :  { %v5463_v23 = vpop.eup %5462  ;;  %5482 = vrcp.f32 %v3413_v9  ;;  %v3451_v10 = vadd.f32 1.0, %v5461_v8  ;;  %v4750_v59 = vmul.f32 -1.442695, %v994_v27  ;;  %v1000_v30 = vadd.f32 %v7486_v34, %v6820_v52 }
 0x1a9   :  { %v5465_v14 = vpop.eup %5464  ;;  %5484 = vrcp.f32 %v3605_v41  ;;  %v3606_v19 = vadd.f32 1.0, %v5463_v23  ;;  %v4942_v32 = vmul.f32 -1.442695, %v909_v24  ;;  %v915_v41 = vadd.f32 %v7503_v21, %v6852_v58 }
 0x1aa   :  { %v5467_v25 = vpop.eup %5466  ;;  %5486 = vrcp.f32 %v3451_v10  ;;  %v3452_v43 = vadd.f32 1.0, %v5465_v14  ;;  %v4788_v23 = vmul.f32 -1.442695, %v998_v63  ;;  %v1004_v34 = vadd.f32 %v7505_v5, %v6812_v51  ;;  %v7878_v14 = vpop.f32.mrb[86].mxu0 }
 0x1ab   :  { %v5469_v61 = vpop.eup %5468  ;;  %4271 = vst [vmem:[%s9211_s3 + $0x68] sm:$0xff] %v5467_v25  ;;  %5488 = vrcp.f32 %v3606_v19  ;;  %v4943_v27 = vmul.f32 -1.442695, %v911_v20  ;;  %v917_v21 = vadd.f32 %v7512_v47, %v6852_v58  ;;  %v7880_v19 = vpop.f32.mrb[86].mxu1  ;;  %v4789_v5 = vmul.f32 -1.442695, %v1000_v30 }
 0x1ac   :  { %v5471_v9 = vpop.eup %5470  ;;  %4464 = vst [vmem:[%s9211_s3 + $0x668] sm:$0xff] %v5469_v61  ;;  %5490 = vrcp.f32 %v3452_v43  ;;  %v1006_v24 = vadd.f32 %v7514_v54, %v6812_v51  ;;  %v7887_v25 = vpop.f32.mrb[87].mxu0  ;;  %v4981_v47 = vmul.f32 -1.442695, %v915_v41  ;;  %v921_v63 = vadd.f32 %v7525_v13, %v6864_v6 }
 0x1ad   :  { %v5473_v8 = vpop.eup %5472  ;;  %4310 = vst [vmem:[%s9211_s3 + $0x198] sm:$0xff] %v5471_v9  ;;  %5492 = vpow2.f32 %v4903_v49  ;;  %v7889_v43 = vpop.f32.mrb[87].mxu1  ;;  %v4827_v54 = vmul.f32 -1.442695, %v1004_v34  ;;  %v4982_v20 = vmul.f32 -1.442695, %v917_v21 }
 0x1ae   :  { %v5475_v40 = vpop.eup %5474  ;;  %4465 = vst [vmem:[%s9211_s3 + $0x670] sm:$0xff] %v5473_v8  ;;  %5494 = vpow2.f32 %v4749_v53  ;;  %v7902_v9 = vpop.f32.mrb[88].mxu0  ;;  %v4828_v13 = vmul.f32 -1.442695, %v1006_v24 }
 0x1af   :  { %v5477_v10 = vpop.eup %5476  ;;  %4311 = vst [vmem:[%s9211_s3 + $0x1a0] sm:$0xff] %v5475_v40  ;;  %5496 = vpow2.f32 %v4904_v46  ;;  %v7909_v8 = vpop.f32.mrb[89].mxu0  ;;  %v5020_v40 = vmul.f32 -1.442695, %v921_v63 }
 0x1b0   :  { %v5479_v49 = vpop.eup %5478  ;;  %4503 = vst [vmem:[%s9211_s3 + $0x7a0] sm:$0xff] %v5477_v10  ;;  %5498 = vpow2.f32 %v4750_v59  ;;  %v7904_v59 = vpop.f32.mrb[88].mxu1  ;;  %9265 = vst [vmem:[#allocation13_spill] sm:$0xff] %v7909_v8 }
 0x1b1   :  { %v5481_v53 = vpop.eup %5480  ;;  %4349 = vst [vmem:[%s9211_s3 + $0x2d0] sm:$0xff] %v5479_v49  ;;  %5500 = vpow2.f32 %v4942_v32  ;;  %v7911_v32 = vpop.f32.mrb[89].mxu1 }
 0x1b2   :  { %v5483_v61 = vpop.eup %5482  ;;  %4504 = vst [vmem:[%s9211_s3 + $0x7a8] sm:$0xff] %v5481_v53  ;;  %5502 = vpow2.f32 %v4788_v23  ;;  %9266 = vst [vmem:[#allocation29_spill] sm:$0xff] %v7911_v32  ;;  %v7922_v10 = vpop.f32.mrb[90].mxu0  ;;  %v9275_v32 = vld [vmem:[#allocation19_spill] sm:$0xff] }
 0x1b3   :  { %v5485_v46 = vpop.eup %5484  ;;  %4350 = vst [vmem:[%s9211_s3 + $0x2d8] sm:$0xff] %v5483_v61  ;;  %5504 = vpow2.f32 %v4943_v27  ;;  %9267 = vst [vmem:[#allocation30_spill] sm:$0xff] %v7922_v10  ;;  %v7924_v27 = vpop.f32.mrb[90].mxu1 }
 0x1b4   :  { %v5487_v30 = vpop.eup %5486  ;;  %4542 = vst [vmem:[%s9211_s3 + $0x8d8] sm:$0xff] %v5485_v46  ;;  %5506 = vpow2.f32 %v4789_v5  ;;  %9268 = vst [vmem:[#allocation31_spill] sm:$0xff] %v7924_v27  ;;  %v7926_v5 = vpop.f32.mrb[91].mxu0 }
 0x1b5   :  { %v5489_v41 = vpop.eup %5488  ;;  %4388 = vst [vmem:[%s9211_s3 + $0x408] sm:$0xff] %v5487_v30  ;;  %5508 = vpow2.f32 %v4981_v47  ;;  %9269 = vst [vmem:[#allocation32_spill] sm:$0xff] %v7926_v5  ;;  %v7940_v8 = vpop.f32.mrb[91].mxu1 }
 0x1b6   :  { %v5491_v23 = vpop.eup %5490  ;;  %4543 = vst [vmem:[%s9211_s3 + $0x8e0] sm:$0xff] %v5489_v41  ;;  %5510 = vpow2.f32 %v4827_v54 }
 0x1b7   :  { %v5493_v34 = vpop.eup %5492  ;;  %4389 = vst [vmem:[%s9211_s3 + $0x410] sm:$0xff] %v5491_v23  ;;  %5512 = vpow2.f32 %v4982_v20 }
 0x1b8   :  { %v5495_v21 = vpop.eup %5494  ;;  %v3490_v49 = vadd.f32 1.0, %v5493_v34  ;;  %5514 = vpow2.f32 %v4828_v13 }
 0x1b9   :  { %v5497_v24 = vpop.eup %5496  ;;  %v3336_v53 = vadd.f32 1.0, %v5495_v21  ;;  %5516 = vpow2.f32 %v5020_v40  ;;  %v9270_v40 = vld [vmem:[#allocation14_spill] sm:$0xff] }
 0x1ba   :  { %v5499_v47 = vpop.eup %5498  ;;  %5518 = vrcp.f32 %v3490_v49  ;;  %v3491_v63 = vadd.f32 1.0, %v5497_v24  ;;  %v1010_v21 = vadd.f32 %v9270_v40, %v6833_v55 }
 0x1bb   :  { %v5501_v61 = vpop.eup %5500  ;;  %5520 = vrcp.f32 %v3336_v53  ;;  %v3337_v54 = vadd.f32 1.0, %v5499_v47  ;;  %v9271_v53 = vld [vmem:[#allocation15_spill] sm:$0xff] }
 0x1bc   :  { %v5503_v46 = vpop.eup %5502  ;;  %5522 = vrcp.f32 %v3491_v63  ;;  %v3529_v20 = vadd.f32 1.0, %v5501_v61  ;;  %v923_v47 = vadd.f32 %v9271_v53, %v6864_v6 }
 0x1bd   :  { %v5505_v30 = vpop.eup %5504  ;;  %5524 = vrcp.f32 %v3337_v54  ;;  %v3375_v41 = vadd.f32 1.0, %v5503_v46  ;;  %v9272_v54 = vld [vmem:[#allocation16_spill] sm:$0xff] }
 0x1be   :  { %v5507_v23 = vpop.eup %5506  ;;  %5526 = vrcp.f32 %v3529_v20  ;;  %v3530_v13 = vadd.f32 1.0, %v5505_v30  ;;  %v1012_v46 = vadd.f32 %v9272_v54, %v6833_v55  ;;  %v1018_v54 = vadd.f32 %v9275_v32, %v6836_v56 }
 0x1bf   :  { %v5509_v34 = vpop.eup %5508  ;;  %5528 = vrcp.f32 %v3375_v41  ;;  %v3376_v5 = vadd.f32 1.0, %v5507_v23  ;;  %v9273_v41 = vld [vmem:[#allocation17_spill] sm:$0xff]  ;;  %v1022_v32 = vadd.f32 %v7550_v18, %v6844_v57 }
 0x1c0   :  { %v5511_v49 = vpop.eup %5510  ;;  %5530 = vrcp.f32 %v3530_v13  ;;  %v3568_v24 = vadd.f32 1.0, %v5509_v34  ;;  %v1016_v23 = vadd.f32 %v9273_v41, %v6836_v56  ;;  %v4866_v13 = vmul.f32 -1.442695, %v1010_v21  ;;  %v9274_v34 = vld [vmem:[#allocation18_spill] sm:$0xff]  ;;  %v9276_v21 = vld [vmem:[#allocation20_spill] sm:$0xff] }
 0x1c1   :  { %v5513_v63 = vpop.eup %5512  ;;  %5532 = vrcp.f32 %v3376_v5  ;;  %v3414_v61 = vadd.f32 1.0, %v5511_v49  ;;  %v1105_v10 = vadd.f32 %v9274_v34, %v6804_v50  ;;  %v5021_v49 = vmul.f32 -1.442695, %v923_v47  ;;  %v9278_v34 = vld [vmem:[#allocation22_spill] sm:$0xff] }
 0x1c2   :  { %v5515_v20 = vpop.eup %5514  ;;  %5534 = vrcp.f32 %v3568_v24  ;;  %v3569_v30 = vadd.f32 1.0, %v5513_v63  ;;  %v4867_v63 = vmul.f32 -1.442695, %v1012_v46  ;;  %v1024_v18 = vadd.f32 %v9278_v34, %v6844_v57 }
 0x1c3   :  { %v5517_v27 = vpop.eup %5516  ;;  %5536 = vrcp.f32 %v3414_v61  ;;  %v3415_v40 = vadd.f32 1.0, %v5515_v20  ;;  %v1107_v61 = vadd.f32 %v9276_v21, %v6804_v50  ;;  %v4751_v46 = vmul.f32 -1.442695, %v1105_v10 }
 0x1c4   :  { %v5519_v53 = vpop.eup %5518  ;;  %5538 = vrcp.f32 %v3569_v30  ;;  %v3607_v5 = vadd.f32 1.0, %v5517_v27  ;;  %v4905_v27 = vmul.f32 -1.442695, %v1016_v23  ;;  %v9277_v30 = vld [vmem:[#allocation21_spill] sm:$0xff]  ;;  %v4906_v23 = vmul.f32 -1.442695, %v1018_v54 }
 0x1c5   :  { %v5521_v24 = vpop.eup %5520  ;;  %4427 = vst [vmem:[%s9211_s3 + $0x540] sm:$0xff] %v5519_v53  ;;  %5540 = vrcp.f32 %v3415_v40  ;;  %v1111_v41 = vadd.f32 %v9277_v30, %v6820_v52  ;;  %v7962_v53 = vpop.f32.mrb[92].mxu1  ;;  %v4752_v10 = vmul.f32 -1.442695, %v1107_v61  ;;  %v9281_v30 = vld [vmem:[#allocation24_spill] sm:$0xff]  ;;  %v9282_v61 = vld [vmem:[#allocation25_spill] sm:$0xff] }
 0x1c6   :  { %v5523_v20 = vpop.eup %5522  ;;  %4272 = vst [vmem:[%s9211_s3 + $0x70] sm:$0xff] %v5521_v24  ;;  %5542 = vrcp.f32 %v3607_v5  ;;  %v7964_v5 = vpop.f32.mrb[92].mxu0  ;;  %v1028_v34 = vadd.f32 %v9281_v30, %v6852_v58 }
 0x1c7   :  { %v5525_v47 = vpop.eup %5524  ;;  %4428 = vst [vmem:[%s9211_s3 + $0x548] sm:$0xff] %v5523_v20  ;;  %5544 = vpow2.f32 %v4866_v13  ;;  %v9279_v13 = vld [vmem:[#allocation23_spill] sm:$0xff]  ;;  %v7971_v20 = vpop.f32.mrb[93].mxu1 }
 0x1c8   :  { %v5527_v40 = vpop.eup %5526  ;;  %4273 = vst [vmem:[%s9211_s3 + $0x78] sm:$0xff] %v5525_v47  ;;  %5546 = vpow2.f32 %v5021_v49  ;;  %v1113_v21 = vadd.f32 %v9279_v13, %v6820_v52  ;;  %v7973_v49 = vpop.f32.mrb[93].mxu0  ;;  %v4944_v47 = vmul.f32 -1.442695, %v1022_v32  ;;  %v1117_v13 = vadd.f32 %v9282_v61, %v6812_v51 }
 0x1c9   :  { %v5529_v24 = vpop.eup %5528  ;;  %4466 = vst [vmem:[%s9211_s3 + $0x678] sm:$0xff] %v5527_v40  ;;  %5548 = vpow2.f32 %v4867_v63  ;;  %9280 = vst [vmem:[#allocation14_spill] sm:$0xff] %v7973_v49  ;;  %v4790_v63 = vmul.f32 -1.442695, %v1111_v41  ;;  %v7988_v32 = vpop.f32.mrb[94].mxu1 }
 0x1ca   :  { %v5531_v54 = vpop.eup %5530  ;;  %4312 = vst [vmem:[%s9211_s3 + $0x1a8] sm:$0xff] %v5529_v24  ;;  %5550 = vpow2.f32 %v4905_v27  ;;  %v4945_v27 = vmul.f32 -1.442695, %v1024_v18  ;;  %v7990_v24 = vpop.f32.mrb[94].mxu0 }
 0x1cb   :  { %v5533_v40 = vpop.eup %5532  ;;  %4467 = vst [vmem:[%s9211_s3 + $0x680] sm:$0xff] %v5531_v54  ;;  %5552 = vpow2.f32 %v4751_v46  ;;  %9283 = vst [vmem:[#allocation15_spill] sm:$0xff] %v7990_v24  ;;  %v4791_v46 = vmul.f32 -1.442695, %v1113_v21  ;;  %v7995_v41 = vpop.f32.mrb[95].mxu1 }
 0x1cc   :  { %v5535_v49 = vpop.eup %5534  ;;  %4313 = vst [vmem:[%s9211_s3 + $0x1b0] sm:$0xff] %v5533_v40  ;;  %5554 = vpow2.f32 %v4906_v23  ;;  %9284 = vst [vmem:[#allocation16_spill] sm:$0xff] %v7995_v41  ;;  %v7997_v54 = vpop.f32.mrb[95].mxu0  ;;  %v4983_v23 = vmul.f32 -1.442695, %v1028_v34 }
 0x1cd   :  { %v5537_v30 = vpop.eup %5536  ;;  %4505 = vst [vmem:[%s9211_s3 + $0x7b0] sm:$0xff] %v5535_v49  ;;  %5556 = vpow2.f32 %v4752_v10  ;;  %9285 = vst [vmem:[#allocation17_spill] sm:$0xff] %v7997_v54  ;;  %v4829_v49 = vmul.f32 -1.442695, %v1117_v13  ;;  %v8008_v21 = vpop.f32.mrb[96].mxu1 }
 0x1ce   :  { %v5539_v61 = vpop.eup %5538  ;;  %4351 = vst [vmem:[%s9211_s3 + $0x2e0] sm:$0xff] %v5537_v30  ;;  %5558 = vpow2.f32 %v4944_v47  ;;  %9286 = vst [vmem:[#allocation18_spill] sm:$0xff] %v8008_v21  ;;  %v8010_v40 = vpop.f32.mrb[96].mxu0 }
 0x1cf   :  { %v5541_v18 = vpop.eup %5540  ;;  %4506 = vst [vmem:[%s9211_s3 + $0x7b8] sm:$0xff] %v5539_v61  ;;  %5560 = vpow2.f32 %v4790_v63  ;;  %9287 = vst [vmem:[#allocation19_spill] sm:$0xff] %v8010_v40  ;;  %v8015_v47 = vpop.f32.mrb[97].mxu1 }
 0x1d0   :  { %v5543_v10 = vpop.eup %5542  ;;  %4352 = vst [vmem:[%s9211_s3 + $0x2e8] sm:$0xff] %v5541_v18  ;;  %5562 = vpow2.f32 %v4945_v27  ;;  %9288 = vst [vmem:[#allocation20_spill] sm:$0xff] %v8015_v47  ;;  %v8017_v34 = vpop.f32.mrb[97].mxu0 }
 0x1d1   :  { %v5545_v30 = vpop.eup %5544  ;;  %4544 = vst [vmem:[%s9211_s3 + $0x8e8] sm:$0xff] %v5543_v10  ;;  %5564 = vpow2.f32 %v4791_v46  ;;  %9289 = vst [vmem:[#allocation21_spill] sm:$0xff] %v8017_v34 }
 0x1d2   :  { %v5547_v63 = vpop.eup %5546  ;;  %v3453_v13 = vadd.f32 1.0, %v5545_v30  ;;  %5566 = vpow2.f32 %v4983_v23 }
 0x1d3   :  { %v5549_v61 = vpop.eup %5548  ;;  %v3608_v18 = vadd.f32 1.0, %v5547_v63  ;;  %5568 = vpow2.f32 %v4829_v49  ;;  %v9290_v49 = vld [vmem:[#allocation26_spill] sm:$0xff] }
 0x1d4   :  { %v5551_v27 = vpop.eup %5550  ;;  %5570 = vrcp.f32 %v3453_v13  ;;  %v3454_v21 = vadd.f32 1.0, %v5549_v61  ;;  %v1030_v63 = vadd.f32 %v9290_v49, %v6852_v58 }
 0x1d5   :  { %v5553_v40 = vpop.eup %5552  ;;  %5572 = vrcp.f32 %v3608_v18  ;;  %v3492_v54 = vadd.f32 1.0, %v5551_v27  ;;  %v1119_v18 = vadd.f32 %v7576_v28, %v6812_v51 }
 0x1d6   :  { %v5555_v41 = vpop.eup %5554  ;;  %5574 = vrcp.f32 %v3454_v21  ;;  %v3338_v10 = vadd.f32 1.0, %v5553_v40 }
 0x1d7   :  { %v5557_v46 = vpop.eup %5556  ;;  %5576 = vrcp.f32 %v3492_v54  ;;  %v3493_v47 = vadd.f32 1.0, %v5555_v41  ;;  %v1034_v41 = vadd.f32 %v7598_v37, %v6864_v6  ;;  %v1125_v37 = vadd.f32 %v7609_v60, %v6833_v55 }
 0x1d8   :  { %v5559_v24 = vpop.eup %5558  ;;  %5578 = vrcp.f32 %v3338_v10  ;;  %v3339_v34 = vadd.f32 1.0, %v5557_v46  ;;  %v1036_v46 = vadd.f32 %v7607_v36, %v6864_v6 }
 0x1d9   :  { %v5561_v30 = vpop.eup %5560  ;;  %5580 = vrcp.f32 %v3493_v47  ;;  %v3531_v23 = vadd.f32 1.0, %v5559_v24  ;;  %v1123_v24 = vadd.f32 %v7600_v45, %v6833_v55  ;;  %v5022_v45 = vmul.f32 -1.442695, %v1034_v41  ;;  %v8046_v41 = vpop.f32.mrb[98].mxu1 }
 0x1da   :  { %v5563_v13 = vpop.eup %5562  ;;  %5582 = vrcp.f32 %v3339_v34  ;;  %v3377_v61 = vadd.f32 1.0, %v5561_v30  ;;  %v4984_v34 = vmul.f32 -1.442695, %v1030_v63  ;;  %v1129_v63 = vadd.f32 %v7624_v3, %v6836_v56 }
 0x1db   :  { %v5565_v21 = vpop.eup %5564  ;;  %5584 = vrcp.f32 %v3531_v23  ;;  %v3532_v40 = vadd.f32 1.0, %v5563_v13  ;;  %v4830_v23 = vmul.f32 -1.442695, %v1119_v18  ;;  %v4868_v36 = vmul.f32 -1.442695, %v1123_v24 }
 0x1dc   :  { %v5567_v54 = vpop.eup %5566  ;;  %5586 = vrcp.f32 %v3377_v61  ;;  %v3378_v27 = vadd.f32 1.0, %v5565_v21  ;;  %v9291_v61 = vld [vmem:[#allocation2_spill] sm:$0xff]  ;;  %v5023_v21 = vmul.f32 -1.442695, %v1036_v46  ;;  %v4869_v24 = vmul.f32 -1.442695, %v1125_v37 }
 0x1dd   :  { %v5569_v47 = vpop.eup %5568  ;;  %5588 = vrcp.f32 %v3532_v40  ;;  %v3570_v10 = vadd.f32 1.0, %v5567_v54  ;;  %v1218_v60 = vadd.f32 %v9291_v61, %v6804_v50  ;;  %v9292_v40 = vld [vmem:[#allocation3_spill] sm:$0xff]  ;;  %v8048_v54 = vpop.f32.mrb[98].mxu0  ;;  %v9295_v37 = vld [vmem:[#allocation6_spill] sm:$0xff] }
 0x1de   :  { %v5571_v28 = vpop.eup %5570  ;;  %5590 = vrcp.f32 %v3378_v27  ;;  %v3416_v30 = vadd.f32 1.0, %v5569_v47  ;;  %v1131_v3 = vadd.f32 %v9292_v40, %v6836_v56  ;;  %v9293_v47 = vld [vmem:[#allocation4_spill] sm:$0xff] }
 0x1df   :  { %v5573_v49 = vpop.eup %5572  ;;  %4390 = vst [vmem:[%s9211_s3 + $0x418] sm:$0xff] %v5571_v28  ;;  %5592 = vrcp.f32 %v3570_v10  ;;  %v1220_v10 = vadd.f32 %v9293_v47, %v6804_v50  ;;  %v8055_v28 = vpop.f32.mrb[99].mxu1 }
 0x1e0   :  { %v5575_v13 = vpop.eup %5574  ;;  %4545 = vst [vmem:[%s9211_s3 + $0x8f0] sm:$0xff] %v5573_v49  ;;  %5594 = vrcp.f32 %v3416_v30  ;;  %v4907_v30 = vmul.f32 -1.442695, %v1129_v63  ;;  %v9294_v49 = vld [vmem:[#allocation5_spill] sm:$0xff]  ;;  %v9296_v63 = vld [vmem:[#allocation27_spill] sm:$0xff] }
 0x1e1   :  { %v5577_v18 = vpop.eup %5576  ;;  %4391 = vst [vmem:[%s9211_s3 + $0x420] sm:$0xff] %v5575_v13  ;;  %5596 = vpow2.f32 %v4984_v34  ;;  %v8057_v34 = vpop.f32.mrb[99].mxu0  ;;  %v1135_v13 = vadd.f32 %v9294_v49, %v6844_v57 }
 0x1e2   :  { %v5579_v27 = vpop.eup %5578  ;;  %4429 = vst [vmem:[%s9211_s3 + $0x550] sm:$0xff] %v5577_v18  ;;  %5598 = vpow2.f32 %v4830_v23  ;;  %v4753_v23 = vmul.f32 -1.442695, %v1218_v60  ;;  %v1224_v18 = vadd.f32 %v9295_v37, %v6820_v52  ;;  %v8074_v47 = vpop.f32.mrb[100].mxu0 }
 0x1e3   :  { %v5581_v46 = vpop.eup %5580  ;;  %4274 = vst [vmem:[%s9211_s3 + $0x80] sm:$0xff] %v5579_v27  ;;  %5600 = vpow2.f32 %v5022_v45  ;;  %v4908_v45 = vmul.f32 -1.442695, %v1131_v3  ;;  %v1137_v27 = vadd.f32 %v9296_v63, %v6844_v57  ;;  %v8076_v49 = vpop.f32.mrb[100].mxu1  ;;  %v4946_v3 = vmul.f32 -1.442695, %v1135_v13 }
 0x1e4   :  { %v5583_v61 = vpop.eup %5582  ;;  %4430 = vst [vmem:[%s9211_s3 + $0x558] sm:$0xff] %v5581_v46  ;;  %5602 = vpow2.f32 %v4868_v36  ;;  %v4754_v36 = vmul.f32 -1.442695, %v1220_v10  ;;  %v8081_v60 = vpop.f32.mrb[101].mxu0 }
 0x1e5   :  { %v5585_v40 = vpop.eup %5584  ;;  %4275 = vst [vmem:[%s9211_s3 + $0x88] sm:$0xff] %v5583_v61  ;;  %5604 = vpow2.f32 %v5023_v21  ;;  %9297 = vst [vmem:[#allocation22_spill] sm:$0xff] %v8081_v60  ;;  %v8083_v37 = vpop.f32.mrb[101].mxu1  ;;  %v4947_v10 = vmul.f32 -1.442695, %v1137_v27 }
 0x1e6   :  { %v5587_v46 = vpop.eup %5586  ;;  %4468 = vst [vmem:[%s9211_s3 + $0x688] sm:$0xff] %v5585_v40  ;;  %5606 = vpow2.f32 %v4869_v24  ;;  %9298 = vst [vmem:[#allocation23_spill] sm:$0xff] %v8083_v37  ;;  %v4792_v40 = vmul.f32 -1.442695, %v1224_v18  ;;  %v8094_v63 = vpop.f32.mrb[102].mxu0 }
 0x1e7   :  { %v5589_v21 = vpop.eup %5588  ;;  %4314 = vst [vmem:[%s9211_s3 + $0x1b8] sm:$0xff] %v5587_v46  ;;  %5608 = vpow2.f32 %v4907_v30  ;;  %9299 = vst [vmem:[#allocation24_spill] sm:$0xff] %v8094_v63  ;;  %v8096_v37 = vpop.f32.mrb[102].mxu1 }
 0x1e8   :  { %v5591_v61 = vpop.eup %5590  ;;  %4469 = vst [vmem:[%s9211_s3 + $0x690] sm:$0xff] %v5589_v21  ;;  %5610 = vpow2.f32 %v4753_v23  ;;  %9300 = vst [vmem:[#allocation25_spill] sm:$0xff] %v8096_v37  ;;  %v8101_v13 = vpop.f32.mrb[103].mxu0 }
 0x1e9   :  { %v5593_v24 = vpop.eup %5592  ;;  %4315 = vst [vmem:[%s9211_s3 + $0x1c0] sm:$0xff] %v5591_v61  ;;  %5612 = vpow2.f32 %v4908_v45  ;;  %9301 = vst [vmem:[#allocation26_spill] sm:$0xff] %v8101_v13  ;;  %v8103_v23 = vpop.f32.mrb[103].mxu1 }
 0x1ea   :  { %v5595_v30 = vpop.eup %5594  ;;  %4507 = vst [vmem:[%s9211_s3 + $0x7c0] sm:$0xff] %v5593_v24  ;;  %5614 = vpow2.f32 %v4754_v36  ;;  %9302 = vst [vmem:[#allocation2_spill] sm:$0xff] %v8103_v23  ;;  %v8108_v61 = vpop.f32.mrb[104].mxu0 }
 0x1eb   :  { %v5597_v18 = vpop.eup %5596  ;;  %4353 = vst [vmem:[%s9211_s3 + $0x2f0] sm:$0xff] %v5595_v30  ;;  %5616 = vpow2.f32 %v4946_v3  ;;  %9303 = vst [vmem:[#allocation3_spill] sm:$0xff] %v8108_v61 }
 0x1ec   :  { %v5599_v45 = vpop.eup %5598  ;;  %v3571_v27 = vadd.f32 1.0, %v5597_v18  ;;  %5618 = vpow2.f32 %v4792_v40 }
 0x1ed   :  { %v5601_v46 = vpop.eup %5600  ;;  %v3417_v21 = vadd.f32 1.0, %v5599_v45  ;;  %5620 = vpow2.f32 %v4947_v10  ;;  %v9304_v45 = vld [vmem:[#allocation28_spill] sm:$0xff] }
 0x1ee   :  { %v5603_v24 = vpop.eup %5602  ;;  %5622 = vrcp.f32 %v3571_v27  ;;  %v3609_v36 = vadd.f32 1.0, %v5601_v46  ;;  %v1226_v61 = vadd.f32 %v9304_v45, %v6820_v52  ;;  %v8122_v45 = vpop.f32.mrb[104].mxu1 }
 0x1ef   :  { %v5605_v13 = vpop.eup %5604  ;;  %5624 = vrcp.f32 %v3417_v21  ;;  %v3455_v23 = vadd.f32 1.0, %v5603_v24  ;;  %v1141_v21 = vadd.f32 %v7682_v29, %v6852_v58 }
 0x1f0   :  { %v5607_v37 = vpop.eup %5606  ;;  %5626 = vrcp.f32 %v3609_v36  ;;  %v3610_v63 = vadd.f32 1.0, %v5605_v13 }
 0x1f1   :  { %v5609_v60 = vpop.eup %5608  ;;  %5628 = vrcp.f32 %v3455_v23  ;;  %v3456_v3 = vadd.f32 1.0, %v5607_v37  ;;  %v1230_v37 = vadd.f32 %v7684_v26, %v6812_v51  ;;  %v1143_v23 = vadd.f32 %v7691_v42, %v6852_v58 }
 0x1f2   :  { %v5611_v30 = vpop.eup %5610  ;;  %5630 = vrcp.f32 %v3610_v63  ;;  %v3494_v40 = vadd.f32 1.0, %v5609_v60  ;;  %v1147_v26 = vadd.f32 %v7710_v16, %v6864_v6  ;;  %v1149_v16 = vadd.f32 %v7717_v62, %v6864_v6 }
 0x1f3   :  { %v5613_v18 = vpop.eup %5612  ;;  %5632 = vrcp.f32 %v3456_v3  ;;  %v3340_v10 = vadd.f32 1.0, %v5611_v30  ;;  %v4793_v30 = vmul.f32 -1.442695, %v1226_v61  ;;  %v4831_v42 = vmul.f32 -1.442695, %v1230_v37 }
 0x1f4   :  { %v5615_v27 = vpop.eup %5614  ;;  %5634 = vrcp.f32 %v3494_v40  ;;  %v3495_v46 = vadd.f32 1.0, %v5613_v18  ;;  %v1232_v40 = vadd.f32 %v7693_v15, %v6812_v51  ;;  %v1236_v61 = vadd.f32 %v7712_v12, %v6833_v55 }
 0x1f5   :  { %v5617_v24 = vpop.eup %5616  ;;  %5636 = vrcp.f32 %v3340_v10  ;;  %v3341_v13 = vadd.f32 1.0, %v5615_v27  ;;  %v4985_v10 = vmul.f32 -1.442695, %v1141_v21  ;;  %v8134_v21 = vpop.f32.mrb[105].mxu0  ;;  %v1238_v37 = vadd.f32 %v7719_v4, %v6833_v55 }
 0x1f6   :  { %v5619_v63 = vpop.eup %5618  ;;  %5638 = vrcp.f32 %v3495_v46  ;;  %v3533_v60 = vadd.f32 1.0, %v5617_v24  ;;  %v4986_v46 = vmul.f32 -1.442695, %v1143_v23  ;;  %v8136_v24 = vpop.f32.mrb[105].mxu1  ;;  %v4832_v12 = vmul.f32 -1.442695, %v1232_v40 }
 0x1f7   :  { %v5621_v36 = vpop.eup %5620  ;;  %5640 = vrcp.f32 %v3341_v13  ;;  %v3379_v3 = vadd.f32 1.0, %v5619_v63  ;;  %v5024_v62 = vmul.f32 -1.442695, %v1147_v26  ;;  %v1331_v4 = vadd.f32 %v7732_v31, %v6804_v50  ;;  %v8158_v40 = vpop.f32.mrb[106].mxu0 }
 0x1f8   :  { %v5623_v29 = vpop.eup %5622  ;;  %5642 = vrcp.f32 %v3533_v60  ;;  %v3534_v18 = vadd.f32 1.0, %v5621_v36  ;;  %v1242_v60 = vadd.f32 %v7730_v7, %v6836_v56  ;;  %v4870_v36 = vmul.f32 -1.442695, %v1236_v61 }
 0x1f9   :  { %v5625_v27 = vpop.eup %5624  ;;  %4508 = vst [vmem:[%s9211_s3 + $0x7c8] sm:$0xff] %v5623_v29  ;;  %5644 = vrcp.f32 %v3379_v3  ;;  %v1244_v7 = vadd.f32 %v7737_v1, %v6836_v56  ;;  %v8160_v29 = vpop.f32.mrb[106].mxu1  ;;  %v4871_v31 = vmul.f32 -1.442695, %v1238_v37 }
 0x1fa   :  { %v5627_v15 = vpop.eup %5626  ;;  %4354 = vst [vmem:[%s9211_s3 + $0x2f8] sm:$0xff] %v5625_v27  ;;  %5646 = vrcp.f32 %v3534_v18  ;;  %v8167_v27 = vpop.f32.mrb[107].mxu0  ;;  %v4909_v1 = vmul.f32 -1.442695, %v1242_v60 }
 0x1fb   :  { %v5629_v13 = vpop.eup %5628  ;;  %4546 = vst [vmem:[%s9211_s3 + $0x8f8] sm:$0xff] %v5627_v15  ;;  %5648 = vpow2.f32 %v4793_v30  ;;  %v5025_v30 = vmul.f32 -1.442695, %v1149_v16  ;;  %v8182_v37 = vpop.f32.mrb[108].mxu0 }
 0x1fc   :  { %v5631_v63 = vpop.eup %5630  ;;  %4392 = vst [vmem:[%s9211_s3 + $0x428] sm:$0xff] %v5629_v13  ;;  %5650 = vpow2.f32 %v4985_v10  ;;  %v9305_v10 = vld [vmem:[#allocation7_spill] sm:$0xff]  ;;  %v4910_v13 = vmul.f32 -1.442695, %v1244_v7 }
 0x1fd   :  { %v5633_v23 = vpop.eup %5632  ;;  %4547 = vst [vmem:[%s9211_s3 + $0x900] sm:$0xff] %v5631_v63  ;;  %5652 = vpow2.f32 %v4831_v42  ;;  %v1333_v26 = vadd.f32 %v9305_v10, %v6804_v50  ;;  %v8169_v42 = vpop.f32.mrb[107].mxu1 }
 0x1fe   :  { %v5635_v3 = vpop.eup %5634  ;;  %4393 = vst [vmem:[%s9211_s3 + $0x430] sm:$0xff] %v5633_v23  ;;  %5654 = vpow2.f32 %v4986_v46  ;;  %v4755_v46 = vmul.f32 -1.442695, %v1331_v4  ;;  %v8189_v23 = vpop.f32.mrb[109].mxu0 }
 0x1ff   :  { %v5637_v18 = vpop.eup %5636  ;;  %4431 = vst [vmem:[%s9211_s3 + $0x560] sm:$0xff] %v5635_v3  ;;  %5656 = vpow2.f32 %v4832_v12  ;;  %v8180_v12 = vpop.f32.mrb[108].mxu1 }
 0x200   :  { %v5639_v61 = vpop.eup %5638  ;;  %4276 = vst [vmem:[%s9211_s3 + $0x90] sm:$0xff] %v5637_v18  ;;  %5658 = vpow2.f32 %v5024_v62  ;;  %v4756_v62 = vmul.f32 -1.442695, %v1333_v26  ;;  %v8187_v60 = vpop.f32.mrb[109].mxu1 }
 0x201   :  { %v5641_v15 = vpop.eup %5640  ;;  %4432 = vst [vmem:[%s9211_s3 + $0x568] sm:$0xff] %v5639_v61  ;;  %5660 = vpow2.f32 %v4870_v36  ;;  %v8197_v7 = vpop.f32.mrb[110].mxu1 }
 0x202   :  { %v5643_v16 = vpop.eup %5642  ;;  %4277 = vst [vmem:[%s9211_s3 + $0x98] sm:$0xff] %v5641_v15  ;;  %5662 = vpow2.f32 %v5025_v30  ;;  %9306 = vst [vmem:[#allocation4_spill] sm:$0xff] %v8197_v7  ;;  %v8199_v10 = vpop.f32.mrb[110].mxu0 }
 0x203   :  { %v5645_v63 = vpop.eup %5644  ;;  %4470 = vst [vmem:[%s9211_s3 + $0x698] sm:$0xff] %v5643_v16  ;;  %5664 = vpow2.f32 %v4871_v31 }
 0x204   :  { %v5647_v36 = vpop.eup %5646  ;;  %4316 = vst [vmem:[%s9211_s3 + $0x1c8] sm:$0xff] %v5645_v63  ;;  %5666 = vpow2.f32 %v4909_v1 }
 0x205   :  { %v5649_v4 = vpop.eup %5648  ;;  %4471 = vst [vmem:[%s9211_s3 + $0x6a0] sm:$0xff] %v5647_v36  ;;  %5668 = vpow2.f32 %v4755_v46 }
 0x206   :  { %v5651_v3 = vpop.eup %5650  ;;  %v3380_v30 = vadd.f32 1.0, %v5649_v4  ;;  %5670 = vpow2.f32 %v4910_v13 }
 0x207   :  { %v5653_v18 = vpop.eup %5652  ;;  %v3572_v31 = vadd.f32 1.0, %v5651_v3  ;;  %5672 = vpow2.f32 %v4756_v62  ;;  %v1248_v3 = vadd.f32 %v7744_v0, %v6844_v57 }
 0x208   :  { %v5655_v26 = vpop.eup %5654  ;;  %5674 = vrcp.f32 %v3380_v30  ;;  %v3418_v61 = vadd.f32 1.0, %v5653_v18 }
 0x209   :  { %v5657_v1 = vpop.eup %5656  ;;  %5676 = vrcp.f32 %v3572_v31  ;;  %v3573_v15 = vadd.f32 1.0, %v5655_v26  ;;  %v1337_v31 = vadd.f32 %v7758_v44, %v6820_v52 }
 0x20a   :  { %v5659_v16 = vpop.eup %5658  ;;  %5678 = vrcp.f32 %v3418_v61  ;;  %v3419_v63 = vadd.f32 1.0, %v5657_v1  ;;  %v1250_v1 = vadd.f32 %v7770_v38, %v6844_v57  ;;  %v1343_v38 = vadd.f32 %v7796_v39, %v6812_v51 }
 0x20b   :  { %v5661_v46 = vpop.eup %5660  ;;  %5680 = vrcp.f32 %v3573_v15  ;;  %v3611_v36 = vadd.f32 1.0, %v5659_v16 }
 0x20c   :  { %v5663_v13 = vpop.eup %5662  ;;  %5682 = vrcp.f32 %v3419_v63  ;;  %v3457_v4 = vadd.f32 1.0, %v5661_v46  ;;  %v1339_v63 = vadd.f32 %v7772_v2, %v6820_v52  ;;  %v4949_v2 = vmul.f32 -1.442695, %v1250_v1 }
 0x20d   :  { %v5665_v7 = vpop.eup %5664  ;;  %5684 = vrcp.f32 %v3611_v36  ;;  %v3612_v62 = vadd.f32 1.0, %v5663_v13  ;;  %v4948_v36 = vmul.f32 -1.442695, %v1248_v3  ;;  %v1256_v3 = vadd.f32 %v7803_v35, %v6852_v58 }
 0x20e   :  { %v5667_v30 = vpop.eup %5666  ;;  %5686 = vrcp.f32 %v3457_v4  ;;  %v3458_v18 = vadd.f32 1.0, %v5665_v7  ;;  %v1254_v7 = vadd.f32 %v7794_v17, %v6852_v58  ;;  %v4794_v4 = vmul.f32 -1.442695, %v1337_v31  ;;  %v8220_v17 = vpop.f32.mrb[111].mxu0 }
 0x20f   :  { %v5669_v26 = vpop.eup %5668  ;;  %5688 = vrcp.f32 %v3612_v62  ;;  %v3496_v61 = vadd.f32 1.0, %v5667_v30  ;;  %v8218_v30 = vpop.f32.mrb[111].mxu1  ;;  %v4795_v39 = vmul.f32 -1.442695, %v1339_v63  ;;  %v1345_v31 = vadd.f32 %v7805_v11, %v6812_v51 }
 0x210   :  { %v5671_v15 = vpop.eup %5670  ;;  %5690 = vrcp.f32 %v3458_v18  ;;  %v3342_v16 = vadd.f32 1.0, %v5669_v26  ;;  %v4987_v35 = vmul.f32 -1.442695, %v1254_v7  ;;  %v8244_v7 = vpop.f32.mrb[112].mxu0 }
 0x211   :  { %v5673_v46 = vpop.eup %5672  ;;  %5692 = vrcp.f32 %v3496_v61  ;;  %v3497_v0 = vadd.f32 1.0, %v5671_v15  ;;  %v1260_v61 = vadd.f32 %v7816_v48, %v6864_v6  ;;  %v4833_v15 = vmul.f32 -1.442695, %v1343_v38 }
 0x212   :  { %v5675_v44 = vpop.eup %5674  ;;  %5694 = vrcp.f32 %v3342_v16  ;;  %v3343_v13 = vadd.f32 1.0, %v5673_v46  ;;  %v9307_v16 = vld [vmem:[#allocation8_spill] sm:$0xff]  ;;  %v4988_v46 = vmul.f32 -1.442695, %v1256_v3 }
 0x213   :  { %v5677_v62 = vpop.eup %5676  ;;  %4317 = vst [vmem:[%s9211_s3 + $0x1d0] sm:$0xff] %v5675_v44  ;;  %5696 = vrcp.f32 %v3497_v0  ;;  %v1349_v11 = vadd.f32 %v9307_v16, %v6833_v55  ;;  %v9308_v0 = vld [vmem:[#allocation9_spill] sm:$0xff] }
 0x214   :  { %v5679_v18 = vpop.eup %5678  ;;  %4509 = vst [vmem:[%s9211_s3 + $0x7d0] sm:$0xff] %v5677_v62  ;;  %5698 = vrcp.f32 %v3343_v13  ;;  %v1262_v48 = vadd.f32 %v9308_v0, %v6864_v6  ;;  %v4834_v13 = vmul.f32 -1.442695, %v1345_v31 }
 0x215   :  { %v5681_v26 = vpop.eup %5680  ;;  %4355 = vst [vmem:[%s9211_s3 + $0x300] sm:$0xff] %v5679_v18  ;;  %5700 = vpow2.f32 %v4948_v36  ;;  %v8242_v36 = vpop.f32.mrb[112].mxu1  ;;  %v5026_v18 = vmul.f32 -1.442695, %v1260_v61 }
 0x216   :  { %v5683_v1 = vpop.eup %5682  ;;  %4510 = vst [vmem:[%s9211_s3 + $0x7d8] sm:$0xff] %v5681_v26  ;;  %5702 = vpow2.f32 %v4794_v4  ;;  %v9309_v4 = vld [vmem:[#allocation10_spill] sm:$0xff]  ;;  %v8251_v62 = vpop.f32.mrb[113].mxu1  ;;  %v9310_v26 = vld [vmem:[#allocation11_spill] sm:$0xff] }
 0x217   :  { %v5685_v63 = vpop.eup %5684  ;;  %4356 = vst [vmem:[%s9211_s3 + $0x308] sm:$0xff] %v5683_v1  ;;  %5704 = vpow2.f32 %v4949_v2  ;;  %v1351_v38 = vadd.f32 %v9309_v4, %v6833_v55  ;;  %v8253_v2 = vpop.f32.mrb[113].mxu0  ;;  %v1355_v1 = vadd.f32 %v9310_v26, %v6836_v56 }
 0x218   :  { %v5687_v44 = vpop.eup %5686  ;;  %4548 = vst [vmem:[%s9211_s3 + $0x908] sm:$0xff] %v5685_v63  ;;  %5706 = vpow2.f32 %v4795_v39  ;;  %v4872_v39 = vmul.f32 -1.442695, %v1349_v11  ;;  %v5027_v63 = vmul.f32 -1.442695, %v1262_v48  ;;  %v8266_v0 = vpop.f32.mrb[114].mxu1 }
 0x219   :  { %v5689_v3 = vpop.eup %5688  ;;  %4394 = vst [vmem:[%s9211_s3 + $0x438] sm:$0xff] %v5687_v44  ;;  %5708 = vpow2.f32 %v4987_v35  ;;  %v8268_v35 = vpop.f32.mrb[114].mxu0  ;;  %v4873_v44 = vmul.f32 -1.442695, %v1351_v38 }
 0x21a   :  { %v5691_v16 = vpop.eup %5690  ;;  %4549 = vst [vmem:[%s9211_s3 + $0x910] sm:$0xff] %v5689_v3  ;;  %5710 = vpow2.f32 %v4833_v15  ;;  %v8273_v15 = vpop.f32.mrb[115].mxu1 }
 0x21b   :  { %v5693_v31 = vpop.eup %5692  ;;  %4395 = vst [vmem:[%s9211_s3 + $0x440] sm:$0xff] %v5691_v16  ;;  %5712 = vpow2.f32 %v4988_v46  ;;  %9311 = vst [vmem:[#allocation5_spill] sm:$0xff] %v8273_v15  ;;  %v8275_v11 = vpop.f32.mrb[115].mxu0  ;;  %v4911_v46 = vmul.f32 -1.442695, %v1355_v1 }
 0x21c   :  { %v5695_v61 = vpop.eup %5694  ;;  %4433 = vst [vmem:[%s9211_s3 + $0x570] sm:$0xff] %v5693_v31  ;;  %5714 = vpow2.f32 %v4834_v13  ;;  %9312 = vst [vmem:[#allocation6_spill] sm:$0xff] %v8275_v11  ;;  %v8286_v13 = vpop.f32.mrb[116].mxu0 }
 0x21d   :  { %v5697_v4 = vpop.eup %5696  ;;  %4278 = vst [vmem:[%s9211_s3 + $0xa0] sm:$0xff] %v5695_v61  ;;  %5716 = vpow2.f32 %v5026_v18  ;;  %9313 = vst [vmem:[#allocation27_spill] sm:$0xff] %v8286_v13  ;;  %v8288_v38 = vpop.f32.mrb[116].mxu1 }
 0x21e   :  { %v5699_v48 = vpop.eup %5698  ;;  %4434 = vst [vmem:[%s9211_s3 + $0x578] sm:$0xff] %v5697_v4  ;;  %5718 = vpow2.f32 %v4872_v39  ;;  %9314 = vst [vmem:[#allocation28_spill] sm:$0xff] %v8288_v38  ;;  %v8290_v18 = vpop.f32.mrb[117].mxu0 }
 0x21f   :  { %v5701_v3 = vpop.eup %5700  ;;  %4279 = vst [vmem:[%s9211_s3 + $0xa8] sm:$0xff] %v5699_v48  ;;  %5720 = vpow2.f32 %v5027_v63  ;;  %9315 = vst [vmem:[#allocation7_spill] sm:$0xff] %v8290_v18 }
 0x220   :  { %v5703_v26 = vpop.eup %5702  ;;  %v3535_v16 = vadd.f32 1.0, %v5701_v3  ;;  %5722 = vpow2.f32 %v4873_v44 }
 0x221   :  { %v5705_v1 = vpop.eup %5704  ;;  %v3381_v31 = vadd.f32 1.0, %v5703_v26  ;;  %5724 = vpow2.f32 %v4911_v46  ;;  %v9316_v46 = vld [vmem:[#allocation12_spill] sm:$0xff] }
 0x222   :  { %v5707_v61 = vpop.eup %5706  ;;  %5726 = vrcp.f32 %v3535_v16  ;;  %v3536_v39 = vadd.f32 1.0, %v5705_v1  ;;  %v1444_v26 = vadd.f32 %v9316_v46, %v6804_v50  ;;  %v8304_v46 = vpop.f32.mrb[117].mxu1 }
 0x223   :  { %v5709_v4 = vpop.eup %5708  ;;  %5728 = vrcp.f32 %v3381_v31  ;;  %v3382_v11 = vadd.f32 1.0, %v5707_v61  ;;  %v1357_v31 = vadd.f32 %v7854_v22, %v6836_v56 }
 0x224   :  { %v5711_v48 = vpop.eup %5710  ;;  %5730 = vrcp.f32 %v3536_v39  ;;  %v3574_v63 = vadd.f32 1.0, %v5709_v4 }
 0x225   :  { %v5713_v13 = vpop.eup %5712  ;;  %5732 = vrcp.f32 %v3382_v11  ;;  %v3420_v38 = vadd.f32 1.0, %v5711_v48  ;;  %v1446_v11 = vadd.f32 %v7856_v33, %v6804_v50  ;;  %v1363_v33 = vadd.f32 %v7887_v25, %v6844_v57 }
 0x226   :  { %v5715_v15 = vpop.eup %5714  ;;  %5734 = vrcp.f32 %v3574_v63  ;;  %v3575_v44 = vadd.f32 1.0, %v5713_v13  ;;  %v4757_v63 = vmul.f32 -1.442695, %v1444_v26  ;;  %v1452_v26 = vadd.f32 %v7889_v43, %v6820_v52 }
 0x227   :  { %v5717_v3 = vpop.eup %5716  ;;  %5736 = vrcp.f32 %v3420_v38  ;;  %v3421_v18 = vadd.f32 1.0, %v5715_v15  ;;  %v1361_v15 = vadd.f32 %v7878_v14, %v6844_v57  ;;  %v4758_v14 = vmul.f32 -1.442695, %v1446_v11 }
 0x228   :  { %v5719_v16 = vpop.eup %5718  ;;  %5738 = vrcp.f32 %v3575_v44  ;;  %v3613_v1 = vadd.f32 1.0, %v5717_v3  ;;  %v1450_v44 = vadd.f32 %v7880_v19, %v6820_v52  ;;  %v4912_v3 = vmul.f32 -1.442695, %v1357_v31 }
 0x229   :  { %v5721_v61 = vpop.eup %5720  ;;  %5740 = vrcp.f32 %v3421_v18  ;;  %v3459_v39 = vadd.f32 1.0, %v5719_v16  ;;  %v1367_v25 = vadd.f32 %v7902_v9, %v6852_v58  ;;  %v1456_v43 = vadd.f32 %v7904_v59, %v6812_v51 }
 0x22a   :  { %v5723_v4 = vpop.eup %5722  ;;  %5742 = vrcp.f32 %v3613_v1  ;;  %v3614_v13 = vadd.f32 1.0, %v5721_v61  ;;  %v4950_v1 = vmul.f32 -1.442695, %v1361_v15  ;;  %v4796_v61 = vmul.f32 -1.442695, %v1450_v44  ;;  %v8328_v15 = vpop.f32.mrb[118].mxu1 }
 0x22b   :  { %v5725_v38 = vpop.eup %5724  ;;  %5744 = vrcp.f32 %v3459_v39  ;;  %v3460_v48 = vadd.f32 1.0, %v5723_v4  ;;  %v4951_v11 = vmul.f32 -1.442695, %v1363_v33  ;;  %v9317_v4 = vld [vmem:[#allocation13_spill] sm:$0xff]  ;;  %v4797_v59 = vmul.f32 -1.442695, %v1452_v26 }
 0x22c   :  { %v5727_v22 = vpop.eup %5726  ;;  %5746 = vrcp.f32 %v3614_v13  ;;  %v3498_v18 = vadd.f32 1.0, %v5725_v38  ;;  %v1369_v9 = vadd.f32 %v9317_v4, %v6852_v58  ;;  %v8326_v13 = vpop.f32.mrb[118].mxu0  ;;  %v9319_v33 = vld [vmem:[#allocation30_spill] sm:$0xff]  ;;  %v9320_v26 = vld [vmem:[#allocation31_spill] sm:$0xff] }
 0x22d   :  { %v5729_v16 = vpop.eup %5728  ;;  %4472 = vst [vmem:[%s9211_s3 + $0x6a8] sm:$0xff] %v5727_v22  ;;  %5748 = vrcp.f32 %v3460_v48  ;;  %v9318_v48 = vld [vmem:[#allocation29_spill] sm:$0xff]  ;;  %v8335_v44 = vpop.f32.mrb[119].mxu0 }
 0x22e   :  { %v5731_v19 = vpop.eup %5730  ;;  %4318 = vst [vmem:[%s9211_s3 + $0x1d8] sm:$0xff] %v5729_v16  ;;  %5750 = vrcp.f32 %v3498_v18  ;;  %v8337_v22 = vpop.f32.mrb[119].mxu1  ;;  %v1373_v16 = vadd.f32 %v9319_v33, %v6864_v6 }
 0x22f   :  { %v5733_v31 = vpop.eup %5732  ;;  %4473 = vst [vmem:[%s9211_s3 + $0x6b0] sm:$0xff] %v5731_v19  ;;  %5752 = vpow2.f32 %v4757_v63  ;;  %v1458_v63 = vadd.f32 %v9318_v48, %v6812_v51  ;;  %v8354_v4 = vpop.f32.mrb[120].mxu1 }
 0x230   :  { %v5735_v39 = vpop.eup %5734  ;;  %4319 = vst [vmem:[%s9211_s3 + $0x1e0] sm:$0xff] %v5733_v31  ;;  %5754 = vpow2.f32 %v4912_v3  ;;  %v4989_v3 = vmul.f32 -1.442695, %v1367_v25  ;;  %v1462_v31 = vadd.f32 %v9320_v26, %v6833_v55  ;;  %v8352_v25 = vpop.f32.mrb[120].mxu0 }
 0x231   :  { %v5737_v38 = vpop.eup %5736  ;;  %4511 = vst [vmem:[%s9211_s3 + $0x7e0] sm:$0xff] %v5735_v39  ;;  %5756 = vpow2.f32 %v4758_v14  ;;  %v4835_v14 = vmul.f32 -1.442695, %v1456_v43  ;;  %v8359_v43 = vpop.f32.mrb[121].mxu0 }
 0x232   :  { %v5739_v18 = vpop.eup %5738  ;;  %4357 = vst [vmem:[%s9211_s3 + $0x310] sm:$0xff] %v5737_v38  ;;  %5758 = vpow2.f32 %v4950_v1  ;;  %v4990_v1 = vmul.f32 -1.442695, %v1369_v9  ;;  %v8361_v48 = vpop.f32.mrb[121].mxu1  ;;  %v4874_v33 = vmul.f32 -1.442695, %v1462_v31 }
 0x233   :  { %v5741_v19 = vpop.eup %5740  ;;  %4512 = vst [vmem:[%s9211_s3 + $0x7e8] sm:$0xff] %v5739_v18  ;;  %5760 = vpow2.f32 %v4796_v61  ;;  %v4836_v61 = vmul.f32 -1.442695, %v1458_v63  ;;  %9321 = vst [vmem:[#allocation8_spill] sm:$0xff] %v8361_v48  ;;  %v8372_v63 = vpop.f32.mrb[122].mxu0 }
 0x234   :  { %v5743_v39 = vpop.eup %5742  ;;  %4358 = vst [vmem:[%s9211_s3 + $0x318] sm:$0xff] %v5741_v19  ;;  %5762 = vpow2.f32 %v4951_v11  ;;  %v5028_v11 = vmul.f32 -1.442695, %v1373_v16  ;;  %9322 = vst [vmem:[#allocation9_spill] sm:$0xff] %v8372_v63  ;;  %v8374_v19 = vpop.f32.mrb[122].mxu1 }
 0x235   :  { %v5745_v38 = vpop.eup %5744  ;;  %4550 = vst [vmem:[%s9211_s3 + $0x918] sm:$0xff] %v5743_v39  ;;  %5764 = vpow2.f32 %v4797_v59  ;;  %9323 = vst [vmem:[#allocation10_spill] sm:$0xff] %v8374_v19  ;;  %v8381_v16 = vpop.f32.mrb[123].mxu1 }
 0x236   :  { %v5747_v18 = vpop.eup %5746  ;;  %4396 = vst [vmem:[%s9211_s3 + $0x448] sm:$0xff] %v5745_v38  ;;  %5766 = vpow2.f32 %v4989_v3  ;;  %v8379_v3 = vpop.f32.mrb[123].mxu0  ;;  %9325 = vst [vmem:[#allocation12_spill] sm:$0xff] %v8381_v16 }
 0x237   :  { %v5749_v9 = vpop.eup %5748  ;;  %4551 = vst [vmem:[%s9211_s3 + $0x920] sm:$0xff] %v5747_v18  ;;  %5768 = vpow2.f32 %v4835_v14  ;;  %9324 = vst [vmem:[#allocation11_spill] sm:$0xff] %v8379_v3 }
 0x238   :  { %v5751_v59 = vpop.eup %5750  ;;  %4397 = vst [vmem:[%s9211_s3 + $0x450] sm:$0xff] %v5749_v9  ;;  %5770 = vpow2.f32 %v4990_v1 }
 0x239   :  { %v5753_v26 = vpop.eup %5752  ;;  %4435 = vst [vmem:[%s9211_s3 + $0x580] sm:$0xff] %v5751_v59  ;;  %5772 = vpow2.f32 %v4836_v61 }
 0x23a   :  { %v5755_v14 = vpop.eup %5754  ;;  %v3344_v31 = vadd.f32 1.0, %v5753_v26  ;;  %5774 = vpow2.f32 %v5028_v11 }
 0x23b   :  { %v5757_v39 = vpop.eup %5756  ;;  %v3499_v38 = vadd.f32 1.0, %v5755_v14  ;;  %5776 = vpow2.f32 %v4874_v33  ;;  %v9326_v33 = vld [vmem:[#allocation32_spill] sm:$0xff] }
 0x23c   :  { %v5759_v1 = vpop.eup %5758  ;;  %5778 = vrcp.f32 %v3344_v31  ;;  %v3345_v18 = vadd.f32 1.0, %v5757_v39  ;;  %v1375_v14 = vadd.f32 %v9326_v33, %v6864_v6  ;;  %v9327_v33 = vld [vmem:[#allocation14_spill] sm:$0xff] }
 0x23d   :  { %v5761_v9 = vpop.eup %5760  ;;  %5780 = vrcp.f32 %v3499_v38  ;;  %v3537_v19 = vadd.f32 1.0, %v5759_v1  ;;  %v1464_v38 = vadd.f32 %v7940_v8, %v6833_v55 }
 0x23e   :  { %v5763_v63 = vpop.eup %5762  ;;  %5782 = vrcp.f32 %v3345_v18  ;;  %v3383_v59 = vadd.f32 1.0, %v5761_v9 }
 0x23f   :  { %v5765_v61 = vpop.eup %5764  ;;  %5784 = vrcp.f32 %v3537_v19  ;;  %v3538_v3 = vadd.f32 1.0, %v5763_v63  ;;  %v1468_v63 = vadd.f32 %v7962_v53, %v6836_v56  ;;  %v1559_v53 = vadd.f32 %v9327_v33, %v6804_v50 }
 0x240   :  { %v5767_v48 = vpop.eup %5766  ;;  %5786 = vrcp.f32 %v3383_v59  ;;  %v3384_v16 = vadd.f32 1.0, %v5765_v61  ;;  %v1470_v61 = vadd.f32 %v7971_v20, %v6836_v56 }
 0x241   :  { %v5769_v26 = vpop.eup %5768  ;;  %5788 = vrcp.f32 %v3538_v3  ;;  %v3576_v11 = vadd.f32 1.0, %v5767_v48  ;;  %v1557_v48 = vadd.f32 %v7964_v5, %v6804_v50  ;;  %v4913_v5 = vmul.f32 -1.442695, %v1468_v63 }
 0x242   :  { %v5771_v31 = vpop.eup %5770  ;;  %5790 = vrcp.f32 %v3384_v16  ;;  %v3422_v39 = vadd.f32 1.0, %v5769_v26  ;;  %v5029_v16 = vmul.f32 -1.442695, %v1375_v14  ;;  %v1474_v14 = vadd.f32 %v7988_v32, %v6844_v57 }
 0x243   :  { %v5773_v1 = vpop.eup %5772  ;;  %5792 = vrcp.f32 %v3576_v11  ;;  %v3577_v18 = vadd.f32 1.0, %v5771_v31  ;;  %v4875_v11 = vmul.f32 -1.442695, %v1464_v38  ;;  %v4759_v20 = vmul.f32 -1.442695, %v1557_v48  ;;  %v9328_v38 = vld [vmem:[#allocation15_spill] sm:$0xff] }
 0x244   :  { %v5775_v19 = vpop.eup %5774  ;;  %5794 = vrcp.f32 %v3422_v39  ;;  %v3423_v9 = vadd.f32 1.0, %v5773_v1  ;;  %v1563_v1 = vadd.f32 %v9328_v38, %v6820_v52  ;;  %v4914_v63 = vmul.f32 -1.442695, %v1470_v61 }
 0x245   :  { %v5777_v3 = vpop.eup %5776  ;;  %5796 = vrcp.f32 %v3577_v18  ;;  %v3615_v59 = vadd.f32 1.0, %v5775_v19  ;;  %v9329_v19 = vld [vmem:[#allocation16_spill] sm:$0xff]  ;;  %v4760_v48 = vmul.f32 -1.442695, %v1559_v53  ;;  %v9333_v53 = vld [vmem:[#allocation19_spill] sm:$0xff] }
 0x246   :  { %v5779_v8 = vpop.eup %5778  ;;  %5798 = vrcp.f32 %v3423_v9  ;;  %v3461_v26 = vadd.f32 1.0, %v5777_v3  ;;  %v1476_v32 = vadd.f32 %v9329_v19, %v6844_v57  ;;  %v8410_v9 = vpop.f32.mrb[124].mxu1  ;;  %v1569_v19 = vadd.f32 %v9333_v53, %v6812_v51 }
 0x247   :  { %v5781_v31 = vpop.eup %5780  ;;  %4280 = vst [vmem:[%s9211_s3 + $0xb0] sm:$0xff] %v5779_v8  ;;  %5800 = vrcp.f32 %v3615_v59  ;;  %v8412_v3 = vpop.f32.mrb[124].mxu0  ;;  %v9330_v8 = vld [vmem:[#allocation17_spill] sm:$0xff] }
 0x248   :  { %v5783_v39 = vpop.eup %5782  ;;  %4436 = vst [vmem:[%s9211_s3 + $0x588] sm:$0xff] %v5781_v31  ;;  %5802 = vrcp.f32 %v3461_v26  ;;  %v1565_v26 = vadd.f32 %v9330_v8, %v6820_v52  ;;  %v8419_v33 = vpop.f32.mrb[125].mxu1  ;;  %v4952_v31 = vmul.f32 -1.442695, %v1474_v14  ;;  %v9334_v14 = vld [vmem:[#allocation20_spill] sm:$0xff] }
 0x249   :  { %v5785_v18 = vpop.eup %5784  ;;  %4281 = vst [vmem:[%s9211_s3 + $0xb8] sm:$0xff] %v5783_v39  ;;  %5804 = vpow2.f32 %v5029_v16  ;;  %v8421_v16 = vpop.f32.mrb[125].mxu0  ;;  %v9332_v39 = vld [vmem:[#allocation18_spill] sm:$0xff] }
 0x24a   :  { %v5787_v59 = vpop.eup %5786  ;;  %4474 = vst [vmem:[%s9211_s3 + $0x6b8] sm:$0xff] %v5785_v18  ;;  %5806 = vpow2.f32 %v4875_v11  ;;  %9331 = vst [vmem:[#allocation13_spill] sm:$0xff] %v8421_v16  ;;  %v1480_v38 = vadd.f32 %v9332_v39, %v6852_v58  ;;  %v4798_v11 = vmul.f32 -1.442695, %v1563_v1  ;;  %v8438_v39 = vpop.f32.mrb[126].mxu1 }
 0x24b   :  { %v5789_v61 = vpop.eup %5788  ;;  %4320 = vst [vmem:[%s9211_s3 + $0x1e8] sm:$0xff] %v5787_v59  ;;  %5808 = vpow2.f32 %v4913_v5  ;;  %v4953_v5 = vmul.f32 -1.442695, %v1476_v32  ;;  %v1482_v59 = vadd.f32 %v9334_v14, %v6852_v58  ;;  %v8440_v16 = vpop.f32.mrb[126].mxu0 }
 0x24c   :  { %v5791_v18 = vpop.eup %5790  ;;  %4475 = vst [vmem:[%s9211_s3 + $0x6c0] sm:$0xff] %v5789_v61  ;;  %5810 = vpow2.f32 %v4759_v20  ;;  %v4799_v20 = vmul.f32 -1.442695, %v1565_v26  ;;  %v8445_v1 = vpop.f32.mrb[127].mxu1  ;;  %v4991_v32 = vmul.f32 -1.442695, %v1480_v38 }
 0x24d   :  { %v5793_v8 = vpop.eup %5792  ;;  %4321 = vst [vmem:[%s9211_s3 + $0x1f0] sm:$0xff] %v5791_v18  ;;  %5812 = vpow2.f32 %v4914_v63  ;;  %9335 = vst [vmem:[#allocation29_spill] sm:$0xff] %v8445_v1  ;;  %v8447_v53 = vpop.f32.mrb[127].mxu0  ;;  %v4992_v26 = vmul.f32 -1.442695, %v1482_v59 }
 0x24e   :  { %v5795_v61 = vpop.eup %5794  ;;  %4513 = vst [vmem:[%s9211_s3 + $0x7f0] sm:$0xff] %v5793_v8  ;;  %5814 = vpow2.f32 %v4760_v48  ;;  %9336 = vst [vmem:[#allocation30_spill] sm:$0xff] %v8447_v53  ;;  %v4837_v8 = vmul.f32 -1.442695, %v1569_v19  ;;  %v8458_v14 = vpop.f32.mrb[128].mxu1 }
 0x24f   :  { %v5797_v63 = vpop.eup %5796  ;;  %4359 = vst [vmem:[%s9211_s3 + $0x320] sm:$0xff] %v5795_v61  ;;  %5816 = vpow2.f32 %v4952_v31  ;;  %9337 = vst [vmem:[#allocation31_spill] sm:$0xff] %v8458_v14  ;;  %v8460_v53 = vpop.f32.mrb[128].mxu0 }
 0x250   :  { %v5799_v18 = vpop.eup %5798  ;;  %4514 = vst [vmem:[%s9211_s3 + $0x7f8] sm:$0xff] %v5797_v63  ;;  %5818 = vpow2.f32 %v4798_v11  ;;  %9338 = vst [vmem:[#allocation32_spill] sm:$0xff] %v8460_v53  ;;  %v8465_v38 = vpop.f32.mrb[129].mxu1 }
 0x251   :  { %v5801_v48 = vpop.eup %5800  ;;  %4360 = vst [vmem:[%s9211_s3 + $0x328] sm:$0xff] %v5799_v18  ;;  %5820 = vpow2.f32 %v4953_v5  ;;  %9339 = vst [vmem:[#allocation14_spill] sm:$0xff] %v8465_v38  ;;  %v8467_v11 = vpop.f32.mrb[129].mxu0 }
 0x252   :  { %v5803_v31 = vpop.eup %5802  ;;  %4552 = vst [vmem:[%s9211_s3 + $0x928] sm:$0xff] %v5801_v48  ;;  %5822 = vpow2.f32 %v4799_v20  ;;  %9340 = vst [vmem:[#allocation15_spill] sm:$0xff] %v8467_v11  ;;  %v8472_v18 = vpop.f32.mrb[130].mxu1 }
 0x253   :  { %v5805_v19 = vpop.eup %5804  ;;  %4398 = vst [vmem:[%s9211_s3 + $0x458] sm:$0xff] %v5803_v31  ;;  %5824 = vpow2.f32 %v4991_v32  ;;  %9341 = vst [vmem:[#allocation16_spill] sm:$0xff] %v8472_v18 }
 0x254   :  { %v5807_v5 = vpop.eup %5806  ;;  %v3616_v59 = vadd.f32 1.0, %v5805_v19  ;;  %5826 = vpow2.f32 %v4837_v8 }
 0x255   :  { %v5809_v61 = vpop.eup %5808  ;;  %v3462_v63 = vadd.f32 1.0, %v5807_v5  ;;  %5828 = vpow2.f32 %v4992_v26  ;;  %v9342_v5 = vld [vmem:[#allocation21_spill] sm:$0xff] }
 0x256   :  { %v5811_v48 = vpop.eup %5810  ;;  %5830 = vrcp.f32 %v3616_v59  ;;  %v3500_v20 = vadd.f32 1.0, %v5809_v61  ;;  %v1571_v18 = vadd.f32 %v9342_v5, %v6812_v51  ;;  %v8486_v5 = vpop.f32.mrb[130].mxu0 }
 0x257   :  { %v5813_v38 = vpop.eup %5812  ;;  %5832 = vrcp.f32 %v3462_v63  ;;  %v3346_v11 = vadd.f32 1.0, %v5811_v48  ;;  %v1486_v63 = vadd.f32 %v8046_v41, %v6864_v6 }
 0x258   :  { %v5815_v53 = vpop.eup %5814  ;;  %5834 = vrcp.f32 %v3500_v20  ;;  %v3501_v14 = vadd.f32 1.0, %v5813_v38 }
 0x259   :  { %v5817_v1 = vpop.eup %5816  ;;  %5836 = vrcp.f32 %v3346_v11  ;;  %v3347_v32 = vadd.f32 1.0, %v5815_v53  ;;  %v1575_v53 = vadd.f32 %v8048_v54, %v6833_v55  ;;  %v1488_v11 = vadd.f32 %v8055_v28, %v6864_v6 }
 0x25a   :  { %v5819_v31 = vpop.eup %5818  ;;  %5838 = vrcp.f32 %v3501_v14  ;;  %v3539_v8 = vadd.f32 1.0, %v5817_v1  ;;  %v1581_v54 = vadd.f32 %v8074_v47, %v6836_v56  ;;  %v9343_v47 = vld [vmem:[#allocation22_spill] sm:$0xff] }
 0x25b   :  { %v5821_v19 = vpop.eup %5820  ;;  %5840 = vrcp.f32 %v3347_v32  ;;  %v3385_v26 = vadd.f32 1.0, %v5819_v31  ;;  %v4838_v31 = vmul.f32 -1.442695, %v1571_v18  ;;  %v4876_v28 = vmul.f32 -1.442695, %v1575_v53  ;;  %v9344_v53 = vld [vmem:[#allocation23_spill] sm:$0xff] }
 0x25c   :  { %v5823_v59 = vpop.eup %5822  ;;  %5842 = vrcp.f32 %v3539_v8  ;;  %v3540_v61 = vadd.f32 1.0, %v5821_v19  ;;  %v1577_v8 = vadd.f32 %v8057_v34, %v6833_v55  ;;  %v1670_v18 = vadd.f32 %v8076_v49, %v6804_v50 }
 0x25d   :  { %v5825_v48 = vpop.eup %5824  ;;  %5844 = vrcp.f32 %v3385_v26  ;;  %v3386_v38 = vadd.f32 1.0, %v5823_v59  ;;  %v5030_v26 = vmul.f32 -1.442695, %v1486_v63  ;;  %v1583_v63 = vadd.f32 %v9343_v47, %v6836_v56 }
 0x25e   :  { %v5827_v14 = vpop.eup %5826  ;;  %5846 = vrcp.f32 %v3540_v61  ;;  %v3578_v1 = vadd.f32 1.0, %v5825_v48  ;;  %v5031_v61 = vmul.f32 -1.442695, %v1488_v11  ;;  %v8498_v48 = vpop.f32.mrb[131].mxu1  ;;  %v4877_v49 = vmul.f32 -1.442695, %v1577_v8 }
 0x25f   :  { %v5829_v20 = vpop.eup %5828  ;;  %5848 = vrcp.f32 %v3386_v38  ;;  %v3424_v32 = vadd.f32 1.0, %v5827_v14  ;;  %v8500_v38 = vpop.f32.mrb[131].mxu0  ;;  %v4915_v11 = vmul.f32 -1.442695, %v1581_v54  ;;  %v9346_v8 = vld [vmem:[#allocation25_spill] sm:$0xff]  ;;  %v9347_v54 = vld [vmem:[#allocation26_spill] sm:$0xff] }
 0x260   :  { %v5831_v41 = vpop.eup %5830  ;;  %5850 = vrcp.f32 %v3578_v1  ;;  %v3579_v19 = vadd.f32 1.0, %v5829_v20  ;;  %v1672_v1 = vadd.f32 %v9344_v53, %v6804_v50  ;;  %v1589_v47 = vadd.f32 %v9347_v54, %v6844_v57  ;;  %v8524_v53 = vpop.f32.mrb[132].mxu1 }
 0x261   :  { %v5833_v59 = vpop.eup %5832  ;;  %4553 = vst [vmem:[%s9211_s3 + $0x930] sm:$0xff] %v5831_v41  ;;  %5852 = vrcp.f32 %v3424_v32  ;;  %v9345_v32 = vld [vmem:[#allocation24_spill] sm:$0xff] }
 0x262   :  { %v5835_v34 = vpop.eup %5834  ;;  %4399 = vst [vmem:[%s9211_s3 + $0x460] sm:$0xff] %v5833_v59  ;;  %5854 = vrcp.f32 %v3579_v19  ;;  %v1587_v41 = vadd.f32 %v9345_v32, %v6844_v57  ;;  %v1676_v59 = vadd.f32 %v9346_v8, %v6820_v52 }
 0x263   :  { %v5837_v14 = vpop.eup %5836  ;;  %4437 = vst [vmem:[%s9211_s3 + $0x590] sm:$0xff] %v5835_v34  ;;  %5856 = vpow2.f32 %v4838_v31  ;;  %v4761_v31 = vmul.f32 -1.442695, %v1670_v18  ;;  %v9348_v18 = vld [vmem:[#allocation2_spill] sm:$0xff] }
 0x264   :  { %v5839_v20 = vpop.eup %5838  ;;  %4282 = vst [vmem:[%s9211_s3 + $0xc0] sm:$0xff] %v5837_v14  ;;  %5858 = vpow2.f32 %v5030_v26  ;;  %v4916_v26 = vmul.f32 -1.442695, %v1583_v63  ;;  %v8522_v14 = vpop.f32.mrb[132].mxu0  ;;  %v1678_v32 = vadd.f32 %v9348_v18, %v6820_v52  ;;  %v4954_v8 = vmul.f32 -1.442695, %v1587_v41 }
 0x265   :  { %v5841_v19 = vpop.eup %5840  ;;  %4438 = vst [vmem:[%s9211_s3 + $0x598] sm:$0xff] %v5839_v20  ;;  %5860 = vpow2.f32 %v4876_v28  ;;  %v4762_v28 = vmul.f32 -1.442695, %v1672_v1 }
 0x266   :  { %v5843_v34 = vpop.eup %5842  ;;  %4283 = vst [vmem:[%s9211_s3 + $0xc8] sm:$0xff] %v5841_v19  ;;  %5862 = vpow2.f32 %v5031_v61  ;;  %v8531_v19 = vpop.f32.mrb[133].mxu0  ;;  %v4801_v41 = vmul.f32 -1.442695, %v1678_v32 }
 0x267   :  { %v5845_v20 = vpop.eup %5844  ;;  %4476 = vst [vmem:[%s9211_s3 + $0x6c8] sm:$0xff] %v5843_v34  ;;  %5864 = vpow2.f32 %v4877_v49  ;;  %v8533_v61 = vpop.f32.mrb[133].mxu1  ;;  %v4800_v49 = vmul.f32 -1.442695, %v1676_v59  ;;  %v4955_v34 = vmul.f32 -1.442695, %v1589_v47 }
 0x268   :  { %9349 = vst [vmem:[#allocation17_spill] sm:$0xff] %v8533_v61  ;;  %v5847_v63 = vpop.eup %5846  ;;  %4322 = vst [vmem:[%s9211_s3 + $0x1f8] sm:$0xff] %v5845_v20  ;;  %5866 = vpow2.f32 %v4915_v11  ;;  %v8544_v18 = vpop.f32.mrb[134].mxu0 }
 0x269   :  { %v5849_v54 = vpop.eup %5848  ;;  %4477 = vst [vmem:[%s9211_s3 + $0x6d0] sm:$0xff] %v5847_v63  ;;  %5868 = vpow2.f32 %v4761_v31  ;;  %9350 = vst [vmem:[#allocation18_spill] sm:$0xff] %v8544_v18  ;;  %v8546_v61 = vpop.f32.mrb[134].mxu1 }
 0x26a   :  { %v5851_v1 = vpop.eup %5850  ;;  %4323 = vst [vmem:[%s9211_s3 + $0x200] sm:$0xff] %v5849_v54  ;;  %5870 = vpow2.f32 %v4916_v26  ;;  %9351 = vst [vmem:[#allocation19_spill] sm:$0xff] %v8546_v61  ;;  %v8551_v31 = vpop.f32.mrb[135].mxu0 }
 0x26b   :  { %v5853_v11 = vpop.eup %5852  ;;  %4515 = vst [vmem:[%s9211_s3 + $0x800] sm:$0xff] %v5851_v1  ;;  %5872 = vpow2.f32 %v4762_v28  ;;  %9352 = vst [vmem:[#allocation20_spill] sm:$0xff] %v8551_v31  ;;  %v8553_v59 = vpop.f32.mrb[135].mxu1 }
 0x26c   :  { %9353 = vst [vmem:[#allocation21_spill] sm:$0xff] %v8553_v59  ;;  %v5855_v20 = vpop.eup %5854  ;;  %4361 = vst [vmem:[%s9211_s3 + $0x330] sm:$0xff] %v5853_v11  ;;  %5874 = vpow2.f32 %v4954_v8  ;;  %v8561_v28 = vpop.f32.mrb[136].mxu0 }
 0x26d   :  { %v5857_v26 = vpop.eup %5856  ;;  %4516 = vst [vmem:[%s9211_s3 + $0x808] sm:$0xff] %v5855_v20  ;;  %5876 = vpow2.f32 %v4800_v49  ;;  %9354 = vst [vmem:[#allocation22_spill] sm:$0xff] %v8561_v28  ;;  %v8563_v1 = vpop.f32.mrb[136].mxu1 }
 0x26e   :  { %v5859_v47 = vpop.eup %5858  ;;  %v3425_v63 = vadd.f32 1.0, %v5857_v26  ;;  %5878 = vpow2.f32 %v4955_v34  ;;  %9355 = vst [vmem:[#allocation23_spill] sm:$0xff] %v8563_v1 }
 0x26f   :  { %v5861_v32 = vpop.eup %5860  ;;  %v3617_v54 = vadd.f32 1.0, %v5859_v47  ;;  %5880 = vpow2.f32 %v4801_v41  ;;  %v9356_v47 = vld [vmem:[#allocation3_spill] sm:$0xff] }
 0x270   :  { %v5863_v59 = vpop.eup %5862  ;;  %5882 = vrcp.f32 %v3425_v63  ;;  %v3463_v11 = vadd.f32 1.0, %v5861_v32  ;;  %v1593_v1 = vadd.f32 %v9356_v47, %v6852_v58 }
 0x271   :  { %v5865_v8 = vpop.eup %5864  ;;  %5884 = vrcp.f32 %v3617_v54  ;;  %v3618_v31 = vadd.f32 1.0, %v5863_v59  ;;  %v1682_v59 = vadd.f32 %v8122_v45, %v6812_v51 }
 0x272   :  { %v5867_v61 = vpop.eup %5866  ;;  %5886 = vrcp.f32 %v3463_v11  ;;  %v3464_v20 = vadd.f32 1.0, %v5865_v8 }
 0x273   :  { %v5869_v49 = vpop.eup %5868  ;;  %5888 = vrcp.f32 %v3618_v31  ;;  %v3502_v26 = vadd.f32 1.0, %v5867_v61  ;;  %v1595_v61 = vadd.f32 %v8134_v21, %v6852_v58  ;;  %v1688_v21 = vadd.f32 %v8160_v29, %v6833_v55 }
 0x274   :  { %v5871_v34 = vpop.eup %5870  ;;  %5890 = vrcp.f32 %v3464_v20  ;;  %v3348_v28 = vadd.f32 1.0, %v5869_v49  ;;  %v1684_v20 = vadd.f32 %v8136_v24, %v6812_v51 }
 0x275   :  { %v5873_v18 = vpop.eup %5872  ;;  %5892 = vrcp.f32 %v3502_v26  ;;  %v3503_v41 = vadd.f32 1.0, %v5871_v34  ;;  %v4994_v24 = vmul.f32 -1.442695, %v1595_v61 }
 0x276   :  { %v5875_v63 = vpop.eup %5874  ;;  %5894 = vrcp.f32 %v3348_v28  ;;  %v3349_v32 = vadd.f32 1.0, %v5873_v18  ;;  %v4993_v28 = vmul.f32 -1.442695, %v1593_v1  ;;  %v1599_v18 = vadd.f32 %v8158_v40, %v6864_v6  ;;  %v8584_v40 = vpop.f32.mrb[137].mxu1 }
 0x277   :  { %v5877_v54 = vpop.eup %5876  ;;  %5896 = vrcp.f32 %v3503_v41  ;;  %v3541_v11 = vadd.f32 1.0, %v5875_v63  ;;  %v4839_v41 = vmul.f32 -1.442695, %v1682_v59  ;;  %v1601_v1 = vadd.f32 %v8167_v27, %v6864_v6  ;;  %v8582_v63 = vpop.f32.mrb[137].mxu0 }
 0x278   :  { %v5879_v31 = vpop.eup %5878  ;;  %5898 = vrcp.f32 %v3349_v32  ;;  %v3387_v8 = vadd.f32 1.0, %v5877_v54  ;;  %v4840_v29 = vmul.f32 -1.442695, %v1684_v20  ;;  %v1690_v59 = vadd.f32 %v8169_v42, %v6833_v55 }
 0x279   :  { %v5881_v49 = vpop.eup %5880  ;;  %5900 = vrcp.f32 %v3541_v11  ;;  %v3542_v26 = vadd.f32 1.0, %v5879_v31  ;;  %v5032_v27 = vmul.f32 -1.442695, %v1599_v18  ;;  %v1694_v11 = vadd.f32 %v8180_v12, %v6836_v56 }
 0x27a   :  { %v5883_v45 = vpop.eup %5882  ;;  %5902 = vrcp.f32 %v3387_v8  ;;  %v3388_v34 = vadd.f32 1.0, %v5881_v49  ;;  %v4878_v31 = vmul.f32 -1.442695, %v1688_v21  ;;  %v1783_v42 = vadd.f32 %v8182_v37, %v6804_v50  ;;  %v8606_v49 = vpop.f32.mrb[138].mxu0  ;;  %v9357_v21 = vld [vmem:[#allocation4_spill] sm:$0xff] }
 0x27b   :  { %v5885_v47 = vpop.eup %5884  ;;  %4362 = vst [vmem:[%s9211_s3 + $0x338] sm:$0xff] %v5883_v45  ;;  %5904 = vrcp.f32 %v3542_v26  ;;  %v5033_v20 = vmul.f32 -1.442695, %v1601_v1  ;;  %v1696_v12 = vadd.f32 %v8187_v60, %v6836_v56  ;;  %v8608_v26 = vpop.f32.mrb[138].mxu1  ;;  %v4879_v37 = vmul.f32 -1.442695, %v1690_v59 }
 0x27c   :  { %v5887_v32 = vpop.eup %5886  ;;  %4554 = vst [vmem:[%s9211_s3 + $0x938] sm:$0xff] %v5885_v47  ;;  %5906 = vrcp.f32 %v3388_v34  ;;  %v1785_v18 = vadd.f32 %v8189_v23, %v6804_v50  ;;  %v8615_v45 = vpop.f32.mrb[139].mxu0  ;;  %v4917_v60 = vmul.f32 -1.442695, %v1694_v11  ;;  %v1700_v47 = vadd.f32 %v9357_v21, %v6844_v57 }
 0x27d   :  { %v5889_v54 = vpop.eup %5888  ;;  %4400 = vst [vmem:[%s9211_s3 + $0x468] sm:$0xff] %v5887_v32  ;;  %5908 = vpow2.f32 %v4993_v28  ;;  %v8617_v34 = vpop.f32.mrb[139].mxu1  ;;  %v4763_v23 = vmul.f32 -1.442695, %v1783_v42  ;;  %v4918_v32 = vmul.f32 -1.442695, %v1696_v12 }
 0x27e   :  { %v5891_v61 = vpop.eup %5890  ;;  %4555 = vst [vmem:[%s9211_s3 + $0x940] sm:$0xff] %v5889_v54  ;;  %5910 = vpow2.f32 %v4839_v41  ;;  %v8632_v59 = vpop.f32.mrb[140].mxu0  ;;  %v4956_v42 = vmul.f32 -1.442695, %v1700_v47 }
 0x27f   :  { %v5893_v8 = vpop.eup %5892  ;;  %4401 = vst [vmem:[%s9211_s3 + $0x470] sm:$0xff] %v5891_v61  ;;  %5912 = vpow2.f32 %v4994_v24  ;;  %v8639_v61 = vpop.f32.mrb[141].mxu0 }
 0x280   :  { %v5895_v28 = vpop.eup %5894  ;;  %4439 = vst [vmem:[%s9211_s3 + $0x5a0] sm:$0xff] %v5893_v8  ;;  %5914 = vpow2.f32 %v4840_v29  ;;  %v8630_v29 = vpop.f32.mrb[140].mxu1 }
 0x281   :  { %v5897_v41 = vpop.eup %5896  ;;  %4284 = vst [vmem:[%s9211_s3 + $0xd0] sm:$0xff] %v5895_v28  ;;  %5916 = vpow2.f32 %v5032_v27  ;;  %v4764_v27 = vmul.f32 -1.442695, %v1785_v18  ;;  %v8637_v11 = vpop.f32.mrb[141].mxu1 }
 0x282   :  { %v5899_v24 = vpop.eup %5898  ;;  %4440 = vst [vmem:[%s9211_s3 + $0x5a8] sm:$0xff] %v5897_v41  ;;  %5918 = vpow2.f32 %v4878_v31  ;;  %v8650_v12 = vpop.f32.mrb[142].mxu1 }
 0x283   :  { %v5901_v1 = vpop.eup %5900  ;;  %4285 = vst [vmem:[%s9211_s3 + $0xd8] sm:$0xff] %v5899_v24  ;;  %5920 = vpow2.f32 %v5033_v20  ;;  %v8652_v28 = vpop.f32.mrb[142].mxu0 }
 0x284   :  { %v5903_v54 = vpop.eup %5902  ;;  %4478 = vst [vmem:[%s9211_s3 + $0x6d8] sm:$0xff] %v5901_v1  ;;  %5922 = vpow2.f32 %v4879_v37  ;;  %9358 = vst [vmem:[#allocation24_spill] sm:$0xff] %v8652_v28  ;;  %v8654_v41 = vpop.f32.mrb[143].mxu1 }
 0x285   :  { %v5905_v31 = vpop.eup %5904  ;;  %4324 = vst [vmem:[%s9211_s3 + $0x208] sm:$0xff] %v5903_v54  ;;  %5924 = vpow2.f32 %v4917_v60  ;;  %9359 = vst [vmem:[#allocation25_spill] sm:$0xff] %v8654_v41 }
 0x286   :  { %v5907_v8 = vpop.eup %5906  ;;  %4479 = vst [vmem:[%s9211_s3 + $0x6e0] sm:$0xff] %v5905_v31  ;;  %5926 = vpow2.f32 %v4763_v23 }
 0x287   :  { %v5909_v20 = vpop.eup %5908  ;;  %4325 = vst [vmem:[%s9211_s3 + $0x210] sm:$0xff] %v5907_v8  ;;  %5928 = vpow2.f32 %v4918_v32 }
 0x288   :  { %v5911_v37 = vpop.eup %5910  ;;  %v3580_v18 = vadd.f32 1.0, %v5909_v20  ;;  %5930 = vpow2.f32 %v4764_v27 }
 0x289   :  { %v5913_v60 = vpop.eup %5912  ;;  %v3426_v21 = vadd.f32 1.0, %v5911_v37  ;;  %5932 = vpow2.f32 %v4956_v42  ;;  %v1789_v42 = vadd.f32 %v8199_v10, %v6820_v52 }
 0x28a   :  { %v5915_v47 = vpop.eup %5914  ;;  %5934 = vrcp.f32 %v3580_v18  ;;  %v3581_v24 = vadd.f32 1.0, %v5913_v60  ;;  %v1702_v60 = vadd.f32 %v8218_v30, %v6844_v57 }
 0x28b   :  { %v5917_v23 = vpop.eup %5916  ;;  %5936 = vrcp.f32 %v3426_v21  ;;  %v3427_v1 = vadd.f32 1.0, %v5915_v47 }
 0x28c   :  { %v5919_v54 = vpop.eup %5918  ;;  %5938 = vrcp.f32 %v3581_v24  ;;  %v3619_v32 = vadd.f32 1.0, %v5917_v23  ;;  %v1791_v24 = vadd.f32 %v8220_v17, %v6820_v52  ;;  %v1708_v17 = vadd.f32 %v8251_v62, %v6852_v58 }
 0x28d   :  { %v5921_v31 = vpop.eup %5920  ;;  %5940 = vrcp.f32 %v3427_v1  ;;  %v3465_v8 = vadd.f32 1.0, %v5919_v54  ;;  %v1712_v62 = vadd.f32 %v8266_v0, %v6864_v6 }
 0x28e   :  { %v5923_v28 = vpop.eup %5922  ;;  %5942 = vrcp.f32 %v3619_v32  ;;  %v3620_v27 = vadd.f32 1.0, %v5921_v31  ;;  %v4802_v32 = vmul.f32 -1.442695, %v1789_v42  ;;  %v1795_v31 = vadd.f32 %v8244_v7, %v6812_v51 }
 0x28f   :  { %v5925_v20 = vpop.eup %5924  ;;  %5944 = vrcp.f32 %v3465_v8  ;;  %v3466_v41 = vadd.f32 1.0, %v5923_v28  ;;  %v1706_v28 = vadd.f32 %v8242_v36, %v6852_v58  ;;  %v4957_v8 = vmul.f32 -1.442695, %v1702_v60 }
 0x290   :  { %v5927_v37 = vpop.eup %5926  ;;  %5946 = vrcp.f32 %v3620_v27  ;;  %v3504_v18 = vadd.f32 1.0, %v5925_v20  ;;  %v8668_v27 = vpop.f32.mrb[143].mxu0  ;;  %v4803_v36 = vmul.f32 -1.442695, %v1791_v24  ;;  %v1797_v42 = vadd.f32 %v8253_v2, %v6812_v51  ;;  %v9360_v24 = vld [vmem:[#allocation5_spill] sm:$0xff] }
 0x291   :  { %v5929_v21 = vpop.eup %5928  ;;  %5948 = vrcp.f32 %v3466_v41  ;;  %v3350_v47 = vadd.f32 1.0, %v5927_v37  ;;  %v4995_v37 = vmul.f32 -1.442695, %v1706_v28  ;;  %v4841_v60 = vmul.f32 -1.442695, %v1795_v31 }
 0x292   :  { %v5931_v23 = vpop.eup %5930  ;;  %5950 = vrcp.f32 %v3504_v18  ;;  %v3505_v1 = vadd.f32 1.0, %v5929_v21  ;;  %v1801_v2 = vadd.f32 %v8268_v35, %v6833_v55  ;;  %v1714_v0 = vadd.f32 %v9360_v24, %v6864_v6 }
 0x293   :  { %v5933_v54 = vpop.eup %5932  ;;  %5952 = vrcp.f32 %v3350_v47  ;;  %v3351_v10 = vadd.f32 1.0, %v5931_v23  ;;  %v4996_v47 = vmul.f32 -1.442695, %v1708_v17  ;;  %v8690_v23 = vpop.f32.mrb[144].mxu1  ;;  %v4842_v35 = vmul.f32 -1.442695, %v1797_v42 }
 0x294   :  { %v5935_v30 = vpop.eup %5934  ;;  %5954 = vrcp.f32 %v3505_v1  ;;  %v3543_v41 = vadd.f32 1.0, %v5933_v54  ;;  %v8692_v1 = vpop.f32.mrb[144].mxu0  ;;  %v9361_v54 = vld [vmem:[#allocation6_spill] sm:$0xff]  ;;  %v9363_v42 = vld [vmem:[#allocation28_spill] sm:$0xff] }
 0x295   :  { %v5937_v20 = vpop.eup %5936  ;;  %4517 = vst [vmem:[%s9211_s3 + $0x810] sm:$0xff] %v5935_v30  ;;  %5956 = vrcp.f32 %v3351_v10  ;;  %v1803_v10 = vadd.f32 %v9361_v54, %v6833_v55  ;;  %v8701_v31 = vpop.f32.mrb[145].mxu0 }
 0x296   :  { %v5939_v7 = vpop.eup %5938  ;;  %4363 = vst [vmem:[%s9211_s3 + $0x340] sm:$0xff] %v5937_v20  ;;  %5958 = vrcp.f32 %v3543_v41  ;;  %v5034_v41 = vmul.f32 -1.442695, %v1712_v62 }
 0x297   :  { %v5941_v18 = vpop.eup %5940  ;;  %4518 = vst [vmem:[%s9211_s3 + $0x818] sm:$0xff] %v5939_v7  ;;  %5960 = vpow2.f32 %v4802_v32  ;;  %v8699_v32 = vpop.f32.mrb[145].mxu1  ;;  %v1896_v7 = vadd.f32 %v9363_v42, %v6804_v50 }
 0x298   :  { %v5943_v21 = vpop.eup %5942  ;;  %4364 = vst [vmem:[%s9211_s3 + $0x348] sm:$0xff] %v5941_v18  ;;  %5962 = vpow2.f32 %v4957_v8  ;;  %v9362_v8 = vld [vmem:[#allocation27_spill] sm:$0xff]  ;;  %v8716_v62 = vpop.f32.mrb[146].mxu1 }
 0x299   :  { %v5945_v28 = vpop.eup %5944  ;;  %4556 = vst [vmem:[%s9211_s3 + $0x948] sm:$0xff] %v5943_v21  ;;  %5964 = vpow2.f32 %v4803_v36  ;;  %v1807_v17 = vadd.f32 %v9362_v8, %v6836_v56  ;;  %v4880_v36 = vmul.f32 -1.442695, %v1801_v2  ;;  %v8718_v21 = vpop.f32.mrb[146].mxu0 }
 0x29a   :  { %v5947_v30 = vpop.eup %5946  ;;  %4402 = vst [vmem:[%s9211_s3 + $0x478] sm:$0xff] %v5945_v28  ;;  %5966 = vpow2.f32 %v4995_v37  ;;  %v5035_v37 = vmul.f32 -1.442695, %v1714_v0  ;;  %v8723_v2 = vpop.f32.mrb[147].mxu1 }
 0x29b   :  { %v5949_v20 = vpop.eup %5948  ;;  %4557 = vst [vmem:[%s9211_s3 + $0x950] sm:$0xff] %v5947_v30  ;;  %5968 = vpow2.f32 %v4841_v60  ;;  %v4881_v60 = vmul.f32 -1.442695, %v1803_v10  ;;  %v8725_v28 = vpop.f32.mrb[147].mxu0  ;;  %v4765_v30 = vmul.f32 -1.442695, %v1896_v7 }
 0x29c   :  { %v5951_v18 = vpop.eup %5950  ;;  %4403 = vst [vmem:[%s9211_s3 + $0x480] sm:$0xff] %v5949_v20  ;;  %5970 = vpow2.f32 %v4996_v47  ;;  %v4919_v47 = vmul.f32 -1.442695, %v1807_v17  ;;  %v8736_v10 = vpop.f32.mrb[148].mxu0 }
 0x29d   :  { %v5953_v24 = vpop.eup %5952  ;;  %4441 = vst [vmem:[%s9211_s3 + $0x5b0] sm:$0xff] %v5951_v18  ;;  %5972 = vpow2.f32 %v4842_v35  ;;  %9364 = vst [vmem:[#allocation26_spill] sm:$0xff] %v8736_v10  ;;  %v8738_v8 = vpop.f32.mrb[148].mxu1 }
 0x29e   :  { %v5955_v54 = vpop.eup %5954  ;;  %4286 = vst [vmem:[%s9211_s3 + $0xe0] sm:$0xff] %v5953_v24  ;;  %5974 = vpow2.f32 %v5034_v41  ;;  %9365 = vst [vmem:[#allocation2_spill] sm:$0xff] %v8738_v8  ;;  %v8743_v41 = vpop.f32.mrb[149].mxu0 }
 0x29f   :  { %v5957_v0 = vpop.eup %5956  ;;  %4442 = vst [vmem:[%s9211_s3 + $0x5b8] sm:$0xff] %v5955_v54  ;;  %5976 = vpow2.f32 %v4880_v36  ;;  %9366 = vst [vmem:[#allocation3_spill] sm:$0xff] %v8743_v41  ;;  %v8745_v17 = vpop.f32.mrb[149].mxu1 }
 0x2a0   :  { %v5959_v35 = vpop.eup %5958  ;;  %4287 = vst [vmem:[%s9211_s3 + $0xe8] sm:$0xff] %v5957_v0  ;;  %5978 = vpow2.f32 %v5035_v37  ;;  %9367 = vst [vmem:[#allocation4_spill] sm:$0xff] %v8745_v17 }
 0x2a1   :  { %v5961_v20 = vpop.eup %5960  ;;  %4480 = vst [vmem:[%s9211_s3 + $0x6e8] sm:$0xff] %v5959_v35  ;;  %5980 = vpow2.f32 %v4881_v60 }
 0x2a2   :  { %v5963_v36 = vpop.eup %5962  ;;  %v3389_v42 = vadd.f32 1.0, %v5961_v20  ;;  %5982 = vpow2.f32 %v4919_v47 }
 0x2a3   :  { %v5965_v7 = vpop.eup %5964  ;;  %v3544_v18 = vadd.f32 1.0, %v5963_v36  ;;  %5984 = vpow2.f32 %v4765_v30  ;;  %v9368_v30 = vld [vmem:[#allocation7_spill] sm:$0xff] }
 0x2a4   :  { %v5967_v37 = vpop.eup %5966  ;;  %5986 = vrcp.f32 %v3389_v42  ;;  %v3390_v24 = vadd.f32 1.0, %v5965_v7  ;;  %v1809_v36 = vadd.f32 %v9368_v30, %v6836_v56 }
 0x2a5   :  { %v5969_v54 = vpop.eup %5968  ;;  %5988 = vrcp.f32 %v3544_v18  ;;  %v3582_v0 = vadd.f32 1.0, %v5967_v37  ;;  %v1898_v18 = vadd.f32 %v8304_v46, %v6804_v50 }
 0x2a6   :  { %v5971_v8 = vpop.eup %5970  ;;  %5990 = vrcp.f32 %v3390_v24  ;;  %v3428_v35 = vadd.f32 1.0, %v5969_v54 }
 0x2a7   :  { %v5973_v60 = vpop.eup %5972  ;;  %5992 = vrcp.f32 %v3582_v0  ;;  %v3583_v41 = vadd.f32 1.0, %v5971_v8  ;;  %v1813_v8 = vadd.f32 %v8326_v13, %v6844_v57  ;;  %v1904_v13 = vadd.f32 %v8337_v22, %v6820_v52 }
 0x2a8   :  { %v5975_v10 = vpop.eup %5974  ;;  %5994 = vrcp.f32 %v3428_v35  ;;  %v3429_v17 = vadd.f32 1.0, %v5973_v60  ;;  %v1815_v60 = vadd.f32 %v8335_v44, %v6844_v57  ;;  %v1908_v22 = vadd.f32 %v8354_v4, %v6812_v51 }
 0x2a9   :  { %v5977_v20 = vpop.eup %5976  ;;  %5996 = vrcp.f32 %v3583_v41  ;;  %v3621_v47 = vadd.f32 1.0, %v5975_v10  ;;  %v1902_v10 = vadd.f32 %v8328_v15, %v6820_v52  ;;  %v4958_v15 = vmul.f32 -1.442695, %v1813_v8 }
 0x2aa   :  { %v5979_v42 = vpop.eup %5978  ;;  %5998 = vrcp.f32 %v3429_v17  ;;  %v3467_v7 = vadd.f32 1.0, %v5977_v20  ;;  %v4920_v17 = vmul.f32 -1.442695, %v1809_v36  ;;  %v1819_v36 = vadd.f32 %v8352_v25, %v6852_v58 }
 0x2ab   :  { %v5981_v37 = vpop.eup %5980  ;;  %6000 = vrcp.f32 %v3621_v47  ;;  %v3622_v24 = vadd.f32 1.0, %v5979_v42  ;;  %v4766_v47 = vmul.f32 -1.442695, %v1898_v18  ;;  %v4804_v44 = vmul.f32 -1.442695, %v1902_v10 }
 0x2ac   :  { %v5983_v54 = vpop.eup %5982  ;;  %6002 = vrcp.f32 %v3467_v7  ;;  %v3468_v0 = vadd.f32 1.0, %v5981_v37  ;;  %v4959_v18 = vmul.f32 -1.442695, %v1815_v60  ;;  %v1821_v25 = vadd.f32 %v8359_v43, %v6852_v58  ;;  %v8774_v37 = vpop.f32.mrb[150].mxu0 }
 0x2ad   :  { %v5985_v41 = vpop.eup %5984  ;;  %6004 = vrcp.f32 %v3622_v24  ;;  %v3506_v35 = vadd.f32 1.0, %v5983_v54  ;;  %v8776_v24 = vpop.f32.mrb[150].mxu1  ;;  %v4805_v4 = vmul.f32 -1.442695, %v1904_v13  ;;  %v9369_v54 = vld [vmem:[#allocation8_spill] sm:$0xff] }
 0x2ae   :  { %v5987_v46 = vpop.eup %5986  ;;  %6006 = vrcp.f32 %v3468_v0  ;;  %v3352_v20 = vadd.f32 1.0, %v5985_v41  ;;  %v1910_v0 = vadd.f32 %v9369_v54, %v6812_v51  ;;  %v8783_v10 = vpop.f32.mrb[151].mxu0  ;;  %v4997_v43 = vmul.f32 -1.442695, %v1819_v36  ;;  %v9372_v36 = vld [vmem:[#allocation11_spill] sm:$0xff] }
 0x2af   :  { %v5989_v30 = vpop.eup %5988  ;;  %4326 = vst [vmem:[%s9211_s3 + $0x218] sm:$0xff] %v5987_v46  ;;  %6008 = vrcp.f32 %v3506_v35  ;;  %v8785_v41 = vpop.f32.mrb[151].mxu1 }
 0x2b0   :  { %v5991_v42 = vpop.eup %5990  ;;  %4481 = vst [vmem:[%s9211_s3 + $0x6f0] sm:$0xff] %v5989_v30  ;;  %6010 = vrcp.f32 %v3352_v20  ;;  %v4843_v20 = vmul.f32 -1.442695, %v1908_v22 }
 0x2b1   :  { %v5993_v7 = vpop.eup %5992  ;;  %4327 = vst [vmem:[%s9211_s3 + $0x220] sm:$0xff] %v5991_v42  ;;  %6012 = vpow2.f32 %v4920_v17  ;;  %v9370_v17 = vld [vmem:[#allocation9_spill] sm:$0xff]  ;;  %v1827_v42 = vadd.f32 %v9372_v36, %v6864_v6 }
 0x2b2   :  { %v5995_v8 = vpop.eup %5994  ;;  %4519 = vst [vmem:[%s9211_s3 + $0x820] sm:$0xff] %v5993_v7  ;;  %6014 = vpow2.f32 %v4766_v47  ;;  %v1825_v60 = vadd.f32 %v9370_v17, %v6864_v6  ;;  %v9371_v47 = vld [vmem:[#allocation10_spill] sm:$0xff]  ;;  %v8802_v7 = vpop.f32.mrb[152].mxu0 }
 0x2b3   :  { %v5997_v35 = vpop.eup %5996  ;;  %4365 = vst [vmem:[%s9211_s3 + $0x350] sm:$0xff] %v5995_v8  ;;  %6016 = vpow2.f32 %v4958_v15  ;;  %v1914_v13 = vadd.f32 %v9371_v47, %v6833_v55  ;;  %v4998_v15 = vmul.f32 -1.442695, %v1821_v25  ;;  %v8804_v8 = vpop.f32.mrb[152].mxu1 }
 0x2b4   :  { %v5999_v46 = vpop.eup %5998  ;;  %4520 = vst [vmem:[%s9211_s3 + $0x828] sm:$0xff] %v5997_v35  ;;  %6018 = vpow2.f32 %v4804_v44  ;;  %v4844_v44 = vmul.f32 -1.442695, %v1910_v0  ;;  %v8809_v22 = vpop.f32.mrb[153].mxu0  ;;  %v5036_v25 = vmul.f32 -1.442695, %v1825_v60 }
 0x2b5   :  { %v6001_v30 = vpop.eup %6000  ;;  %4366 = vst [vmem:[%s9211_s3 + $0x358] sm:$0xff] %v5999_v46  ;;  %6020 = vpow2.f32 %v4959_v18  ;;  %v8811_v35 = vpop.f32.mrb[153].mxu1  ;;  %v4882_v46 = vmul.f32 -1.442695, %v1914_v13  ;;  %v5037_v0 = vmul.f32 -1.442695, %v1827_v42 }
 0x2b6   :  { %v6003_v54 = vpop.eup %6002  ;;  %4558 = vst [vmem:[%s9211_s3 + $0x958] sm:$0xff] %v6001_v30  ;;  %6022 = vpow2.f32 %v4805_v4  ;;  %v8822_v47 = vpop.f32.mrb[154].mxu0 }
 0x2b7   :  { %v6005_v18 = vpop.eup %6004  ;;  %4404 = vst [vmem:[%s9211_s3 + $0x488] sm:$0xff] %v6003_v54  ;;  %6024 = vpow2.f32 %v4997_v43  ;;  %9373 = vst [vmem:[#allocation5_spill] sm:$0xff] %v8822_v47  ;;  %v8824_v30 = vpop.f32.mrb[154].mxu1 }
 0x2b8   :  { %v6007_v17 = vpop.eup %6006  ;;  %4559 = vst [vmem:[%s9211_s3 + $0x960] sm:$0xff] %v6005_v18  ;;  %6026 = vpow2.f32 %v4843_v20  ;;  %9374 = vst [vmem:[#allocation6_spill] sm:$0xff] %v8824_v30  ;;  %v8829_v60 = vpop.f32.mrb[155].mxu0 }
 0x2b9   :  { %v6009_v4 = vpop.eup %6008  ;;  %4405 = vst [vmem:[%s9211_s3 + $0x490] sm:$0xff] %v6007_v17  ;;  %6028 = vpow2.f32 %v4998_v15  ;;  %9375 = vst [vmem:[#allocation27_spill] sm:$0xff] %v8829_v60  ;;  %v8831_v20 = vpop.f32.mrb[155].mxu1 }
 0x2ba   :  { %v6011_v43 = vpop.eup %6010  ;;  %4443 = vst [vmem:[%s9211_s3 + $0x5c0] sm:$0xff] %v6009_v4  ;;  %6030 = vpow2.f32 %v4844_v44  ;;  %9376 = vst [vmem:[#allocation28_spill] sm:$0xff] %v8831_v20 }
 0x2bb   :  { %v6013_v13 = vpop.eup %6012  ;;  %4288 = vst [vmem:[%s9211_s3 + $0xf0] sm:$0xff] %v6011_v43  ;;  %6032 = vpow2.f32 %v5036_v25 }
 0x2bc   :  { %v6015_v15 = vpop.eup %6014  ;;  %v3507_v36 = vadd.f32 1.0, %v6013_v13  ;;  %6034 = vpow2.f32 %v4882_v46 }
 0x2bd   :  { %v6017_v42 = vpop.eup %6016  ;;  %v3353_v54 = vadd.f32 1.0, %v6015_v15  ;;  %6036 = vpow2.f32 %v5037_v0  ;;  %v9377_v0 = vld [vmem:[#allocation12_spill] sm:$0xff] }
 0x2be   :  { %v6019_v18 = vpop.eup %6018  ;;  %6038 = vrcp.f32 %v3507_v36  ;;  %v3545_v17 = vadd.f32 1.0, %v6017_v42  ;;  %v1916_v15 = vadd.f32 %v9377_v0, %v6833_v55 }
 0x2bf   :  { %v6021_v44 = vpop.eup %6020  ;;  %6040 = vrcp.f32 %v3353_v54  ;;  %v3391_v4 = vadd.f32 1.0, %v6019_v18  ;;  %v1920_v54 = vadd.f32 %v8410_v9, %v6836_v56 }
 0x2c0   :  { %v6023_v60 = vpop.eup %6022  ;;  %6042 = vrcp.f32 %v3545_v17  ;;  %v3546_v20 = vadd.f32 1.0, %v6021_v44 }
 0x2c1   :  { %v6025_v30 = vpop.eup %6024  ;;  %6044 = vrcp.f32 %v3391_v4  ;;  %v3392_v47 = vadd.f32 1.0, %v6023_v60  ;;  %v2009_v60 = vadd.f32 %v8412_v3, %v6804_v50  ;;  %v4921_v0 = vmul.f32 -1.442695, %v1920_v54 }
 0x2c2   :  { %v6027_v43 = vpop.eup %6026  ;;  %6046 = vrcp.f32 %v3546_v20  ;;  %v3584_v25 = vadd.f32 1.0, %v6025_v30  ;;  %v1926_v3 = vadd.f32 %v8438_v39, %v6844_v57 }
 0x2c3   :  { %v6029_v13 = vpop.eup %6028  ;;  %6048 = vrcp.f32 %v3392_v47  ;;  %v3430_v46 = vadd.f32 1.0, %v6027_v43  ;;  %v1922_v47 = vadd.f32 %v8419_v33, %v6836_v56  ;;  %v4883_v43 = vmul.f32 -1.442695, %v1916_v15 }
 0x2c4   :  { %v6031_v36 = vpop.eup %6030  ;;  %6050 = vrcp.f32 %v3584_v25  ;;  %v3585_v42 = vadd.f32 1.0, %v6029_v13  ;;  %v9378_v25 = vld [vmem:[#allocation13_spill] sm:$0xff]  ;;  %v4767_v33 = vmul.f32 -1.442695, %v2009_v60  ;;  %v2015_v15 = vadd.f32 %v8440_v16, %v6820_v52 }
 0x2c5   :  { %v6033_v18 = vpop.eup %6032  ;;  %6052 = vrcp.f32 %v3430_v46  ;;  %v3431_v17 = vadd.f32 1.0, %v6031_v36  ;;  %v2011_v13 = vadd.f32 %v9378_v25, %v6804_v50  ;;  %v4922_v54 = vmul.f32 -1.442695, %v1922_v47 }
 0x2c6   :  { %v6035_v20 = vpop.eup %6034  ;;  %6054 = vrcp.f32 %v3585_v42  ;;  %v3623_v30 = vadd.f32 1.0, %v6033_v18  ;;  %v9379_v18 = vld [vmem:[#allocation29_spill] sm:$0xff]  ;;  %v4960_v47 = vmul.f32 -1.442695, %v1926_v3  ;;  %v9383_v3 = vld [vmem:[#allocation14_spill] sm:$0xff] }
 0x2c7   :  { %v6037_v44 = vpop.eup %6036  ;;  %6056 = vrcp.f32 %v3431_v17  ;;  %v3469_v4 = vadd.f32 1.0, %v6035_v20  ;;  %v1928_v39 = vadd.f32 %v9379_v18, %v6844_v57  ;;  %v4768_v60 = vmul.f32 -1.442695, %v2011_v13  ;;  %v9380_v20 = vld [vmem:[#allocation30_spill] sm:$0xff]  ;;  %v9382_v13 = vld [vmem:[#allocation32_spill] sm:$0xff] }
 0x2c8   :  { %v6039_v9 = vpop.eup %6038  ;;  %6058 = vrcp.f32 %v3623_v30  ;;  %v3624_v46 = vadd.f32 1.0, %v6037_v44  ;;  %v2017_v16 = vadd.f32 %v9380_v20, %v6820_v52  ;;  %v9381_v44 = vld [vmem:[#allocation31_spill] sm:$0xff] }
 0x2c9   :  { %v6041_v36 = vpop.eup %6040  ;;  %4444 = vst [vmem:[%s9211_s3 + $0x5c8] sm:$0xff] %v6039_v9  ;;  %6060 = vrcp.f32 %v3469_v4  ;;  %v1932_v4 = vadd.f32 %v9381_v44, %v6852_v58  ;;  %v2021_v9 = vadd.f32 %v9382_v13, %v6812_v51 }
 0x2ca   :  { %v6043_v42 = vpop.eup %6042  ;;  %4289 = vst [vmem:[%s9211_s3 + $0xf8] sm:$0xff] %v6041_v36  ;;  %6062 = vrcp.f32 %v3624_v46  ;;  %v1934_v36 = vadd.f32 %v9383_v3, %v6852_v58 }
 0x2cb   :  { %v6045_v17 = vpop.eup %6044  ;;  %4482 = vst [vmem:[%s9211_s3 + $0x6f8] sm:$0xff] %v6043_v42  ;;  %6064 = vpow2.f32 %v4883_v43  ;;  %v4806_v43 = vmul.f32 -1.442695, %v2015_v15  ;;  %v9384_v15 = vld [vmem:[#allocation15_spill] sm:$0xff]  ;;  %v4845_v20 = vmul.f32 -1.442695, %v2021_v9 }
 0x2cc   :  { %v6047_v30 = vpop.eup %6046  ;;  %4328 = vst [vmem:[%s9211_s3 + $0x228] sm:$0xff] %v6045_v17  ;;  %6066 = vpow2.f32 %v4921_v0  ;;  %v4961_v0 = vmul.f32 -1.442695, %v1928_v39  ;;  %v2023_v18 = vadd.f32 %v9384_v15, %v6812_v51 }
 0x2cd   :  { %v6049_v25 = vpop.eup %6048  ;;  %4483 = vst [vmem:[%s9211_s3 + $0x700] sm:$0xff] %v6047_v30  ;;  %6068 = vpow2.f32 %v4767_v33  ;;  %v4807_v33 = vmul.f32 -1.442695, %v2017_v16 }
 0x2ce   :  { %v6051_v46 = vpop.eup %6050  ;;  %4329 = vst [vmem:[%s9211_s3 + $0x230] sm:$0xff] %v6049_v25  ;;  %6070 = vpow2.f32 %v4922_v54  ;;  %v4999_v54 = vmul.f32 -1.442695, %v1932_v4 }
 0x2cf   :  { %v6053_v42 = vpop.eup %6052  ;;  %4521 = vst [vmem:[%s9211_s3 + $0x830] sm:$0xff] %v6051_v46  ;;  %6072 = vpow2.f32 %v4768_v60  ;;  %v5000_v60 = vmul.f32 -1.442695, %v1934_v36 }
 0x2d0   :  { %v6055_v17 = vpop.eup %6054  ;;  %4367 = vst [vmem:[%s9211_s3 + $0x360] sm:$0xff] %v6053_v42  ;;  %6074 = vpow2.f32 %v4960_v47  ;;  %v4846_v47 = vmul.f32 -1.442695, %v2023_v18 }
 0x2d1   :  { %v6057_v39 = vpop.eup %6056  ;;  %4522 = vst [vmem:[%s9211_s3 + $0x838] sm:$0xff] %v6055_v17  ;;  %6076 = vpow2.f32 %v4806_v43 }
 0x2d2   :  { %v6059_v30 = vpop.eup %6058  ;;  %4368 = vst [vmem:[%s9211_s3 + $0x368] sm:$0xff] %v6057_v39  ;;  %6078 = vpow2.f32 %v4961_v0 }
 0x2d3   :  { %v6061_v16 = vpop.eup %6060  ;;  %4560 = vst [vmem:[%s9211_s3 + $0x968] sm:$0xff] %v6059_v30  ;;  %6080 = vpow2.f32 %v4807_v33  ;;  %v9385_v30 = vld [vmem:[#allocation16_spill] sm:$0xff] }
 0x2d4   :  { %v6063_v44 = vpop.eup %6062  ;;  %4406 = vst [vmem:[%s9211_s3 + $0x498] sm:$0xff] %v6061_v16  ;;  %6082 = vpow2.f32 %v4999_v54 }
 0x2d5   :  { %v6065_v4 = vpop.eup %6064  ;;  %4561 = vst [vmem:[%s9211_s3 + $0x970] sm:$0xff] %v6063_v44  ;;  %6084 = vpow2.f32 %v4845_v20  ;;  %v2027_v44 = vadd.f32 %v8486_v5, %v6833_v55 }
 0x2d6   :  { %v6067_v25 = vpop.eup %6066  ;;  %v3470_v43 = vadd.f32 1.0, %v6065_v4  ;;  %6086 = vpow2.f32 %v5000_v60  ;;  %v1938_v60 = vadd.f32 %v9385_v30, %v6864_v6 }
 0x2d7   :  { %v6069_v13 = vpop.eup %6068  ;;  %v3508_v9 = vadd.f32 1.0, %v6067_v25  ;;  %6088 = vpow2.f32 %v4846_v47 }
 0x2d8   :  { %v6071_v46 = vpop.eup %6070  ;;  %6090 = vrcp.f32 %v3470_v43  ;;  %v3354_v0 = vadd.f32 1.0, %v6069_v13  ;;  %v1940_v43 = vadd.f32 %v8498_v48, %v6864_v6  ;;  %v2122_v48 = vadd.f32 %v8524_v53, %v6804_v50 }
 0x2d9   :  { %v6073_v3 = vpop.eup %6072  ;;  %6092 = vrcp.f32 %v3508_v9  ;;  %v3509_v36 = vadd.f32 1.0, %v6071_v46  ;;  %v2029_v46 = vadd.f32 %v8500_v38, %v6833_v55 }
 0x2da   :  { %v6075_v42 = vpop.eup %6074  ;;  %6094 = vrcp.f32 %v3354_v0  ;;  %v3355_v33 = vadd.f32 1.0, %v6073_v3  ;;  %v5039_v38 = vmul.f32 -1.442695, %v1940_v43 }
 0x2db   :  { %v6077_v15 = vpop.eup %6076  ;;  %6096 = vrcp.f32 %v3509_v36  ;;  %v3547_v18 = vadd.f32 1.0, %v6075_v42  ;;  %v5038_v36 = vmul.f32 -1.442695, %v1938_v60  ;;  %v2033_v42 = vadd.f32 %v8522_v14, %v6836_v56  ;;  %v9387_v60 = vld [vmem:[#allocation18_spill] sm:$0xff] }
 0x2dc   :  { %v6079_v17 = vpop.eup %6078  ;;  %6098 = vrcp.f32 %v3355_v33  ;;  %v3393_v54 = vadd.f32 1.0, %v6077_v15  ;;  %v4884_v15 = vmul.f32 -1.442695, %v2027_v44  ;;  %v4885_v14 = vmul.f32 -1.442695, %v2029_v46  ;;  %v9388_v44 = vld [vmem:[#allocation19_spill] sm:$0xff] }
 0x2dd   :  { %v6081_v39 = vpop.eup %6080  ;;  %6100 = vrcp.f32 %v3547_v18  ;;  %v3548_v20 = vadd.f32 1.0, %v6079_v17  ;;  %v2035_v17 = vadd.f32 %v8531_v19, %v6836_v56  ;;  %v4923_v30 = vmul.f32 -1.442695, %v2033_v42 }
 0x2de   :  { %v6083_v16 = vpop.eup %6082  ;;  %6102 = vrcp.f32 %v3393_v54  ;;  %v3394_v47 = vadd.f32 1.0, %v6081_v39  ;;  %v9386_v39 = vld [vmem:[#allocation17_spill] sm:$0xff]  ;;  %v2039_v19 = vadd.f32 %v9387_v60, %v6844_v57 }
 0x2df   :  { %v6085_v4 = vpop.eup %6084  ;;  %6104 = vrcp.f32 %v3548_v20  ;;  %v3586_v25 = vadd.f32 1.0, %v6083_v16  ;;  %v2124_v53 = vadd.f32 %v9386_v39, %v6804_v50  ;;  %v4924_v43 = vmul.f32 -1.442695, %v2035_v17 }
 0x2e0   :  { %v6087_v13 = vpop.eup %6086  ;;  %6106 = vrcp.f32 %v3394_v47  ;;  %v3432_v9 = vadd.f32 1.0, %v6085_v4  ;;  %v4769_v47 = vmul.f32 -1.442695, %v2122_v48  ;;  %v2128_v4 = vadd.f32 %v9388_v44, %v6820_v52 }
 0x2e1   :  { %v6089_v0 = vpop.eup %6088  ;;  %6108 = vrcp.f32 %v3586_v25  ;;  %v3587_v3 = vadd.f32 1.0, %v6087_v13  ;;  %v9389_v13 = vld [vmem:[#allocation20_spill] sm:$0xff] }
 0x2e2   :  { %v6091_v5 = vpop.eup %6090  ;;  %6110 = vrcp.f32 %v3432_v9  ;;  %v3433_v33 = vadd.f32 1.0, %v6089_v0  ;;  %v2041_v9 = vadd.f32 %v9389_v13, %v6844_v57  ;;  %v4770_v0 = vmul.f32 -1.442695, %v2124_v53 }
 0x2e3   :  { %v6093_v18 = vpop.eup %6092  ;;  %4407 = vst [vmem:[%s9211_s3 + $0x4a0] sm:$0xff] %v6091_v5  ;;  %6112 = vrcp.f32 %v3587_v3  ;;  %v9390_v3 = vld [vmem:[#allocation21_spill] sm:$0xff]  ;;  %v4962_v5 = vmul.f32 -1.442695, %v2039_v19 }
 0x2e4   :  { %v6095_v54 = vpop.eup %6094  ;;  %4445 = vst [vmem:[%s9211_s3 + $0x5d0] sm:$0xff] %v6093_v18  ;;  %6114 = vrcp.f32 %v3433_v33  ;;  %v9391_v33 = vld [vmem:[#allocation22_spill] sm:$0xff]  ;;  %v4808_v18 = vmul.f32 -1.442695, %v2128_v4  ;;  %v4963_v17 = vmul.f32 -1.442695, %v2041_v9 }
 0x2e5   :  { %v6097_v20 = vpop.eup %6096  ;;  %4290 = vst [vmem:[%s9211_s3 + $0x100] sm:$0xff] %v6095_v54  ;;  %6116 = vpow2.f32 %v5038_v36  ;;  %v2130_v36 = vadd.f32 %v9390_v3, %v6820_v52 }
 0x2e6   :  { %v6099_v16 = vpop.eup %6098  ;;  %4446 = vst [vmem:[%s9211_s3 + $0x5d8] sm:$0xff] %v6097_v20  ;;  %6118 = vpow2.f32 %v4884_v15  ;;  %v2045_v15 = vadd.f32 %v9391_v33, %v6852_v58  ;;  %v9392_v33 = vld [vmem:[#allocation23_spill] sm:$0xff] }
 0x2e7   :  { %v6101_v25 = vpop.eup %6100  ;;  %4291 = vst [vmem:[%s9211_s3 + $0x108] sm:$0xff] %v6099_v16  ;;  %6120 = vpow2.f32 %v5039_v38 }
 0x2e8   :  { %v6103_v46 = vpop.eup %6102  ;;  %4484 = vst [vmem:[%s9211_s3 + $0x708] sm:$0xff] %v6101_v25  ;;  %6122 = vpow2.f32 %v4885_v14  ;;  %v4809_v14 = vmul.f32 -1.442695, %v2130_v36  ;;  %v5001_v53 = vmul.f32 -1.442695, %v2045_v15  ;;  %v2134_v15 = vadd.f32 %v9392_v33, %v6812_v51 }
 0x2e9   :  { %v6105_v42 = vpop.eup %6104  ;;  %4330 = vst [vmem:[%s9211_s3 + $0x238] sm:$0xff] %v6103_v46  ;;  %6124 = vpow2.f32 %v4923_v30 }
 0x2ea   :  { %v6107_v48 = vpop.eup %6106  ;;  %4485 = vst [vmem:[%s9211_s3 + $0x710] sm:$0xff] %v6105_v42  ;;  %6126 = vpow2.f32 %v4769_v47 }
 0x2eb   :  { %v6109_v38 = vpop.eup %6108  ;;  %4331 = vst [vmem:[%s9211_s3 + $0x240] sm:$0xff] %v6107_v48  ;;  %6128 = vpow2.f32 %v4924_v43 }
 0x2ec   :  { %v6111_v54 = vpop.eup %6110  ;;  %4523 = vst [vmem:[%s9211_s3 + $0x840] sm:$0xff] %v6109_v38  ;;  %6130 = vpow2.f32 %v4770_v0  ;;  %v2047_v38 = vadd.f32 %v8582_v63, %v6852_v58 }
 0x2ed   :  { %v6113_v39 = vpop.eup %6112  ;;  %4369 = vst [vmem:[%s9211_s3 + $0x370] sm:$0xff] %v6111_v54  ;;  %6132 = vpow2.f32 %v4962_v5 }
 0x2ee   :  { %v6115_v20 = vpop.eup %6114  ;;  %4524 = vst [vmem:[%s9211_s3 + $0x848] sm:$0xff] %v6113_v39  ;;  %6134 = vpow2.f32 %v4808_v18 }
 0x2ef   :  { %v6117_v30 = vpop.eup %6116  ;;  %4370 = vst [vmem:[%s9211_s3 + $0x378] sm:$0xff] %v6115_v20  ;;  %6136 = vpow2.f32 %v4963_v17  ;;  %v2051_v20 = vadd.f32 %v8606_v49, %v6864_v6 }
 0x2f0   :  { %v6119_v60 = vpop.eup %6118  ;;  %v3625_v19 = vadd.f32 1.0, %v6117_v30  ;;  %6138 = vpow2.f32 %v4809_v14  ;;  %v2136_v14 = vadd.f32 %v8584_v40, %v6812_v51  ;;  %v2053_v40 = vadd.f32 %v8615_v45, %v6864_v6 }
 0x2f1   :  { %v6121_v16 = vpop.eup %6120  ;;  %v3471_v47 = vadd.f32 1.0, %v6119_v60  ;;  %6140 = vpow2.f32 %v5001_v53  ;;  %v2146_v45 = vadd.f32 %v8630_v29, %v6836_v56  ;;  %v2148_v29 = vadd.f32 %v8637_v11, %v6836_v56 }
 0x2f2   :  { %v6123_v44 = vpop.eup %6122  ;;  %6142 = vrcp.f32 %v3625_v19  ;;  %v3626_v4 = vadd.f32 1.0, %v6121_v16  ;;  %v4847_v19 = vmul.f32 -1.442695, %v2134_v15  ;;  %v2140_v16 = vadd.f32 %v8608_v26, %v6833_v55 }
 0x2f3   :  { %v6125_v25 = vpop.eup %6124  ;;  %6144 = vrcp.f32 %v3471_v47  ;;  %v3472_v43 = vadd.f32 1.0, %v6123_v44  ;;  %v5002_v44 = vmul.f32 -1.442695, %v2047_v38  ;;  %v4848_v49 = vmul.f32 -1.442695, %v2136_v14 }
 0x2f4   :  { %v6127_v13 = vpop.eup %6126  ;;  %6146 = vrcp.f32 %v3626_v4  ;;  %v3510_v9 = vadd.f32 1.0, %v6125_v25  ;;  %v2142_v25 = vadd.f32 %v8617_v34, %v6833_v55  ;;  %v5040_v26 = vmul.f32 -1.442695, %v2051_v20 }
 0x2f5   :  { %v6129_v46 = vpop.eup %6128  ;;  %6148 = vrcp.f32 %v3472_v43  ;;  %v3356_v0 = vadd.f32 1.0, %v6127_v13  ;;  %v2235_v34 = vadd.f32 %v8632_v59, %v6804_v50  ;;  %v2237_v59 = vadd.f32 %v8639_v61, %v6804_v50 }
 0x2f6   :  { %v6131_v3 = vpop.eup %6130  ;;  %6150 = vrcp.f32 %v3510_v9  ;;  %v3511_v36 = vadd.f32 1.0, %v6129_v46  ;;  %v4886_v9 = vmul.f32 -1.442695, %v2140_v16  ;;  %v2152_v11 = vadd.f32 %v8650_v12, %v6844_v57 }
 0x2f7   :  { %v6133_v42 = vpop.eup %6132  ;;  %6152 = vrcp.f32 %v3356_v0  ;;  %v3357_v5 = vadd.f32 1.0, %v6131_v3  ;;  %v5041_v0 = vmul.f32 -1.442695, %v2053_v40  ;;  %v4771_v15 = vmul.f32 -1.442695, %v2235_v34 }
 0x2f8   :  { %v6135_v48 = vpop.eup %6134  ;;  %6154 = vrcp.f32 %v3511_v36  ;;  %v3549_v18 = vadd.f32 1.0, %v6133_v42  ;;  %v4887_v36 = vmul.f32 -1.442695, %v2142_v25  ;;  %v4926_v38 = vmul.f32 -1.442695, %v2148_v29 }
 0x2f9   :  { %v6137_v17 = vpop.eup %6136  ;;  %6156 = vrcp.f32 %v3357_v5  ;;  %v3395_v54 = vadd.f32 1.0, %v6135_v48  ;;  %v4925_v5 = vmul.f32 -1.442695, %v2146_v45  ;;  %v9393_v48 = vld [vmem:[#allocation24_spill] sm:$0xff]  ;;  %v4772_v12 = vmul.f32 -1.442695, %v2237_v59 }
 0x2fa   :  { %v6139_v39 = vpop.eup %6138  ;;  %6158 = vrcp.f32 %v3549_v18  ;;  %v3550_v53 = vadd.f32 1.0, %v6137_v17  ;;  %v2241_v61 = vadd.f32 %v9393_v48, %v6820_v52  ;;  %v4964_v14 = vmul.f32 -1.442695, %v2152_v11 }
 0x2fb   :  { %v6141_v30 = vpop.eup %6140  ;;  %6160 = vrcp.f32 %v3395_v54  ;;  %v3396_v60 = vadd.f32 1.0, %v6139_v39 }
 0x2fc   :  { %v6143_v63 = vpop.eup %6142  ;;  %6162 = vrcp.f32 %v3550_v53  ;;  %v3588_v47 = vadd.f32 1.0, %v6141_v30  ;;  %v4810_v53 = vmul.f32 -1.442695, %v2241_v61 }
 0x2fd   :  { %v6145_v4 = vpop.eup %6144  ;;  %4562 = vst [vmem:[%s9211_s3 + $0x978] sm:$0xff] %v6143_v63  ;;  %6164 = vrcp.f32 %v3396_v60 }
 0x2fe   :  { %v6147_v43 = vpop.eup %6146  ;;  %4408 = vst [vmem:[%s9211_s3 + $0x4a8] sm:$0xff] %v6145_v4  ;;  %6166 = vrcp.f32 %v3588_v47 }
 0x2ff   :  { %v6149_v13 = vpop.eup %6148  ;;  %4563 = vst [vmem:[%s9211_s3 + $0x980] sm:$0xff] %v6147_v43  ;;  %6168 = vpow2.f32 %v4847_v19 }
 0x300   :  { %v6151_v46 = vpop.eup %6150  ;;  %4409 = vst [vmem:[%s9211_s3 + $0x4b0] sm:$0xff] %v6149_v13  ;;  %6170 = vpow2.f32 %v5002_v44 }
 0x301   :  { %v6153_v3 = vpop.eup %6152  ;;  %4447 = vst [vmem:[%s9211_s3 + $0x5e0] sm:$0xff] %v6151_v46  ;;  %6172 = vpow2.f32 %v4848_v49  ;;  %v9394_v46 = vld [vmem:[#allocation25_spill] sm:$0xff] }
 0x302   :  { %v6155_v42 = vpop.eup %6154  ;;  %4292 = vst [vmem:[%s9211_s3 + $0x110] sm:$0xff] %v6153_v3  ;;  %6174 = vpow2.f32 %v5040_v26 }
 0x303   :  { %v6157_v33 = vpop.eup %6156  ;;  %4448 = vst [vmem:[%s9211_s3 + $0x5e8] sm:$0xff] %v6155_v42  ;;  %6176 = vpow2.f32 %v4886_v9 }
 0x304   :  { %v6159_v18 = vpop.eup %6158  ;;  %4293 = vst [vmem:[%s9211_s3 + $0x118] sm:$0xff] %v6157_v33  ;;  %6178 = vpow2.f32 %v5041_v0  ;;  %v2154_v0 = vadd.f32 %v9394_v46, %v6844_v57 }
 0x305   :  { %v6161_v17 = vpop.eup %6160  ;;  %4486 = vst [vmem:[%s9211_s3 + $0x718] sm:$0xff] %v6159_v18  ;;  %6180 = vpow2.f32 %v4887_v36  ;;  %v2243_v36 = vadd.f32 %v8668_v27, %v6820_v52 }
 0x306   :  { %v6163_v54 = vpop.eup %6162  ;;  %4332 = vst [vmem:[%s9211_s3 + $0x248] sm:$0xff] %v6161_v17  ;;  %6182 = vpow2.f32 %v4925_v5  ;;  %v2158_v5 = vadd.f32 %v8690_v23, %v6852_v58  ;;  %v4965_v18 = vmul.f32 -1.442695, %v2154_v0  ;;  %v2249_v23 = vadd.f32 %v8701_v31, %v6812_v51 }
 0x307   :  { %v6165_v39 = vpop.eup %6164  ;;  %4487 = vst [vmem:[%s9211_s3 + $0x720] sm:$0xff] %v6163_v54  ;;  %6184 = vpow2.f32 %v4771_v15  ;;  %v2247_v15 = vadd.f32 %v8692_v1, %v6812_v51  ;;  %v2253_v31 = vadd.f32 %v8718_v21, %v6833_v55  ;;  %v2255_v21 = vadd.f32 %v8725_v28, %v6833_v55 }
 0x308   :  { %v6167_v20 = vpop.eup %6166  ;;  %4333 = vst [vmem:[%s9211_s3 + $0x250] sm:$0xff] %v6165_v39  ;;  %6186 = vpow2.f32 %v4926_v38  ;;  %v2160_v38 = vadd.f32 %v8699_v32, %v6852_v58  ;;  %v5003_v1 = vmul.f32 -1.442695, %v2158_v5 }
 0x309   :  { %v6169_v30 = vpop.eup %6168  ;;  %4525 = vst [vmem:[%s9211_s3 + $0x850] sm:$0xff] %v6167_v20  ;;  %6188 = vpow2.f32 %v4772_v12  ;;  %v4811_v12 = vmul.f32 -1.442695, %v2243_v36  ;;  %v4849_v32 = vmul.f32 -1.442695, %v2247_v15 }
 0x30a   :  { %v6171_v60 = vpop.eup %6170  ;;  %v3434_v19 = vadd.f32 1.0, %v6169_v30  ;;  %6190 = vpow2.f32 %v4964_v14  ;;  %v2164_v14 = vadd.f32 %v8716_v62, %v6864_v6  ;;  %v5004_v20 = vmul.f32 -1.442695, %v2160_v38 }
 0x30b   :  { %v6173_v16 = vpop.eup %6172  ;;  %v3589_v63 = vadd.f32 1.0, %v6171_v60  ;;  %6192 = vpow2.f32 %v4810_v53  ;;  %v2166_v62 = vadd.f32 %v8723_v2, %v6864_v6  ;;  %v4850_v60 = vmul.f32 -1.442695, %v2249_v23 }
 0x30c   :  { %v6175_v47 = vpop.eup %6174  ;;  %6194 = vrcp.f32 %v3434_v19  ;;  %v3435_v44 = vadd.f32 1.0, %v6173_v16  ;;  %v5042_v16 = vmul.f32 -1.442695, %v2164_v14 }
 0x30d   :  { %v6177_v40 = vpop.eup %6176  ;;  %6196 = vrcp.f32 %v3589_v63  ;;  %v3627_v4 = vadd.f32 1.0, %v6175_v47  ;;  %v9395_v63 = vld [vmem:[#allocation26_spill] sm:$0xff] }
 0x30e   :  { %v6179_v49 = vpop.eup %6178  ;;  %6198 = vrcp.f32 %v3435_v44  ;;  %v3473_v25 = vadd.f32 1.0, %v6177_v40  ;;  %v2259_v2 = vadd.f32 %v9395_v63, %v6836_v56  ;;  %v4888_v44 = vmul.f32 -1.442695, %v2253_v31  ;;  %v9396_v40 = vld [vmem:[#allocation2_spill] sm:$0xff] }
 0x30f   :  { %v6181_v43 = vpop.eup %6180  ;;  %6200 = vrcp.f32 %v3627_v4  ;;  %v3628_v26 = vadd.f32 1.0, %v6179_v49  ;;  %v2353_v28 = vadd.f32 %v9396_v40, %v6820_v52  ;;  %v5043_v49 = vmul.f32 -1.442695, %v2166_v62 }
 0x310   :  { %v6183_v45 = vpop.eup %6182  ;;  %6202 = vrcp.f32 %v3473_v25  ;;  %v3474_v13 = vadd.f32 1.0, %v6181_v43  ;;  %v9397_v25 = vld [vmem:[#allocation3_spill] sm:$0xff]  ;;  %v4927_v52 = vmul.f32 -1.442695, %v2259_v2  ;;  %v2265_v31 = vadd.f32 %v8774_v37, %v6844_v57 }
 0x311   :  { %v6185_v9 = vpop.eup %6184  ;;  %6204 = vrcp.f32 %v3628_v26  ;;  %v3512_v34 = vadd.f32 1.0, %v6183_v45  ;;  %v2261_v43 = vadd.f32 %v9397_v25, %v6836_v56  ;;  %v4889_v45 = vmul.f32 -1.442695, %v2255_v21 }
 0x312   :  { %v6187_v29 = vpop.eup %6186  ;;  %6206 = vrcp.f32 %v3474_v13  ;;  %v3358_v3 = vadd.f32 1.0, %v6185_v9  ;;  %v2363_v62 = vadd.f32 %v8776_v24, %v6833_v55  ;;  %v2267_v21 = vadd.f32 %v8783_v10, %v6844_v57 }
 0x313   :  { %v6189_v59 = vpop.eup %6188  ;;  %6208 = vrcp.f32 %v3512_v34  ;;  %v3513_v42 = vadd.f32 1.0, %v6187_v29  ;;  %v4812_v34 = vmul.f32 -1.442695, %v2353_v28  ;;  %v4928_v0 = vmul.f32 -1.442695, %v2261_v43 }
 0x314   :  { %v6191_v11 = vpop.eup %6190  ;;  %6210 = vrcp.f32 %v3358_v3  ;;  %v3359_v33 = vadd.f32 1.0, %v6189_v59  ;;  %v2358_v63 = vadd.f32 %v8785_v41, %v6812_v51  ;;  %v2271_v55 = vadd.f32 %v8802_v7, %v6852_v58 }
 0x315   :  { %v6193_v48 = vpop.eup %6192  ;;  %6212 = vrcp.f32 %v3513_v42  ;;  %v3551_v61 = vadd.f32 1.0, %v6191_v11  ;;  %v4890_v10 = vmul.f32 -1.442695, %v2363_v62  ;;  %v4967_v51 = vmul.f32 -1.442695, %v2267_v21 }
 0x316   :  { %v6195_v27 = vpop.eup %6194  ;;  %6214 = vrcp.f32 %v3359_v33  ;;  %v3397_v17 = vadd.f32 1.0, %v6193_v48  ;;  %v2273_v41 = vadd.f32 %v8809_v22, %v6852_v58  ;;  %v4851_v28 = vmul.f32 -1.442695, %v2358_v63 }
 0x317   :  { %v6197_v54 = vpop.eup %6196  ;;  %4371 = vst [vmem:[%s9211_s3 + $0x380] sm:$0xff] %v6195_v27  ;;  %6216 = vrcp.f32 %v3551_v61 }
 0x318   :  { %v6199_v39 = vpop.eup %6198  ;;  %4526 = vst [vmem:[%s9211_s3 + $0x858] sm:$0xff] %v6197_v54  ;;  %6218 = vrcp.f32 %v3397_v17 }
 0x319   :  { %v6201_v53 = vpop.eup %6200  ;;  %4372 = vst [vmem:[%s9211_s3 + $0x388] sm:$0xff] %v6199_v39  ;;  %6220 = vpow2.f32 %v4965_v18 }
 0x31a   :  { %v6203_v30 = vpop.eup %6202  ;;  %4564 = vst [vmem:[%s9211_s3 + $0x988] sm:$0xff] %v6201_v53  ;;  %6222 = vpow2.f32 %v4811_v12 }
 0x31b   :  { %v6205_v19 = vpop.eup %6204  ;;  %4410 = vst [vmem:[%s9211_s3 + $0x4b8] sm:$0xff] %v6203_v30  ;;  %6224 = vpow2.f32 %v5003_v1  ;;  %v9398_v1 = vld [vmem:[#allocation4_spill] sm:$0xff] }
 0x31c   :  { %v6207_v47 = vpop.eup %6206  ;;  %4565 = vst [vmem:[%s9211_s3 + $0x990] sm:$0xff] %v6205_v19  ;;  %6226 = vpow2.f32 %v4849_v32  ;;  %v2348_v14 = vadd.f32 %v9398_v1, %v6804_v50 }
 0x31d   :  { %v6209_v4 = vpop.eup %6208  ;;  %4411 = vst [vmem:[%s9211_s3 + $0x4c0] sm:$0xff] %v6207_v47  ;;  %6228 = vpow2.f32 %v5004_v20  ;;  %v4966_v47 = vmul.f32 -1.442695, %v2265_v31 }
 0x31e   :  { %v6211_v26 = vpop.eup %6210  ;;  %4449 = vst [vmem:[%s9211_s3 + $0x5f0] sm:$0xff] %v6209_v4  ;;  %6230 = vpow2.f32 %v4850_v60  ;;  %v5005_v4 = vmul.f32 -1.442695, %v2271_v55 }
 0x31f   :  { %v6213_v13 = vpop.eup %6212  ;;  %4294 = vst [vmem:[%s9211_s3 + $0x120] sm:$0xff] %v6211_v26  ;;  %6232 = vpow2.f32 %v5042_v16  ;;  %v4773_v16 = vmul.f32 -1.442695, %v2348_v14  ;;  %v9400_v26 = vld [vmem:[#allocation6_spill] sm:$0xff] }
 0x320   :  { %v6215_v9 = vpop.eup %6214  ;;  %4450 = vst [vmem:[%s9211_s3 + $0x5f8] sm:$0xff] %v6213_v13  ;;  %6234 = vpow2.f32 %v4888_v44  ;;  %v2373_v44 = vadd.f32 %v8804_v8, %v6844_v57  ;;  %v2368_v57 = vadd.f32 %v8811_v35, %v6836_v56  ;;  %v2383_v56 = vadd.f32 %v9400_v26, %v6864_v6  ;;  %v9401_v13 = vld [vmem:[#allocation27_spill] sm:$0xff] }
 0x321   :  { %v6217_v46 = vpop.eup %6216  ;;  %4295 = vst [vmem:[%s9211_s3 + $0x128] sm:$0xff] %v6215_v9  ;;  %6236 = vpow2.f32 %v5043_v49  ;;  %v9399_v49 = vld [vmem:[#allocation5_spill] sm:$0xff] }
 0x322   :  { %v6219_v29 = vpop.eup %6218  ;;  %4488 = vst [vmem:[%s9211_s3 + $0x728] sm:$0xff] %v6217_v46  ;;  %6238 = vpow2.f32 %v4889_v45  ;;  %v2277_v22 = vadd.f32 %v9399_v49, %v6864_v6  ;;  %v4968_v43 = vmul.f32 -1.442695, %v2373_v44  ;;  %v5006_v45 = vmul.f32 -1.442695, %v2273_v41  ;;  %v9402_v46 = vld [vmem:[#allocation28_spill] sm:$0xff] }
 0x323   :  { %v6221_v3 = vpop.eup %6220  ;;  %4334 = vst [vmem:[%s9211_s3 + $0x258] sm:$0xff] %v6219_v29  ;;  %6240 = vpow2.f32 %v4927_v52  ;;  %v2279_v52 = vadd.f32 %v9401_v13, %v6864_v6  ;;  %v5046_v6 = vmul.f32 -1.442695, %v2383_v56 }
 0x324   :  { %v6223_v36 = vpop.eup %6222  ;;  %v3552_v59 = vadd.f32 1.0, %v6221_v3  ;;  %6242 = vpow2.f32 %v4812_v34  ;;  %v4929_v34 = vmul.f32 -1.442695, %v2368_v57  ;;  %v5044_v3 = vmul.f32 -1.442695, %v2277_v22 }
 0x325   :  { %v6225_v42 = vpop.eup %6224  ;;  %v3398_v5 = vadd.f32 1.0, %v6223_v36  ;;  %6244 = vpow2.f32 %v4928_v0  ;;  %v2378_v0 = vadd.f32 %v9402_v46, %v6852_v58  ;;  %v5045_v58 = vmul.f32 -1.442695, %v2279_v52 }
 0x326   :  { %v6227_v11 = vpop.eup %6226  ;;  %6246 = vrcp.f32 %v3552_v59  ;;  %v3590_v33 = vadd.f32 1.0, %v6225_v42 }
 0x327   :  { %v6229_v15 = vpop.eup %6228  ;;  %6248 = vrcp.f32 %v3398_v5  ;;  %v3436_v48 = vadd.f32 1.0, %v6227_v11  ;;  %v5007_v5 = vmul.f32 -1.442695, %v2378_v0 }
 0x328   :  { %v6231_v61 = vpop.eup %6230  ;;  %6250 = vrcp.f32 %v3590_v33  ;;  %v3591_v18 = vadd.f32 1.0, %v6229_v15 }
 0x329   :  { %v6233_v38 = vpop.eup %6232  ;;  %6252 = vrcp.f32 %v3436_v48  ;;  %v3437_v27 = vadd.f32 1.0, %v6231_v61 }
 0x32a   :  { %v6235_v17 = vpop.eup %6234  ;;  %6254 = vrcp.f32 %v3591_v18  ;;  %v3629_v12 = vadd.f32 1.0, %v6233_v38 }
 0x32b   :  { %v6237_v23 = vpop.eup %6236  ;;  %6256 = vrcp.f32 %v3437_v27  ;;  %v3475_v54 = vadd.f32 1.0, %v6235_v17 }
 0x32c   :  { %v6239_v39 = vpop.eup %6238  ;;  %6258 = vrcp.f32 %v3629_v12  ;;  %v3630_v32 = vadd.f32 1.0, %v6237_v23 }
 0x32d   :  { %v6241_v53 = vpop.eup %6240  ;;  %6260 = vrcp.f32 %v3475_v54  ;;  %v3476_v20 = vadd.f32 1.0, %v6239_v39 }
 0x32e   :  { %v6243_v30 = vpop.eup %6242  ;;  %6262 = vrcp.f32 %v3630_v32  ;;  %v3514_v60 = vadd.f32 1.0, %v6241_v53 }
 0x32f   :  { %v6245_v19 = vpop.eup %6244  ;;  %6264 = vrcp.f32 %v3476_v20  ;;  %v3399_v50 = vadd.f32 1.0, %v6243_v30 }
 0x330   :  { %v6247_v37 = vpop.eup %6246  ;;  %6266 = vrcp.f32 %v3514_v60  ;;  %v3515_v2 = vadd.f32 1.0, %v6245_v19 }
 0x331   :  { %v6249_v24 = vpop.eup %6248  ;;  %4489 = vst [vmem:[%s9211_s3 + $0x730] sm:$0xff] %v6247_v37  ;;  %6268 = vrcp.f32 %v3399_v50 }
 0x332   :  { %v6251_v40 = vpop.eup %6250  ;;  %4335 = vst [vmem:[%s9211_s3 + $0x260] sm:$0xff] %v6249_v24  ;;  %6270 = vrcp.f32 %v3515_v2 }
 0x333   :  { %v6253_v7 = vpop.eup %6252  ;;  %4527 = vst [vmem:[%s9211_s3 + $0x860] sm:$0xff] %v6251_v40  ;;  %6272 = vpow2.f32 %v4773_v16 }
 0x334   :  { %v6255_v8 = vpop.eup %6254  ;;  %4373 = vst [vmem:[%s9211_s3 + $0x390] sm:$0xff] %v6253_v7  ;;  %6274 = vpow2.f32 %v4966_v47 }
 0x335   :  { %v6257_v25 = vpop.eup %6256  ;;  %4528 = vst [vmem:[%s9211_s3 + $0x868] sm:$0xff] %v6255_v8  ;;  %6276 = vpow2.f32 %v4890_v10 }
 0x336   :  { %v6259_v35 = vpop.eup %6258  ;;  %4374 = vst [vmem:[%s9211_s3 + $0x398] sm:$0xff] %v6257_v25  ;;  %6278 = vpow2.f32 %v4967_v51 }
 0x337   :  { %v6261_v9 = vpop.eup %6260  ;;  %4566 = vst [vmem:[%s9211_s3 + $0x998] sm:$0xff] %v6259_v35  ;;  %6280 = vpow2.f32 %v4851_v28 }
 0x338   :  { %v6263_v29 = vpop.eup %6262  ;;  %4412 = vst [vmem:[%s9211_s3 + $0x4c8] sm:$0xff] %v6261_v9  ;;  %6282 = vpow2.f32 %v5005_v4 }
 0x339   :  { %v6265_v36 = vpop.eup %6264  ;;  %4567 = vst [vmem:[%s9211_s3 + $0x9a0] sm:$0xff] %v6263_v29  ;;  %6284 = vpow2.f32 %v4968_v43 }
 0x33a   :  { %v6267_v59 = vpop.eup %6266  ;;  %4413 = vst [vmem:[%s9211_s3 + $0x4d0] sm:$0xff] %v6265_v36  ;;  %6286 = vpow2.f32 %v5006_v45 }
 0x33b   :  { %v6269_v42 = vpop.eup %6268  ;;  %4451 = vst [vmem:[%s9211_s3 + $0x600] sm:$0xff] %v6267_v59  ;;  %6288 = vpow2.f32 %v4929_v34 }
 0x33c   :  { %v6271_v11 = vpop.eup %6270  ;;  %4336 = vst.msk [vmem:[%s9211_s3 + $0x268] sm:$0xff] %vm4296_vm1, %v6269_v42  ;;  %6290 = vpow2.f32 %v5044_v3 }
 0x33d   :  { %v6273_v33 = vpop.eup %6272  ;;  %4452 = vst [vmem:[%s9211_s3 + $0x608] sm:$0xff] %v6271_v11  ;;  %6292 = vpow2.f32 %v5046_v6 }
 0x33e   :  { %v6275_v15 = vpop.eup %6274  ;;  %v3360_v48 = vadd.f32 1.0, %v6273_v33  ;;  %6294 = vpow2.f32 %v5045_v58 }
 0x33f   :  { %v6277_v61 = vpop.eup %6276  ;;  %v3553_v18 = vadd.f32 1.0, %v6275_v15  ;;  %6296 = vpow2.f32 %v5007_v5 }
 0x340   :  { %v6279_v38 = vpop.eup %6278  ;;  %6298 = vrcp.f32 %v3360_v48  ;;  %v3477_v27 = vadd.f32 1.0, %v6277_v61 }
 0x341   :  { %v6281_v17 = vpop.eup %6280  ;;  %6300 = vrcp.f32 %v3553_v18  ;;  %v3554_v12 = vadd.f32 1.0, %v6279_v38 }
 0x342   :  { %v6283_v23 = vpop.eup %6282  ;;  %6302 = vrcp.f32 %v3477_v27  ;;  %v3438_v54 = vadd.f32 1.0, %v6281_v17 }
 0x343   :  { %v6285_v1 = vpop.eup %6284  ;;  %6304 = vrcp.f32 %v3554_v12  ;;  %v3592_v14 = vadd.f32 1.0, %v6283_v23 }
 0x344   :  { %v6287_v39 = vpop.eup %6286  ;;  %6306 = vrcp.f32 %v3438_v54  ;;  %v3555_v32 = vadd.f32 1.0, %v6285_v1 }
 0x345   :  { %v6289_v31 = vpop.eup %6288  ;;  %6308 = vrcp.f32 %v3592_v14  ;;  %v3593_v53 = vadd.f32 1.0, %v6287_v39 }
 0x346   :  { %v6291_v20 = vpop.eup %6290  ;;  %6310 = vrcp.f32 %v3555_v32  ;;  %v3516_v62 = vadd.f32 1.0, %v6289_v31 }
 0x347   :  { %v6293_v30 = vpop.eup %6292  ;;  %6312 = vrcp.f32 %v3593_v53  ;;  %v3631_v60 = vadd.f32 1.0, %v6291_v20 }
 0x348   :  { %v6295_v21 = vpop.eup %6294  ;;  %6314 = vrcp.f32 %v3516_v62  ;;  %v3633_v19 = vadd.f32 1.0, %v6293_v30 }
 0x349   :  { %v6297_v50 = vpop.eup %6296  ;;  %6316 = vrcp.f32 %v3631_v60  ;;  %v3632_v16 = vadd.f32 1.0, %v6295_v21 }
 0x34a   :  { %v6299_v63 = vpop.eup %6298  ;;  %6318 = vrcp.f32 %v3633_v19  ;;  %v3594_v37 = vadd.f32 1.0, %v6297_v50 }
 0x34b   :  { %v6301_v2 = vpop.eup %6300  ;;  %4297 = vst.msk [vmem:[%s9211_s3 + $0x130] sm:$0xff] %vm4296_vm1, %v6299_v63  ;;  %6320 = vrcp.f32 %v3632_v16 }
 0x34c   :  { %v6303_v47 = vpop.eup %6302  ;;  %4490 = vst [vmem:[%s9211_s3 + $0x738] sm:$0xff] %v6301_v2  ;;  %6322 = vrcp.f32 %v3594_v37 }
 0x34d   :  { %v6305_v55 = vpop.eup %6304  ;;  %4414 = vst.msk [vmem:[%s9211_s3 + $0x4d8] sm:$0xff] %vm4296_vm1, %v6303_v47 }
 0x34e   :  { %v6307_v24 = vpop.eup %6306  ;;  %4491 = vst [vmem:[%s9211_s3 + $0x740] sm:$0xff] %v6305_v55 }
 0x34f   :  { %v6309_v10 = vpop.eup %6308  ;;  %4375 = vst.msk [vmem:[%s9211_s3 + $0x3a0] sm:$0xff] %vm4296_vm1, %v6307_v24 }
 0x350   :  { %v6311_v44 = vpop.eup %6310  ;;  %4529 = vst [vmem:[%s9211_s3 + $0x870] sm:$0xff] %v6309_v10 }
 0x351   :  { %v6313_v40 = vpop.eup %6312  ;;  %4492 = vst.msk [vmem:[%s9211_s3 + $0x748] sm:$0xff] %vm4296_vm1, %v6311_v44 }
 0x352   :  { %v6315_v51 = vpop.eup %6314  ;;  %4530 = vst [vmem:[%s9211_s3 + $0x878] sm:$0xff] %v6313_v40 }
 0x353   :  { %v6317_v41 = vpop.eup %6316  ;;  %4453 = vst.msk [vmem:[%s9211_s3 + $0x610] sm:$0xff] %vm4296_vm1, %v6315_v51 }
 0x354   :  { %v6319_v7 = vpop.eup %6318  ;;  %4568 = vst [vmem:[%s9211_s3 + $0x9a8] sm:$0xff] %v6317_v41 }
 0x355   :  { %v6321_v28 = vpop.eup %6320  ;;  %4570 = vst.msk [vmem:[%s9211_s3 + $0x9b8] sm:$0xff] %vm4296_vm1, %v6319_v7 }
 0x356   :  { %v6323_v57 = vpop.eup %6322  ;;  %4569 = vst [vmem:[%s9211_s3 + $0x9b0] sm:$0xff] %v6321_v28 }
 0x357   :  { %4531 = vst.msk [vmem:[%s9211_s3 + $0x880] sm:$0xff] %vm4296_vm1, %v6323_v57 }

// kernel: model_forward.7
= control target key start
LH: loop header
LB: loop body
LE: loop exit
PB: predicated region body
PF: predicated region fallthrough
CT: control target
= control target key end

     0   :  { %s6450_s12 = smov 0   ;;  %s6452_s13 = smov 0   ;;  %s8282_s0 = inlined_call_operand.vmem [shape: f32[4,78400], index: 0, kind: input, shape index: {}]   ;;  %s8283_s1 = inlined_call_operand.vmem [shape: f32[32,4], index: 1, kind: input, shape index: {}]   ;;  %s8284_s2 = inlined_call_operand.vmem [shape: f32[32,1], index: 2, kind: input, shape index: {}]   ;;  %s8285_s3 = inlined_call_operand.vmem [shape: f32[32,78400], index: 3, kind: output, shape index: {}]  }
   0x1   :  { %s6454_s14 = smov 0  }
   0x2 LB: > { %s6463_s15 = sadd.s32 4294967295, %s6360_s14   ;;  %s6465_s16 = sadd.s32 1, %s6360_s14   ;;  %s6360_s14 = sphi %s6454_s14, %s8305_s14   ;;  %s6356_s13 = sphi %s6452_s13, %s8304_s13   ;;  %s6352_s12 = sphi %s6450_s12, %s8303_s12  }
   0x3   : > { %s85_s17 = ssub.s32 %s6360_s14, %s6465_s16  ;;  %s88_s18 = sadd.s32 1, %s6356_s13 }
   0x4   : > { %p86_p0 = scmp.eq.s32.totalorder %s85_s17, 0  ;;  %p98_p1 = scmp.ne.s32.totalorder %s6356_s13, %s6352_s12 }
   0x5   : > { %p99_p2 = scmp.eq.s32.totalorder %s6463_s15, 7  ;;  %p5178_p3 = scmp.ge.s32.totalorder %s6360_s14, 1 }
   0x6   : > { %s6473_s19 = scalar_select %p86_p0, %s6356_s13, %s88_s18  }
   0x7   : > { %p6475_p4 = por %p99_p2, %p98_p1  ;;  %p146_p5 = scmp.lt.s32.totalorder %s6360_s14, 9 }
   0x9   : > { %p147_p6 = pnand %p5178_p3, %p146_p5 }
   0xa   : > { %s6480_s21 = smul.u32 (!%p147_p6), 78, %s6463_s15  ;;  %v6426_v0 = vmov (!%p147_p6), 0.0   ;;  %v237_v1 = vld [vmem:[%s8284_s2 + $0x10] sm:$0xff] (!%p147_p6)  ;;  %v6427_v2 = vmov (!%p147_p6), 0   ;;  %v235_v3 = vld [vmem:[%s8284_s2] sm:$0xff] (!%p147_p6)  ;;  %v238_v4 = vld [vmem:[%s8284_s2 + $0x18] sm:$0xff] (!%p147_p6) }
   0xb   : > { %150 = sbr.rel (%p147_p6) target bundleno = 732 (0x2dc), region = 32  ;;  %571 = vmatprep.mubr.f32.mxu0 (!%p147_p6), %v6426_v0  ;;  %583 = vmatprep.mubr.f32.mxu1 (!%p147_p6), %v6426_v0  ;;  %v236_v5 = vld [vmem:[%s8284_s2 + $0x8] sm:$0xff] (!%p147_p6)  ;;  %vm350_vm0 = vcmask (!%p147_p6), 1043456   ;;  %v6509_v10 = vld [vmem:[%s8283_s1] sm:$0xff] (!%p147_p6)  ;;  %vm337_vm1 = vcmask (!%p147_p6), 31744   ;;  %v6514_v11 = vld [vmem:[%s8283_s1 + $0x10] sm:$0xff] (!%p147_p6) }
   0xc   : > { %p178_p7 = scmp.lt.s32.totalorder (!%p147_p6), %s6480_s21, 612  ;;  %5606 = vset.pattern.permute.xlu1 (!%p147_p6), %v6427_v2  ;;  %5605 = vset.pattern.permute.xlu0 (!%p147_p6), %v6427_v2  ;;  %v6531_v16 = vld [vmem:[%s8283_s1 + $0x8] sm:$0xff] (!%p147_p6)  ;;  %v6536_v17 = vld [vmem:[%s8283_s1 + $0x18] sm:$0xff] (!%p147_p6)  ;;  %s170_s23 = sand.u32 (!%p147_p6), 1, %s6352_s12  }
   0xd   : > { %251 = vperm.xlu1 (!%p147_p6), %5606, %v237_v1   ;;  %241 = vperm.xlu0 (!%p147_p6), %5605, %v235_v3   ;;  %s6973_s12 = smul.u32 (!%p147_p6), 2496, %s170_s23 }
   0xf   : > { %s6996_s24 = scalar_lea.vmem (!%p147_p6), [#allocation2], %s6973_s12  }
  0x11   : > { %256 = vperm.xlu1 (!%p147_p6), %5606, %v238_v4   ;;  %246 = vperm.xlu0 (!%p147_p6), %5605, %v236_v5  }
  0x12   : > { %s179_s26 = scalar_select %p178_p7, %s6480_s21, 612 }
  0x13   : > { %s4610_s6 = ssub.s32 (%p6475_p4), 613, %s6480_s21 }
  0x14   : > { %s5179_s4 = sshll.u32 %s179_s26, 2  ;;  %p4611_p8 = scmp.lt.s32.totalorder (%p6475_p4), %s4610_s6, 78 }
  0x15   : > { %s6501_s7 = scalar_lea.vmem %s8282_s0, %s5179_s4 }
  0x16   : > { %v196_v6 = vld [vmem:[%s6501_s7] sm:$0xff]  ;;  %v197_v7 = vld [vmem:[%s6501_s7 + $0x8] sm:$0xff]  ;;  %v198_v8 = vld [vmem:[%s6501_s7 + $0x10] sm:$0xff] }
  0x17   : > { %v298_v9 = vcombine.high %v196_v6, %v196_v6  ;;  %v299_v12 = vcombine.high %v197_v7, %v197_v7  ;;  %v300_v13 = vcombine.high %v198_v8, %v198_v8  ;;  %v199_v14 = vld [vmem:[%s6501_s7 + $0x18] sm:$0xff]  ;;  %v200_v15 = vld [vmem:[%s6501_s7 + $0x20] sm:$0xff]  ;;  %v201_v20 = vld [vmem:[%s6501_s7 + $0x28] sm:$0xff] }
  0x18   : > { %v301_v18 = vcombine.high %v199_v14, %v199_v14  ;;  %v302_v19 = vcombine.high %v200_v15, %v200_v15  ;;  %v202_v21 = vld [vmem:[%s6501_s7 + $0x30] sm:$0xff]  ;;  %v303_v22 = vcombine.high %v201_v20, %v201_v20  ;;  %v203_v24 = vld [vmem:[%s6501_s7 + $0x38] sm:$0xff]  ;;  %v204_v25 = vld [vmem:[%s6501_s7 + $0x40] sm:$0xff] }
  0x19   : > { %5180 = vmatprep.subr.msk.mxu0 %vm350_vm0, %v298_v9  ;;  %5446 = vmatprep.subr.msk.mxu1 %vm350_vm0, %v298_v9  ;;  %v304_v23 = vcombine.high %v202_v21, %v202_v21  ;;  %v305_v26 = vcombine.high %v203_v24, %v203_v24  ;;  %v306_v27 = vcombine.high %v204_v25, %v204_v25  ;;  %v205_v28 = vld [vmem:[%s6501_s7 + $0x48] sm:$0xff]  ;;  %v206_v29 = vld [vmem:[%s6501_s7 + $0x50] sm:$0xff]  ;;  %v207_v32 = vld [vmem:[%s6501_s7 + $0x58] sm:$0xff] }
  0x1a   : > { %5181 = vmatpush1.msk.msra.mxu0 %vm350_vm0, %v196_v6  ;;  %5447 = vmatpush1.msk.msra.mxu1 %vm350_vm0, %v196_v6  ;;  %v307_v30 = vcombine.high %v205_v28, %v205_v28  ;;  %v308_v31 = vcombine.high %v206_v29, %v206_v29  ;;  %v208_v33 = vld [vmem:[%s6501_s7 + $0x60] sm:$0xff]  ;;  %v309_v34 = vcombine.high %v207_v32, %v207_v32  ;;  %v209_v36 = vld [vmem:[%s6501_s7 + $0x68] sm:$0xff]  ;;  %v210_v37 = vld [vmem:[%s6501_s7 + $0x70] sm:$0xff] }
  0x1b   : > { %5182 = vmatmul.mubr.msk.f32.vlgmr.msra.gmra.mrb[0].mxu0 %vm337_vm1, %v6509_v10  ;;  %5184 = vmatmul.mubr.msk.f32.vlgmr.msra.gmra.mrb[0].mxu1 %vm337_vm1, %v6514_v11  ;;  %v310_v35 = vcombine.high %v208_v33, %v208_v33  ;;  %v311_v38 = vcombine.high %v209_v36, %v209_v36  ;;  %v312_v39 = vcombine.high %v210_v37, %v210_v37  ;;  %v211_v40 = vld [vmem:[%s6501_s7 + $0x78] sm:$0xff]  ;;  %v212_v41 = vld [vmem:[%s6501_s7 + $0x80] sm:$0xff]  ;;  %v213_v44 = vld [vmem:[%s6501_s7 + $0x88] sm:$0xff] }
  0x1c   : > { %5186 = vmatprep.subr.msk.mxu1 %vm350_vm0, %v299_v12  ;;  %5192 = vmatprep.subr.msk.mxu0 %vm350_vm0, %v300_v13  ;;  %v313_v42 = vcombine.high %v211_v40, %v211_v40  ;;  %v314_v43 = vcombine.high %v212_v41, %v212_v41  ;;  %v214_v45 = vld [vmem:[%s6501_s7 + $0x90] sm:$0xff]  ;;  %v315_v46 = vcombine.high %v213_v44, %v213_v44  ;;  %v215_v48 = vld [vmem:[%s6501_s7 + $0x98] sm:$0xff]  ;;  %v216_v49 = vld [vmem:[%s6501_s7 + $0xa0] sm:$0xff] }
  0x1d   : > { %5187 = vmatpush1.msk.msra.mxu1 %vm350_vm0, %v197_v7  ;;  %5193 = vmatpush1.msk.msra.mxu0 %vm350_vm0, %v198_v8  ;;  %v316_v47 = vcombine.high %v214_v45, %v214_v45  ;;  %v317_v50 = vcombine.high %v215_v48, %v215_v48  ;;  %v318_v51 = vcombine.high %v216_v49, %v216_v49  ;;  %v217_v52 = vld [vmem:[%s6501_s7 + $0xa8] sm:$0xff]  ;;  %v218_v53 = vld [vmem:[%s6501_s7 + $0xb0] sm:$0xff]  ;;  %v219_v56 = vld [vmem:[%s6501_s7 + $0xb8] sm:$0xff] }
  0x1e   : > { %577 = vmatprep.mubr.f32.mxu0 %v6426_v0  ;;  %589 = vmatprep.mubr.f32.mxu1 %v6426_v0  ;;  %v319_v54 = vcombine.high %v217_v52, %v217_v52  ;;  %v320_v55 = vcombine.high %v218_v53, %v218_v53  ;;  %v220_v57 = vld [vmem:[%s6501_s7 + $0xc0] sm:$0xff]  ;;  %v321_v58 = vcombine.high %v219_v56, %v219_v56  ;;  %v221_v60 = vld [vmem:[%s6501_s7 + $0xc8] sm:$0xff]  ;;  %v222_v61 = vld [vmem:[%s6501_s7 + $0xd0] sm:$0xff] }
  0x1f   : > { %5183 = vmatmul.mubr.msk.f32.gmra.mrb[2].mxu0 %vm337_vm1, %v6531_v16  ;;  %5185 = vmatmul.mubr.msk.f32.gmra.mrb[2].mxu1 %vm337_vm1, %v6536_v17  ;;  %v322_v59 = vcombine.high %v220_v57, %v220_v57  ;;  %v323_v62 = vcombine.high %v221_v60, %v221_v60  ;;  %v324_v63 = vcombine.high %v222_v61, %v222_v61  ;;  %v223_v1 = vld [vmem:[%s6501_s7 + $0xd8] sm:$0xff]  ;;  %v224_v2 = vld [vmem:[%s6501_s7 + $0xe0] sm:$0xff]  ;;  %v225_v5 = vld [vmem:[%s6501_s7 + $0xe8] sm:$0xff] }
  0x20   : > { %660 = vmatprep.mubr.f32.mxu1 %v6426_v0  ;;  %749 = vmatprep.mubr.f32.mxu0 %v6426_v0  ;;  %v325_v3 = vcombine.high %v223_v1, %v223_v1  ;;  %v326_v4 = vcombine.high %v224_v2, %v224_v2  ;;  %v226_v6 = vld [vmem:[%s6501_s7 + $0xf0] sm:$0xff]  ;;  %v327_v7 = vcombine.high %v225_v5, %v225_v5 }
  0x21   : > { %5198 = vmatprep.subr.msk.mxu1 %vm350_vm0, %v301_v18  ;;  %5204 = vmatprep.subr.msk.mxu0 %vm350_vm0, %v302_v19  ;;  %v328_v8 = vcombine.high %v226_v6, %v226_v6 }
  0x23   : > { %5188 = vmatmul.mubr.msk.f32.vlgmr.msra.gmra.mrb[4].mxu1 %vm337_vm1, %v6509_v10  ;;  %5194 = vmatmul.mubr.msk.f32.vlgmr.msra.gmra.mrb[4].mxu0 %vm337_vm1, %v6509_v10 }
  0x24   : > { %5199 = vmatpush1.msk.msra.mxu1 %vm350_vm0, %v199_v14  ;;  %5205 = vmatpush1.msk.msra.mxu0 %vm350_vm0, %v200_v15 }
  0x25   : > { %666 = vmatprep.mubr.f32.mxu1 %v6426_v0  ;;  %755 = vmatprep.mubr.f32.mxu0 %v6426_v0 }
  0x26   : > { %5210 = vmatprep.subr.msk.mxu1 %vm350_vm0, %v303_v22  ;;  %5216 = vmatprep.subr.msk.mxu0 %vm350_vm0, %v304_v23  ;;  %v6948_v22 = vld [vmem:[%s6501_s7 + $0x100] sm:$0xff] }
  0x27   : > { %5189 = vmatmul.mubr.msk.f32.gmra.mrb[6].mxu1 %vm337_vm1, %v6531_v16  ;;  %5195 = vmatmul.mubr.msk.f32.gmra.mrb[6].mxu0 %vm337_vm1, %v6531_v16 }
  0x28   : > { %672 = vmatprep.mubr.f32.mxu1 %v6426_v0  ;;  %761 = vmatprep.mubr.f32.mxu0 %v6426_v0 }
  0x2b   : > { %5190 = vmatmul.mubr.msk.f32.gmra.mrb[8].mxu1 %vm337_vm1, %v6514_v11  ;;  %5196 = vmatmul.mubr.msk.f32.gmra.mrb[8].mxu0 %vm337_vm1, %v6514_v11 }
  0x2c   : > { %678 = vmatprep.mubr.f32.mxu1 %v6426_v0  ;;  %767 = vmatprep.mubr.f32.mxu0 %v6426_v0 }
  0x2f   : > { %5191 = vmatmul.mubr.msk.f32.gmra.mrb[10].mxu1 %vm337_vm1, %v6536_v17  ;;  %5197 = vmatmul.mubr.msk.f32.gmra.mrb[10].mxu0 %vm337_vm1, %v6536_v17 }
  0x30   : > { %838 = vmatprep.mubr.f32.mxu1 %v6426_v0  ;;  %927 = vmatprep.mubr.f32.mxu0 %v6426_v0 }
  0x33   : > { %5200 = vmatmul.mubr.msk.f32.vlgmr.msra.gmra.mrb[12].mxu1 %vm337_vm1, %v6509_v10  ;;  %5206 = vmatmul.mubr.msk.f32.vlgmr.msra.gmra.mrb[12].mxu0 %vm337_vm1, %v6509_v10 }
  0x34   : > { %5211 = vmatpush1.msk.msra.mxu1 %vm350_vm0, %v201_v20  ;;  %5217 = vmatpush1.msk.msra.mxu0 %vm350_vm0, %v202_v21  ;;  %v6945_v21 = vld [vmem:[%s6501_s7 + $0xf8] sm:$0xff] }
  0x35   : > { %844 = vmatprep.mubr.f32.mxu1 %v6426_v0  ;;  %933 = vmatprep.mubr.f32.mxu0 %v6426_v0 }
  0x36   : > { %5222 = vmatprep.subr.msk.mxu1 %vm350_vm0, %v305_v26  ;;  %5228 = vmatprep.subr.msk.mxu0 %vm350_vm0, %v306_v27 }
  0x37   : > { %5201 = vmatmul.mubr.msk.f32.gmra.mrb[14].mxu1 %vm337_vm1, %v6531_v16  ;;  %5207 = vmatmul.mubr.msk.f32.gmra.mrb[14].mxu0 %vm337_vm1, %v6531_v16 }
  0x38   : > { %850 = vmatprep.mubr.f32.mxu1 %v6426_v0  ;;  %939 = vmatprep.mubr.f32.mxu0 %v6426_v0 }
  0x3b   : > { %5202 = vmatmul.mubr.msk.f32.gmra.mrb[16].mxu1 %vm337_vm1, %v6514_v11  ;;  %5208 = vmatmul.mubr.msk.f32.gmra.mrb[16].mxu0 %vm337_vm1, %v6514_v11 }
  0x3c   : > { %856 = vmatprep.mubr.f32.mxu1 %v6426_v0  ;;  %945 = vmatprep.mubr.f32.mxu0 %v6426_v0 }
  0x3f   : > { %5203 = vmatmul.mubr.msk.f32.gmra.mrb[18].mxu1 %vm337_vm1, %v6536_v17  ;;  %5209 = vmatmul.mubr.msk.f32.gmra.mrb[18].mxu0 %vm337_vm1, %v6536_v17 }
  0x40   : > { %1016 = vmatprep.mubr.f32.mxu1 %v6426_v0  ;;  %1105 = vmatprep.mubr.f32.mxu0 %v6426_v0 }
  0x43   : > { %5212 = vmatmul.mubr.msk.f32.vlgmr.msra.gmra.mrb[20].mxu1 %vm337_vm1, %v6509_v10  ;;  %5218 = vmatmul.mubr.msk.f32.vlgmr.msra.gmra.mrb[20].mxu0 %vm337_vm1, %v6509_v10 }
  0x44   : > { %5223 = vmatpush1.msk.msra.mxu1 %vm350_vm0, %v203_v24  ;;  %5229 = vmatpush1.msk.msra.mxu0 %vm350_vm0, %v204_v25 }
  0x45   : > { %1022 = vmatprep.mubr.f32.mxu1 %v6426_v0  ;;  %1111 = vmatprep.mubr.f32.mxu0 %v6426_v0 }
  0x46   : > { %5234 = vmatprep.subr.msk.mxu1 %vm350_vm0, %v307_v30  ;;  %5240 = vmatprep.subr.msk.mxu0 %vm350_vm0, %v308_v31  ;;  %v330_v30 = vcombine.high %v6948_v22, %v6948_v22 }
  0x47   : > { %5213 = vmatmul.mubr.msk.f32.gmra.mrb[22].mxu1 %vm337_vm1, %v6531_v16  ;;  %5219 = vmatmul.mubr.msk.f32.gmra.mrb[22].mxu0 %vm337_vm1, %v6531_v16 }
  0x48   : > { %1028 = vmatprep.mubr.f32.mxu1 %v6426_v0  ;;  %1117 = vmatprep.mubr.f32.mxu0 %v6426_v0 }
  0x4b   : > { %5214 = vmatmul.mubr.msk.f32.gmra.mrb[24].mxu1 %vm337_vm1, %v6514_v11  ;;  %5220 = vmatmul.mubr.msk.f32.gmra.mrb[24].mxu0 %vm337_vm1, %v6514_v11 }
  0x4c   : > { %1034 = vmatprep.mubr.f32.mxu1 %v6426_v0  ;;  %1123 = vmatprep.mubr.f32.mxu0 %v6426_v0 }
  0x4f   : > { %5215 = vmatmul.mubr.msk.f32.gmra.mrb[26].mxu1 %vm337_vm1, %v6536_v17  ;;  %5221 = vmatmul.mubr.msk.f32.gmra.mrb[26].mxu0 %vm337_vm1, %v6536_v17 }
  0x50   : > { %1194 = vmatprep.mubr.f32.mxu1 %v6426_v0  ;;  %1283 = vmatprep.mubr.f32.mxu0 %v6426_v0 }
  0x53   : > { %5224 = vmatmul.mubr.msk.f32.vlgmr.msra.gmra.mrb[28].mxu1 %vm337_vm1, %v6509_v10  ;;  %5230 = vmatmul.mubr.msk.f32.vlgmr.msra.gmra.mrb[28].mxu0 %vm337_vm1, %v6509_v10 }
  0x54   : > { %5235 = vmatpush1.msk.msra.mxu1 %vm350_vm0, %v205_v28  ;;  %5241 = vmatpush1.msk.msra.mxu0 %vm350_vm0, %v206_v29  ;;  %v329_v29 = vcombine.high %v6945_v21, %v6945_v21 }
  0x55   : > { %1200 = vmatprep.mubr.f32.mxu1 %v6426_v0  ;;  %1289 = vmatprep.mubr.f32.mxu0 %v6426_v0 }
  0x56   : > { %5246 = vmatprep.subr.msk.mxu1 %vm350_vm0, %v309_v34  ;;  %5252 = vmatprep.subr.msk.mxu0 %vm350_vm0, %v310_v35 }
  0x57   : > { %5225 = vmatmul.mubr.msk.f32.gmra.mrb[30].mxu1 %vm337_vm1, %v6531_v16  ;;  %5231 = vmatmul.mubr.msk.f32.gmra.mrb[30].mxu0 %vm337_vm1, %v6531_v16 }
  0x58   : > { %1206 = vmatprep.mubr.f32.mxu1 %v6426_v0  ;;  %1295 = vmatprep.mubr.f32.mxu0 %v6426_v0 }
  0x5b   : > { %5226 = vmatmul.mubr.msk.f32.gmra.mrb[32].mxu1 %vm337_vm1, %v6514_v11  ;;  %5232 = vmatmul.mubr.msk.f32.gmra.mrb[32].mxu0 %vm337_vm1, %v6514_v11 }
  0x5c   : > { %1212 = vmatprep.mubr.f32.mxu1 %v6426_v0  ;;  %1301 = vmatprep.mubr.f32.mxu0 %v6426_v0 }
  0x5f   : > { %5227 = vmatmul.mubr.msk.f32.gmra.mrb[34].mxu1 %vm337_vm1, %v6536_v17  ;;  %5233 = vmatmul.mubr.msk.f32.gmra.mrb[34].mxu0 %vm337_vm1, %v6536_v17 }
  0x60   : > { %1372 = vmatprep.mubr.f32.mxu1 %v6426_v0  ;;  %1461 = vmatprep.mubr.f32.mxu0 %v6426_v0 }
  0x63   : > { %5236 = vmatmul.mubr.msk.f32.vlgmr.msra.gmra.mrb[36].mxu1 %vm337_vm1, %v6509_v10  ;;  %5242 = vmatmul.mubr.msk.f32.vlgmr.msra.gmra.mrb[36].mxu0 %vm337_vm1, %v6509_v10 }
  0x64   : > { %5247 = vmatpush1.msk.msra.mxu1 %vm350_vm0, %v207_v32  ;;  %5253 = vmatpush1.msk.msra.mxu0 %vm350_vm0, %v208_v33 }
  0x65   : > { %1378 = vmatprep.mubr.f32.mxu1 %v6426_v0  ;;  %1467 = vmatprep.mubr.f32.mxu0 %v6426_v0 }
  0x66   : > { %5258 = vmatprep.subr.msk.mxu1 %vm350_vm0, %v311_v38  ;;  %5264 = vmatprep.subr.msk.mxu0 %vm350_vm0, %v312_v39 }
  0x67   : > { %5237 = vmatmul.mubr.msk.f32.gmra.mrb[38].mxu1 %vm337_vm1, %v6531_v16  ;;  %5243 = vmatmul.mubr.msk.f32.gmra.mrb[38].mxu0 %vm337_vm1, %v6531_v16 }
  0x68   : > { %1384 = vmatprep.mubr.f32.mxu1 %v6426_v0  ;;  %1473 = vmatprep.mubr.f32.mxu0 %v6426_v0 }
  0x6b   : > { %5238 = vmatmul.mubr.msk.f32.gmra.mrb[40].mxu1 %vm337_vm1, %v6514_v11  ;;  %5244 = vmatmul.mubr.msk.f32.gmra.mrb[40].mxu0 %vm337_vm1, %v6514_v11 }
  0x6c   : > { %1390 = vmatprep.mubr.f32.mxu1 %v6426_v0  ;;  %1479 = vmatprep.mubr.f32.mxu0 %v6426_v0 }
  0x6f   : > { %5239 = vmatmul.mubr.msk.f32.gmra.mrb[42].mxu1 %vm337_vm1, %v6536_v17  ;;  %5245 = vmatmul.mubr.msk.f32.gmra.mrb[42].mxu0 %vm337_vm1, %v6536_v17 }
  0x70   : > { %1550 = vmatprep.mubr.f32.mxu1 %v6426_v0  ;;  %1639 = vmatprep.mubr.f32.mxu0 %v6426_v0 }
  0x73   : > { %5248 = vmatmul.mubr.msk.f32.vlgmr.msra.gmra.mrb[44].mxu1 %vm337_vm1, %v6509_v10  ;;  %5254 = vmatmul.mubr.msk.f32.vlgmr.msra.gmra.mrb[44].mxu0 %vm337_vm1, %v6509_v10 }
  0x74   : > { %5259 = vmatpush1.msk.msra.mxu1 %vm350_vm0, %v209_v36  ;;  %5265 = vmatpush1.msk.msra.mxu0 %vm350_vm0, %v210_v37 }
  0x75   : > { %1556 = vmatprep.mubr.f32.mxu1 %v6426_v0  ;;  %1645 = vmatprep.mubr.f32.mxu0 %v6426_v0 }
  0x76   : > { %5270 = vmatprep.subr.msk.mxu1 %vm350_vm0, %v313_v42  ;;  %5276 = vmatprep.subr.msk.mxu0 %vm350_vm0, %v314_v43 }
  0x77   : > { %5249 = vmatmul.mubr.msk.f32.gmra.mrb[46].mxu1 %vm337_vm1, %v6531_v16  ;;  %5255 = vmatmul.mubr.msk.f32.gmra.mrb[46].mxu0 %vm337_vm1, %v6531_v16 }
  0x78   : > { %1562 = vmatprep.mubr.f32.mxu1 %v6426_v0  ;;  %1651 = vmatprep.mubr.f32.mxu0 %v6426_v0 }
  0x7b   : > { %5250 = vmatmul.mubr.msk.f32.gmra.mrb[48].mxu1 %vm337_vm1, %v6514_v11  ;;  %5256 = vmatmul.mubr.msk.f32.gmra.mrb[48].mxu0 %vm337_vm1, %v6514_v11 }
  0x7c   : > { %1568 = vmatprep.mubr.f32.mxu1 %v6426_v0  ;;  %1657 = vmatprep.mubr.f32.mxu0 %v6426_v0 }
  0x7f   : > { %5251 = vmatmul.mubr.msk.f32.gmra.mrb[50].mxu1 %vm337_vm1, %v6536_v17  ;;  %5257 = vmatmul.mubr.msk.f32.gmra.mrb[50].mxu0 %vm337_vm1, %v6536_v17 }
  0x80   : > { %1728 = vmatprep.mubr.f32.mxu1 %v6426_v0  ;;  %1817 = vmatprep.mubr.f32.mxu0 %v6426_v0 }
  0x83   : > { %5260 = vmatmul.mubr.msk.f32.vlgmr.msra.gmra.mrb[52].mxu1 %vm337_vm1, %v6509_v10  ;;  %5266 = vmatmul.mubr.msk.f32.vlgmr.msra.gmra.mrb[52].mxu0 %vm337_vm1, %v6509_v10 }
  0x84   : > { %5271 = vmatpush1.msk.msra.mxu1 %vm350_vm0, %v211_v40  ;;  %5277 = vmatpush1.msk.msra.mxu0 %vm350_vm0, %v212_v41 }
  0x85   : > { %1734 = vmatprep.mubr.f32.mxu1 %v6426_v0  ;;  %1823 = vmatprep.mubr.f32.mxu0 %v6426_v0 }
  0x86   : > { %5282 = vmatprep.subr.msk.mxu1 %vm350_vm0, %v315_v46  ;;  %5288 = vmatprep.subr.msk.mxu0 %vm350_vm0, %v316_v47 }
  0x87   : > { %5261 = vmatmul.mubr.msk.f32.gmra.mrb[54].mxu1 %vm337_vm1, %v6531_v16  ;;  %5267 = vmatmul.mubr.msk.f32.gmra.mrb[54].mxu0 %vm337_vm1, %v6531_v16 }
  0x88   : > { %1740 = vmatprep.mubr.f32.mxu1 %v6426_v0  ;;  %1829 = vmatprep.mubr.f32.mxu0 %v6426_v0 }
  0x8b   : > { %5262 = vmatmul.mubr.msk.f32.gmra.mrb[56].mxu1 %vm337_vm1, %v6514_v11  ;;  %5268 = vmatmul.mubr.msk.f32.gmra.mrb[56].mxu0 %vm337_vm1, %v6514_v11 }
  0x8c   : > { %1746 = vmatprep.mubr.f32.mxu1 %v6426_v0  ;;  %1835 = vmatprep.mubr.f32.mxu0 %v6426_v0  ;;  %v6928_v9 = vpop.permute.xlu1 %251  ;;  %v6930_v12 = vpop.permute.xlu0 %241 }
  0x8f   : > { %5263 = vmatmul.mubr.msk.f32.gmra.mrb[58].mxu1 %vm337_vm1, %v6536_v17  ;;  %5269 = vmatmul.mubr.msk.f32.gmra.mrb[58].mxu0 %vm337_vm1, %v6536_v17 }
  0x90   : > { %1906 = vmatprep.mubr.f32.mxu1 %v6426_v0  ;;  %1995 = vmatprep.mubr.f32.mxu0 %v6426_v0  ;;  %v6954_v25 = vpop.permute.xlu1 %256  ;;  %v6956_v26 = vpop.permute.xlu0 %246 }
  0x93   : > { %5272 = vmatmul.mubr.msk.f32.vlgmr.msra.gmra.mrb[60].mxu1 %vm337_vm1, %v6509_v10  ;;  %5278 = vmatmul.mubr.msk.f32.vlgmr.msra.gmra.mrb[60].mxu0 %vm337_vm1, %v6509_v10 }
  0x94   : > { %5283 = vmatpush1.msk.msra.mxu1 %vm350_vm0, %v213_v44  ;;  %5289 = vmatpush1.msk.msra.mxu0 %vm350_vm0, %v214_v45 }
  0x95   : > { %1912 = vmatprep.mubr.f32.mxu1 %v6426_v0  ;;  %2001 = vmatprep.mubr.f32.mxu0 %v6426_v0 }
  0x96   : > { %5294 = vmatprep.subr.msk.mxu1 %vm350_vm0, %v317_v50  ;;  %5300 = vmatprep.subr.msk.mxu0 %vm350_vm0, %v318_v51 }
  0x97   : > { %5273 = vmatmul.mubr.msk.f32.gmra.mrb[62].mxu1 %vm337_vm1, %v6531_v16  ;;  %5279 = vmatmul.mubr.msk.f32.gmra.mrb[62].mxu0 %vm337_vm1, %v6531_v16 }
  0x98   : > { %1918 = vmatprep.mubr.f32.mxu1 %v6426_v0  ;;  %2007 = vmatprep.mubr.f32.mxu0 %v6426_v0 }
  0x9b   : > { %5274 = vmatmul.mubr.msk.f32.gmra.mrb[64].mxu1 %vm337_vm1, %v6514_v11  ;;  %5280 = vmatmul.mubr.msk.f32.gmra.mrb[64].mxu0 %vm337_vm1, %v6514_v11 }
  0x9c   : > { %1924 = vmatprep.mubr.f32.mxu1 %v6426_v0  ;;  %2013 = vmatprep.mubr.f32.mxu0 %v6426_v0 }
  0x9f   : > { %5275 = vmatmul.mubr.msk.f32.gmra.mrb[66].mxu1 %vm337_vm1, %v6536_v17  ;;  %5281 = vmatmul.mubr.msk.f32.gmra.mrb[66].mxu0 %vm337_vm1, %v6536_v17 }
  0xa0   : > { %2084 = vmatprep.mubr.f32.mxu1 %v6426_v0  ;;  %2173 = vmatprep.mubr.f32.mxu0 %v6426_v0 }
  0xa3   : > { %5284 = vmatmul.mubr.msk.f32.vlgmr.msra.gmra.mrb[68].mxu1 %vm337_vm1, %v6509_v10  ;;  %5290 = vmatmul.mubr.msk.f32.vlgmr.msra.gmra.mrb[68].mxu0 %vm337_vm1, %v6509_v10 }
  0xa4   : > { %5295 = vmatpush1.msk.msra.mxu1 %vm350_vm0, %v215_v48  ;;  %5301 = vmatpush1.msk.msra.mxu0 %vm350_vm0, %v216_v49 }
  0xa5   : > { %2090 = vmatprep.mubr.f32.mxu1 %v6426_v0  ;;  %2179 = vmatprep.mubr.f32.mxu0 %v6426_v0 }
  0xa6   : > { %5306 = vmatprep.subr.msk.mxu1 %vm350_vm0, %v319_v54  ;;  %5312 = vmatprep.subr.msk.mxu0 %vm350_vm0, %v320_v55 }
  0xa7   : > { %5285 = vmatmul.mubr.msk.f32.gmra.mrb[70].mxu1 %vm337_vm1, %v6531_v16  ;;  %5291 = vmatmul.mubr.msk.f32.gmra.mrb[70].mxu0 %vm337_vm1, %v6531_v16 }
  0xa8   : > { %2096 = vmatprep.mubr.f32.mxu1 %v6426_v0  ;;  %2185 = vmatprep.mubr.f32.mxu0 %v6426_v0 }
  0xab   : > { %5286 = vmatmul.mubr.msk.f32.gmra.mrb[72].mxu1 %vm337_vm1, %v6514_v11  ;;  %5292 = vmatmul.mubr.msk.f32.gmra.mrb[72].mxu0 %vm337_vm1, %v6514_v11 }
  0xac   : > { %2102 = vmatprep.mubr.f32.mxu1 %v6426_v0  ;;  %2191 = vmatprep.mubr.f32.mxu0 %v6426_v0 }
  0xaf   : > { %5287 = vmatmul.mubr.msk.f32.gmra.mrb[74].mxu1 %vm337_vm1, %v6536_v17  ;;  %5293 = vmatmul.mubr.msk.f32.gmra.mrb[74].mxu0 %vm337_vm1, %v6536_v17 }
  0xb0   : > { %2262 = vmatprep.mubr.f32.mxu1 %v6426_v0  ;;  %2351 = vmatprep.mubr.f32.mxu0 %v6426_v0 }
  0xb3   : > { %5296 = vmatmul.mubr.msk.f32.vlgmr.msra.gmra.mrb[76].mxu1 %vm337_vm1, %v6509_v10  ;;  %5302 = vmatmul.mubr.msk.f32.vlgmr.msra.gmra.mrb[76].mxu0 %vm337_vm1, %v6509_v10 }
  0xb4   : > { %5307 = vmatpush1.msk.msra.mxu1 %vm350_vm0, %v217_v52  ;;  %5313 = vmatpush1.msk.msra.mxu0 %vm350_vm0, %v218_v53 }
  0xb5   : > { %2268 = vmatprep.mubr.f32.mxu1 %v6426_v0  ;;  %2357 = vmatprep.mubr.f32.mxu0 %v6426_v0 }
  0xb6   : > { %5318 = vmatprep.subr.msk.mxu1 %vm350_vm0, %v321_v58  ;;  %5324 = vmatprep.subr.msk.mxu0 %vm350_vm0, %v322_v59 }
  0xb7   : > { %5297 = vmatmul.mubr.msk.f32.gmra.mrb[78].mxu1 %vm337_vm1, %v6531_v16  ;;  %5303 = vmatmul.mubr.msk.f32.gmra.mrb[78].mxu0 %vm337_vm1, %v6531_v16 }
  0xb8   : > { %2274 = vmatprep.mubr.f32.mxu1 %v6426_v0  ;;  %2363 = vmatprep.mubr.f32.mxu0 %v6426_v0 }
  0xbb   : > { %5298 = vmatmul.mubr.msk.f32.gmra.mrb[80].mxu1 %vm337_vm1, %v6514_v11  ;;  %5304 = vmatmul.mubr.msk.f32.gmra.mrb[80].mxu0 %vm337_vm1, %v6514_v11 }
  0xbc   : > { %2280 = vmatprep.mubr.f32.mxu1 %v6426_v0  ;;  %2369 = vmatprep.mubr.f32.mxu0 %v6426_v0 }
  0xbf   : > { %5299 = vmatmul.mubr.msk.f32.gmra.mrb[82].mxu1 %vm337_vm1, %v6536_v17  ;;  %5305 = vmatmul.mubr.msk.f32.gmra.mrb[82].mxu0 %vm337_vm1, %v6536_v17 }
  0xc0   : > { %2440 = vmatprep.mubr.f32.mxu1 %v6426_v0  ;;  %2529 = vmatprep.mubr.f32.mxu0 %v6426_v0 }
  0xc3   : > { %5308 = vmatmul.mubr.msk.f32.vlgmr.msra.gmra.mrb[84].mxu1 %vm337_vm1, %v6509_v10  ;;  %5314 = vmatmul.mubr.msk.f32.vlgmr.msra.gmra.mrb[84].mxu0 %vm337_vm1, %v6509_v10 }
  0xc4   : > { %5319 = vmatpush1.msk.msra.mxu1 %vm350_vm0, %v219_v56  ;;  %5325 = vmatpush1.msk.msra.mxu0 %vm350_vm0, %v220_v57 }
  0xc5   : > { %2446 = vmatprep.mubr.f32.mxu1 %v6426_v0  ;;  %2535 = vmatprep.mubr.f32.mxu0 %v6426_v0 }
  0xc6   : > { %5330 = vmatprep.subr.msk.mxu1 %vm350_vm0, %v323_v62  ;;  %5336 = vmatprep.subr.msk.mxu0 %vm350_vm0, %v324_v63 }
  0xc7   : > { %5309 = vmatmul.mubr.msk.f32.gmra.mrb[86].mxu1 %vm337_vm1, %v6531_v16  ;;  %5315 = vmatmul.mubr.msk.f32.gmra.mrb[86].mxu0 %vm337_vm1, %v6531_v16 }
  0xc8   : > { %2452 = vmatprep.mubr.f32.mxu1 %v6426_v0  ;;  %2541 = vmatprep.mubr.f32.mxu0 %v6426_v0 }
  0xcb   : > { %5310 = vmatmul.mubr.msk.f32.gmra.mrb[88].mxu1 %vm337_vm1, %v6514_v11  ;;  %5316 = vmatmul.mubr.msk.f32.gmra.mrb[88].mxu0 %vm337_vm1, %v6514_v11 }
  0xcc   : > { %2458 = vmatprep.mubr.f32.mxu1 %v6426_v0  ;;  %2547 = vmatprep.mubr.f32.mxu0 %v6426_v0 }
  0xcf   : > { %5311 = vmatmul.mubr.msk.f32.gmra.mrb[90].mxu1 %vm337_vm1, %v6536_v17  ;;  %5317 = vmatmul.mubr.msk.f32.gmra.mrb[90].mxu0 %vm337_vm1, %v6536_v17 }
  0xd0   : > { %2618 = vmatprep.mubr.f32.mxu1 %v6426_v0  ;;  %2707 = vmatprep.mubr.f32.mxu0 %v6426_v0 }
  0xd3   : > { %5320 = vmatmul.mubr.msk.f32.vlgmr.msra.gmra.mrb[92].mxu1 %vm337_vm1, %v6509_v10  ;;  %5326 = vmatmul.mubr.msk.f32.vlgmr.msra.gmra.mrb[92].mxu0 %vm337_vm1, %v6509_v10 }
  0xd4   : > { %5331 = vmatpush1.msk.msra.mxu1 %vm350_vm0, %v221_v60  ;;  %5337 = vmatpush1.msk.msra.mxu0 %vm350_vm0, %v222_v61 }
  0xd5   : > { %2624 = vmatprep.mubr.f32.mxu1 %v6426_v0  ;;  %2713 = vmatprep.mubr.f32.mxu0 %v6426_v0 }
  0xd6   : > { %5342 = vmatprep.subr.msk.mxu1 %vm350_vm0, %v325_v3  ;;  %5348 = vmatprep.subr.msk.mxu0 %vm350_vm0, %v326_v4 }
  0xd7   : > { %5321 = vmatmul.mubr.msk.f32.gmra.mrb[94].mxu1 %vm337_vm1, %v6531_v16  ;;  %5327 = vmatmul.mubr.msk.f32.gmra.mrb[94].mxu0 %vm337_vm1, %v6531_v16 }
  0xd8   : > { %2630 = vmatprep.mubr.f32.mxu1 %v6426_v0  ;;  %2719 = vmatprep.mubr.f32.mxu0 %v6426_v0 }
  0xdb   : > { %5322 = vmatmul.mubr.msk.f32.gmra.mrb[96].mxu1 %vm337_vm1, %v6514_v11  ;;  %5328 = vmatmul.mubr.msk.f32.gmra.mrb[96].mxu0 %vm337_vm1, %v6514_v11 }
  0xdc   : > { %2636 = vmatprep.mubr.f32.mxu1 %v6426_v0  ;;  %2725 = vmatprep.mubr.f32.mxu0 %v6426_v0 }
  0xdf   : > { %5323 = vmatmul.mubr.msk.f32.gmra.mrb[98].mxu1 %vm337_vm1, %v6536_v17  ;;  %5329 = vmatmul.mubr.msk.f32.gmra.mrb[98].mxu0 %vm337_vm1, %v6536_v17 }
  0xe0   : > { %2796 = vmatprep.mubr.f32.mxu1 %v6426_v0  ;;  %2885 = vmatprep.mubr.f32.mxu0 %v6426_v0 }
  0xe3   : > { %5332 = vmatmul.mubr.msk.f32.vlgmr.msra.gmra.mrb[100].mxu1 %vm337_vm1, %v6509_v10  ;;  %5338 = vmatmul.mubr.msk.f32.vlgmr.msra.gmra.mrb[100].mxu0 %vm337_vm1, %v6509_v10 }
  0xe4   : > { %5343 = vmatpush1.msk.msra.mxu1 %vm350_vm0, %v223_v1  ;;  %5349 = vmatpush1.msk.msra.mxu0 %vm350_vm0, %v224_v2  ;;  %v7013_v1 = vld [vmem:[%s6501_s7 + $0x108] sm:$0xff]  ;;  %v7016_v2 = vld [vmem:[%s6501_s7 + $0x110] sm:$0xff] }
  0xe5   : > { %2802 = vmatprep.mubr.f32.mxu1 %v6426_v0  ;;  %2891 = vmatprep.mubr.f32.mxu0 %v6426_v0 }
  0xe6   : > { %5354 = vmatprep.subr.msk.mxu1 %vm350_vm0, %v327_v7  ;;  %5360 = vmatprep.subr.msk.mxu0 %vm350_vm0, %v328_v8 }
  0xe7   : > { %5333 = vmatmul.mubr.msk.f32.gmra.mrb[102].mxu1 %vm337_vm1, %v6531_v16  ;;  %5339 = vmatmul.mubr.msk.f32.gmra.mrb[102].mxu0 %vm337_vm1, %v6531_v16 }
  0xe8   : > { %2808 = vmatprep.mubr.f32.mxu1 %v6426_v0  ;;  %2897 = vmatprep.mubr.f32.mxu0 %v6426_v0 }
  0xeb   : > { %5334 = vmatmul.mubr.msk.f32.gmra.mrb[104].mxu1 %vm337_vm1, %v6514_v11  ;;  %5340 = vmatmul.mubr.msk.f32.gmra.mrb[104].mxu0 %vm337_vm1, %v6514_v11 }
  0xec   : > { %2814 = vmatprep.mubr.f32.mxu1 %v6426_v0  ;;  %2903 = vmatprep.mubr.f32.mxu0 %v6426_v0 }
  0xee   : > { %v573_v13 = vpop.f32.mrb[0].mxu0  ;;  %v585_v14 = vpop.f32.mrb[0].mxu1 }
  0xef   : > { %v586_v15 = vadd.f32 %v585_v14, %v6928_v9  ;;  %v574_v18 = vadd.f32 %v573_v13, %v6930_v12  ;;  %v575_v19 = vpop.f32.mrb[1].mxu0  ;;  %v587_v20 = vpop.f32.mrb[1].mxu1  ;;  %5335 = vmatmul.mubr.msk.f32.gmra.mrb[106].mxu1 %vm337_vm1, %v6536_v17  ;;  %5341 = vmatmul.mubr.msk.f32.gmra.mrb[106].mxu0 %vm337_vm1, %v6536_v17  ;;  %v331_v13 = vcombine.high %v7013_v1, %v7013_v1 }
  0xf0   : > { %v576_v23 = vadd.f32 %v575_v19, %v6930_v12  ;;  %v588_v24 = vadd.f32 %v587_v20, %v6928_v9  ;;  %2974 = vmatprep.mubr.f32.mxu1 %v6426_v0  ;;  %3063 = vmatprep.mubr.f32.mxu0 %v6426_v0  ;;  %v332_v14 = vcombine.high %v7016_v2, %v7016_v2 }
  0xf1   : > { %5646 = vtanh.f32 %v586_v15 }
  0xf2   : > { %5648 = vtanh.f32 %v574_v18  ;;  %v579_v27 = vpop.f32.mrb[2].mxu0  ;;  %v591_v28 = vpop.f32.mrb[2].mxu1 }
  0xf3   : > { %5650 = vtanh.f32 %v576_v23  ;;  %v592_v31 = vadd.f32 %v591_v28, %v6954_v25  ;;  %v580_v32 = vadd.f32 %v579_v27, %v6956_v26  ;;  %v581_v33 = vpop.f32.mrb[3].mxu0  ;;  %v593_v34 = vpop.f32.mrb[3].mxu1  ;;  %5344 = vmatmul.mubr.msk.f32.vlgmr.msra.gmra.mrb[108].mxu1 %vm337_vm1, %v6509_v10  ;;  %5350 = vmatmul.mubr.msk.f32.vlgmr.msra.gmra.mrb[108].mxu0 %vm337_vm1, %v6509_v10 }
  0xf4   : > { %5652 = vtanh.f32 %v588_v24  ;;  %v582_v35 = vadd.f32 %v581_v33, %v6956_v26  ;;  %v594_v36 = vadd.f32 %v593_v34, %v6954_v25  ;;  %5355 = vmatpush1.msk.msra.mxu1 %vm350_vm0, %v225_v5  ;;  %5361 = vmatpush1.msk.msra.mxu0 %vm350_vm0, %v226_v6 }
  0xf5   : > { %5654 = vtanh.f32 %v592_v31  ;;  %2980 = vmatprep.mubr.f32.mxu1 %v6426_v0  ;;  %3069 = vmatprep.mubr.f32.mxu0 %v6426_v0 }
  0xf6   : > { %5656 = vtanh.f32 %v580_v32  ;;  %v662_v37 = vpop.f32.mrb[4].mxu1  ;;  %v751_v38 = vpop.f32.mrb[4].mxu0  ;;  %5366 = vmatprep.subr.msk.mxu1 %vm350_vm0, %v329_v29  ;;  %5372 = vmatprep.subr.msk.mxu0 %vm350_vm0, %v330_v30 }
  0xf7   : > { %5658 = vtanh.f32 %v582_v35  ;;  %v663_v39 = vadd.f32 %v662_v37, %v6930_v12  ;;  %v752_v40 = vadd.f32 %v751_v38, %v6930_v12  ;;  %v664_v41 = vpop.f32.mrb[5].mxu1  ;;  %v753_v42 = vpop.f32.mrb[5].mxu0  ;;  %5345 = vmatmul.mubr.msk.f32.gmra.mrb[110].mxu1 %vm337_vm1, %v6531_v16  ;;  %5351 = vmatmul.mubr.msk.f32.gmra.mrb[110].mxu0 %vm337_vm1, %v6531_v16 }
  0xf8   : > { %5660 = vtanh.f32 %v594_v36  ;;  %v665_v43 = vadd.f32 %v664_v41, %v6930_v12  ;;  %v754_v44 = vadd.f32 %v753_v42, %v6930_v12  ;;  %2986 = vmatprep.mubr.f32.mxu1 %v6426_v0  ;;  %3075 = vmatprep.mubr.f32.mxu0 %v6426_v0 }
  0xf9   : > { %5662 = vtanh.f32 %v663_v39 }
  0xfa   : > { %5664 = vtanh.f32 %v752_v40  ;;  %v668_v45 = vpop.f32.mrb[6].mxu1  ;;  %v757_v46 = vpop.f32.mrb[6].mxu0 }
  0xfb   : > { %v5647_v47 = vpop.eup %5646  ;;  %5666 = vtanh.f32 %v665_v43  ;;  %v669_v48 = vadd.f32 %v668_v45, %v6956_v26  ;;  %v758_v49 = vadd.f32 %v757_v46, %v6956_v26  ;;  %v670_v50 = vpop.f32.mrb[7].mxu1  ;;  %5346 = vmatmul.mubr.msk.f32.gmra.mrb[112].mxu1 %vm337_vm1, %v6514_v11  ;;  %5352 = vmatmul.mubr.msk.f32.gmra.mrb[112].mxu0 %vm337_vm1, %v6514_v11 }
  0xfc   : > { %v759_v51 = vpop.f32.mrb[7].mxu0  ;;  %v5649_v52 = vpop.eup %5648  ;;  %4446 = vst [vmem:[%s6996_s24 + $0x4e0] sm:$0xff] %v5647_v47  ;;  %5668 = vtanh.f32 %v754_v44  ;;  %v671_v53 = vadd.f32 %v670_v50, %v6956_v26  ;;  %2992 = vmatprep.mubr.f32.mxu1 %v6426_v0  ;;  %3081 = vmatprep.mubr.f32.mxu0 %v6426_v0 }
  0xfd   : > { %v760_v54 = vadd.f32 %v759_v51, %v6956_v26  ;;  %v5651_v55 = vpop.eup %5650  ;;  %4290 = vst [vmem:[%s6996_s24] sm:$0xff] %v5649_v52  ;;  %5670 = vtanh.f32 %v669_v48 }
  0xfe   : > { %v5653_v56 = vpop.eup %5652  ;;  %4291 = vst [vmem:[%s6996_s24 + $0x8] sm:$0xff] %v5651_v55  ;;  %5672 = vtanh.f32 %v758_v49  ;;  %v674_v57 = vpop.f32.mrb[8].mxu1 }
  0xff   : > { %v763_v58 = vpop.f32.mrb[8].mxu0  ;;  %v5655_v59 = vpop.eup %5654  ;;  %4447 = vst [vmem:[%s6996_s24 + $0x4e8] sm:$0xff] %v5653_v56  ;;  %5674 = vtanh.f32 %v671_v53  ;;  %v675_v60 = vadd.f32 %v674_v57, %v6928_v9  ;;  %5347 = vmatmul.mubr.msk.f32.gmra.mrb[114].mxu1 %vm337_vm1, %v6536_v17  ;;  %5353 = vmatmul.mubr.msk.f32.gmra.mrb[114].mxu0 %vm337_vm1, %v6536_v17  ;;  %v7083_v57 = vld [vmem:[%s8283_s1 + $0x18] sm:$0xff] }
 0x100   : > { %v764_v61 = vadd.f32 %v763_v58, %v6928_v9  ;;  %v676_v62 = vpop.f32.mrb[9].mxu1  ;;  %v765_v63 = vpop.f32.mrb[9].mxu0  ;;  %4524 = vst [vmem:[%s6996_s24 + $0x750] sm:$0xff] %v5655_v59  ;;  %5676 = vtanh.f32 %v760_v54  ;;  %3152 = vmatprep.mubr.f32.mxu1 %v6426_v0  ;;  %3241 = vmatprep.mubr.f32.mxu0 %v6426_v0  ;;  %v7090_v58 = vld [vmem:[%s6501_s7 + $0x118] sm:$0xff]  ;;  %v7093_v59 = vld [vmem:[%s6501_s7 + $0x120] sm:$0xff] }
 0x101   : > { %v5657_v3 = vpop.eup %5656  ;;  %v677_v4 = vadd.f32 %v676_v62, %v6928_v9  ;;  %v766_v5 = vadd.f32 %v765_v63, %v6928_v9  ;;  %5678 = vtanh.f32 %v675_v60 }
 0x102   : > { %v5659_v6 = vpop.eup %5658  ;;  %4368 = vst [vmem:[%s6996_s24 + $0x270] sm:$0xff] %v5657_v3  ;;  %5680 = vtanh.f32 %v764_v61  ;;  %v680_v7 = vpop.f32.mrb[10].mxu1 }
 0x103   : > { %v5661_v17 = vpop.eup %5660  ;;  %4369 = vst [vmem:[%s6996_s24 + $0x278] sm:$0xff] %v5659_v6  ;;  %v769_v8 = vpop.f32.mrb[10].mxu0  ;;  %5682 = vtanh.f32 %v677_v4  ;;  %v681_v18 = vadd.f32 %v680_v7, %v6954_v25  ;;  %5356 = vmatmul.mubr.msk.f32.vlgmr.msra.gmra.mrb[116].mxu1 %vm337_vm1, %v6509_v10  ;;  %5362 = vmatmul.mubr.msk.f32.vlgmr.msra.gmra.mrb[116].mxu0 %vm337_vm1, %v6509_v10  ;;  %v333_v6 = vcombine.high %v7090_v58, %v7090_v58 }
 0x104   : > { %v5663_v15 = vpop.eup %5662  ;;  %4525 = vst [vmem:[%s6996_s24 + $0x758] sm:$0xff] %v5661_v17  ;;  %v770_v19 = vadd.f32 %v769_v8, %v6954_v25  ;;  %v682_v20 = vpop.f32.mrb[11].mxu1  ;;  %5684 = vtanh.f32 %v766_v5  ;;  %5367 = vmatpush1.msk.msra.mxu1 %vm350_vm0, %v6945_v21  ;;  %5373 = vmatpush1.msk.msra.mxu0 %vm350_vm0, %v6948_v22  ;;  %v334_v17 = vcombine.high %v7093_v59, %v7093_v59 }
 0x105   : > { %v771_v23 = vpop.f32.mrb[11].mxu0  ;;  %v5665_v24 = vpop.eup %5664  ;;  %4292 = vst [vmem:[%s6996_s24 + $0x10] sm:$0xff] %v5663_v15  ;;  %v683_v27 = vadd.f32 %v682_v20, %v6954_v25  ;;  %5686 = vtanh.f32 %v681_v18  ;;  %3158 = vmatprep.mubr.f32.mxu1 %v6426_v0  ;;  %3247 = vmatprep.mubr.f32.mxu0 %v6426_v0  ;;  %v7112_v18 = vld [vmem:[%s8283_s1] sm:$0xff] }
 0x106   : > { %v772_v28 = vadd.f32 %v771_v23, %v6954_v25  ;;  %v5667_v29 = vpop.eup %5666  ;;  %4294 = vst [vmem:[%s6996_s24 + $0x20] sm:$0xff] %v5665_v24  ;;  %5688 = vtanh.f32 %v770_v19  ;;  %v840_v30 = vpop.f32.mrb[12].mxu1  ;;  %5378 = vmatprep.subr.msk.mxu1 %vm350_vm0, %v331_v13  ;;  %5384 = vmatprep.subr.msk.mxu0 %vm350_vm0, %v332_v14 }
 0x107   : > { %v5669_v10 = vpop.eup %5668  ;;  %4293 = vst [vmem:[%s6996_s24 + $0x18] sm:$0xff] %v5667_v29  ;;  %v929_v31 = vpop.f32.mrb[12].mxu0  ;;  %5690 = vtanh.f32 %v683_v27  ;;  %v841_v22 = vadd.f32 %v840_v30, %v6930_v12  ;;  %5357 = vmatmul.mubr.msk.f32.gmra.mrb[118].mxu1 %vm337_vm1, %v6531_v16  ;;  %5363 = vmatmul.mubr.msk.f32.gmra.mrb[118].mxu0 %vm337_vm1, %v6531_v16 }
 0x108   : > { %v5671_v21 = vpop.eup %5670  ;;  %4295 = vst [vmem:[%s6996_s24 + $0x28] sm:$0xff] %v5669_v10  ;;  %v930_v32 = vadd.f32 %v929_v31, %v6930_v12  ;;  %v842_v33 = vpop.f32.mrb[13].mxu1  ;;  %5692 = vtanh.f32 %v772_v28  ;;  %3164 = vmatprep.mubr.f32.mxu1 %v6426_v0  ;;  %3253 = vmatprep.mubr.f32.mxu0 %v6426_v0 }
 0x109   : > { %v931_v34 = vpop.f32.mrb[13].mxu0  ;;  %v5673_v35 = vpop.eup %5672  ;;  %4370 = vst [vmem:[%s6996_s24 + $0x280] sm:$0xff] %v5671_v21  ;;  %v843_v36 = vadd.f32 %v842_v33, %v6930_v12  ;;  %5694 = vtanh.f32 %v841_v22  ;;  %v7137_v21 = vld [vmem:[%s8283_s1 + $0x8] sm:$0xff] }
 0x10a   : > { %v932_v37 = vadd.f32 %v931_v34, %v6930_v12  ;;  %v5675_v38 = vpop.eup %5674  ;;  %4372 = vst [vmem:[%s6996_s24 + $0x290] sm:$0xff] %v5673_v35  ;;  %5696 = vtanh.f32 %v930_v32  ;;  %v846_v16 = vpop.f32.mrb[14].mxu1 }
 0x10b   : > { %v5677_v39 = vpop.eup %5676  ;;  %4371 = vst [vmem:[%s6996_s24 + $0x288] sm:$0xff] %v5675_v38  ;;  %v935_v40 = vpop.f32.mrb[14].mxu0  ;;  %5698 = vtanh.f32 %v843_v36  ;;  %v847_v42 = vadd.f32 %v846_v16, %v6956_v26  ;;  %5358 = vmatmul.mubr.msk.f32.gmra.mrb[120].mxu1 %vm337_vm1, %v6514_v11  ;;  %5364 = vmatmul.mubr.msk.f32.gmra.mrb[120].mxu0 %vm337_vm1, %v6514_v11 }
 0x10c   : > { %v5679_v41 = vpop.eup %5678  ;;  %4373 = vst [vmem:[%s6996_s24 + $0x298] sm:$0xff] %v5677_v39  ;;  %v936_v43 = vadd.f32 %v935_v40, %v6956_v26  ;;  %v848_v44 = vpop.f32.mrb[15].mxu1  ;;  %5700 = vtanh.f32 %v932_v37  ;;  %3170 = vmatprep.mubr.f32.mxu1 %v6426_v0  ;;  %3259 = vmatprep.mubr.f32.mxu0 %v6426_v0 }
 0x10d   : > { %v937_v45 = vpop.f32.mrb[15].mxu0  ;;  %v5681_v46 = vpop.eup %5680  ;;  %4448 = vst [vmem:[%s6996_s24 + $0x4f0] sm:$0xff] %v5679_v41  ;;  %v849_v47 = vadd.f32 %v848_v44, %v6956_v26  ;;  %5702 = vtanh.f32 %v847_v42  ;;  %v7156_v42 = vld [vmem:[%s8283_s1 + $0x10] sm:$0xff] }
 0x10e   : > { %v938_v48 = vadd.f32 %v937_v45, %v6956_v26  ;;  %v5683_v49 = vpop.eup %5682  ;;  %4450 = vst [vmem:[%s6996_s24 + $0x500] sm:$0xff] %v5681_v46  ;;  %5704 = vtanh.f32 %v936_v43  ;;  %v852_v11 = vpop.f32.mrb[16].mxu1 }
 0x10f   : > { %v5685_v50 = vpop.eup %5684  ;;  %4449 = vst [vmem:[%s6996_s24 + $0x4f8] sm:$0xff] %v5683_v49  ;;  %v941_v51 = vpop.f32.mrb[16].mxu0  ;;  %5706 = vtanh.f32 %v849_v47  ;;  %v853_v53 = vadd.f32 %v852_v11, %v6928_v9  ;;  %5359 = vmatmul.mubr.msk.f32.gmra.mrb[122].mxu1 %vm337_vm1, %v7083_v57  ;;  %5365 = vmatmul.mubr.msk.f32.gmra.mrb[122].mxu0 %vm337_vm1, %v7083_v57 }
 0x110   : > { %v5687_v52 = vpop.eup %5686  ;;  %4451 = vst [vmem:[%s6996_s24 + $0x508] sm:$0xff] %v5685_v50  ;;  %v942_v54 = vadd.f32 %v941_v51, %v6928_v9  ;;  %v854_v55 = vpop.f32.mrb[17].mxu1  ;;  %5708 = vtanh.f32 %v938_v48  ;;  %3330 = vmatprep.mubr.f32.mxu1 %v6426_v0  ;;  %3419 = vmatprep.mubr.f32.mxu0 %v6426_v0 }
 0x111   : > { %v943_v56 = vpop.f32.mrb[17].mxu0  ;;  %v5689_v60 = vpop.eup %5688  ;;  %4526 = vst [vmem:[%s6996_s24 + $0x760] sm:$0xff] %v5687_v52  ;;  %v855_v61 = vadd.f32 %v854_v55, %v6928_v9  ;;  %5710 = vtanh.f32 %v853_v53  ;;  %v7180_v55 = vld [vmem:[%s6501_s7 + $0x130] sm:$0xff] }
 0x112   : > { %v944_v62 = vadd.f32 %v943_v56, %v6928_v9  ;;  %v5691_v63 = vpop.eup %5690  ;;  %4528 = vst [vmem:[%s6996_s24 + $0x770] sm:$0xff] %v5689_v60  ;;  %5712 = vtanh.f32 %v942_v54  ;;  %v858_v4 = vpop.f32.mrb[18].mxu1  ;;  %v7177_v54 = vld [vmem:[%s6501_s7 + $0x128] sm:$0xff]  ;;  %s5441_s7 = smul.u32 (%p6475_p4), 624, %s6463_s15 }
 0x113   : > { %v5693_v3 = vpop.eup %5692  ;;  %4527 = vst [vmem:[%s6996_s24 + $0x768] sm:$0xff] %v5691_v63  ;;  %v947_v5 = vpop.f32.mrb[18].mxu0  ;;  %5714 = vtanh.f32 %v855_v61  ;;  %v859_v8 = vadd.f32 %v858_v4, %v6954_v25  ;;  %5368 = vmatmul.mubr.msk.f32.vlgmr.msra.gmra.mrb[124].mxu1 %vm337_vm1, %v7112_v18  ;;  %5374 = vmatmul.mubr.msk.f32.vlgmr.msra.gmra.mrb[124].mxu0 %vm337_vm1, %v7112_v18 }
 0x114   : > { %v5695_v7 = vpop.eup %5694  ;;  %4529 = vst [vmem:[%s6996_s24 + $0x778] sm:$0xff] %v5693_v3  ;;  %v948_v13 = vadd.f32 %v947_v5, %v6954_v25  ;;  %v860_v14 = vpop.f32.mrb[19].mxu1  ;;  %5716 = vtanh.f32 %v944_v62  ;;  %5379 = vmatpush1.msk.msra.mxu1 %vm350_vm0, %v7013_v1  ;;  %5385 = vmatpush1.msk.msra.mxu0 %vm350_vm0, %v7016_v2  ;;  %v335_v5 = vcombine.high %v7177_v54, %v7177_v54  ;;  %s7813_s10 = scalar_lea.vmem (%p6475_p4), %s8285_s3, %s5441_s7  }
 0x115   : > { %v949_v15 = vpop.f32.mrb[19].mxu0  ;;  %v5697_v19 = vpop.eup %5696  ;;  %4296 = vst [vmem:[%s6996_s24 + $0x30] sm:$0xff] %v5695_v7  ;;  %v861_v20 = vadd.f32 %v860_v14, %v6954_v25  ;;  %5718 = vtanh.f32 %v859_v8  ;;  %3336 = vmatprep.mubr.f32.mxu1 %v6426_v0  ;;  %3425 = vmatprep.mubr.f32.mxu0 %v6426_v0 }
 0x116   : > { %v950_v23 = vadd.f32 %v949_v15, %v6954_v25  ;;  %v5699_v24 = vpop.eup %5698  ;;  %4298 = vst [vmem:[%s6996_s24 + $0x40] sm:$0xff] %v5697_v19  ;;  %5720 = vtanh.f32 %v948_v13  ;;  %v1018_v28 = vpop.f32.mrb[20].mxu1  ;;  %5390 = vmatprep.subr.msk.mxu1 %vm350_vm0, %v333_v6  ;;  %5396 = vmatprep.subr.msk.mxu0 %vm350_vm0, %v334_v17  ;;  %v336_v6 = vcombine.high %v7180_v55, %v7180_v55 }
 0x117   : > { %v5701_v27 = vpop.eup %5700  ;;  %4297 = vst [vmem:[%s6996_s24 + $0x38] sm:$0xff] %v5699_v24  ;;  %v1107_v29 = vpop.f32.mrb[20].mxu0  ;;  %5722 = vtanh.f32 %v861_v20  ;;  %v1019_v2 = vadd.f32 %v1018_v28, %v6930_v12  ;;  %5369 = vmatmul.mubr.msk.f32.gmra.mrb[126].mxu1 %vm337_vm1, %v7137_v21  ;;  %5375 = vmatmul.mubr.msk.f32.gmra.mrb[126].mxu0 %vm337_vm1, %v7137_v21 }
 0x118   : > { %v5703_v1 = vpop.eup %5702  ;;  %4299 = vst [vmem:[%s6996_s24 + $0x48] sm:$0xff] %v5701_v27  ;;  %v1108_v10 = vadd.f32 %v1107_v29, %v6930_v12  ;;  %v1020_v30 = vpop.f32.mrb[21].mxu1  ;;  %5724 = vtanh.f32 %v950_v23  ;;  %3342 = vmatprep.mubr.f32.mxu1 %v6426_v0  ;;  %3431 = vmatprep.mubr.f32.mxu0 %v6426_v0 }
 0x119   : > { %v1109_v31 = vpop.f32.mrb[21].mxu0  ;;  %v5705_v22 = vpop.eup %5704  ;;  %4374 = vst [vmem:[%s6996_s24 + $0x2a0] sm:$0xff] %v5703_v1  ;;  %v1021_v32 = vadd.f32 %v1020_v30, %v6930_v12  ;;  %5726 = vtanh.f32 %v1019_v2 }
 0x11a   : > { %v1110_v33 = vadd.f32 %v1109_v31, %v6930_v12  ;;  %v5707_v34 = vpop.eup %5706  ;;  %4376 = vst [vmem:[%s6996_s24 + $0x2b0] sm:$0xff] %v5705_v22  ;;  %5728 = vtanh.f32 %v1108_v10  ;;  %v1024_v36 = vpop.f32.mrb[22].mxu1 }
 0x11b   : > { %v5709_v35 = vpop.eup %5708  ;;  %4375 = vst [vmem:[%s6996_s24 + $0x2a8] sm:$0xff] %v5707_v34  ;;  %v1113_v37 = vpop.f32.mrb[22].mxu0  ;;  %5730 = vtanh.f32 %v1021_v32  ;;  %v1025_v39 = vadd.f32 %v1024_v36, %v6956_v26  ;;  %5370 = vmatmul.mubr.msk.f32.gmra.mrb[128].mxu1 %vm337_vm1, %v7156_v42  ;;  %5376 = vmatmul.mubr.msk.f32.gmra.mrb[128].mxu0 %vm337_vm1, %v7156_v42 }
 0x11c   : > { %v5711_v38 = vpop.eup %5710  ;;  %4377 = vst [vmem:[%s6996_s24 + $0x2b8] sm:$0xff] %v5709_v35  ;;  %v1114_v16 = vadd.f32 %v1113_v37, %v6956_v26  ;;  %v1026_v40 = vpop.f32.mrb[23].mxu1  ;;  %5732 = vtanh.f32 %v1110_v33  ;;  %3348 = vmatprep.mubr.f32.mxu1 %v6426_v0  ;;  %3437 = vmatprep.mubr.f32.mxu0 %v6426_v0 }
 0x11d   : > { %v1115_v41 = vpop.f32.mrb[23].mxu0  ;;  %v5713_v43 = vpop.eup %5712  ;;  %4452 = vst [vmem:[%s6996_s24 + $0x510] sm:$0xff] %v5711_v38  ;;  %v1027_v44 = vadd.f32 %v1026_v40, %v6956_v26  ;;  %5734 = vtanh.f32 %v1025_v39 }
 0x11e   : > { %v1116_v45 = vadd.f32 %v1115_v41, %v6956_v26  ;;  %v5715_v46 = vpop.eup %5714  ;;  %4454 = vst [vmem:[%s6996_s24 + $0x520] sm:$0xff] %v5713_v43  ;;  %5736 = vtanh.f32 %v1114_v16  ;;  %v1030_v48 = vpop.f32.mrb[24].mxu1 }
 0x11f   : > { %v5717_v47 = vpop.eup %5716  ;;  %4453 = vst [vmem:[%s6996_s24 + $0x518] sm:$0xff] %v5715_v46  ;;  %v1119_v49 = vpop.f32.mrb[24].mxu0  ;;  %5738 = vtanh.f32 %v1027_v44  ;;  %v1031_v11 = vadd.f32 %v1030_v48, %v6928_v9  ;;  %5371 = vmatmul.mubr.msk.f32.gmra.mrb[130].mxu1 %vm337_vm1, %v7083_v57  ;;  %5377 = vmatmul.mubr.msk.f32.gmra.mrb[130].mxu0 %vm337_vm1, %v7083_v57 }
 0x120   : > { %v5719_v50 = vpop.eup %5718  ;;  %4455 = vst [vmem:[%s6996_s24 + $0x528] sm:$0xff] %v5717_v47  ;;  %v1120_v51 = vadd.f32 %v1119_v49, %v6928_v9  ;;  %v1032_v52 = vpop.f32.mrb[25].mxu1  ;;  %5740 = vtanh.f32 %v1116_v45  ;;  %3508 = vmatprep.mubr.f32.mxu1 %v6426_v0  ;;  %3597 = vmatprep.mubr.f32.mxu0 %v6426_v0 }
 0x121   : > { %v1121_v53 = vpop.f32.mrb[25].mxu0  ;;  %v5721_v56 = vpop.eup %5720  ;;  %4530 = vst [vmem:[%s6996_s24 + $0x780] sm:$0xff] %v5719_v50  ;;  %v1033_v60 = vadd.f32 %v1032_v52, %v6928_v9  ;;  %5742 = vtanh.f32 %v1031_v11 }
 0x122   : > { %v1122_v61 = vadd.f32 %v1121_v53, %v6928_v9  ;;  %v5723_v62 = vpop.eup %5722  ;;  %4532 = vst [vmem:[%s6996_s24 + $0x790] sm:$0xff] %v5721_v56  ;;  %5744 = vtanh.f32 %v1120_v51  ;;  %v1036_v3 = vpop.f32.mrb[26].mxu1 }
 0x123   : > { %v5725_v63 = vpop.eup %5724  ;;  %4531 = vst [vmem:[%s6996_s24 + $0x788] sm:$0xff] %v5723_v62  ;;  %v1125_v4 = vpop.f32.mrb[26].mxu0  ;;  %5746 = vtanh.f32 %v1033_v60  ;;  %v1037_v7 = vadd.f32 %v1036_v3, %v6954_v25  ;;  %5380 = vmatmul.mubr.msk.f32.vlgmr.msra.gmra.mrb[132].mxu1 %vm337_vm1, %v7112_v18  ;;  %5386 = vmatmul.mubr.msk.f32.vlgmr.msra.gmra.mrb[132].mxu0 %vm337_vm1, %v7112_v18 }
 0x124   : > { %v5727_v17 = vpop.eup %5726  ;;  %4533 = vst [vmem:[%s6996_s24 + $0x798] sm:$0xff] %v5725_v63  ;;  %v1126_v8 = vadd.f32 %v1125_v4, %v6954_v25  ;;  %v1038_v13 = vpop.f32.mrb[27].mxu1  ;;  %5748 = vtanh.f32 %v1122_v61  ;;  %5391 = vmatpush1.msk.msra.mxu1 %vm350_vm0, %v7090_v58  ;;  %5397 = vmatpush1.msk.msra.mxu0 %vm350_vm0, %v7093_v59 }
 0x125   : > { %v1127_v14 = vpop.f32.mrb[27].mxu0  ;;  %v5729_v15 = vpop.eup %5728  ;;  %4300 = vst [vmem:[%s6996_s24 + $0x50] sm:$0xff] %v5727_v17  ;;  %v1039_v19 = vadd.f32 %v1038_v13, %v6954_v25  ;;  %5750 = vtanh.f32 %v1037_v7  ;;  %3514 = vmatprep.mubr.f32.mxu1 %v6426_v0  ;;  %3603 = vmatprep.mubr.f32.mxu0 %v6426_v0 }
 0x126   : > { %v1128_v20 = vadd.f32 %v1127_v14, %v6954_v25  ;;  %v5731_v23 = vpop.eup %5730  ;;  %4302 = vst [vmem:[%s6996_s24 + $0x60] sm:$0xff] %v5729_v15  ;;  %5752 = vtanh.f32 %v1126_v8  ;;  %v1196_v27 = vpop.f32.mrb[28].mxu1  ;;  %5402 = vmatprep.subr.msk.mxu1 %vm350_vm0, %v335_v5  ;;  %5408 = vmatprep.subr.msk.mxu0 %vm350_vm0, %v336_v6 }
 0x127   : > { %v5733_v24 = vpop.eup %5732  ;;  %4301 = vst [vmem:[%s6996_s24 + $0x58] sm:$0xff] %v5731_v23  ;;  %v1285_v28 = vpop.f32.mrb[28].mxu0  ;;  %5754 = vtanh.f32 %v1039_v19  ;;  %v1197_v59 = vadd.f32 %v1196_v27, %v6930_v12  ;;  %5381 = vmatmul.mubr.msk.f32.gmra.mrb[134].mxu1 %vm337_vm1, %v7137_v21  ;;  %5387 = vmatmul.mubr.msk.f32.gmra.mrb[134].mxu0 %vm337_vm1, %v7137_v21 }
 0x128   : > { %v5735_v58 = vpop.eup %5734  ;;  %4303 = vst [vmem:[%s6996_s24 + $0x68] sm:$0xff] %v5733_v24  ;;  %v1286_v29 = vadd.f32 %v1285_v28, %v6930_v12  ;;  %v1198_v1 = vpop.f32.mrb[29].mxu1  ;;  %5756 = vtanh.f32 %v1128_v20  ;;  %3520 = vmatprep.mubr.f32.mxu1 %v6426_v0  ;;  %3609 = vmatprep.mubr.f32.mxu0 %v6426_v0 }
 0x129   : > { %v1287_v2 = vpop.f32.mrb[29].mxu0  ;;  %v5737_v10 = vpop.eup %5736  ;;  %4378 = vst [vmem:[%s6996_s24 + $0x2c0] sm:$0xff] %v5735_v58  ;;  %v1199_v30 = vadd.f32 %v1198_v1, %v6930_v12  ;;  %5758 = vtanh.f32 %v1197_v59 }
 0x12a   : > { %v1288_v31 = vadd.f32 %v1287_v2, %v6930_v12  ;;  %v5739_v22 = vpop.eup %5738  ;;  %4380 = vst [vmem:[%s6996_s24 + $0x2d0] sm:$0xff] %v5737_v10  ;;  %5760 = vtanh.f32 %v1286_v29  ;;  %v1202_v33 = vpop.f32.mrb[30].mxu1 }
 0x12b   : > { %v5741_v32 = vpop.eup %5740  ;;  %4379 = vst [vmem:[%s6996_s24 + $0x2c8] sm:$0xff] %v5739_v22  ;;  %v1291_v34 = vpop.f32.mrb[30].mxu0  ;;  %5762 = vtanh.f32 %v1199_v30  ;;  %v1203_v36 = vadd.f32 %v1202_v33, %v6956_v26  ;;  %5382 = vmatmul.mubr.msk.f32.gmra.mrb[136].mxu1 %vm337_vm1, %v7156_v42  ;;  %5388 = vmatmul.mubr.msk.f32.gmra.mrb[136].mxu0 %vm337_vm1, %v7156_v42 }
 0x12c   : > { %v5743_v35 = vpop.eup %5742  ;;  %4381 = vst [vmem:[%s6996_s24 + $0x2d8] sm:$0xff] %v5741_v32  ;;  %v1292_v37 = vadd.f32 %v1291_v34, %v6956_v26  ;;  %v1204_v38 = vpop.f32.mrb[31].mxu1  ;;  %5764 = vtanh.f32 %v1288_v31  ;;  %3526 = vmatprep.mubr.f32.mxu1 %v6426_v0  ;;  %3615 = vmatprep.mubr.f32.mxu0 %v6426_v0 }
 0x12d   : > { %v1293_v39 = vpop.f32.mrb[31].mxu0  ;;  %v5745_v16 = vpop.eup %5744  ;;  %4456 = vst [vmem:[%s6996_s24 + $0x530] sm:$0xff] %v5743_v35  ;;  %v1205_v40 = vadd.f32 %v1204_v38, %v6956_v26  ;;  %5766 = vtanh.f32 %v1203_v36 }
 0x12e   : > { %v1294_v41 = vadd.f32 %v1293_v39, %v6956_v26  ;;  %v5747_v43 = vpop.eup %5746  ;;  %4458 = vst [vmem:[%s6996_s24 + $0x540] sm:$0xff] %v5745_v16  ;;  %5768 = vtanh.f32 %v1292_v37  ;;  %v1208_v45 = vpop.f32.mrb[32].mxu1 }
 0x12f   : > { %v5749_v44 = vpop.eup %5748  ;;  %4457 = vst [vmem:[%s6996_s24 + $0x538] sm:$0xff] %v5747_v43  ;;  %v1297_v46 = vpop.f32.mrb[32].mxu0  ;;  %5770 = vtanh.f32 %v1205_v40  ;;  %v1209_v48 = vadd.f32 %v1208_v45, %v6928_v9  ;;  %5383 = vmatmul.mubr.msk.f32.gmra.mrb[138].mxu1 %vm337_vm1, %v7083_v57  ;;  %5389 = vmatmul.mubr.msk.f32.gmra.mrb[138].mxu0 %vm337_vm1, %v7083_v57 }
 0x130   : > { %v5751_v47 = vpop.eup %5750  ;;  %4459 = vst [vmem:[%s6996_s24 + $0x548] sm:$0xff] %v5749_v44  ;;  %v1298_v49 = vadd.f32 %v1297_v46, %v6928_v9  ;;  %v1210_v50 = vpop.f32.mrb[33].mxu1  ;;  %5772 = vtanh.f32 %v1294_v41  ;;  %3686 = vmatprep.mubr.f32.mxu1 %v6426_v0  ;;  %3775 = vmatprep.mubr.f32.mxu0 %v6426_v0 }
 0x131   : > { %v1299_v11 = vpop.f32.mrb[33].mxu0  ;;  %v5753_v51 = vpop.eup %5752  ;;  %4534 = vst [vmem:[%s6996_s24 + $0x7a0] sm:$0xff] %v5751_v47  ;;  %v1211_v52 = vadd.f32 %v1210_v50, %v6928_v9  ;;  %5774 = vtanh.f32 %v1209_v48 }
 0x132   : > { %v1300_v53 = vadd.f32 %v1299_v11, %v6928_v9  ;;  %v5755_v56 = vpop.eup %5754  ;;  %4536 = vst [vmem:[%s6996_s24 + $0x7b0] sm:$0xff] %v5753_v51  ;;  %5776 = vtanh.f32 %v1298_v49  ;;  %v1214_v61 = vpop.f32.mrb[34].mxu1 }
 0x133   : > { %v5757_v60 = vpop.eup %5756  ;;  %4535 = vst [vmem:[%s6996_s24 + $0x7a8] sm:$0xff] %v5755_v56  ;;  %v1303_v62 = vpop.f32.mrb[34].mxu0  ;;  %5778 = vtanh.f32 %v1211_v52  ;;  %v1215_v3 = vadd.f32 %v1214_v61, %v6954_v25  ;;  %5392 = vmatmul.mubr.msk.f32.vlgmr.msra.gmra.mrb[140].mxu1 %vm337_vm1, %v7112_v18  ;;  %5398 = vmatmul.mubr.msk.f32.vlgmr.msra.gmra.mrb[140].mxu0 %vm337_vm1, %v7112_v18 }
 0x134   : > { %v5759_v63 = vpop.eup %5758  ;;  %4537 = vst [vmem:[%s6996_s24 + $0x7b8] sm:$0xff] %v5757_v60  ;;  %v1304_v4 = vadd.f32 %v1303_v62, %v6954_v25  ;;  %v1216_v5 = vpop.f32.mrb[35].mxu1  ;;  %5780 = vtanh.f32 %v1300_v53  ;;  %5403 = vmatpush1.msk.msra.mxu1 %vm350_vm0, %v7177_v54  ;;  %5409 = vmatpush1.msk.msra.mxu0 %vm350_vm0, %v7180_v55 }
 0x135   : > { %v1305_v6 = vpop.f32.mrb[35].mxu0  ;;  %v5761_v17 = vpop.eup %5760  ;;  %4304 = vst [vmem:[%s6996_s24 + $0x70] sm:$0xff] %v5759_v63  ;;  %v1217_v7 = vadd.f32 %v1216_v5, %v6954_v25  ;;  %5782 = vtanh.f32 %v1215_v3  ;;  %3692 = vmatprep.mubr.f32.mxu1 %v6426_v0  ;;  %3781 = vmatprep.mubr.f32.mxu0 %v6426_v0 }
 0x136   : > { %v1306_v8 = vadd.f32 %v1305_v6, %v6954_v25  ;;  %v5763_v13 = vpop.eup %5762  ;;  %4306 = vst [vmem:[%s6996_s24 + $0x80] sm:$0xff] %v5761_v17  ;;  %5784 = vtanh.f32 %v1304_v4  ;;  %v1374_v15 = vpop.f32.mrb[36].mxu1 }
 0x137   : > { %v5765_v14 = vpop.eup %5764  ;;  %4305 = vst [vmem:[%s6996_s24 + $0x78] sm:$0xff] %v5763_v13  ;;  %v1463_v19 = vpop.f32.mrb[36].mxu0  ;;  %5786 = vtanh.f32 %v1217_v7  ;;  %v1375_v54 = vadd.f32 %v1374_v15, %v6930_v12  ;;  %5393 = vmatmul.mubr.msk.f32.gmra.mrb[142].mxu1 %vm337_vm1, %v7137_v21  ;;  %5399 = vmatmul.mubr.msk.f32.gmra.mrb[142].mxu0 %vm337_vm1, %v7137_v21 }
 0x138   : > { %v5767_v20 = vpop.eup %5766  ;;  %4307 = vst [vmem:[%s6996_s24 + $0x88] sm:$0xff] %v5765_v14  ;;  %v1464_v55 = vadd.f32 %v1463_v19, %v6930_v12  ;;  %v1376_v23 = vpop.f32.mrb[37].mxu1  ;;  %5788 = vtanh.f32 %v1306_v8  ;;  %3698 = vmatprep.mubr.f32.mxu1 %v6426_v0  ;;  %3787 = vmatprep.mubr.f32.mxu0 %v6426_v0 }
 0x139   : > { %v1465_v24 = vpop.f32.mrb[37].mxu0  ;;  %v5769_v27 = vpop.eup %5768  ;;  %4382 = vst [vmem:[%s6996_s24 + $0x2e0] sm:$0xff] %v5767_v20  ;;  %v1377_v28 = vadd.f32 %v1376_v23, %v6930_v12  ;;  %5790 = vtanh.f32 %v1375_v54 }
 0x13a   : > { %v1466_v58 = vadd.f32 %v1465_v24, %v6930_v12  ;;  %v5771_v59 = vpop.eup %5770  ;;  %4384 = vst [vmem:[%s6996_s24 + $0x2f0] sm:$0xff] %v5769_v27  ;;  %5792 = vtanh.f32 %v1464_v55  ;;  %v1380_v1 = vpop.f32.mrb[38].mxu1 }
 0x13b   : > { %v5773_v29 = vpop.eup %5772  ;;  %4383 = vst [vmem:[%s6996_s24 + $0x2e8] sm:$0xff] %v5771_v59  ;;  %v1469_v2 = vpop.f32.mrb[38].mxu0  ;;  %5794 = vtanh.f32 %v1377_v28  ;;  %v1381_v30 = vadd.f32 %v1380_v1, %v6956_v26  ;;  %5394 = vmatmul.mubr.msk.f32.gmra.mrb[144].mxu1 %vm337_vm1, %v7156_v42  ;;  %5400 = vmatmul.mubr.msk.f32.gmra.mrb[144].mxu0 %vm337_vm1, %v7156_v42 }
 0x13c   : > { %v5775_v10 = vpop.eup %5774  ;;  %4385 = vst [vmem:[%s6996_s24 + $0x2f8] sm:$0xff] %v5773_v29  ;;  %v1470_v31 = vadd.f32 %v1469_v2, %v6956_v26  ;;  %v1382_v22 = vpop.f32.mrb[39].mxu1  ;;  %5796 = vtanh.f32 %v1466_v58  ;;  %3704 = vmatprep.mubr.f32.mxu1 %v6426_v0  ;;  %3793 = vmatprep.mubr.f32.mxu0 %v6426_v0 }
 0x13d   : > { %v1471_v32 = vpop.f32.mrb[39].mxu0  ;;  %v5777_v33 = vpop.eup %5776  ;;  %4460 = vst [vmem:[%s6996_s24 + $0x550] sm:$0xff] %v5775_v10  ;;  %v1383_v34 = vadd.f32 %v1382_v22, %v6956_v26  ;;  %5798 = vtanh.f32 %v1381_v30 }
 0x13e   : > { %v1472_v35 = vadd.f32 %v1471_v32, %v6956_v26  ;;  %v5779_v36 = vpop.eup %5778  ;;  %4462 = vst [vmem:[%s6996_s24 + $0x560] sm:$0xff] %v5777_v33  ;;  %5800 = vtanh.f32 %v1470_v31  ;;  %v1386_v38 = vpop.f32.mrb[40].mxu1 }
 0x13f   : > { %v5781_v37 = vpop.eup %5780  ;;  %4461 = vst [vmem:[%s6996_s24 + $0x558] sm:$0xff] %v5779_v36  ;;  %v1475_v39 = vpop.f32.mrb[40].mxu0  ;;  %5802 = vtanh.f32 %v1383_v34  ;;  %v1387_v40 = vadd.f32 %v1386_v38, %v6928_v9  ;;  %5395 = vmatmul.mubr.msk.f32.gmra.mrb[146].mxu1 %vm337_vm1, %v7083_v57  ;;  %5401 = vmatmul.mubr.msk.f32.gmra.mrb[146].mxu0 %vm337_vm1, %v7083_v57 }
 0x140   : > { %v5783_v16 = vpop.eup %5782  ;;  %4463 = vst [vmem:[%s6996_s24 + $0x568] sm:$0xff] %v5781_v37  ;;  %v1476_v41 = vadd.f32 %v1475_v39, %v6928_v9  ;;  %v1388_v43 = vpop.f32.mrb[41].mxu1  ;;  %5804 = vtanh.f32 %v1472_v35  ;;  %3864 = vmatprep.mubr.f32.mxu1 %v6426_v0  ;;  %3953 = vmatprep.mubr.f32.mxu0 %v6426_v0 }
 0x141   : > { %v1477_v44 = vpop.f32.mrb[41].mxu0  ;;  %v5785_v45 = vpop.eup %5784  ;;  %4538 = vst [vmem:[%s6996_s24 + $0x7c0] sm:$0xff] %v5783_v16  ;;  %v1389_v46 = vadd.f32 %v1388_v43, %v6928_v9  ;;  %5806 = vtanh.f32 %v1387_v40 }
 0x142   : > { %v1478_v47 = vadd.f32 %v1477_v44, %v6928_v9  ;;  %v5787_v48 = vpop.eup %5786  ;;  %4540 = vst [vmem:[%s6996_s24 + $0x7d0] sm:$0xff] %v5785_v45  ;;  %5808 = vtanh.f32 %v1476_v41  ;;  %v1392_v50 = vpop.f32.mrb[42].mxu1 }
 0x143   : > { %v5789_v49 = vpop.eup %5788  ;;  %4539 = vst [vmem:[%s6996_s24 + $0x7c8] sm:$0xff] %v5787_v48  ;;  %v1481_v11 = vpop.f32.mrb[42].mxu0  ;;  %5810 = vtanh.f32 %v1389_v46  ;;  %v1393_v52 = vadd.f32 %v1392_v50, %v6954_v25  ;;  %5404 = vmatmul.mubr.msk.f32.vlgmr.msra.gmra.mrb[148].mxu1 %vm337_vm1, %v7112_v18  ;;  %5410 = vmatmul.mubr.msk.f32.vlgmr.msra.gmra.mrb[148].mxu0 %vm337_vm1, %v7112_v18 }
 0x144   : > { %v5791_v51 = vpop.eup %5790  ;;  %4541 = vst [vmem:[%s6996_s24 + $0x7d8] sm:$0xff] %v5789_v49  ;;  %v1482_v53 = vadd.f32 %v1481_v11, %v6954_v25  ;;  %v1394_v56 = vpop.f32.mrb[43].mxu1  ;;  %5812 = vtanh.f32 %v1478_v47  ;;  %3870 = vmatprep.mubr.f32.mxu1 %v6426_v0  ;;  %3959 = vmatprep.mubr.f32.mxu0 %v6426_v0 }
 0x145   : > { %v1483_v60 = vpop.f32.mrb[43].mxu0  ;;  %v5793_v61 = vpop.eup %5792  ;;  %4308 = vst [vmem:[%s6996_s24 + $0x90] sm:$0xff] %v5791_v51  ;;  %v1395_v62 = vadd.f32 %v1394_v56, %v6954_v25  ;;  %5814 = vtanh.f32 %v1393_v52 }
 0x146   : > { %v1484_v63 = vadd.f32 %v1483_v60, %v6954_v25  ;;  %v5795_v3 = vpop.eup %5794  ;;  %4310 = vst [vmem:[%s6996_s24 + $0xa0] sm:$0xff] %v5793_v61  ;;  %5816 = vtanh.f32 %v1482_v53  ;;  %v1552_v18 = vpop.f32.mrb[44].mxu1 }
 0x147   : > { %v5797_v4 = vpop.eup %5796  ;;  %4309 = vst [vmem:[%s6996_s24 + $0x98] sm:$0xff] %v5795_v3  ;;  %v1641_v5 = vpop.f32.mrb[44].mxu0  ;;  %5818 = vtanh.f32 %v1395_v62  ;;  %v1553_v17 = vadd.f32 %v1552_v18, %v6930_v12  ;;  %5405 = vmatmul.mubr.msk.f32.gmra.mrb[150].mxu1 %vm337_vm1, %v7137_v21  ;;  %5411 = vmatmul.mubr.msk.f32.gmra.mrb[150].mxu0 %vm337_vm1, %v7137_v21 }
 0x148   : > { %v5799_v6 = vpop.eup %5798  ;;  %4311 = vst [vmem:[%s6996_s24 + $0xa8] sm:$0xff] %v5797_v4  ;;  %v1642_v7 = vadd.f32 %v1641_v5, %v6930_v12  ;;  %v1554_v8 = vpop.f32.mrb[45].mxu1  ;;  %5820 = vtanh.f32 %v1484_v63  ;;  %3876 = vmatprep.mubr.f32.mxu1 %v6426_v0  ;;  %3965 = vmatprep.mubr.f32.mxu0 %v6426_v0 }
 0x149   : > { %v1643_v13 = vpop.f32.mrb[45].mxu0  ;;  %v5801_v14 = vpop.eup %5800  ;;  %4386 = vst [vmem:[%s6996_s24 + $0x300] sm:$0xff] %v5799_v6  ;;  %v1555_v15 = vadd.f32 %v1554_v8, %v6930_v12  ;;  %5822 = vtanh.f32 %v1553_v17 }
 0x14a   : > { %v1644_v19 = vadd.f32 %v1643_v13, %v6930_v12  ;;  %v5803_v20 = vpop.eup %5802  ;;  %4388 = vst [vmem:[%s6996_s24 + $0x310] sm:$0xff] %v5801_v14  ;;  %5824 = vtanh.f32 %v1642_v7  ;;  %v1558_v21 = vpop.f32.mrb[46].mxu1 }
 0x14b   : > { %v5805_v54 = vpop.eup %5804  ;;  %4387 = vst [vmem:[%s6996_s24 + $0x308] sm:$0xff] %v5803_v20  ;;  %v1647_v55 = vpop.f32.mrb[46].mxu0  ;;  %5826 = vtanh.f32 %v1555_v15  ;;  %v1559_v24 = vadd.f32 %v1558_v21, %v6956_v26  ;;  %5406 = vmatmul.mubr.msk.f32.gmra.mrb[152].mxu1 %vm337_vm1, %v7156_v42  ;;  %5412 = vmatmul.mubr.msk.f32.gmra.mrb[152].mxu0 %vm337_vm1, %v7156_v42 }
 0x14c   : > { %v5807_v23 = vpop.eup %5806  ;;  %4389 = vst [vmem:[%s6996_s24 + $0x318] sm:$0xff] %v5805_v54  ;;  %v1648_v27 = vadd.f32 %v1647_v55, %v6956_v26  ;;  %v1560_v28 = vpop.f32.mrb[47].mxu1  ;;  %5828 = vtanh.f32 %v1644_v19  ;;  %3882 = vmatprep.mubr.f32.mxu1 %v6426_v0  ;;  %3971 = vmatprep.mubr.f32.mxu0 %v6426_v0 }
 0x14d   : > { %v1649_v58 = vpop.f32.mrb[47].mxu0  ;;  %v5809_v59 = vpop.eup %5808  ;;  %4464 = vst [vmem:[%s6996_s24 + $0x570] sm:$0xff] %v5807_v23  ;;  %v1561_v29 = vadd.f32 %v1560_v28, %v6956_v26  ;;  %5830 = vtanh.f32 %v1559_v24 }
 0x14e   : > { %v1650_v1 = vadd.f32 %v1649_v58, %v6956_v26  ;;  %v5811_v2 = vpop.eup %5810  ;;  %4466 = vst [vmem:[%s6996_s24 + $0x580] sm:$0xff] %v5809_v59  ;;  %5832 = vtanh.f32 %v1648_v27  ;;  %v1564_v42 = vpop.f32.mrb[48].mxu1 }
 0x14f   : > { %v5813_v10 = vpop.eup %5812  ;;  %4465 = vst [vmem:[%s6996_s24 + $0x578] sm:$0xff] %v5811_v2  ;;  %v1653_v30 = vpop.f32.mrb[48].mxu0  ;;  %5834 = vtanh.f32 %v1561_v29  ;;  %v1565_v22 = vadd.f32 %v1564_v42, %v6928_v9  ;;  %5407 = vmatmul.mubr.msk.f32.gmra.mrb[154].mxu1 %vm337_vm1, %v7083_v57  ;;  %5413 = vmatmul.mubr.msk.f32.gmra.mrb[154].mxu0 %vm337_vm1, %v7083_v57 }
 0x150   : > { %v5815_v31 = vpop.eup %5814  ;;  %4467 = vst [vmem:[%s6996_s24 + $0x588] sm:$0xff] %v5813_v10  ;;  %v1654_v32 = vadd.f32 %v1653_v30, %v6928_v9  ;;  %v1566_v33 = vpop.f32.mrb[49].mxu1  ;;  %5836 = vtanh.f32 %v1650_v1 }
 0x151   : > { %v1655_v0 = vpop.f32.mrb[49].mxu0  ;;  %v5817_v34 = vpop.eup %5816  ;;  %4542 = vst [vmem:[%s6996_s24 + $0x7e0] sm:$0xff] %v5815_v31  ;;  %v1567_v35 = vadd.f32 %v1566_v33, %v6928_v9  ;;  %5838 = vtanh.f32 %v1565_v22 }
 0x152   : > { %v1656_v36 = vadd.f32 %v1655_v0, %v6928_v9  ;;  %v5819_v37 = vpop.eup %5818  ;;  %4544 = vst [vmem:[%s6996_s24 + $0x7f0] sm:$0xff] %v5817_v34  ;;  %5840 = vtanh.f32 %v1654_v32  ;;  %v1570_v39 = vpop.f32.mrb[50].mxu1 }
 0x153   : > { %v5821_v38 = vpop.eup %5820  ;;  %4543 = vst [vmem:[%s6996_s24 + $0x7e8] sm:$0xff] %v5819_v37  ;;  %v1659_v16 = vpop.f32.mrb[50].mxu0  ;;  %5842 = vtanh.f32 %v1567_v35  ;;  %v1571_v57 = vadd.f32 %v1570_v39, %v6954_v25 }
 0x154   : > { %v5823_v40 = vpop.eup %5822  ;;  %4545 = vst [vmem:[%s6996_s24 + $0x7f8] sm:$0xff] %v5821_v38  ;;  %v1660_v41 = vadd.f32 %v1659_v16, %v6954_v25  ;;  %v1572_v43 = vpop.f32.mrb[51].mxu1  ;;  %5844 = vtanh.f32 %v1656_v36 }
 0x155   : > { %v1661_v44 = vpop.f32.mrb[51].mxu0  ;;  %v5825_v45 = vpop.eup %5824  ;;  %4312 = vst [vmem:[%s6996_s24 + $0xb0] sm:$0xff] %v5823_v40  ;;  %v1573_v46 = vadd.f32 %v1572_v43, %v6954_v25  ;;  %5846 = vtanh.f32 %v1571_v57 }
 0x156   : > { %v1662_v47 = vadd.f32 %v1661_v44, %v6954_v25  ;;  %v5827_v48 = vpop.eup %5826  ;;  %4314 = vst [vmem:[%s6996_s24 + $0xc0] sm:$0xff] %v5825_v45  ;;  %5848 = vtanh.f32 %v1660_v41  ;;  %v1730_v50 = vpop.f32.mrb[52].mxu1 }
 0x157   : > { %v5829_v49 = vpop.eup %5828  ;;  %4313 = vst [vmem:[%s6996_s24 + $0xb8] sm:$0xff] %v5827_v48  ;;  %v1819_v11 = vpop.f32.mrb[52].mxu0  ;;  %5850 = vtanh.f32 %v1573_v46  ;;  %v1731_v52 = vadd.f32 %v1730_v50, %v6930_v12 }
 0x158   : > { %v5831_v51 = vpop.eup %5830  ;;  %4315 = vst [vmem:[%s6996_s24 + $0xc8] sm:$0xff] %v5829_v49  ;;  %v1820_v53 = vadd.f32 %v1819_v11, %v6930_v12  ;;  %v1732_v56 = vpop.f32.mrb[53].mxu1  ;;  %5852 = vtanh.f32 %v1662_v47 }
 0x159   : > { %v1821_v60 = vpop.f32.mrb[53].mxu0  ;;  %v5833_v61 = vpop.eup %5832  ;;  %4390 = vst [vmem:[%s6996_s24 + $0x320] sm:$0xff] %v5831_v51  ;;  %v1733_v62 = vadd.f32 %v1732_v56, %v6930_v12  ;;  %5854 = vtanh.f32 %v1731_v52 }
 0x15a   : > { %v1822_v63 = vadd.f32 %v1821_v60, %v6930_v12  ;;  %v5835_v3 = vpop.eup %5834  ;;  %4392 = vst [vmem:[%s6996_s24 + $0x330] sm:$0xff] %v5833_v61  ;;  %5856 = vtanh.f32 %v1820_v53  ;;  %v1736_v18 = vpop.f32.mrb[54].mxu1 }
 0x15b   : > { %v5837_v4 = vpop.eup %5836  ;;  %4391 = vst [vmem:[%s6996_s24 + $0x328] sm:$0xff] %v5835_v3  ;;  %v1825_v5 = vpop.f32.mrb[54].mxu0  ;;  %5858 = vtanh.f32 %v1733_v62  ;;  %v1737_v17 = vadd.f32 %v1736_v18, %v6956_v26 }
 0x15c   : > { %v5839_v6 = vpop.eup %5838  ;;  %4393 = vst [vmem:[%s6996_s24 + $0x338] sm:$0xff] %v5837_v4  ;;  %v1826_v7 = vadd.f32 %v1825_v5, %v6956_v26  ;;  %v1738_v8 = vpop.f32.mrb[55].mxu1  ;;  %5860 = vtanh.f32 %v1822_v63 }
 0x15d   : > { %v1827_v13 = vpop.f32.mrb[55].mxu0  ;;  %v5841_v14 = vpop.eup %5840  ;;  %4468 = vst [vmem:[%s6996_s24 + $0x590] sm:$0xff] %v5839_v6  ;;  %v1739_v15 = vadd.f32 %v1738_v8, %v6956_v26  ;;  %5862 = vtanh.f32 %v1737_v17 }
 0x15e   : > { %v1828_v19 = vadd.f32 %v1827_v13, %v6956_v26  ;;  %v5843_v20 = vpop.eup %5842  ;;  %4470 = vst [vmem:[%s6996_s24 + $0x5a0] sm:$0xff] %v5841_v14  ;;  %5864 = vtanh.f32 %v1826_v7  ;;  %v1742_v21 = vpop.f32.mrb[56].mxu1 }
 0x15f   : > { %v5845_v54 = vpop.eup %5844  ;;  %4469 = vst [vmem:[%s6996_s24 + $0x598] sm:$0xff] %v5843_v20  ;;  %v1831_v55 = vpop.f32.mrb[56].mxu0  ;;  %5866 = vtanh.f32 %v1739_v15  ;;  %v1743_v24 = vadd.f32 %v1742_v21, %v6928_v9 }
 0x160   : > { %v5847_v23 = vpop.eup %5846  ;;  %4471 = vst [vmem:[%s6996_s24 + $0x5a8] sm:$0xff] %v5845_v54  ;;  %v1832_v27 = vadd.f32 %v1831_v55, %v6928_v9  ;;  %v1744_v28 = vpop.f32.mrb[57].mxu1  ;;  %5868 = vtanh.f32 %v1828_v19 }
 0x161   : > { %v1833_v58 = vpop.f32.mrb[57].mxu0  ;;  %v5849_v59 = vpop.eup %5848  ;;  %4546 = vst [vmem:[%s6996_s24 + $0x800] sm:$0xff] %v5847_v23  ;;  %v1745_v29 = vadd.f32 %v1744_v28, %v6928_v9  ;;  %5870 = vtanh.f32 %v1743_v24 }
 0x162   : > { %v1834_v1 = vadd.f32 %v1833_v58, %v6928_v9  ;;  %v5851_v2 = vpop.eup %5850  ;;  %4548 = vst [vmem:[%s6996_s24 + $0x810] sm:$0xff] %v5849_v59  ;;  %5872 = vtanh.f32 %v1832_v27  ;;  %v1748_v42 = vpop.f32.mrb[58].mxu1 }
 0x163   : > { %v5853_v10 = vpop.eup %5852  ;;  %4547 = vst [vmem:[%s6996_s24 + $0x808] sm:$0xff] %v5851_v2  ;;  %v1837_v30 = vpop.f32.mrb[58].mxu0  ;;  %5874 = vtanh.f32 %v1745_v29  ;;  %v1749_v22 = vadd.f32 %v1748_v42, %v6954_v25 }
 0x164   : > { %v5855_v31 = vpop.eup %5854  ;;  %4549 = vst [vmem:[%s6996_s24 + $0x818] sm:$0xff] %v5853_v10  ;;  %v1838_v32 = vadd.f32 %v1837_v30, %v6954_v25  ;;  %v1750_v33 = vpop.f32.mrb[59].mxu1  ;;  %5876 = vtanh.f32 %v1834_v1 }
 0x165   : > { %v1839_v0 = vpop.f32.mrb[59].mxu0  ;;  %v5857_v34 = vpop.eup %5856  ;;  %4316 = vst [vmem:[%s6996_s24 + $0xd0] sm:$0xff] %v5855_v31  ;;  %v1751_v35 = vadd.f32 %v1750_v33, %v6954_v25  ;;  %5878 = vtanh.f32 %v1749_v22 }
 0x166   : > { %v1840_v36 = vadd.f32 %v1839_v0, %v6954_v25  ;;  %v5859_v37 = vpop.eup %5858  ;;  %4318 = vst [vmem:[%s6996_s24 + $0xe0] sm:$0xff] %v5857_v34  ;;  %5880 = vtanh.f32 %v1838_v32  ;;  %v1908_v39 = vpop.f32.mrb[60].mxu1 }
 0x167   : > { %v5861_v38 = vpop.eup %5860  ;;  %4317 = vst [vmem:[%s6996_s24 + $0xd8] sm:$0xff] %v5859_v37  ;;  %v1997_v16 = vpop.f32.mrb[60].mxu0  ;;  %5882 = vtanh.f32 %v1751_v35  ;;  %v1909_v57 = vadd.f32 %v1908_v39, %v6930_v12 }
 0x168   : > { %v5863_v40 = vpop.eup %5862  ;;  %4319 = vst [vmem:[%s6996_s24 + $0xe8] sm:$0xff] %v5861_v38  ;;  %v1998_v41 = vadd.f32 %v1997_v16, %v6930_v12  ;;  %v1910_v43 = vpop.f32.mrb[61].mxu1  ;;  %5884 = vtanh.f32 %v1840_v36 }
 0x169   : > { %v1999_v44 = vpop.f32.mrb[61].mxu0  ;;  %v5865_v45 = vpop.eup %5864  ;;  %4394 = vst [vmem:[%s6996_s24 + $0x340] sm:$0xff] %v5863_v40  ;;  %v1911_v46 = vadd.f32 %v1910_v43, %v6930_v12  ;;  %5886 = vtanh.f32 %v1909_v57 }
 0x16a   : > { %v2000_v47 = vadd.f32 %v1999_v44, %v6930_v12  ;;  %v5867_v48 = vpop.eup %5866  ;;  %4396 = vst [vmem:[%s6996_s24 + $0x350] sm:$0xff] %v5865_v45  ;;  %5888 = vtanh.f32 %v1998_v41  ;;  %v1914_v50 = vpop.f32.mrb[62].mxu1 }
 0x16b   : > { %v5869_v49 = vpop.eup %5868  ;;  %4395 = vst [vmem:[%s6996_s24 + $0x348] sm:$0xff] %v5867_v48  ;;  %v2003_v11 = vpop.f32.mrb[62].mxu0  ;;  %5890 = vtanh.f32 %v1911_v46  ;;  %v1915_v52 = vadd.f32 %v1914_v50, %v6956_v26 }
 0x16c   : > { %v5871_v51 = vpop.eup %5870  ;;  %4397 = vst [vmem:[%s6996_s24 + $0x358] sm:$0xff] %v5869_v49  ;;  %v2004_v53 = vadd.f32 %v2003_v11, %v6956_v26  ;;  %v1916_v56 = vpop.f32.mrb[63].mxu1  ;;  %5892 = vtanh.f32 %v2000_v47 }
 0x16d   : > { %v2005_v60 = vpop.f32.mrb[63].mxu0  ;;  %v5873_v61 = vpop.eup %5872  ;;  %4472 = vst [vmem:[%s6996_s24 + $0x5b0] sm:$0xff] %v5871_v51  ;;  %v1917_v62 = vadd.f32 %v1916_v56, %v6956_v26  ;;  %5894 = vtanh.f32 %v1915_v52 }
 0x16e   : > { %v2006_v63 = vadd.f32 %v2005_v60, %v6956_v26  ;;  %v5875_v3 = vpop.eup %5874  ;;  %4474 = vst [vmem:[%s6996_s24 + $0x5c0] sm:$0xff] %v5873_v61  ;;  %5896 = vtanh.f32 %v2004_v53  ;;  %v1920_v18 = vpop.f32.mrb[64].mxu1 }
 0x16f   : > { %v5877_v4 = vpop.eup %5876  ;;  %4473 = vst [vmem:[%s6996_s24 + $0x5b8] sm:$0xff] %v5875_v3  ;;  %v2009_v5 = vpop.f32.mrb[64].mxu0  ;;  %5898 = vtanh.f32 %v1917_v62  ;;  %v1921_v17 = vadd.f32 %v1920_v18, %v6928_v9 }
 0x170   : > { %v5879_v6 = vpop.eup %5878  ;;  %4475 = vst [vmem:[%s6996_s24 + $0x5c8] sm:$0xff] %v5877_v4  ;;  %v2010_v7 = vadd.f32 %v2009_v5, %v6928_v9  ;;  %v1922_v8 = vpop.f32.mrb[65].mxu1  ;;  %5900 = vtanh.f32 %v2006_v63 }
 0x171   : > { %v2011_v13 = vpop.f32.mrb[65].mxu0  ;;  %v5881_v14 = vpop.eup %5880  ;;  %4550 = vst [vmem:[%s6996_s24 + $0x820] sm:$0xff] %v5879_v6  ;;  %v1923_v15 = vadd.f32 %v1922_v8, %v6928_v9  ;;  %5902 = vtanh.f32 %v1921_v17 }
 0x172   : > { %v2012_v19 = vadd.f32 %v2011_v13, %v6928_v9  ;;  %v5883_v20 = vpop.eup %5882  ;;  %4552 = vst [vmem:[%s6996_s24 + $0x830] sm:$0xff] %v5881_v14  ;;  %5904 = vtanh.f32 %v2010_v7  ;;  %v1926_v21 = vpop.f32.mrb[66].mxu1 }
 0x173   : > { %v5885_v54 = vpop.eup %5884  ;;  %4551 = vst [vmem:[%s6996_s24 + $0x828] sm:$0xff] %v5883_v20  ;;  %v2015_v55 = vpop.f32.mrb[66].mxu0  ;;  %5906 = vtanh.f32 %v1923_v15  ;;  %v1927_v24 = vadd.f32 %v1926_v21, %v6954_v25 }
 0x174   : > { %v5887_v23 = vpop.eup %5886  ;;  %4553 = vst [vmem:[%s6996_s24 + $0x838] sm:$0xff] %v5885_v54  ;;  %v2016_v27 = vadd.f32 %v2015_v55, %v6954_v25  ;;  %v1928_v28 = vpop.f32.mrb[67].mxu1  ;;  %5908 = vtanh.f32 %v2012_v19 }
 0x175   : > { %v2017_v58 = vpop.f32.mrb[67].mxu0  ;;  %v5889_v59 = vpop.eup %5888  ;;  %4320 = vst [vmem:[%s6996_s24 + $0xf0] sm:$0xff] %v5887_v23  ;;  %v1929_v29 = vadd.f32 %v1928_v28, %v6954_v25  ;;  %5910 = vtanh.f32 %v1927_v24 }
 0x176   : > { %v2018_v1 = vadd.f32 %v2017_v58, %v6954_v25  ;;  %v5891_v2 = vpop.eup %5890  ;;  %4322 = vst [vmem:[%s6996_s24 + $0x100] sm:$0xff] %v5889_v59  ;;  %5912 = vtanh.f32 %v2016_v27  ;;  %v2086_v42 = vpop.f32.mrb[68].mxu1 }
 0x177   : > { %v5893_v10 = vpop.eup %5892  ;;  %4321 = vst [vmem:[%s6996_s24 + $0xf8] sm:$0xff] %v5891_v2  ;;  %v2175_v30 = vpop.f32.mrb[68].mxu0  ;;  %5914 = vtanh.f32 %v1929_v29  ;;  %v2087_v22 = vadd.f32 %v2086_v42, %v6930_v12 }
 0x178   : > { %v5895_v31 = vpop.eup %5894  ;;  %4323 = vst [vmem:[%s6996_s24 + $0x108] sm:$0xff] %v5893_v10  ;;  %v2176_v32 = vadd.f32 %v2175_v30, %v6930_v12  ;;  %v2088_v33 = vpop.f32.mrb[69].mxu1  ;;  %5916 = vtanh.f32 %v2018_v1 }
 0x179   : > { %v2177_v0 = vpop.f32.mrb[69].mxu0  ;;  %v5897_v34 = vpop.eup %5896  ;;  %4398 = vst [vmem:[%s6996_s24 + $0x360] sm:$0xff] %v5895_v31  ;;  %v2089_v35 = vadd.f32 %v2088_v33, %v6930_v12  ;;  %5918 = vtanh.f32 %v2087_v22 }
 0x17a   : > { %v2178_v36 = vadd.f32 %v2177_v0, %v6930_v12  ;;  %v5899_v37 = vpop.eup %5898  ;;  %4400 = vst [vmem:[%s6996_s24 + $0x370] sm:$0xff] %v5897_v34  ;;  %5920 = vtanh.f32 %v2176_v32  ;;  %v2092_v39 = vpop.f32.mrb[70].mxu1 }
 0x17b   : > { %v5901_v38 = vpop.eup %5900  ;;  %4399 = vst [vmem:[%s6996_s24 + $0x368] sm:$0xff] %v5899_v37  ;;  %v2181_v16 = vpop.f32.mrb[70].mxu0  ;;  %5922 = vtanh.f32 %v2089_v35  ;;  %v2093_v57 = vadd.f32 %v2092_v39, %v6956_v26 }
 0x17c   : > { %v5903_v40 = vpop.eup %5902  ;;  %4401 = vst [vmem:[%s6996_s24 + $0x378] sm:$0xff] %v5901_v38  ;;  %v2182_v41 = vadd.f32 %v2181_v16, %v6956_v26  ;;  %v2094_v43 = vpop.f32.mrb[71].mxu1  ;;  %5924 = vtanh.f32 %v2178_v36 }
 0x17d   : > { %v2183_v44 = vpop.f32.mrb[71].mxu0  ;;  %v5905_v45 = vpop.eup %5904  ;;  %4476 = vst [vmem:[%s6996_s24 + $0x5d0] sm:$0xff] %v5903_v40  ;;  %v2095_v46 = vadd.f32 %v2094_v43, %v6956_v26  ;;  %5926 = vtanh.f32 %v2093_v57 }
 0x17e   : > { %v2184_v47 = vadd.f32 %v2183_v44, %v6956_v26  ;;  %v5907_v48 = vpop.eup %5906  ;;  %4478 = vst [vmem:[%s6996_s24 + $0x5e0] sm:$0xff] %v5905_v45  ;;  %5928 = vtanh.f32 %v2182_v41  ;;  %v2098_v50 = vpop.f32.mrb[72].mxu1 }
 0x17f   : > { %v5909_v49 = vpop.eup %5908  ;;  %4477 = vst [vmem:[%s6996_s24 + $0x5d8] sm:$0xff] %v5907_v48  ;;  %v2187_v11 = vpop.f32.mrb[72].mxu0  ;;  %5930 = vtanh.f32 %v2095_v46  ;;  %v2099_v52 = vadd.f32 %v2098_v50, %v6928_v9 }
 0x180   : > { %v5911_v51 = vpop.eup %5910  ;;  %4479 = vst [vmem:[%s6996_s24 + $0x5e8] sm:$0xff] %v5909_v49  ;;  %v2188_v53 = vadd.f32 %v2187_v11, %v6928_v9  ;;  %v2100_v56 = vpop.f32.mrb[73].mxu1  ;;  %5932 = vtanh.f32 %v2184_v47 }
 0x181   : > { %v2189_v60 = vpop.f32.mrb[73].mxu0  ;;  %v5913_v61 = vpop.eup %5912  ;;  %4554 = vst [vmem:[%s6996_s24 + $0x840] sm:$0xff] %v5911_v51  ;;  %v2101_v62 = vadd.f32 %v2100_v56, %v6928_v9  ;;  %5934 = vtanh.f32 %v2099_v52 }
 0x182   : > { %v2190_v63 = vadd.f32 %v2189_v60, %v6928_v9  ;;  %v5915_v3 = vpop.eup %5914  ;;  %4556 = vst [vmem:[%s6996_s24 + $0x850] sm:$0xff] %v5913_v61  ;;  %5936 = vtanh.f32 %v2188_v53  ;;  %v2104_v18 = vpop.f32.mrb[74].mxu1 }
 0x183   : > { %v5917_v4 = vpop.eup %5916  ;;  %4555 = vst [vmem:[%s6996_s24 + $0x848] sm:$0xff] %v5915_v3  ;;  %v2193_v5 = vpop.f32.mrb[74].mxu0  ;;  %5938 = vtanh.f32 %v2101_v62  ;;  %v2105_v17 = vadd.f32 %v2104_v18, %v6954_v25 }
 0x184   : > { %v5919_v6 = vpop.eup %5918  ;;  %4557 = vst [vmem:[%s6996_s24 + $0x858] sm:$0xff] %v5917_v4  ;;  %v2194_v7 = vadd.f32 %v2193_v5, %v6954_v25  ;;  %v2106_v8 = vpop.f32.mrb[75].mxu1  ;;  %5940 = vtanh.f32 %v2190_v63 }
 0x185   : > { %v2195_v13 = vpop.f32.mrb[75].mxu0  ;;  %v5921_v14 = vpop.eup %5920  ;;  %4324 = vst [vmem:[%s6996_s24 + $0x110] sm:$0xff] %v5919_v6  ;;  %v2107_v15 = vadd.f32 %v2106_v8, %v6954_v25  ;;  %5942 = vtanh.f32 %v2105_v17 }
 0x186   : > { %v2196_v19 = vadd.f32 %v2195_v13, %v6954_v25  ;;  %v5923_v20 = vpop.eup %5922  ;;  %4326 = vst [vmem:[%s6996_s24 + $0x120] sm:$0xff] %v5921_v14  ;;  %5944 = vtanh.f32 %v2194_v7  ;;  %v2264_v21 = vpop.f32.mrb[76].mxu1 }
 0x187   : > { %v5925_v54 = vpop.eup %5924  ;;  %4325 = vst [vmem:[%s6996_s24 + $0x118] sm:$0xff] %v5923_v20  ;;  %v2353_v55 = vpop.f32.mrb[76].mxu0  ;;  %5946 = vtanh.f32 %v2107_v15  ;;  %v2265_v24 = vadd.f32 %v2264_v21, %v6930_v12 }
 0x188   : > { %v5927_v23 = vpop.eup %5926  ;;  %4327 = vst [vmem:[%s6996_s24 + $0x128] sm:$0xff] %v5925_v54  ;;  %v2354_v27 = vadd.f32 %v2353_v55, %v6930_v12  ;;  %v2266_v28 = vpop.f32.mrb[77].mxu1  ;;  %5948 = vtanh.f32 %v2196_v19 }
 0x189   : > { %v2355_v58 = vpop.f32.mrb[77].mxu0  ;;  %v5929_v59 = vpop.eup %5928  ;;  %4402 = vst [vmem:[%s6996_s24 + $0x380] sm:$0xff] %v5927_v23  ;;  %v2267_v29 = vadd.f32 %v2266_v28, %v6930_v12  ;;  %5950 = vtanh.f32 %v2265_v24 }
 0x18a   : > { %v2356_v1 = vadd.f32 %v2355_v58, %v6930_v12  ;;  %v5931_v2 = vpop.eup %5930  ;;  %4404 = vst [vmem:[%s6996_s24 + $0x390] sm:$0xff] %v5929_v59  ;;  %5952 = vtanh.f32 %v2354_v27  ;;  %v2270_v42 = vpop.f32.mrb[78].mxu1 }
 0x18b   : > { %v5933_v10 = vpop.eup %5932  ;;  %4403 = vst [vmem:[%s6996_s24 + $0x388] sm:$0xff] %v5931_v2  ;;  %v2359_v30 = vpop.f32.mrb[78].mxu0  ;;  %5954 = vtanh.f32 %v2267_v29  ;;  %v2271_v22 = vadd.f32 %v2270_v42, %v6956_v26 }
 0x18c   : > { %v5935_v31 = vpop.eup %5934  ;;  %4405 = vst [vmem:[%s6996_s24 + $0x398] sm:$0xff] %v5933_v10  ;;  %v2360_v32 = vadd.f32 %v2359_v30, %v6956_v26  ;;  %v2272_v33 = vpop.f32.mrb[79].mxu1  ;;  %5956 = vtanh.f32 %v2356_v1 }
 0x18d   : > { %v2361_v0 = vpop.f32.mrb[79].mxu0  ;;  %v5937_v34 = vpop.eup %5936  ;;  %4480 = vst [vmem:[%s6996_s24 + $0x5f0] sm:$0xff] %v5935_v31  ;;  %v2273_v35 = vadd.f32 %v2272_v33, %v6956_v26  ;;  %5958 = vtanh.f32 %v2271_v22 }
 0x18e   : > { %v2362_v36 = vadd.f32 %v2361_v0, %v6956_v26  ;;  %v5939_v37 = vpop.eup %5938  ;;  %4482 = vst [vmem:[%s6996_s24 + $0x600] sm:$0xff] %v5937_v34  ;;  %5960 = vtanh.f32 %v2360_v32  ;;  %v2276_v39 = vpop.f32.mrb[80].mxu1 }
 0x18f   : > { %v5941_v38 = vpop.eup %5940  ;;  %4481 = vst [vmem:[%s6996_s24 + $0x5f8] sm:$0xff] %v5939_v37  ;;  %v2365_v16 = vpop.f32.mrb[80].mxu0  ;;  %5962 = vtanh.f32 %v2273_v35  ;;  %v2277_v57 = vadd.f32 %v2276_v39, %v6928_v9 }
 0x190   : > { %v5943_v40 = vpop.eup %5942  ;;  %4483 = vst [vmem:[%s6996_s24 + $0x608] sm:$0xff] %v5941_v38  ;;  %v2366_v41 = vadd.f32 %v2365_v16, %v6928_v9  ;;  %v2278_v43 = vpop.f32.mrb[81].mxu1  ;;  %5964 = vtanh.f32 %v2362_v36 }
 0x191   : > { %v2367_v44 = vpop.f32.mrb[81].mxu0  ;;  %v5945_v45 = vpop.eup %5944  ;;  %4558 = vst [vmem:[%s6996_s24 + $0x860] sm:$0xff] %v5943_v40  ;;  %v2279_v46 = vadd.f32 %v2278_v43, %v6928_v9  ;;  %5966 = vtanh.f32 %v2277_v57 }
 0x192   : > { %v2368_v47 = vadd.f32 %v2367_v44, %v6928_v9  ;;  %v5947_v48 = vpop.eup %5946  ;;  %4560 = vst [vmem:[%s6996_s24 + $0x870] sm:$0xff] %v5945_v45  ;;  %5968 = vtanh.f32 %v2366_v41  ;;  %v2282_v50 = vpop.f32.mrb[82].mxu1 }
 0x193   : > { %v5949_v49 = vpop.eup %5948  ;;  %4559 = vst [vmem:[%s6996_s24 + $0x868] sm:$0xff] %v5947_v48  ;;  %v2371_v11 = vpop.f32.mrb[82].mxu0  ;;  %5970 = vtanh.f32 %v2279_v46  ;;  %v2283_v52 = vadd.f32 %v2282_v50, %v6954_v25 }
 0x194   : > { %v5951_v51 = vpop.eup %5950  ;;  %4561 = vst [vmem:[%s6996_s24 + $0x878] sm:$0xff] %v5949_v49  ;;  %v2372_v53 = vadd.f32 %v2371_v11, %v6954_v25  ;;  %v2284_v56 = vpop.f32.mrb[83].mxu1  ;;  %5972 = vtanh.f32 %v2368_v47 }
 0x195   : > { %v2373_v60 = vpop.f32.mrb[83].mxu0  ;;  %v5953_v61 = vpop.eup %5952  ;;  %4328 = vst [vmem:[%s6996_s24 + $0x130] sm:$0xff] %v5951_v51  ;;  %v2285_v62 = vadd.f32 %v2284_v56, %v6954_v25  ;;  %5974 = vtanh.f32 %v2283_v52 }
 0x196   : > { %v2374_v63 = vadd.f32 %v2373_v60, %v6954_v25  ;;  %v5955_v3 = vpop.eup %5954  ;;  %4330 = vst [vmem:[%s6996_s24 + $0x140] sm:$0xff] %v5953_v61  ;;  %5976 = vtanh.f32 %v2372_v53  ;;  %v2442_v18 = vpop.f32.mrb[84].mxu1 }
 0x197   : > { %v5957_v4 = vpop.eup %5956  ;;  %4329 = vst [vmem:[%s6996_s24 + $0x138] sm:$0xff] %v5955_v3  ;;  %v2531_v5 = vpop.f32.mrb[84].mxu0  ;;  %5978 = vtanh.f32 %v2285_v62  ;;  %v2443_v17 = vadd.f32 %v2442_v18, %v6930_v12 }
 0x198   : > { %v5959_v6 = vpop.eup %5958  ;;  %4331 = vst [vmem:[%s6996_s24 + $0x148] sm:$0xff] %v5957_v4  ;;  %v2532_v7 = vadd.f32 %v2531_v5, %v6930_v12  ;;  %v2444_v8 = vpop.f32.mrb[85].mxu1  ;;  %5980 = vtanh.f32 %v2374_v63 }
 0x199   : > { %v2533_v13 = vpop.f32.mrb[85].mxu0  ;;  %v5961_v14 = vpop.eup %5960  ;;  %4406 = vst [vmem:[%s6996_s24 + $0x3a0] sm:$0xff] %v5959_v6  ;;  %v2445_v15 = vadd.f32 %v2444_v8, %v6930_v12  ;;  %5982 = vtanh.f32 %v2443_v17 }
 0x19a   : > { %v2534_v19 = vadd.f32 %v2533_v13, %v6930_v12  ;;  %v5963_v20 = vpop.eup %5962  ;;  %4408 = vst [vmem:[%s6996_s24 + $0x3b0] sm:$0xff] %v5961_v14  ;;  %5984 = vtanh.f32 %v2532_v7  ;;  %v2448_v21 = vpop.f32.mrb[86].mxu1 }
 0x19b   : > { %v5965_v54 = vpop.eup %5964  ;;  %4407 = vst [vmem:[%s6996_s24 + $0x3a8] sm:$0xff] %v5963_v20  ;;  %v2537_v55 = vpop.f32.mrb[86].mxu0  ;;  %5986 = vtanh.f32 %v2445_v15  ;;  %v2449_v24 = vadd.f32 %v2448_v21, %v6956_v26 }
 0x19c   : > { %v5967_v23 = vpop.eup %5966  ;;  %4409 = vst [vmem:[%s6996_s24 + $0x3b8] sm:$0xff] %v5965_v54  ;;  %v2538_v27 = vadd.f32 %v2537_v55, %v6956_v26  ;;  %v2450_v28 = vpop.f32.mrb[87].mxu1  ;;  %5988 = vtanh.f32 %v2534_v19 }
 0x19d   : > { %v2539_v58 = vpop.f32.mrb[87].mxu0  ;;  %v5969_v59 = vpop.eup %5968  ;;  %4484 = vst [vmem:[%s6996_s24 + $0x610] sm:$0xff] %v5967_v23  ;;  %v2451_v29 = vadd.f32 %v2450_v28, %v6956_v26  ;;  %5990 = vtanh.f32 %v2449_v24 }
 0x19e   : > { %v2540_v1 = vadd.f32 %v2539_v58, %v6956_v26  ;;  %v5971_v2 = vpop.eup %5970  ;;  %4486 = vst [vmem:[%s6996_s24 + $0x620] sm:$0xff] %v5969_v59  ;;  %5992 = vtanh.f32 %v2538_v27  ;;  %v2454_v42 = vpop.f32.mrb[88].mxu1 }
 0x19f   : > { %v5973_v10 = vpop.eup %5972  ;;  %4485 = vst [vmem:[%s6996_s24 + $0x618] sm:$0xff] %v5971_v2  ;;  %v2543_v30 = vpop.f32.mrb[88].mxu0  ;;  %5994 = vtanh.f32 %v2451_v29  ;;  %v2455_v22 = vadd.f32 %v2454_v42, %v6928_v9 }
 0x1a0   : > { %v5975_v31 = vpop.eup %5974  ;;  %4487 = vst [vmem:[%s6996_s24 + $0x628] sm:$0xff] %v5973_v10  ;;  %v2544_v32 = vadd.f32 %v2543_v30, %v6928_v9  ;;  %v2456_v33 = vpop.f32.mrb[89].mxu1  ;;  %5996 = vtanh.f32 %v2540_v1 }
 0x1a1   : > { %v2545_v0 = vpop.f32.mrb[89].mxu0  ;;  %v5977_v34 = vpop.eup %5976  ;;  %4562 = vst [vmem:[%s6996_s24 + $0x880] sm:$0xff] %v5975_v31  ;;  %v2457_v35 = vadd.f32 %v2456_v33, %v6928_v9  ;;  %5998 = vtanh.f32 %v2455_v22 }
 0x1a2   : > { %v2546_v36 = vadd.f32 %v2545_v0, %v6928_v9  ;;  %v5979_v37 = vpop.eup %5978  ;;  %4564 = vst [vmem:[%s6996_s24 + $0x890] sm:$0xff] %v5977_v34  ;;  %6000 = vtanh.f32 %v2544_v32  ;;  %v2460_v39 = vpop.f32.mrb[90].mxu1 }
 0x1a3   : > { %v5981_v38 = vpop.eup %5980  ;;  %4563 = vst [vmem:[%s6996_s24 + $0x888] sm:$0xff] %v5979_v37  ;;  %v2549_v16 = vpop.f32.mrb[90].mxu0  ;;  %6002 = vtanh.f32 %v2457_v35  ;;  %v2461_v57 = vadd.f32 %v2460_v39, %v6954_v25 }
 0x1a4   : > { %v5983_v40 = vpop.eup %5982  ;;  %4565 = vst [vmem:[%s6996_s24 + $0x898] sm:$0xff] %v5981_v38  ;;  %v2550_v41 = vadd.f32 %v2549_v16, %v6954_v25  ;;  %v2462_v43 = vpop.f32.mrb[91].mxu1  ;;  %6004 = vtanh.f32 %v2546_v36 }
 0x1a5   : > { %v2551_v44 = vpop.f32.mrb[91].mxu0  ;;  %v5985_v45 = vpop.eup %5984  ;;  %4332 = vst [vmem:[%s6996_s24 + $0x150] sm:$0xff] %v5983_v40  ;;  %v2463_v46 = vadd.f32 %v2462_v43, %v6954_v25  ;;  %6006 = vtanh.f32 %v2461_v57 }
 0x1a6   : > { %v2552_v47 = vadd.f32 %v2551_v44, %v6954_v25  ;;  %v5987_v48 = vpop.eup %5986  ;;  %4334 = vst [vmem:[%s6996_s24 + $0x160] sm:$0xff] %v5985_v45  ;;  %6008 = vtanh.f32 %v2550_v41  ;;  %v2620_v50 = vpop.f32.mrb[92].mxu1 }
 0x1a7   : > { %v5989_v49 = vpop.eup %5988  ;;  %4333 = vst [vmem:[%s6996_s24 + $0x158] sm:$0xff] %v5987_v48  ;;  %v2709_v11 = vpop.f32.mrb[92].mxu0  ;;  %6010 = vtanh.f32 %v2463_v46  ;;  %v2621_v52 = vadd.f32 %v2620_v50, %v6930_v12 }
 0x1a8   : > { %v5991_v51 = vpop.eup %5990  ;;  %4335 = vst [vmem:[%s6996_s24 + $0x168] sm:$0xff] %v5989_v49  ;;  %v2710_v53 = vadd.f32 %v2709_v11, %v6930_v12  ;;  %v2622_v56 = vpop.f32.mrb[93].mxu1  ;;  %6012 = vtanh.f32 %v2552_v47 }
 0x1a9   : > { %v2711_v60 = vpop.f32.mrb[93].mxu0  ;;  %v5993_v61 = vpop.eup %5992  ;;  %4410 = vst [vmem:[%s6996_s24 + $0x3c0] sm:$0xff] %v5991_v51  ;;  %v2623_v62 = vadd.f32 %v2622_v56, %v6930_v12  ;;  %6014 = vtanh.f32 %v2621_v52 }
 0x1aa   : > { %v2712_v63 = vadd.f32 %v2711_v60, %v6930_v12  ;;  %v5995_v3 = vpop.eup %5994  ;;  %4412 = vst [vmem:[%s6996_s24 + $0x3d0] sm:$0xff] %v5993_v61  ;;  %6016 = vtanh.f32 %v2710_v53  ;;  %v2626_v18 = vpop.f32.mrb[94].mxu1 }
 0x1ab   : > { %v5997_v4 = vpop.eup %5996  ;;  %4411 = vst [vmem:[%s6996_s24 + $0x3c8] sm:$0xff] %v5995_v3  ;;  %v2715_v5 = vpop.f32.mrb[94].mxu0  ;;  %6018 = vtanh.f32 %v2623_v62  ;;  %v2627_v17 = vadd.f32 %v2626_v18, %v6956_v26 }
 0x1ac   : > { %v5999_v6 = vpop.eup %5998  ;;  %4413 = vst [vmem:[%s6996_s24 + $0x3d8] sm:$0xff] %v5997_v4  ;;  %v2716_v7 = vadd.f32 %v2715_v5, %v6956_v26  ;;  %v2628_v8 = vpop.f32.mrb[95].mxu1  ;;  %6020 = vtanh.f32 %v2712_v63 }
 0x1ad   : > { %v2717_v13 = vpop.f32.mrb[95].mxu0  ;;  %v6001_v14 = vpop.eup %6000  ;;  %4488 = vst [vmem:[%s6996_s24 + $0x630] sm:$0xff] %v5999_v6  ;;  %v2629_v15 = vadd.f32 %v2628_v8, %v6956_v26  ;;  %6022 = vtanh.f32 %v2627_v17 }
 0x1ae   : > { %v2718_v19 = vadd.f32 %v2717_v13, %v6956_v26  ;;  %v6003_v20 = vpop.eup %6002  ;;  %4490 = vst [vmem:[%s6996_s24 + $0x640] sm:$0xff] %v6001_v14  ;;  %6024 = vtanh.f32 %v2716_v7  ;;  %v2632_v21 = vpop.f32.mrb[96].mxu1 }
 0x1af   : > { %v6005_v54 = vpop.eup %6004  ;;  %4489 = vst [vmem:[%s6996_s24 + $0x638] sm:$0xff] %v6003_v20  ;;  %v2721_v55 = vpop.f32.mrb[96].mxu0  ;;  %6026 = vtanh.f32 %v2629_v15  ;;  %v2633_v24 = vadd.f32 %v2632_v21, %v6928_v9 }
 0x1b0   : > { %v6007_v23 = vpop.eup %6006  ;;  %4491 = vst [vmem:[%s6996_s24 + $0x648] sm:$0xff] %v6005_v54  ;;  %v2722_v27 = vadd.f32 %v2721_v55, %v6928_v9  ;;  %v2634_v28 = vpop.f32.mrb[97].mxu1  ;;  %6028 = vtanh.f32 %v2718_v19 }
 0x1b1   : > { %v2723_v58 = vpop.f32.mrb[97].mxu0  ;;  %v6009_v59 = vpop.eup %6008  ;;  %4566 = vst [vmem:[%s6996_s24 + $0x8a0] sm:$0xff] %v6007_v23  ;;  %v2635_v29 = vadd.f32 %v2634_v28, %v6928_v9  ;;  %6030 = vtanh.f32 %v2633_v24 }
 0x1b2   : > { %v2724_v1 = vadd.f32 %v2723_v58, %v6928_v9  ;;  %v6011_v2 = vpop.eup %6010  ;;  %4568 = vst [vmem:[%s6996_s24 + $0x8b0] sm:$0xff] %v6009_v59  ;;  %6032 = vtanh.f32 %v2722_v27  ;;  %v2638_v42 = vpop.f32.mrb[98].mxu1 }
 0x1b3   : > { %v6013_v10 = vpop.eup %6012  ;;  %4567 = vst [vmem:[%s6996_s24 + $0x8a8] sm:$0xff] %v6011_v2  ;;  %v2727_v30 = vpop.f32.mrb[98].mxu0  ;;  %6034 = vtanh.f32 %v2635_v29  ;;  %v2639_v22 = vadd.f32 %v2638_v42, %v6954_v25 }
 0x1b4   : > { %v6015_v31 = vpop.eup %6014  ;;  %4569 = vst [vmem:[%s6996_s24 + $0x8b8] sm:$0xff] %v6013_v10  ;;  %v2728_v32 = vadd.f32 %v2727_v30, %v6954_v25  ;;  %v2640_v33 = vpop.f32.mrb[99].mxu1  ;;  %6036 = vtanh.f32 %v2724_v1 }
 0x1b5   : > { %v2729_v0 = vpop.f32.mrb[99].mxu0  ;;  %v6017_v34 = vpop.eup %6016  ;;  %4336 = vst [vmem:[%s6996_s24 + $0x170] sm:$0xff] %v6015_v31  ;;  %v2641_v35 = vadd.f32 %v2640_v33, %v6954_v25  ;;  %6038 = vtanh.f32 %v2639_v22 }
 0x1b6   : > { %v2730_v36 = vadd.f32 %v2729_v0, %v6954_v25  ;;  %v6019_v37 = vpop.eup %6018  ;;  %4338 = vst [vmem:[%s6996_s24 + $0x180] sm:$0xff] %v6017_v34  ;;  %6040 = vtanh.f32 %v2728_v32  ;;  %v2798_v39 = vpop.f32.mrb[100].mxu1 }
 0x1b7   : > { %v6021_v38 = vpop.eup %6020  ;;  %4337 = vst [vmem:[%s6996_s24 + $0x178] sm:$0xff] %v6019_v37  ;;  %v2887_v16 = vpop.f32.mrb[100].mxu0  ;;  %6042 = vtanh.f32 %v2641_v35  ;;  %v2799_v57 = vadd.f32 %v2798_v39, %v6930_v12 }
 0x1b8   : > { %v6023_v40 = vpop.eup %6022  ;;  %4339 = vst [vmem:[%s6996_s24 + $0x188] sm:$0xff] %v6021_v38  ;;  %v2888_v41 = vadd.f32 %v2887_v16, %v6930_v12  ;;  %v2800_v43 = vpop.f32.mrb[101].mxu1  ;;  %6044 = vtanh.f32 %v2730_v36 }
 0x1b9   : > { %v2889_v44 = vpop.f32.mrb[101].mxu0  ;;  %v6025_v45 = vpop.eup %6024  ;;  %4414 = vst [vmem:[%s6996_s24 + $0x3e0] sm:$0xff] %v6023_v40  ;;  %v2801_v46 = vadd.f32 %v2800_v43, %v6930_v12  ;;  %6046 = vtanh.f32 %v2799_v57 }
 0x1ba   : > { %v2890_v47 = vadd.f32 %v2889_v44, %v6930_v12  ;;  %v6027_v48 = vpop.eup %6026  ;;  %4416 = vst [vmem:[%s6996_s24 + $0x3f0] sm:$0xff] %v6025_v45  ;;  %6048 = vtanh.f32 %v2888_v41  ;;  %v2804_v50 = vpop.f32.mrb[102].mxu1 }
 0x1bb   : > { %v6029_v49 = vpop.eup %6028  ;;  %4415 = vst [vmem:[%s6996_s24 + $0x3e8] sm:$0xff] %v6027_v48  ;;  %v2893_v11 = vpop.f32.mrb[102].mxu0  ;;  %6050 = vtanh.f32 %v2801_v46  ;;  %v2805_v52 = vadd.f32 %v2804_v50, %v6956_v26 }
 0x1bc   : > { %v6031_v51 = vpop.eup %6030  ;;  %4417 = vst [vmem:[%s6996_s24 + $0x3f8] sm:$0xff] %v6029_v49  ;;  %v2894_v53 = vadd.f32 %v2893_v11, %v6956_v26  ;;  %v2806_v56 = vpop.f32.mrb[103].mxu1  ;;  %6052 = vtanh.f32 %v2890_v47 }
 0x1bd   : > { %v2895_v60 = vpop.f32.mrb[103].mxu0  ;;  %v6033_v61 = vpop.eup %6032  ;;  %4492 = vst [vmem:[%s6996_s24 + $0x650] sm:$0xff] %v6031_v51  ;;  %v2807_v62 = vadd.f32 %v2806_v56, %v6956_v26  ;;  %6054 = vtanh.f32 %v2805_v52 }
 0x1be   : > { %v2896_v63 = vadd.f32 %v2895_v60, %v6956_v26  ;;  %v6035_v3 = vpop.eup %6034  ;;  %4494 = vst [vmem:[%s6996_s24 + $0x660] sm:$0xff] %v6033_v61  ;;  %6056 = vtanh.f32 %v2894_v53  ;;  %v2810_v18 = vpop.f32.mrb[104].mxu1 }
 0x1bf   : > { %v6037_v4 = vpop.eup %6036  ;;  %4493 = vst [vmem:[%s6996_s24 + $0x658] sm:$0xff] %v6035_v3  ;;  %v2899_v5 = vpop.f32.mrb[104].mxu0  ;;  %6058 = vtanh.f32 %v2807_v62  ;;  %v2811_v17 = vadd.f32 %v2810_v18, %v6928_v9 }
 0x1c0   : > { %v6039_v6 = vpop.eup %6038  ;;  %4495 = vst [vmem:[%s6996_s24 + $0x668] sm:$0xff] %v6037_v4  ;;  %v2900_v7 = vadd.f32 %v2899_v5, %v6928_v9  ;;  %v2812_v8 = vpop.f32.mrb[105].mxu1  ;;  %6060 = vtanh.f32 %v2896_v63 }
 0x1c1   : > { %v2901_v13 = vpop.f32.mrb[105].mxu0  ;;  %v6041_v14 = vpop.eup %6040  ;;  %4570 = vst [vmem:[%s6996_s24 + $0x8c0] sm:$0xff] %v6039_v6  ;;  %v2813_v15 = vadd.f32 %v2812_v8, %v6928_v9  ;;  %6062 = vtanh.f32 %v2811_v17 }
 0x1c2   : > { %v2902_v19 = vadd.f32 %v2901_v13, %v6928_v9  ;;  %v6043_v20 = vpop.eup %6042  ;;  %4572 = vst [vmem:[%s6996_s24 + $0x8d0] sm:$0xff] %v6041_v14  ;;  %6064 = vtanh.f32 %v2900_v7  ;;  %v2816_v21 = vpop.f32.mrb[106].mxu1 }
 0x1c3   : > { %v6045_v54 = vpop.eup %6044  ;;  %4571 = vst [vmem:[%s6996_s24 + $0x8c8] sm:$0xff] %v6043_v20  ;;  %v2905_v55 = vpop.f32.mrb[106].mxu0  ;;  %6066 = vtanh.f32 %v2813_v15  ;;  %v2817_v24 = vadd.f32 %v2816_v21, %v6954_v25 }
 0x1c4   : > { %v6047_v23 = vpop.eup %6046  ;;  %4573 = vst [vmem:[%s6996_s24 + $0x8d8] sm:$0xff] %v6045_v54  ;;  %v2906_v27 = vadd.f32 %v2905_v55, %v6954_v25  ;;  %v2818_v28 = vpop.f32.mrb[107].mxu1  ;;  %6068 = vtanh.f32 %v2902_v19 }
 0x1c5   : > { %v2907_v58 = vpop.f32.mrb[107].mxu0  ;;  %v6049_v59 = vpop.eup %6048  ;;  %4340 = vst [vmem:[%s6996_s24 + $0x190] sm:$0xff] %v6047_v23  ;;  %v2819_v29 = vadd.f32 %v2818_v28, %v6954_v25  ;;  %6070 = vtanh.f32 %v2817_v24 }
 0x1c6   : > { %v2908_v1 = vadd.f32 %v2907_v58, %v6954_v25  ;;  %v6051_v2 = vpop.eup %6050  ;;  %4342 = vst [vmem:[%s6996_s24 + $0x1a0] sm:$0xff] %v6049_v59  ;;  %6072 = vtanh.f32 %v2906_v27  ;;  %v2976_v42 = vpop.f32.mrb[108].mxu1 }
 0x1c7   : > { %v6053_v10 = vpop.eup %6052  ;;  %4341 = vst [vmem:[%s6996_s24 + $0x198] sm:$0xff] %v6051_v2  ;;  %v3065_v30 = vpop.f32.mrb[108].mxu0  ;;  %6074 = vtanh.f32 %v2819_v29  ;;  %v2977_v22 = vadd.f32 %v2976_v42, %v6930_v12 }
 0x1c8   : > { %v6055_v31 = vpop.eup %6054  ;;  %4343 = vst [vmem:[%s6996_s24 + $0x1a8] sm:$0xff] %v6053_v10  ;;  %v3066_v32 = vadd.f32 %v3065_v30, %v6930_v12  ;;  %v2978_v33 = vpop.f32.mrb[109].mxu1  ;;  %6076 = vtanh.f32 %v2908_v1 }
 0x1c9   : > { %v3067_v0 = vpop.f32.mrb[109].mxu0  ;;  %v6057_v34 = vpop.eup %6056  ;;  %4418 = vst [vmem:[%s6996_s24 + $0x400] sm:$0xff] %v6055_v31  ;;  %v2979_v35 = vadd.f32 %v2978_v33, %v6930_v12  ;;  %6078 = vtanh.f32 %v2977_v22 }
 0x1ca   : > { %v3068_v36 = vadd.f32 %v3067_v0, %v6930_v12  ;;  %v6059_v37 = vpop.eup %6058  ;;  %4420 = vst [vmem:[%s6996_s24 + $0x410] sm:$0xff] %v6057_v34  ;;  %6080 = vtanh.f32 %v3066_v32  ;;  %v2982_v39 = vpop.f32.mrb[110].mxu1 }
 0x1cb   : > { %v6061_v38 = vpop.eup %6060  ;;  %4419 = vst [vmem:[%s6996_s24 + $0x408] sm:$0xff] %v6059_v37  ;;  %v3071_v16 = vpop.f32.mrb[110].mxu0  ;;  %6082 = vtanh.f32 %v2979_v35  ;;  %v2983_v57 = vadd.f32 %v2982_v39, %v6956_v26 }
 0x1cc   : > { %v6063_v40 = vpop.eup %6062  ;;  %4421 = vst [vmem:[%s6996_s24 + $0x418] sm:$0xff] %v6061_v38  ;;  %v3072_v41 = vadd.f32 %v3071_v16, %v6956_v26  ;;  %v2984_v43 = vpop.f32.mrb[111].mxu1  ;;  %6084 = vtanh.f32 %v3068_v36 }
 0x1cd   : > { %v3073_v44 = vpop.f32.mrb[111].mxu0  ;;  %v6065_v45 = vpop.eup %6064  ;;  %4496 = vst [vmem:[%s6996_s24 + $0x670] sm:$0xff] %v6063_v40  ;;  %v2985_v46 = vadd.f32 %v2984_v43, %v6956_v26  ;;  %6086 = vtanh.f32 %v2983_v57 }
 0x1ce   : > { %v3074_v47 = vadd.f32 %v3073_v44, %v6956_v26  ;;  %v6067_v48 = vpop.eup %6066  ;;  %4498 = vst [vmem:[%s6996_s24 + $0x680] sm:$0xff] %v6065_v45  ;;  %6088 = vtanh.f32 %v3072_v41  ;;  %v2988_v50 = vpop.f32.mrb[112].mxu1 }
 0x1cf   : > { %v6069_v49 = vpop.eup %6068  ;;  %4497 = vst [vmem:[%s6996_s24 + $0x678] sm:$0xff] %v6067_v48  ;;  %v3077_v11 = vpop.f32.mrb[112].mxu0  ;;  %6090 = vtanh.f32 %v2985_v46  ;;  %v2989_v52 = vadd.f32 %v2988_v50, %v6928_v9 }
 0x1d0   : > { %v6071_v51 = vpop.eup %6070  ;;  %4499 = vst [vmem:[%s6996_s24 + $0x688] sm:$0xff] %v6069_v49  ;;  %v3078_v53 = vadd.f32 %v3077_v11, %v6928_v9  ;;  %v2990_v56 = vpop.f32.mrb[113].mxu1  ;;  %6092 = vtanh.f32 %v3074_v47 }
 0x1d1   : > { %v3079_v60 = vpop.f32.mrb[113].mxu0  ;;  %v6073_v61 = vpop.eup %6072  ;;  %4574 = vst [vmem:[%s6996_s24 + $0x8e0] sm:$0xff] %v6071_v51  ;;  %v2991_v62 = vadd.f32 %v2990_v56, %v6928_v9  ;;  %6094 = vtanh.f32 %v2989_v52 }
 0x1d2   : > { %v3080_v63 = vadd.f32 %v3079_v60, %v6928_v9  ;;  %v6075_v3 = vpop.eup %6074  ;;  %4576 = vst [vmem:[%s6996_s24 + $0x8f0] sm:$0xff] %v6073_v61  ;;  %6096 = vtanh.f32 %v3078_v53  ;;  %v2994_v18 = vpop.f32.mrb[114].mxu1 }
 0x1d3   : > { %v6077_v4 = vpop.eup %6076  ;;  %4575 = vst [vmem:[%s6996_s24 + $0x8e8] sm:$0xff] %v6075_v3  ;;  %v3083_v5 = vpop.f32.mrb[114].mxu0  ;;  %6098 = vtanh.f32 %v2991_v62  ;;  %v2995_v17 = vadd.f32 %v2994_v18, %v6954_v25 }
 0x1d4   : > { %v6079_v6 = vpop.eup %6078  ;;  %4577 = vst [vmem:[%s6996_s24 + $0x8f8] sm:$0xff] %v6077_v4  ;;  %v3084_v7 = vadd.f32 %v3083_v5, %v6954_v25  ;;  %v2996_v8 = vpop.f32.mrb[115].mxu1  ;;  %6100 = vtanh.f32 %v3080_v63 }
 0x1d5   : > { %v3085_v13 = vpop.f32.mrb[115].mxu0  ;;  %v6081_v14 = vpop.eup %6080  ;;  %4344 = vst [vmem:[%s6996_s24 + $0x1b0] sm:$0xff] %v6079_v6  ;;  %v2997_v15 = vadd.f32 %v2996_v8, %v6954_v25  ;;  %6102 = vtanh.f32 %v2995_v17 }
 0x1d6   : > { %v3086_v19 = vadd.f32 %v3085_v13, %v6954_v25  ;;  %v6083_v20 = vpop.eup %6082  ;;  %4346 = vst [vmem:[%s6996_s24 + $0x1c0] sm:$0xff] %v6081_v14  ;;  %6104 = vtanh.f32 %v3084_v7  ;;  %v3154_v21 = vpop.f32.mrb[116].mxu1 }
 0x1d7   : > { %v6085_v54 = vpop.eup %6084  ;;  %4345 = vst [vmem:[%s6996_s24 + $0x1b8] sm:$0xff] %v6083_v20  ;;  %v3243_v55 = vpop.f32.mrb[116].mxu0  ;;  %6106 = vtanh.f32 %v2997_v15  ;;  %v3155_v24 = vadd.f32 %v3154_v21, %v6930_v12 }
 0x1d8   : > { %v6087_v23 = vpop.eup %6086  ;;  %4347 = vst [vmem:[%s6996_s24 + $0x1c8] sm:$0xff] %v6085_v54  ;;  %v3244_v27 = vadd.f32 %v3243_v55, %v6930_v12  ;;  %v3156_v28 = vpop.f32.mrb[117].mxu1  ;;  %6108 = vtanh.f32 %v3086_v19 }
 0x1d9   : > { %v3245_v58 = vpop.f32.mrb[117].mxu0  ;;  %v6089_v59 = vpop.eup %6088  ;;  %4422 = vst [vmem:[%s6996_s24 + $0x420] sm:$0xff] %v6087_v23  ;;  %v3157_v29 = vadd.f32 %v3156_v28, %v6930_v12  ;;  %6110 = vtanh.f32 %v3155_v24 }
 0x1da   : > { %v3246_v1 = vadd.f32 %v3245_v58, %v6930_v12  ;;  %v6091_v2 = vpop.eup %6090  ;;  %4424 = vst [vmem:[%s6996_s24 + $0x430] sm:$0xff] %v6089_v59  ;;  %6112 = vtanh.f32 %v3244_v27  ;;  %v3160_v42 = vpop.f32.mrb[118].mxu1 }
 0x1db   : > { %v6093_v10 = vpop.eup %6092  ;;  %4423 = vst [vmem:[%s6996_s24 + $0x428] sm:$0xff] %v6091_v2  ;;  %v3249_v30 = vpop.f32.mrb[118].mxu0  ;;  %6114 = vtanh.f32 %v3157_v29  ;;  %v3161_v22 = vadd.f32 %v3160_v42, %v6956_v26 }
 0x1dc   : > { %v6095_v31 = vpop.eup %6094  ;;  %4425 = vst [vmem:[%s6996_s24 + $0x438] sm:$0xff] %v6093_v10  ;;  %v3250_v32 = vadd.f32 %v3249_v30, %v6956_v26  ;;  %v3162_v33 = vpop.f32.mrb[119].mxu1  ;;  %6116 = vtanh.f32 %v3246_v1 }
 0x1dd   : > { %v3251_v0 = vpop.f32.mrb[119].mxu0  ;;  %v6097_v34 = vpop.eup %6096  ;;  %4500 = vst [vmem:[%s6996_s24 + $0x690] sm:$0xff] %v6095_v31  ;;  %v3163_v35 = vadd.f32 %v3162_v33, %v6956_v26  ;;  %6118 = vtanh.f32 %v3161_v22 }
 0x1de   : > { %v3252_v36 = vadd.f32 %v3251_v0, %v6956_v26  ;;  %v6099_v37 = vpop.eup %6098  ;;  %4502 = vst [vmem:[%s6996_s24 + $0x6a0] sm:$0xff] %v6097_v34  ;;  %6120 = vtanh.f32 %v3250_v32  ;;  %v3166_v39 = vpop.f32.mrb[120].mxu1 }
 0x1df   : > { %v6101_v38 = vpop.eup %6100  ;;  %4501 = vst [vmem:[%s6996_s24 + $0x698] sm:$0xff] %v6099_v37  ;;  %v3255_v16 = vpop.f32.mrb[120].mxu0  ;;  %6122 = vtanh.f32 %v3163_v35  ;;  %v3167_v57 = vadd.f32 %v3166_v39, %v6928_v9 }
 0x1e0   : > { %v6103_v40 = vpop.eup %6102  ;;  %4503 = vst [vmem:[%s6996_s24 + $0x6a8] sm:$0xff] %v6101_v38  ;;  %v3256_v41 = vadd.f32 %v3255_v16, %v6928_v9  ;;  %v3168_v43 = vpop.f32.mrb[121].mxu1  ;;  %6124 = vtanh.f32 %v3252_v36 }
 0x1e1   : > { %v3257_v44 = vpop.f32.mrb[121].mxu0  ;;  %v6105_v45 = vpop.eup %6104  ;;  %4578 = vst [vmem:[%s6996_s24 + $0x900] sm:$0xff] %v6103_v40  ;;  %v3169_v46 = vadd.f32 %v3168_v43, %v6928_v9  ;;  %6126 = vtanh.f32 %v3167_v57 }
 0x1e2   : > { %v3258_v47 = vadd.f32 %v3257_v44, %v6928_v9  ;;  %v6107_v48 = vpop.eup %6106  ;;  %4580 = vst [vmem:[%s6996_s24 + $0x910] sm:$0xff] %v6105_v45  ;;  %6128 = vtanh.f32 %v3256_v41  ;;  %v3172_v50 = vpop.f32.mrb[122].mxu1 }
 0x1e3   : > { %v6109_v49 = vpop.eup %6108  ;;  %4579 = vst [vmem:[%s6996_s24 + $0x908] sm:$0xff] %v6107_v48  ;;  %v3261_v11 = vpop.f32.mrb[122].mxu0  ;;  %6130 = vtanh.f32 %v3169_v46  ;;  %v3173_v52 = vadd.f32 %v3172_v50, %v6954_v25 }
 0x1e4   : > { %v6111_v51 = vpop.eup %6110  ;;  %4581 = vst [vmem:[%s6996_s24 + $0x918] sm:$0xff] %v6109_v49  ;;  %v3262_v53 = vadd.f32 %v3261_v11, %v6954_v25  ;;  %v3174_v56 = vpop.f32.mrb[123].mxu1  ;;  %6132 = vtanh.f32 %v3258_v47 }
 0x1e5   : > { %v3263_v60 = vpop.f32.mrb[123].mxu0  ;;  %v6113_v61 = vpop.eup %6112  ;;  %4348 = vst [vmem:[%s6996_s24 + $0x1d0] sm:$0xff] %v6111_v51  ;;  %v3175_v62 = vadd.f32 %v3174_v56, %v6954_v25  ;;  %6134 = vtanh.f32 %v3173_v52 }
 0x1e6   : > { %v3264_v63 = vadd.f32 %v3263_v60, %v6954_v25  ;;  %v6115_v3 = vpop.eup %6114  ;;  %4350 = vst [vmem:[%s6996_s24 + $0x1e0] sm:$0xff] %v6113_v61  ;;  %6136 = vtanh.f32 %v3262_v53  ;;  %v3332_v18 = vpop.f32.mrb[124].mxu1 }
 0x1e7   : > { %v6117_v4 = vpop.eup %6116  ;;  %4349 = vst [vmem:[%s6996_s24 + $0x1d8] sm:$0xff] %v6115_v3  ;;  %v3421_v5 = vpop.f32.mrb[124].mxu0  ;;  %6138 = vtanh.f32 %v3175_v62  ;;  %v3333_v17 = vadd.f32 %v3332_v18, %v6930_v12 }
 0x1e8   : > { %v6119_v6 = vpop.eup %6118  ;;  %4351 = vst [vmem:[%s6996_s24 + $0x1e8] sm:$0xff] %v6117_v4  ;;  %v3422_v7 = vadd.f32 %v3421_v5, %v6930_v12  ;;  %v3334_v8 = vpop.f32.mrb[125].mxu1  ;;  %6140 = vtanh.f32 %v3264_v63 }
 0x1e9   : > { %v3423_v13 = vpop.f32.mrb[125].mxu0  ;;  %v6121_v14 = vpop.eup %6120  ;;  %4426 = vst [vmem:[%s6996_s24 + $0x440] sm:$0xff] %v6119_v6  ;;  %v3335_v15 = vadd.f32 %v3334_v8, %v6930_v12  ;;  %6142 = vtanh.f32 %v3333_v17 }
 0x1ea   : > { %v3424_v19 = vadd.f32 %v3423_v13, %v6930_v12  ;;  %v6123_v20 = vpop.eup %6122  ;;  %4428 = vst [vmem:[%s6996_s24 + $0x450] sm:$0xff] %v6121_v14  ;;  %6144 = vtanh.f32 %v3422_v7  ;;  %v3338_v21 = vpop.f32.mrb[126].mxu1 }
 0x1eb   : > { %v6125_v54 = vpop.eup %6124  ;;  %4427 = vst [vmem:[%s6996_s24 + $0x448] sm:$0xff] %v6123_v20  ;;  %v3427_v55 = vpop.f32.mrb[126].mxu0  ;;  %6146 = vtanh.f32 %v3335_v15  ;;  %v3339_v24 = vadd.f32 %v3338_v21, %v6956_v26 }
 0x1ec   : > { %v6127_v23 = vpop.eup %6126  ;;  %4429 = vst [vmem:[%s6996_s24 + $0x458] sm:$0xff] %v6125_v54  ;;  %v3428_v27 = vadd.f32 %v3427_v55, %v6956_v26  ;;  %v3340_v28 = vpop.f32.mrb[127].mxu1  ;;  %6148 = vtanh.f32 %v3424_v19 }
 0x1ed   : > { %v3429_v58 = vpop.f32.mrb[127].mxu0  ;;  %v6129_v59 = vpop.eup %6128  ;;  %4504 = vst [vmem:[%s6996_s24 + $0x6b0] sm:$0xff] %v6127_v23  ;;  %v3341_v29 = vadd.f32 %v3340_v28, %v6956_v26  ;;  %6150 = vtanh.f32 %v3339_v24 }
 0x1ee   : > { %v3430_v1 = vadd.f32 %v3429_v58, %v6956_v26  ;;  %v6131_v2 = vpop.eup %6130  ;;  %4506 = vst [vmem:[%s6996_s24 + $0x6c0] sm:$0xff] %v6129_v59  ;;  %6152 = vtanh.f32 %v3428_v27  ;;  %v3344_v42 = vpop.f32.mrb[128].mxu1 }
 0x1ef   : > { %v6133_v10 = vpop.eup %6132  ;;  %4505 = vst [vmem:[%s6996_s24 + $0x6b8] sm:$0xff] %v6131_v2  ;;  %v3433_v30 = vpop.f32.mrb[128].mxu0  ;;  %6154 = vtanh.f32 %v3341_v29  ;;  %v3345_v22 = vadd.f32 %v3344_v42, %v6928_v9 }
 0x1f0   : > { %v6135_v31 = vpop.eup %6134  ;;  %4507 = vst [vmem:[%s6996_s24 + $0x6c8] sm:$0xff] %v6133_v10  ;;  %v3434_v32 = vadd.f32 %v3433_v30, %v6928_v9  ;;  %v3346_v33 = vpop.f32.mrb[129].mxu1  ;;  %6156 = vtanh.f32 %v3430_v1 }
 0x1f1   : > { %v3435_v0 = vpop.f32.mrb[129].mxu0  ;;  %v6137_v34 = vpop.eup %6136  ;;  %4582 = vst [vmem:[%s6996_s24 + $0x920] sm:$0xff] %v6135_v31  ;;  %v3347_v35 = vadd.f32 %v3346_v33, %v6928_v9  ;;  %6158 = vtanh.f32 %v3345_v22 }
 0x1f2   : > { %v3436_v36 = vadd.f32 %v3435_v0, %v6928_v9  ;;  %v6139_v37 = vpop.eup %6138  ;;  %4584 = vst [vmem:[%s6996_s24 + $0x930] sm:$0xff] %v6137_v34  ;;  %6160 = vtanh.f32 %v3434_v32  ;;  %v3350_v39 = vpop.f32.mrb[130].mxu1 }
 0x1f3   : > { %v6141_v38 = vpop.eup %6140  ;;  %4583 = vst [vmem:[%s6996_s24 + $0x928] sm:$0xff] %v6139_v37  ;;  %v3439_v16 = vpop.f32.mrb[130].mxu0  ;;  %6162 = vtanh.f32 %v3347_v35  ;;  %v3351_v57 = vadd.f32 %v3350_v39, %v6954_v25 }
 0x1f4   : > { %v6143_v40 = vpop.eup %6142  ;;  %4585 = vst [vmem:[%s6996_s24 + $0x938] sm:$0xff] %v6141_v38  ;;  %v3440_v41 = vadd.f32 %v3439_v16, %v6954_v25  ;;  %v3352_v43 = vpop.f32.mrb[131].mxu1  ;;  %6164 = vtanh.f32 %v3436_v36 }
 0x1f5   : > { %v3441_v44 = vpop.f32.mrb[131].mxu0  ;;  %v6145_v45 = vpop.eup %6144  ;;  %4352 = vst [vmem:[%s6996_s24 + $0x1f0] sm:$0xff] %v6143_v40  ;;  %v3353_v46 = vadd.f32 %v3352_v43, %v6954_v25  ;;  %6166 = vtanh.f32 %v3351_v57 }
 0x1f6   : > { %v3442_v47 = vadd.f32 %v3441_v44, %v6954_v25  ;;  %v6147_v48 = vpop.eup %6146  ;;  %4354 = vst [vmem:[%s6996_s24 + $0x200] sm:$0xff] %v6145_v45  ;;  %6168 = vtanh.f32 %v3440_v41  ;;  %v3510_v50 = vpop.f32.mrb[132].mxu1 }
 0x1f7   : > { %v6149_v49 = vpop.eup %6148  ;;  %4353 = vst [vmem:[%s6996_s24 + $0x1f8] sm:$0xff] %v6147_v48  ;;  %v3599_v11 = vpop.f32.mrb[132].mxu0  ;;  %6170 = vtanh.f32 %v3353_v46  ;;  %v3511_v52 = vadd.f32 %v3510_v50, %v6930_v12 }
 0x1f8   : > { %v6151_v51 = vpop.eup %6150  ;;  %4355 = vst [vmem:[%s6996_s24 + $0x208] sm:$0xff] %v6149_v49  ;;  %v3600_v53 = vadd.f32 %v3599_v11, %v6930_v12  ;;  %v3512_v56 = vpop.f32.mrb[133].mxu1  ;;  %6172 = vtanh.f32 %v3442_v47 }
 0x1f9   : > { %v3601_v60 = vpop.f32.mrb[133].mxu0  ;;  %v6153_v61 = vpop.eup %6152  ;;  %4430 = vst [vmem:[%s6996_s24 + $0x460] sm:$0xff] %v6151_v51  ;;  %v3513_v62 = vadd.f32 %v3512_v56, %v6930_v12  ;;  %6174 = vtanh.f32 %v3511_v52 }
 0x1fa   : > { %v3602_v63 = vadd.f32 %v3601_v60, %v6930_v12  ;;  %v6155_v3 = vpop.eup %6154  ;;  %4432 = vst [vmem:[%s6996_s24 + $0x470] sm:$0xff] %v6153_v61  ;;  %6176 = vtanh.f32 %v3600_v53  ;;  %v3516_v18 = vpop.f32.mrb[134].mxu1 }
 0x1fb   : > { %v6157_v4 = vpop.eup %6156  ;;  %4431 = vst [vmem:[%s6996_s24 + $0x468] sm:$0xff] %v6155_v3  ;;  %v3605_v5 = vpop.f32.mrb[134].mxu0  ;;  %6178 = vtanh.f32 %v3513_v62  ;;  %v3517_v17 = vadd.f32 %v3516_v18, %v6956_v26 }
 0x1fc   : > { %v6159_v6 = vpop.eup %6158  ;;  %4433 = vst [vmem:[%s6996_s24 + $0x478] sm:$0xff] %v6157_v4  ;;  %v3606_v7 = vadd.f32 %v3605_v5, %v6956_v26  ;;  %v3518_v8 = vpop.f32.mrb[135].mxu1  ;;  %6180 = vtanh.f32 %v3602_v63 }
 0x1fd   : > { %v3607_v13 = vpop.f32.mrb[135].mxu0  ;;  %v6161_v14 = vpop.eup %6160  ;;  %4508 = vst [vmem:[%s6996_s24 + $0x6d0] sm:$0xff] %v6159_v6  ;;  %v3519_v15 = vadd.f32 %v3518_v8, %v6956_v26  ;;  %6182 = vtanh.f32 %v3517_v17 }
 0x1fe   : > { %v3608_v19 = vadd.f32 %v3607_v13, %v6956_v26  ;;  %v6163_v20 = vpop.eup %6162  ;;  %4510 = vst [vmem:[%s6996_s24 + $0x6e0] sm:$0xff] %v6161_v14  ;;  %6184 = vtanh.f32 %v3606_v7  ;;  %v3522_v21 = vpop.f32.mrb[136].mxu1 }
 0x1ff   : > { %v6165_v54 = vpop.eup %6164  ;;  %4509 = vst [vmem:[%s6996_s24 + $0x6d8] sm:$0xff] %v6163_v20  ;;  %v3611_v55 = vpop.f32.mrb[136].mxu0  ;;  %6186 = vtanh.f32 %v3519_v15  ;;  %v3523_v24 = vadd.f32 %v3522_v21, %v6928_v9 }
 0x200   : > { %v6167_v23 = vpop.eup %6166  ;;  %4511 = vst [vmem:[%s6996_s24 + $0x6e8] sm:$0xff] %v6165_v54  ;;  %v3612_v27 = vadd.f32 %v3611_v55, %v6928_v9  ;;  %v3524_v28 = vpop.f32.mrb[137].mxu1  ;;  %6188 = vtanh.f32 %v3608_v19 }
 0x201   : > { %v3613_v58 = vpop.f32.mrb[137].mxu0  ;;  %v6169_v59 = vpop.eup %6168  ;;  %4586 = vst [vmem:[%s6996_s24 + $0x940] sm:$0xff] %v6167_v23  ;;  %v3525_v29 = vadd.f32 %v3524_v28, %v6928_v9  ;;  %6190 = vtanh.f32 %v3523_v24 }
 0x202   : > { %v3614_v1 = vadd.f32 %v3613_v58, %v6928_v9  ;;  %v6171_v2 = vpop.eup %6170  ;;  %4588 = vst [vmem:[%s6996_s24 + $0x950] sm:$0xff] %v6169_v59  ;;  %6192 = vtanh.f32 %v3612_v27  ;;  %v3528_v42 = vpop.f32.mrb[138].mxu1 }
 0x203   : > { %v6173_v10 = vpop.eup %6172  ;;  %4587 = vst [vmem:[%s6996_s24 + $0x948] sm:$0xff] %v6171_v2  ;;  %v3617_v30 = vpop.f32.mrb[138].mxu0  ;;  %6194 = vtanh.f32 %v3525_v29  ;;  %v3529_v22 = vadd.f32 %v3528_v42, %v6954_v25 }
 0x204   : > { %v6175_v31 = vpop.eup %6174  ;;  %4589 = vst [vmem:[%s6996_s24 + $0x958] sm:$0xff] %v6173_v10  ;;  %v3618_v32 = vadd.f32 %v3617_v30, %v6954_v25  ;;  %v3530_v33 = vpop.f32.mrb[139].mxu1  ;;  %6196 = vtanh.f32 %v3614_v1 }
 0x205   : > { %v3619_v0 = vpop.f32.mrb[139].mxu0  ;;  %v6177_v34 = vpop.eup %6176  ;;  %4356 = vst [vmem:[%s6996_s24 + $0x210] sm:$0xff] %v6175_v31  ;;  %v3531_v35 = vadd.f32 %v3530_v33, %v6954_v25  ;;  %6198 = vtanh.f32 %v3529_v22 }
 0x206   : > { %v3620_v36 = vadd.f32 %v3619_v0, %v6954_v25  ;;  %v6179_v37 = vpop.eup %6178  ;;  %4358 = vst [vmem:[%s6996_s24 + $0x220] sm:$0xff] %v6177_v34  ;;  %6200 = vtanh.f32 %v3618_v32  ;;  %v3688_v39 = vpop.f32.mrb[140].mxu1 }
 0x207   : > { %v6181_v38 = vpop.eup %6180  ;;  %4357 = vst [vmem:[%s6996_s24 + $0x218] sm:$0xff] %v6179_v37  ;;  %v3777_v16 = vpop.f32.mrb[140].mxu0  ;;  %6202 = vtanh.f32 %v3531_v35  ;;  %v3689_v57 = vadd.f32 %v3688_v39, %v6930_v12 }
 0x208   : > { %v6183_v40 = vpop.eup %6182  ;;  %4359 = vst [vmem:[%s6996_s24 + $0x228] sm:$0xff] %v6181_v38  ;;  %v3778_v41 = vadd.f32 %v3777_v16, %v6930_v12  ;;  %v3690_v43 = vpop.f32.mrb[141].mxu1  ;;  %6204 = vtanh.f32 %v3620_v36 }
 0x209   : > { %v3779_v44 = vpop.f32.mrb[141].mxu0  ;;  %v6185_v45 = vpop.eup %6184  ;;  %4434 = vst [vmem:[%s6996_s24 + $0x480] sm:$0xff] %v6183_v40  ;;  %v3691_v46 = vadd.f32 %v3690_v43, %v6930_v12  ;;  %6206 = vtanh.f32 %v3689_v57 }
 0x20a   : > { %v3780_v47 = vadd.f32 %v3779_v44, %v6930_v12  ;;  %v6187_v48 = vpop.eup %6186  ;;  %4436 = vst [vmem:[%s6996_s24 + $0x490] sm:$0xff] %v6185_v45  ;;  %6208 = vtanh.f32 %v3778_v41  ;;  %v3694_v50 = vpop.f32.mrb[142].mxu1 }
 0x20b   : > { %v6189_v49 = vpop.eup %6188  ;;  %4435 = vst [vmem:[%s6996_s24 + $0x488] sm:$0xff] %v6187_v48  ;;  %v3783_v11 = vpop.f32.mrb[142].mxu0  ;;  %6210 = vtanh.f32 %v3691_v46  ;;  %v3695_v52 = vadd.f32 %v3694_v50, %v6956_v26 }
 0x20c   : > { %v6191_v51 = vpop.eup %6190  ;;  %4437 = vst [vmem:[%s6996_s24 + $0x498] sm:$0xff] %v6189_v49  ;;  %v3784_v53 = vadd.f32 %v3783_v11, %v6956_v26  ;;  %v3696_v56 = vpop.f32.mrb[143].mxu1  ;;  %6212 = vtanh.f32 %v3780_v47 }
 0x20d   : > { %v3785_v60 = vpop.f32.mrb[143].mxu0  ;;  %v6193_v61 = vpop.eup %6192  ;;  %4512 = vst [vmem:[%s6996_s24 + $0x6f0] sm:$0xff] %v6191_v51  ;;  %v3697_v62 = vadd.f32 %v3696_v56, %v6956_v26  ;;  %6214 = vtanh.f32 %v3695_v52 }
 0x20e   : > { %v3786_v63 = vadd.f32 %v3785_v60, %v6956_v26  ;;  %v6195_v3 = vpop.eup %6194  ;;  %4514 = vst [vmem:[%s6996_s24 + $0x700] sm:$0xff] %v6193_v61  ;;  %6216 = vtanh.f32 %v3784_v53  ;;  %v3700_v18 = vpop.f32.mrb[144].mxu1 }
 0x20f   : > { %v6197_v4 = vpop.eup %6196  ;;  %4513 = vst [vmem:[%s6996_s24 + $0x6f8] sm:$0xff] %v6195_v3  ;;  %v3789_v5 = vpop.f32.mrb[144].mxu0  ;;  %6218 = vtanh.f32 %v3697_v62  ;;  %v3701_v17 = vadd.f32 %v3700_v18, %v6928_v9 }
 0x210   : > { %v6199_v6 = vpop.eup %6198  ;;  %4515 = vst [vmem:[%s6996_s24 + $0x708] sm:$0xff] %v6197_v4  ;;  %v3790_v7 = vadd.f32 %v3789_v5, %v6928_v9  ;;  %v3702_v8 = vpop.f32.mrb[145].mxu1  ;;  %6220 = vtanh.f32 %v3786_v63 }
 0x211   : > { %v3791_v13 = vpop.f32.mrb[145].mxu0  ;;  %v6201_v14 = vpop.eup %6200  ;;  %4590 = vst [vmem:[%s6996_s24 + $0x960] sm:$0xff] %v6199_v6  ;;  %v3703_v15 = vadd.f32 %v3702_v8, %v6928_v9  ;;  %6222 = vtanh.f32 %v3701_v17 }
 0x212   : > { %v3792_v19 = vadd.f32 %v3791_v13, %v6928_v9  ;;  %v6203_v20 = vpop.eup %6202  ;;  %4592 = vst [vmem:[%s6996_s24 + $0x970] sm:$0xff] %v6201_v14  ;;  %6224 = vtanh.f32 %v3790_v7  ;;  %v3706_v21 = vpop.f32.mrb[146].mxu1 }
 0x213   : > { %v6205_v54 = vpop.eup %6204  ;;  %4591 = vst [vmem:[%s6996_s24 + $0x968] sm:$0xff] %v6203_v20  ;;  %v3795_v55 = vpop.f32.mrb[146].mxu0  ;;  %6226 = vtanh.f32 %v3703_v15  ;;  %v3707_v24 = vadd.f32 %v3706_v21, %v6954_v25 }
 0x214   : > { %v6207_v23 = vpop.eup %6206  ;;  %4593 = vst [vmem:[%s6996_s24 + $0x978] sm:$0xff] %v6205_v54  ;;  %v3796_v27 = vadd.f32 %v3795_v55, %v6954_v25  ;;  %v3708_v28 = vpop.f32.mrb[147].mxu1  ;;  %6228 = vtanh.f32 %v3792_v19 }
 0x215   : > { %v3797_v58 = vpop.f32.mrb[147].mxu0  ;;  %v6209_v59 = vpop.eup %6208  ;;  %4360 = vst [vmem:[%s6996_s24 + $0x230] sm:$0xff] %v6207_v23  ;;  %v3709_v29 = vadd.f32 %v3708_v28, %v6954_v25  ;;  %6230 = vtanh.f32 %v3707_v24 }
 0x216   : > { %v3798_v1 = vadd.f32 %v3797_v58, %v6954_v25  ;;  %v6211_v2 = vpop.eup %6210  ;;  %4362 = vst [vmem:[%s6996_s24 + $0x240] sm:$0xff] %v6209_v59  ;;  %6232 = vtanh.f32 %v3796_v27  ;;  %v3866_v42 = vpop.f32.mrb[148].mxu1 }
 0x217   : > { %v6213_v10 = vpop.eup %6212  ;;  %4361 = vst [vmem:[%s6996_s24 + $0x238] sm:$0xff] %v6211_v2  ;;  %v3955_v30 = vpop.f32.mrb[148].mxu0  ;;  %6234 = vtanh.f32 %v3709_v29  ;;  %v3867_v22 = vadd.f32 %v3866_v42, %v6930_v12 }
 0x218   : > { %v6215_v31 = vpop.eup %6214  ;;  %4363 = vst [vmem:[%s6996_s24 + $0x248] sm:$0xff] %v6213_v10  ;;  %v3956_v32 = vadd.f32 %v3955_v30, %v6930_v12  ;;  %v3868_v33 = vpop.f32.mrb[149].mxu1  ;;  %6236 = vtanh.f32 %v3798_v1 }
 0x219   : > { %v3957_v0 = vpop.f32.mrb[149].mxu0  ;;  %v6217_v34 = vpop.eup %6216  ;;  %4438 = vst [vmem:[%s6996_s24 + $0x4a0] sm:$0xff] %v6215_v31  ;;  %v3869_v35 = vadd.f32 %v3868_v33, %v6930_v12  ;;  %6238 = vtanh.f32 %v3867_v22 }
 0x21a   : > { %v3958_v36 = vadd.f32 %v3957_v0, %v6930_v12  ;;  %v6219_v37 = vpop.eup %6218  ;;  %4440 = vst [vmem:[%s6996_s24 + $0x4b0] sm:$0xff] %v6217_v34  ;;  %6240 = vtanh.f32 %v3956_v32  ;;  %v3872_v39 = vpop.f32.mrb[150].mxu1 }
 0x21b   : > { %v6221_v38 = vpop.eup %6220  ;;  %4439 = vst [vmem:[%s6996_s24 + $0x4a8] sm:$0xff] %v6219_v37  ;;  %v3961_v16 = vpop.f32.mrb[150].mxu0  ;;  %6242 = vtanh.f32 %v3869_v35  ;;  %v3873_v57 = vadd.f32 %v3872_v39, %v6956_v26 }
 0x21c   : > { %v6223_v40 = vpop.eup %6222  ;;  %4441 = vst [vmem:[%s6996_s24 + $0x4b8] sm:$0xff] %v6221_v38  ;;  %v3962_v41 = vadd.f32 %v3961_v16, %v6956_v26  ;;  %v3874_v43 = vpop.f32.mrb[151].mxu1  ;;  %6244 = vtanh.f32 %v3958_v36 }
 0x21d   : > { %v3963_v12 = vpop.f32.mrb[151].mxu0  ;;  %v6225_v44 = vpop.eup %6224  ;;  %4516 = vst [vmem:[%s6996_s24 + $0x710] sm:$0xff] %v6223_v40  ;;  %v3875_v45 = vadd.f32 %v3874_v43, %v6956_v26  ;;  %6246 = vtanh.f32 %v3873_v57 }
 0x21e   : > { %v3964_v46 = vadd.f32 %v3963_v12, %v6956_v26  ;;  %v6227_v47 = vpop.eup %6226  ;;  %4518 = vst [vmem:[%s6996_s24 + $0x720] sm:$0xff] %v6225_v44  ;;  %6248 = vtanh.f32 %v3962_v41  ;;  %v3878_v49 = vpop.f32.mrb[152].mxu1 }
 0x21f   : > { %v6229_v48 = vpop.eup %6228  ;;  %4517 = vst [vmem:[%s6996_s24 + $0x718] sm:$0xff] %v6227_v47  ;;  %v3967_v50 = vpop.f32.mrb[152].mxu0  ;;  %6250 = vtanh.f32 %v3875_v45  ;;  %v3879_v51 = vadd.f32 %v3878_v49, %v6928_v9 }
 0x220   : > { %v6231_v11 = vpop.eup %6230  ;;  %4519 = vst [vmem:[%s6996_s24 + $0x728] sm:$0xff] %v6229_v48  ;;  %v3968_v52 = vadd.f32 %v3967_v50, %v6928_v9  ;;  %v3880_v53 = vpop.f32.mrb[153].mxu1  ;;  %6252 = vtanh.f32 %v3964_v46 }
 0x221   : > { %v3969_v26 = vpop.f32.mrb[153].mxu0  ;;  %v6233_v56 = vpop.eup %6232  ;;  %4594 = vst [vmem:[%s6996_s24 + $0x980] sm:$0xff] %v6231_v11  ;;  %v3881_v60 = vadd.f32 %v3880_v53, %v6928_v9  ;;  %6254 = vtanh.f32 %v3879_v51 }
 0x222   : > { %v3970_v61 = vadd.f32 %v3969_v26, %v6928_v9  ;;  %v6235_v62 = vpop.eup %6234  ;;  %4596 = vst [vmem:[%s6996_s24 + $0x990] sm:$0xff] %v6233_v56  ;;  %6256 = vtanh.f32 %v3968_v52  ;;  %v3884_v3 = vpop.f32.mrb[154].mxu1 }
 0x223   : > { %v6237_v63 = vpop.eup %6236  ;;  %4595 = vst [vmem:[%s6996_s24 + $0x988] sm:$0xff] %v6235_v62  ;;  %v3973_v4 = vpop.f32.mrb[154].mxu0  ;;  %6258 = vtanh.f32 %v3881_v60  ;;  %v3885_v5 = vadd.f32 %v3884_v3, %v6954_v25 }
 0x224   : > { %v6239_v18 = vpop.eup %6238  ;;  %4597 = vst [vmem:[%s6996_s24 + $0x998] sm:$0xff] %v6237_v63  ;;  %v3974_v6 = vadd.f32 %v3973_v4, %v6954_v25  ;;  %v3886_v9 = vpop.f32.mrb[155].mxu1  ;;  %6260 = vtanh.f32 %v3970_v61 }
 0x225   : > { %v3975_v17 = vpop.f32.mrb[155].mxu0  ;;  %v6241_v7 = vpop.eup %6240  ;;  %4364 = vst [vmem:[%s6996_s24 + $0x250] sm:$0xff] %v6239_v18  ;;  %v3887_v8 = vadd.f32 %v3886_v9, %v6954_v25  ;;  %6262 = vtanh.f32 %v3885_v5 }
 0x226   : > { %v3976_v13 = vadd.f32 %v3975_v17, %v6954_v25  ;;  %v6243_v14 = vpop.eup %6242  ;;  %4366 = vst [vmem:[%s6996_s24 + $0x260] sm:$0xff] %v6241_v7  ;;  %6264 = vtanh.f32 %v3974_v6 }
 0x227   : > { %v6245_v15 = vpop.eup %6244  ;;  %4365 = vst [vmem:[%s6996_s24 + $0x258] sm:$0xff] %v6243_v14  ;;  %6266 = vtanh.f32 %v3887_v8 }
 0x228   : > { %v6247_v19 = vpop.eup %6246  ;;  %4367 = vst [vmem:[%s6996_s24 + $0x268] sm:$0xff] %v6245_v15  ;;  %6268 = vtanh.f32 %v3976_v13 }
 0x229   : > { %v6249_v20 = vpop.eup %6248  ;;  %4442 = vst [vmem:[%s6996_s24 + $0x4c0] sm:$0xff] %v6247_v19 }
 0x22a   : > { %v6251_v25 = vpop.eup %6250  ;;  %4444 = vst [vmem:[%s6996_s24 + $0x4d0] sm:$0xff] %v6249_v20 }
 0x22b   : > { %v6253_v54 = vpop.eup %6252  ;;  %4443 = vst [vmem:[%s6996_s24 + $0x4c8] sm:$0xff] %v6251_v25 }
 0x22c   : > { %v6255_v21 = vpop.eup %6254  ;;  %4445 = vst [vmem:[%s6996_s24 + $0x4d8] sm:$0xff] %v6253_v54 }
 0x22d   : > { %v6257_v55 = vpop.eup %6256  ;;  %4520 = vst [vmem:[%s6996_s24 + $0x730] sm:$0xff] %v6255_v21 }
 0x22e   : > { %v6259_v23 = vpop.eup %6258  ;;  %4522 = vst [vmem:[%s6996_s24 + $0x740] sm:$0xff] %v6257_v55  ;;  %4608 = sbr.rel (!%p6475_p4) target bundleno = 732 (0x2dc), region = 36 }
 0x22f   : > { %v6261_v24 = vpop.eup %6260  ;;  %4521 = vst [vmem:[%s6996_s24 + $0x738] sm:$0xff] %v6259_v23 }
 0x230   : > { %v6263_v27 = vpop.eup %6262  ;;  %4523 = vst [vmem:[%s6996_s24 + $0x748] sm:$0xff] %v6261_v24 }
 0x231   : > { %v6265_v28 = vpop.eup %6264  ;;  %4598 = vst [vmem:[%s6996_s24 + $0x9a0] sm:$0xff] %v6263_v27 }
 0x232   : > { %v6267_v58 = vpop.eup %6266  ;;  %4600 = vst [vmem:[%s6996_s24 + $0x9b0] sm:$0xff] %v6265_v28 }
 0x233   : > { %v6269_v59 = vpop.eup %6268  ;;  %4599 = vst [vmem:[%s6996_s24 + $0x9a8] sm:$0xff] %v6267_v58 }
 0x234   : > { %4601 = vst [vmem:[%s6996_s24 + $0x9b8] sm:$0xff] %v6269_v59 }
 0x235   : > { %s8307_s6 = smov (!%p4611_p8, %s4610_s6), 78 }
 0x236   : > { %s5414_s11 = sshll.u32 %s8307_s6, 9  ;;  %s7815_s14 = sshll.u32 %s8307_s6, 3 }
 0x237   : > { %p5418_p9 = scmp.eq.s32.totalorder %s5414_s11, 0 }
 0x238   : > { %p4621_p10 = scmp.lt.u32.totalorder (!%p5418_p9), %s7815_s14, 8 }
 0x239   : > { %4620 = sbr.rel (%p5418_p9) target bundleno = 732 (0x2dc), region = 40 }
 0x240   : > { %4624 = sbr.rel (%p4621_p10) target bundleno = 723 (0x2d3), region = 44  ;;  %s7819_s20 = sand.u32 (!%p4621_p10), 7, %s7815_s14  }
 0x241   : > { %p4646_p11 = scmp.eq.s32.totalorder (!%p4621_p10), %s7819_s20, 0  ;;  %p5419_p12 = scmp.ne.s32.totalorder (!%p4621_p10), %s7819_s20, 0 }
 0x247   : > { %4649 = sbr.rel (%p5419_p12) target bundleno = 650 (0x28a), region = 59  ;;  %s4650_s15 = sshrl.u32 (!%p5419_p12), %s7815_s14, 3 }
 0x248   : > { %s7826_s21 = sshrl.u32 (!%p5419_p12), %s4650_s15, 4 }
 0x249   : > { %p5420_p13 = scmp.le.s32.totalorder (!%p5419_p12), %s7826_s21, 0 }
 0x24e   : > { %5103 = sbr.rel (%p5420_p13) target bundleno = 630 (0x276), region = 140  ;;  %s8287_s17 = smov (!%p5420_p13), %s7813_s10 }
 0x24f   : > { %s8288_s18 = smov (!%p5420_p13), %s6996_s24  ;;  %s7835_s22 = smov (!%p5420_p13), 0  }
 0x250   : > { %s7837_s23 = smov (!%p5420_p13), 0  }
 0x255 LB: >> { %v4663_v29 = vld [vmem:[%s6368_s18] sm:$0xff]  ;;  %v4665_v1 = vld [vmem:[%s6368_s18 + $0x8] sm:$0xff]  ;;  %v4667_v2 = vld [vmem:[%s6368_s18 + $0x10] sm:$0xff]  ;;  %s4791_s12 = sadd.s32 1, %s6372_s22  ;;  %s4657_s23 = sadd.s32 1, %s6376_s23   ;;  %s6376_s23 = sphi %s7837_s23, %s4657_s23   ;;  %s6372_s22 = sphi %s7835_s22, %s8291_s22   ;;  %s6368_s18 = sphi %s8288_s18, %s8290_s18   ;;  %s6364_s17 = sphi %s8287_s17, %s8289_s17  }
 0x256   : >> { %4664 = vst [vmem:[%s6364_s17] sm:$0xff] %v4663_v29  ;;  %4666 = vst [vmem:[%s6364_s17 + $0x8] sm:$0xff] %v4665_v1  ;;  %v4669_v10 = vld [vmem:[%s6368_s18 + $0x18] sm:$0xff]  ;;  %v4671_v42 = vld [vmem:[%s6368_s18 + $0x20] sm:$0xff]  ;;  %p4792_p0 = scmp.ge.s32.totalorder %s4791_s12, %s7826_s21  ;;  %p4656_p1 = scmp.ge.s32.totalorder %s4657_s23, %s7826_s21 }
 0x257   : >> { %4668 = vst [vmem:[%s6364_s17 + $0x10] sm:$0xff] %v4667_v2  ;;  %v4673_v30 = vld [vmem:[%s6368_s18 + $0x28] sm:$0xff]  ;;  %4670 = vst [vmem:[%s6364_s17 + $0x18] sm:$0xff] %v4669_v10  ;;  %v4675_v31 = vld [vmem:[%s6368_s18 + $0x30] sm:$0xff] }
 0x258   : >> { %4672 = vst [vmem:[%s6364_s17 + $0x20] sm:$0xff] %v4671_v42  ;;  %4674 = vst [vmem:[%s6364_s17 + $0x28] sm:$0xff] %v4673_v30  ;;  %v4677_v22 = vld [vmem:[%s6368_s18 + $0x38] sm:$0xff]  ;;  %v4679_v32 = vld [vmem:[%s6368_s18 + $0x40] sm:$0xff]  ;;  %s8309_s12 = smov (%p4792_p0, %s4791_s12), 0 }
 0x259   : >> { %4676 = vst [vmem:[%s6364_s17 + $0x30] sm:$0xff] %v4675_v31  ;;  %4678 = vst [vmem:[%s6364_s17 + $0x38] sm:$0xff] %v4677_v22  ;;  %v4681_v33 = vld [vmem:[%s6368_s18 + $0x48] sm:$0xff]  ;;  %v4683_v0 = vld [vmem:[%s6368_s18 + $0x50] sm:$0xff]  ;;  %s5421_s25 = sshll.u32 %s8309_s12, 7  ;;  %s8291_s22 = smov %s8309_s12 }
 0x25a   : >> { %4680 = vst [vmem:[%s6364_s17 + $0x40] sm:$0xff] %v4679_v32  ;;  %v4685_v34 = vld [vmem:[%s6368_s18 + $0x58] sm:$0xff]  ;;  %4682 = vst [vmem:[%s6364_s17 + $0x48] sm:$0xff] %v4681_v33  ;;  %v4687_v35 = vld [vmem:[%s6368_s18 + $0x60] sm:$0xff]  ;;  %s7893_s26 = scalar_lea.vmem %s6996_s24, %s5421_s25 [#allocation2]   ;;  %s7896_s27 = scalar_lea.vmem %s7813_s10, %s5421_s25  }
 0x25b   : >> { %4684 = vst [vmem:[%s6364_s17 + $0x50] sm:$0xff] %v4683_v0  ;;  %4686 = vst [vmem:[%s6364_s17 + $0x58] sm:$0xff] %v4685_v34  ;;  %v4689_v36 = vld [vmem:[%s6368_s18 + $0x68] sm:$0xff]  ;;  %v4691_v37 = vld [vmem:[%s6368_s18 + $0x70] sm:$0xff] }
 0x25c   : >> { %4688 = vst [vmem:[%s6364_s17 + $0x60] sm:$0xff] %v4687_v35  ;;  %4690 = vst [vmem:[%s6364_s17 + $0x68] sm:$0xff] %v4689_v36  ;;  %v4693_v38 = vld [vmem:[%s6368_s18 + $0x78] sm:$0xff]  ;;  %v4695_v39 = vld [vmem:[%s6368_s18 + $0x270] sm:$0xff] }
 0x25d   : >> { %4692 = vst [vmem:[%s6364_s17 + $0x70] sm:$0xff] %v4691_v37  ;;  %v4697_v16 = vld [vmem:[%s6368_s18 + $0x278] sm:$0xff]  ;;  %4694 = vst [vmem:[%s6364_s17 + $0x78] sm:$0xff] %v4693_v38  ;;  %v4699_v40 = vld [vmem:[%s6368_s18 + $0x280] sm:$0xff] }
 0x25e   : >> { %4696 = vst [vmem:[%s6364_s17 + $0x1328] sm:$0xff] %v4695_v39  ;;  %4698 = vst [vmem:[%s6364_s17 + $0x1330] sm:$0xff] %v4697_v16  ;;  %v4701_v57 = vld [vmem:[%s6368_s18 + $0x288] sm:$0xff]  ;;  %v4703_v41 = vld [vmem:[%s6368_s18 + $0x290] sm:$0xff] }
 0x25f   : >> { %4700 = vst [vmem:[%s6364_s17 + $0x1338] sm:$0xff] %v4699_v40  ;;  %4702 = vst [vmem:[%s6364_s17 + $0x1340] sm:$0xff] %v4701_v57  ;;  %v4705_v43 = vld [vmem:[%s6368_s18 + $0x298] sm:$0xff]  ;;  %v4707_v12 = vld [vmem:[%s6368_s18 + $0x2a0] sm:$0xff] }
 0x260   : >> { %4704 = vst [vmem:[%s6364_s17 + $0x1348] sm:$0xff] %v4703_v41  ;;  %v4709_v44 = vld [vmem:[%s6368_s18 + $0x2a8] sm:$0xff]  ;;  %4706 = vst [vmem:[%s6364_s17 + $0x1350] sm:$0xff] %v4705_v43  ;;  %v4711_v45 = vld [vmem:[%s6368_s18 + $0x2b0] sm:$0xff] }
 0x261   : >> { %4708 = vst [vmem:[%s6364_s17 + $0x1358] sm:$0xff] %v4707_v12  ;;  %4710 = vst [vmem:[%s6364_s17 + $0x1360] sm:$0xff] %v4709_v44  ;;  %v4713_v46 = vld [vmem:[%s6368_s18 + $0x2b8] sm:$0xff]  ;;  %v4715_v47 = vld [vmem:[%s6368_s18 + $0x2c0] sm:$0xff] }
 0x262   : >> { %4712 = vst [vmem:[%s6364_s17 + $0x1368] sm:$0xff] %v4711_v45  ;;  %4714 = vst [vmem:[%s6364_s17 + $0x1370] sm:$0xff] %v4713_v46  ;;  %v4717_v48 = vld [vmem:[%s6368_s18 + $0x2c8] sm:$0xff]  ;;  %v4719_v49 = vld [vmem:[%s6368_s18 + $0x2d0] sm:$0xff] }
 0x263   : >> { %4716 = vst [vmem:[%s6364_s17 + $0x1378] sm:$0xff] %v4715_v47  ;;  %v4721_v50 = vld [vmem:[%s6368_s18 + $0x2d8] sm:$0xff]  ;;  %4718 = vst [vmem:[%s6364_s17 + $0x1380] sm:$0xff] %v4717_v48  ;;  %v4723_v11 = vld [vmem:[%s6368_s18 + $0x2e0] sm:$0xff] }
 0x264   : >> { %4720 = vst [vmem:[%s6364_s17 + $0x1388] sm:$0xff] %v4719_v49  ;;  %4722 = vst [vmem:[%s6364_s17 + $0x1390] sm:$0xff] %v4721_v50  ;;  %v4725_v51 = vld [vmem:[%s6368_s18 + $0x2e8] sm:$0xff]  ;;  %v4727_v52 = vld [vmem:[%s6368_s18 + $0x4e0] sm:$0xff] }
 0x265   : >> { %4724 = vst [vmem:[%s6364_s17 + $0x1398] sm:$0xff] %v4723_v11  ;;  %4726 = vst [vmem:[%s6364_s17 + $0x13a0] sm:$0xff] %v4725_v51  ;;  %v4729_v53 = vld [vmem:[%s6368_s18 + $0x4e8] sm:$0xff]  ;;  %v4731_v26 = vld [vmem:[%s6368_s18 + $0x4f0] sm:$0xff] }
 0x266   : >> { %4728 = vst [vmem:[%s6364_s17 + $0x2650] sm:$0xff] %v4727_v52  ;;  %v4733_v56 = vld [vmem:[%s6368_s18 + $0x4f8] sm:$0xff]  ;;  %4730 = vst [vmem:[%s6364_s17 + $0x2658] sm:$0xff] %v4729_v53  ;;  %v4735_v60 = vld [vmem:[%s6368_s18 + $0x500] sm:$0xff] }
 0x267   : >> { %4732 = vst [vmem:[%s6364_s17 + $0x2660] sm:$0xff] %v4731_v26  ;;  %4734 = vst [vmem:[%s6364_s17 + $0x2668] sm:$0xff] %v4733_v56  ;;  %v4737_v61 = vld [vmem:[%s6368_s18 + $0x508] sm:$0xff]  ;;  %v4739_v62 = vld [vmem:[%s6368_s18 + $0x510] sm:$0xff] }
 0x268   : >> { %4736 = vst [vmem:[%s6364_s17 + $0x2670] sm:$0xff] %v4735_v60  ;;  %4738 = vst [vmem:[%s6364_s17 + $0x2678] sm:$0xff] %v4737_v61  ;;  %v4741_v63 = vld [vmem:[%s6368_s18 + $0x518] sm:$0xff]  ;;  %v4743_v3 = vld [vmem:[%s6368_s18 + $0x520] sm:$0xff] }
 0x269   : >> { %4740 = vst [vmem:[%s6364_s17 + $0x2680] sm:$0xff] %v4739_v62  ;;  %v4745_v4 = vld [vmem:[%s6368_s18 + $0x528] sm:$0xff]  ;;  %4742 = vst [vmem:[%s6364_s17 + $0x2688] sm:$0xff] %v4741_v63  ;;  %v4747_v18 = vld [vmem:[%s6368_s18 + $0x530] sm:$0xff] }
 0x26a   : >> { %4744 = vst [vmem:[%s6364_s17 + $0x2690] sm:$0xff] %v4743_v3  ;;  %4746 = vst [vmem:[%s6364_s17 + $0x2698] sm:$0xff] %v4745_v4  ;;  %v4749_v5 = vld [vmem:[%s6368_s18 + $0x538] sm:$0xff]  ;;  %v4751_v6 = vld [vmem:[%s6368_s18 + $0x540] sm:$0xff] }
 0x26b   : >> { %4748 = vst [vmem:[%s6364_s17 + $0x26a0] sm:$0xff] %v4747_v18  ;;  %4750 = vst [vmem:[%s6364_s17 + $0x26a8] sm:$0xff] %v4749_v5  ;;  %v4753_v9 = vld [vmem:[%s6368_s18 + $0x548] sm:$0xff]  ;;  %v4755_v17 = vld [vmem:[%s6368_s18 + $0x550] sm:$0xff] }
 0x26c   : >> { %4752 = vst [vmem:[%s6364_s17 + $0x26b0] sm:$0xff] %v4751_v6  ;;  %v4757_v7 = vld [vmem:[%s6368_s18 + $0x558] sm:$0xff]  ;;  %4754 = vst [vmem:[%s6364_s17 + $0x26b8] sm:$0xff] %v4753_v9  ;;  %v4759_v8 = vld [vmem:[%s6368_s18 + $0x750] sm:$0xff] }
 0x26d   : >> { %4756 = vst [vmem:[%s6364_s17 + $0x26c0] sm:$0xff] %v4755_v17  ;;  %4758 = vst [vmem:[%s6364_s17 + $0x26c8] sm:$0xff] %v4757_v7  ;;  %v4761_v13 = vld [vmem:[%s6368_s18 + $0x758] sm:$0xff]  ;;  %v4763_v14 = vld [vmem:[%s6368_s18 + $0x760] sm:$0xff] }
 0x26e   : >> { %4760 = vst [vmem:[%s6364_s17 + $0x3978] sm:$0xff] %v4759_v8  ;;  %4762 = vst [vmem:[%s6364_s17 + $0x3980] sm:$0xff] %v4761_v13  ;;  %v4765_v15 = vld [vmem:[%s6368_s18 + $0x768] sm:$0xff]  ;;  %v4767_v19 = vld [vmem:[%s6368_s18 + $0x770] sm:$0xff] }
 0x26f   : >> { %4764 = vst [vmem:[%s6364_s17 + $0x3988] sm:$0xff] %v4763_v14  ;;  %v4769_v20 = vld [vmem:[%s6368_s18 + $0x778] sm:$0xff]  ;;  %4766 = vst [vmem:[%s6364_s17 + $0x3990] sm:$0xff] %v4765_v15  ;;  %v4771_v25 = vld [vmem:[%s6368_s18 + $0x780] sm:$0xff]  ;;  %4659 = sbr.rel (!%p4656_p1) target bundleno = 597 (0x255), region = 146 }
 0x270   : >> { %4768 = vst [vmem:[%s6364_s17 + $0x3998] sm:$0xff] %v4767_v19  ;;  %4770 = vst [vmem:[%s6364_s17 + $0x39a0] sm:$0xff] %v4769_v20  ;;  %v4773_v54 = vld [vmem:[%s6368_s18 + $0x788] sm:$0xff]  ;;  %v4775_v21 = vld [vmem:[%s6368_s18 + $0x790] sm:$0xff] }
 0x271   : >> { %4772 = vst [vmem:[%s6364_s17 + $0x39a8] sm:$0xff] %v4771_v25  ;;  %4774 = vst [vmem:[%s6364_s17 + $0x39b0] sm:$0xff] %v4773_v54  ;;  %v4777_v55 = vld [vmem:[%s6368_s18 + $0x798] sm:$0xff]  ;;  %v4779_v23 = vld [vmem:[%s6368_s18 + $0x7a0] sm:$0xff] }
 0x272   : >> { %4776 = vst [vmem:[%s6364_s17 + $0x39b8] sm:$0xff] %v4775_v21  ;;  %v4781_v24 = vld [vmem:[%s6368_s18 + $0x7a8] sm:$0xff]  ;;  %4778 = vst [vmem:[%s6364_s17 + $0x39c0] sm:$0xff] %v4777_v55  ;;  %v4783_v27 = vld [vmem:[%s6368_s18 + $0x7b0] sm:$0xff] }
 0x273   : >> { %4780 = vst [vmem:[%s6364_s17 + $0x39c8] sm:$0xff] %v4779_v23  ;;  %4782 = vst [vmem:[%s6364_s17 + $0x39d0] sm:$0xff] %v4781_v24  ;;  %v4785_v28 = vld [vmem:[%s6368_s18 + $0x7b8] sm:$0xff]  ;;  %v4787_v58 = vld [vmem:[%s6368_s18 + $0x7c0] sm:$0xff] }
 0x274   : >> { %4784 = vst [vmem:[%s6364_s17 + $0x39d8] sm:$0xff] %v4783_v27  ;;  %4786 = vst [vmem:[%s6364_s17 + $0x39e0] sm:$0xff] %v4785_v28  ;;  %v4789_v59 = vld [vmem:[%s6368_s18 + $0x7c8] sm:$0xff]  ;;  %s8290_s18 = smov %s7893_s26 }
 0x275   : >> { %4788 = vst [vmem:[%s6364_s17 + $0x39e8] sm:$0xff] %v4787_v58  ;;  %4790 = vst [vmem:[%s6364_s17 + $0x39f0] sm:$0xff] %v4789_v59  ;;  %s8289_s17 = smov %s7896_s27 }
 0x276 PF: > { %s8002_s28 = sand.u32 15, %s4650_s15   ;;  %s5442_s29 = sshll.u32 %s7826_s21, 11 }
 0x277   : > { %s4802_s30 = sshra.s32 %s5442_s29, 4  ;;  %p5426_p2 = scmp.le.s32.totalorder %s8002_s28, 0 }
 0x278   : > { %s8006_s4 = scalar_lea.vmem %s6996_s24, %s4802_s30 [#allocation2]   ;;  %s8009_s5 = scalar_lea.vmem %s7813_s10, %s4802_s30  }
 0x279   : > { %5117 = sbr.rel (%p5426_p2) target bundleno = 650 (0x28a), region = 151  ;;  %s8292_s6 = smov (!%p5426_p2), %s8009_s5 }
 0x27a   : > { %s8293_s7 = smov (!%p5426_p2), %s8006_s4  ;;  %s8018_s8 = smov (!%p5426_p2), 0  }
 0x27b   : > { %s6390_s9 = smov (!%p5426_p2), 0  }
 0x280 LB: >> { %v4818_v29 = vld [vmem:[%s6384_s7] sm:$0xff]  ;;  %v4820_v1 = vld [vmem:[%s6384_s7 + $0x270] sm:$0xff]  ;;  %s4826_s11 = sadd.s32 1, %s6388_s8  ;;  %s4812_s9 = sadd.s32 1, %s6392_s9   ;;  %s6392_s9 = sphi %s6390_s9, %s4812_s9   ;;  %s6388_s8 = sphi %s8018_s8, %s8294_s8   ;;  %s6384_s7 = sphi %s8293_s7, %s4831_s7   ;;  %s6380_s6 = sphi %s8292_s6, %s4832_s6  }
 0x281   : >> { %v4822_v2 = vld [vmem:[%s6384_s7 + $0x4e0] sm:$0xff]  ;;  %4819 = vst [vmem:[%s6380_s6] sm:$0xff] %v4818_v29  ;;  %4821 = vst [vmem:[%s6380_s6 + $0x1328] sm:$0xff] %v4820_v1  ;;  %v4824_v10 = vld [vmem:[%s6384_s7 + $0x750] sm:$0xff]  ;;  %p4827_p3 = scmp.ge.s32.totalorder %s4826_s11, %s8002_s28  ;;  %p4811_p4 = scmp.ge.s32.totalorder %s4812_s9, %s8002_s28 }
 0x282   : >> { %4823 = vst [vmem:[%s6380_s6 + $0x2650] sm:$0xff] %v4822_v2  ;;  %4825 = vst [vmem:[%s6380_s6 + $0x3978] sm:$0xff] %v4824_v10 }
 0x283   : >> { %s8311_s11 = smov (%p4827_p3, %s4826_s11), 0  ;;  %4814 = sbr.rel (!%p4811_p4) target bundleno = 640 (0x280), region = 157 }
 0x284   : >> { %s5427_s15 = sshll.u32 %s8311_s11, 3  ;;  %s8294_s8 = smov %s8311_s11 }
 0x285   : >> { %s4831_s7 = scalar_lea.vmem %s8006_s4, %s5427_s15 [#allocation2]   ;;  %s4832_s6 = scalar_lea.vmem %s8009_s5, %s5427_s15  }
 0x28a PF: > { %4835 = sbr.rel (%p4646_p11) target bundleno = 723 (0x2d3), region = 77  ;;  %s4837_s21 = ssub.s32 (!%p4646_p11), %s7815_s14, %s7819_s20 }
 0x28b   : > { %s4841_s17 = sshrl.u32 (!%p4646_p11), %s7815_s14, 3  ;;  %s8039_s18 = scalar_lea.vmem (!%p4646_p11), %s6996_s24, %s4837_s21 [#allocation2] }
 0x28c   : > { %s8042_s22 = scalar_lea.vmem (!%p4646_p11), %s7813_s10, %s4837_s21  ;;  %s8046_s23 = sshrl.u32 (!%p4646_p11), %s4841_s17, 4 }
 0x28d   : > { %p5429_p5 = scmp.le.s32.totalorder (!%p4646_p11), %s8046_s23, 0 }
 0x291   : > { %5131 = sbr.rel (%p5429_p5) target bundleno = 697 (0x2b9), region = 162  ;;  %s8295_s12 = smov (!%p5429_p5), %s7813_s10 }
 0x292   : > { %s8296_s25 = smov (!%p5429_p5), %s6996_s24  ;;  %s8055_s26 = smov (!%p5429_p5), 0  }
 0x293   : > { %s8057_s27 = smov (!%p5429_p5), 0  }
 0x298 LB: >> { %v4854_v42 = vld [vmem:[%s6400_s25] sm:$0xff]  ;;  %v4856_v30 = vld [vmem:[%s6400_s25 + $0x8] sm:$0xff]  ;;  %v4858_v31 = vld [vmem:[%s6400_s25 + $0x10] sm:$0xff]  ;;  %s4982_s28 = sadd.s32 1, %s6404_s26  ;;  %s4848_s27 = sadd.s32 1, %s6408_s27   ;;  %s6408_s27 = sphi %s8057_s27, %s4848_s27   ;;  %s6404_s26 = sphi %s8055_s26, %s8299_s26   ;;  %s6400_s25 = sphi %s8296_s25, %s8298_s25   ;;  %s6396_s12 = sphi %s8295_s12, %s8297_s12  }
 0x299   : >> { %4855 = vst [vmem:[%s6396_s12] sm:$0xff] %v4854_v42  ;;  %4857 = vst [vmem:[%s6396_s12 + $0x8] sm:$0xff] %v4856_v30  ;;  %v4860_v22 = vld [vmem:[%s6400_s25 + $0x18] sm:$0xff]  ;;  %v4862_v32 = vld [vmem:[%s6400_s25 + $0x20] sm:$0xff]  ;;  %p4983_p6 = scmp.ge.s32.totalorder %s4982_s28, %s8046_s23  ;;  %p4847_p7 = scmp.ge.s32.totalorder %s4848_s27, %s8046_s23 }
 0x29a   : >> { %4859 = vst [vmem:[%s6396_s12 + $0x10] sm:$0xff] %v4858_v31  ;;  %v4864_v33 = vld [vmem:[%s6400_s25 + $0x28] sm:$0xff]  ;;  %4861 = vst [vmem:[%s6396_s12 + $0x18] sm:$0xff] %v4860_v22  ;;  %v4866_v0 = vld [vmem:[%s6400_s25 + $0x30] sm:$0xff] }
 0x29b   : >> { %4863 = vst [vmem:[%s6396_s12 + $0x20] sm:$0xff] %v4862_v32  ;;  %4865 = vst [vmem:[%s6396_s12 + $0x28] sm:$0xff] %v4864_v33  ;;  %v4868_v34 = vld [vmem:[%s6400_s25 + $0x38] sm:$0xff]  ;;  %v4870_v35 = vld [vmem:[%s6400_s25 + $0x40] sm:$0xff]  ;;  %s8313_s28 = smov (%p4983_p6, %s4982_s28), 0 }
 0x29c   : >> { %4867 = vst [vmem:[%s6396_s12 + $0x30] sm:$0xff] %v4866_v0  ;;  %4869 = vst [vmem:[%s6396_s12 + $0x38] sm:$0xff] %v4868_v34  ;;  %v4872_v36 = vld [vmem:[%s6400_s25 + $0x48] sm:$0xff]  ;;  %v4874_v37 = vld [vmem:[%s6400_s25 + $0x50] sm:$0xff]  ;;  %s5430_s29 = sshll.u32 %s8313_s28, 7  ;;  %s8299_s26 = smov %s8313_s28 }
 0x29d   : >> { %4871 = vst [vmem:[%s6396_s12 + $0x40] sm:$0xff] %v4870_v35  ;;  %v4876_v38 = vld [vmem:[%s6400_s25 + $0x58] sm:$0xff]  ;;  %4873 = vst [vmem:[%s6396_s12 + $0x48] sm:$0xff] %v4872_v36  ;;  %v4878_v39 = vld [vmem:[%s6400_s25 + $0x60] sm:$0xff]  ;;  %s8113_s30 = scalar_lea.vmem %s6996_s24, %s5430_s29 [#allocation2]   ;;  %s8116_s4 = scalar_lea.vmem %s7813_s10, %s5430_s29  }
 0x29e   : >> { %4875 = vst [vmem:[%s6396_s12 + $0x50] sm:$0xff] %v4874_v37  ;;  %4877 = vst [vmem:[%s6396_s12 + $0x58] sm:$0xff] %v4876_v38  ;;  %v4880_v16 = vld [vmem:[%s6400_s25 + $0x68] sm:$0xff]  ;;  %v4882_v40 = vld [vmem:[%s6400_s25 + $0x70] sm:$0xff] }
 0x29f   : >> { %4879 = vst [vmem:[%s6396_s12 + $0x60] sm:$0xff] %v4878_v39  ;;  %4881 = vst [vmem:[%s6396_s12 + $0x68] sm:$0xff] %v4880_v16  ;;  %v4884_v57 = vld [vmem:[%s6400_s25 + $0x78] sm:$0xff]  ;;  %v4886_v41 = vld [vmem:[%s6400_s25 + $0x270] sm:$0xff] }
 0x2a0   : >> { %4883 = vst [vmem:[%s6396_s12 + $0x70] sm:$0xff] %v4882_v40  ;;  %v4888_v43 = vld [vmem:[%s6400_s25 + $0x278] sm:$0xff]  ;;  %4885 = vst [vmem:[%s6396_s12 + $0x78] sm:$0xff] %v4884_v57  ;;  %v4890_v12 = vld [vmem:[%s6400_s25 + $0x280] sm:$0xff] }
 0x2a1   : >> { %4887 = vst [vmem:[%s6396_s12 + $0x1328] sm:$0xff] %v4886_v41  ;;  %4889 = vst [vmem:[%s6396_s12 + $0x1330] sm:$0xff] %v4888_v43  ;;  %v4892_v44 = vld [vmem:[%s6400_s25 + $0x288] sm:$0xff]  ;;  %v4894_v45 = vld [vmem:[%s6400_s25 + $0x290] sm:$0xff] }
 0x2a2   : >> { %4891 = vst [vmem:[%s6396_s12 + $0x1338] sm:$0xff] %v4890_v12  ;;  %4893 = vst [vmem:[%s6396_s12 + $0x1340] sm:$0xff] %v4892_v44  ;;  %v4896_v46 = vld [vmem:[%s6400_s25 + $0x298] sm:$0xff]  ;;  %v4898_v47 = vld [vmem:[%s6400_s25 + $0x2a0] sm:$0xff] }
 0x2a3   : >> { %4895 = vst [vmem:[%s6396_s12 + $0x1348] sm:$0xff] %v4894_v45  ;;  %v4900_v48 = vld [vmem:[%s6400_s25 + $0x2a8] sm:$0xff]  ;;  %4897 = vst [vmem:[%s6396_s12 + $0x1350] sm:$0xff] %v4896_v46  ;;  %v4902_v49 = vld [vmem:[%s6400_s25 + $0x2b0] sm:$0xff] }
 0x2a4   : >> { %4899 = vst [vmem:[%s6396_s12 + $0x1358] sm:$0xff] %v4898_v47  ;;  %4901 = vst [vmem:[%s6396_s12 + $0x1360] sm:$0xff] %v4900_v48  ;;  %v4904_v50 = vld [vmem:[%s6400_s25 + $0x2b8] sm:$0xff]  ;;  %v4906_v11 = vld [vmem:[%s6400_s25 + $0x2c0] sm:$0xff] }
 0x2a5   : >> { %4903 = vst [vmem:[%s6396_s12 + $0x1368] sm:$0xff] %v4902_v49  ;;  %4905 = vst [vmem:[%s6396_s12 + $0x1370] sm:$0xff] %v4904_v50  ;;  %v4908_v51 = vld [vmem:[%s6400_s25 + $0x2c8] sm:$0xff]  ;;  %v4910_v52 = vld [vmem:[%s6400_s25 + $0x2d0] sm:$0xff] }
 0x2a6   : >> { %4907 = vst [vmem:[%s6396_s12 + $0x1378] sm:$0xff] %v4906_v11  ;;  %v4912_v53 = vld [vmem:[%s6400_s25 + $0x2d8] sm:$0xff]  ;;  %4909 = vst [vmem:[%s6396_s12 + $0x1380] sm:$0xff] %v4908_v51  ;;  %v4914_v26 = vld [vmem:[%s6400_s25 + $0x2e0] sm:$0xff] }
 0x2a7   : >> { %4911 = vst [vmem:[%s6396_s12 + $0x1388] sm:$0xff] %v4910_v52  ;;  %4913 = vst [vmem:[%s6396_s12 + $0x1390] sm:$0xff] %v4912_v53  ;;  %v4916_v56 = vld [vmem:[%s6400_s25 + $0x2e8] sm:$0xff]  ;;  %v4918_v60 = vld [vmem:[%s6400_s25 + $0x4e0] sm:$0xff] }
 0x2a8   : >> { %4915 = vst [vmem:[%s6396_s12 + $0x1398] sm:$0xff] %v4914_v26  ;;  %4917 = vst [vmem:[%s6396_s12 + $0x13a0] sm:$0xff] %v4916_v56  ;;  %v4920_v61 = vld [vmem:[%s6400_s25 + $0x4e8] sm:$0xff]  ;;  %v4922_v62 = vld [vmem:[%s6400_s25 + $0x4f0] sm:$0xff] }
 0x2a9   : >> { %4919 = vst [vmem:[%s6396_s12 + $0x2650] sm:$0xff] %v4918_v60  ;;  %v4924_v63 = vld [vmem:[%s6400_s25 + $0x4f8] sm:$0xff]  ;;  %4921 = vst [vmem:[%s6396_s12 + $0x2658] sm:$0xff] %v4920_v61  ;;  %v4926_v3 = vld [vmem:[%s6400_s25 + $0x500] sm:$0xff] }
 0x2aa   : >> { %4923 = vst [vmem:[%s6396_s12 + $0x2660] sm:$0xff] %v4922_v62  ;;  %4925 = vst [vmem:[%s6396_s12 + $0x2668] sm:$0xff] %v4924_v63  ;;  %v4928_v4 = vld [vmem:[%s6400_s25 + $0x508] sm:$0xff]  ;;  %v4930_v18 = vld [vmem:[%s6400_s25 + $0x510] sm:$0xff] }
 0x2ab   : >> { %4927 = vst [vmem:[%s6396_s12 + $0x2670] sm:$0xff] %v4926_v3  ;;  %4929 = vst [vmem:[%s6396_s12 + $0x2678] sm:$0xff] %v4928_v4  ;;  %v4932_v5 = vld [vmem:[%s6400_s25 + $0x518] sm:$0xff]  ;;  %v4934_v6 = vld [vmem:[%s6400_s25 + $0x520] sm:$0xff] }
 0x2ac   : >> { %4931 = vst [vmem:[%s6396_s12 + $0x2680] sm:$0xff] %v4930_v18  ;;  %v4936_v9 = vld [vmem:[%s6400_s25 + $0x528] sm:$0xff]  ;;  %4933 = vst [vmem:[%s6396_s12 + $0x2688] sm:$0xff] %v4932_v5  ;;  %v4938_v17 = vld [vmem:[%s6400_s25 + $0x530] sm:$0xff] }
 0x2ad   : >> { %4935 = vst [vmem:[%s6396_s12 + $0x2690] sm:$0xff] %v4934_v6  ;;  %4937 = vst [vmem:[%s6396_s12 + $0x2698] sm:$0xff] %v4936_v9  ;;  %v4940_v7 = vld [vmem:[%s6400_s25 + $0x538] sm:$0xff]  ;;  %v4942_v8 = vld [vmem:[%s6400_s25 + $0x540] sm:$0xff] }
 0x2ae   : >> { %4939 = vst [vmem:[%s6396_s12 + $0x26a0] sm:$0xff] %v4938_v17  ;;  %4941 = vst [vmem:[%s6396_s12 + $0x26a8] sm:$0xff] %v4940_v7  ;;  %v4944_v13 = vld [vmem:[%s6400_s25 + $0x548] sm:$0xff]  ;;  %v4946_v14 = vld [vmem:[%s6400_s25 + $0x550] sm:$0xff] }
 0x2af   : >> { %4943 = vst [vmem:[%s6396_s12 + $0x26b0] sm:$0xff] %v4942_v8  ;;  %v4948_v15 = vld [vmem:[%s6400_s25 + $0x558] sm:$0xff]  ;;  %4945 = vst [vmem:[%s6396_s12 + $0x26b8] sm:$0xff] %v4944_v13  ;;  %v4950_v19 = vld [vmem:[%s6400_s25 + $0x750] sm:$0xff] }
 0x2b0   : >> { %4947 = vst [vmem:[%s6396_s12 + $0x26c0] sm:$0xff] %v4946_v14  ;;  %4949 = vst [vmem:[%s6396_s12 + $0x26c8] sm:$0xff] %v4948_v15  ;;  %v4952_v20 = vld [vmem:[%s6400_s25 + $0x758] sm:$0xff]  ;;  %v4954_v25 = vld [vmem:[%s6400_s25 + $0x760] sm:$0xff] }
 0x2b1   : >> { %4951 = vst [vmem:[%s6396_s12 + $0x3978] sm:$0xff] %v4950_v19  ;;  %4953 = vst [vmem:[%s6396_s12 + $0x3980] sm:$0xff] %v4952_v20  ;;  %v4956_v54 = vld [vmem:[%s6400_s25 + $0x768] sm:$0xff]  ;;  %v4958_v21 = vld [vmem:[%s6400_s25 + $0x770] sm:$0xff] }
 0x2b2   : >> { %4955 = vst [vmem:[%s6396_s12 + $0x3988] sm:$0xff] %v4954_v25  ;;  %v4960_v55 = vld [vmem:[%s6400_s25 + $0x778] sm:$0xff]  ;;  %4957 = vst [vmem:[%s6396_s12 + $0x3990] sm:$0xff] %v4956_v54  ;;  %v4962_v23 = vld [vmem:[%s6400_s25 + $0x780] sm:$0xff]  ;;  %4850 = sbr.rel (!%p4847_p7) target bundleno = 664 (0x298), region = 168 }
 0x2b3   : >> { %4959 = vst [vmem:[%s6396_s12 + $0x3998] sm:$0xff] %v4958_v21  ;;  %4961 = vst [vmem:[%s6396_s12 + $0x39a0] sm:$0xff] %v4960_v55  ;;  %v4964_v24 = vld [vmem:[%s6400_s25 + $0x788] sm:$0xff]  ;;  %v4966_v27 = vld [vmem:[%s6400_s25 + $0x790] sm:$0xff] }
 0x2b4   : >> { %4963 = vst [vmem:[%s6396_s12 + $0x39a8] sm:$0xff] %v4962_v23  ;;  %4965 = vst [vmem:[%s6396_s12 + $0x39b0] sm:$0xff] %v4964_v24  ;;  %v4968_v28 = vld [vmem:[%s6400_s25 + $0x798] sm:$0xff]  ;;  %v4970_v58 = vld [vmem:[%s6400_s25 + $0x7a0] sm:$0xff] }
 0x2b5   : >> { %4967 = vst [vmem:[%s6396_s12 + $0x39b8] sm:$0xff] %v4966_v27  ;;  %v4972_v59 = vld [vmem:[%s6400_s25 + $0x7a8] sm:$0xff]  ;;  %4969 = vst [vmem:[%s6396_s12 + $0x39c0] sm:$0xff] %v4968_v28  ;;  %v4974_v29 = vld [vmem:[%s6400_s25 + $0x7b0] sm:$0xff] }
 0x2b6   : >> { %4971 = vst [vmem:[%s6396_s12 + $0x39c8] sm:$0xff] %v4970_v58  ;;  %4973 = vst [vmem:[%s6396_s12 + $0x39d0] sm:$0xff] %v4972_v59  ;;  %v4976_v1 = vld [vmem:[%s6400_s25 + $0x7b8] sm:$0xff]  ;;  %v4978_v2 = vld [vmem:[%s6400_s25 + $0x7c0] sm:$0xff] }
 0x2b7   : >> { %4975 = vst [vmem:[%s6396_s12 + $0x39d8] sm:$0xff] %v4974_v29  ;;  %4977 = vst [vmem:[%s6396_s12 + $0x39e0] sm:$0xff] %v4976_v1  ;;  %v4980_v10 = vld [vmem:[%s6400_s25 + $0x7c8] sm:$0xff]  ;;  %s8298_s25 = smov %s8113_s30 }
 0x2b8   : >> { %4979 = vst [vmem:[%s6396_s12 + $0x39e8] sm:$0xff] %v4978_v2  ;;  %4981 = vst [vmem:[%s6396_s12 + $0x39f0] sm:$0xff] %v4980_v10  ;;  %s8297_s12 = smov %s8116_s4 }
 0x2b9 PF: > { %s8222_s5 = sand.u32 15, %s4841_s17   ;;  %s5444_s6 = sshll.u32 %s8046_s23, 11 }
 0x2ba   : > { %s4993_s7 = sshra.s32 %s5444_s6, 4  ;;  %p5435_p8 = scmp.le.s32.totalorder %s8222_s5, 0 }
 0x2bb   : > { %s8226_s8 = scalar_lea.vmem %s6996_s24, %s4993_s7 [#allocation2]   ;;  %s8229_s9 = scalar_lea.vmem %s7813_s10, %s4993_s7  }
 0x2bc   : > { %5145 = sbr.rel (%p5435_p8) target bundleno = 717 (0x2cd), region = 173  ;;  %s8300_s11 = smov (!%p5435_p8), %s8229_s9 }
 0x2bd   : > { %s8301_s15 = smov (!%p5435_p8), %s8226_s8  ;;  %s8238_s21 = smov (!%p5435_p8), 0  }
 0x2be   : > { %s6422_s12 = smov (!%p5435_p8), 0  }
 0x2c3 LB: >> { %v5009_v42 = vld [vmem:[%s6416_s15] sm:$0xff]  ;;  %v5011_v30 = vld [vmem:[%s6416_s15 + $0x270] sm:$0xff]  ;;  %s5017_s17 = sadd.s32 1, %s6420_s21  ;;  %s5003_s12 = sadd.s32 1, %s6424_s12   ;;  %s6424_s12 = sphi %s6422_s12, %s5003_s12   ;;  %s6420_s21 = sphi %s8238_s21, %s8302_s21   ;;  %s6416_s15 = sphi %s8301_s15, %s5022_s15   ;;  %s6412_s11 = sphi %s8300_s11, %s5023_s11  }
 0x2c4   : >> { %v5013_v31 = vld [vmem:[%s6416_s15 + $0x4e0] sm:$0xff]  ;;  %5010 = vst [vmem:[%s6412_s11] sm:$0xff] %v5009_v42  ;;  %5012 = vst [vmem:[%s6412_s11 + $0x1328] sm:$0xff] %v5011_v30  ;;  %v5015_v22 = vld [vmem:[%s6416_s15 + $0x750] sm:$0xff]  ;;  %p5018_p9 = scmp.ge.s32.totalorder %s5017_s17, %s8222_s5  ;;  %p5002_p10 = scmp.ge.s32.totalorder %s5003_s12, %s8222_s5 }
 0x2c5   : >> { %5014 = vst [vmem:[%s6412_s11 + $0x2650] sm:$0xff] %v5013_v31  ;;  %5016 = vst [vmem:[%s6412_s11 + $0x3978] sm:$0xff] %v5015_v22 }
 0x2c6   : >> { %s8315_s17 = smov (%p5018_p9, %s5017_s17), 0  ;;  %5005 = sbr.rel (!%p5002_p10) target bundleno = 707 (0x2c3), region = 179 }
 0x2c7   : >> { %s5436_s23 = sshll.u32 %s8315_s17, 3  ;;  %s8302_s21 = smov %s8315_s17 }
 0x2c8   : >> { %s5022_s15 = scalar_lea.vmem %s8226_s8, %s5436_s23 [#allocation2]   ;;  %s5023_s11 = scalar_lea.vmem %s8229_s9, %s5436_s23  }
 0x2cd PF: > { %s6428_s25 = smov 0  }
 0x2ce   : > { %s5024_s26 = sshllo.u32 %s6428_s25, %s7819_s20 }
 0x2cf   : > { %v5033_v32 = vld [vmem:[%s8039_s18] sm:%s5024_s26]  ;;  %v5035_v33 = vld [vmem:[%s8039_s18 + $0x270] sm:%s5024_s26] }
 0x2d0   : > { %5034 = vst [vmem:[%s8042_s22] sm:%s5024_s26] %v5033_v32  ;;  %5036 = vst [vmem:[%s8042_s22 + $0x1328] sm:%s5024_s26] %v5035_v33 }
 0x2d1   : > { %v5037_v0 = vld [vmem:[%s8039_s18 + $0x4e0] sm:%s5024_s26]  ;;  %v5039_v34 = vld [vmem:[%s8039_s18 + $0x750] sm:%s5024_s26] }
 0x2d2   : > { %5038 = vst [vmem:[%s8042_s22 + $0x2650] sm:%s5024_s26] %v5037_v0  ;;  %5040 = vst [vmem:[%s8042_s22 + $0x3978] sm:%s5024_s26] %v5039_v34 }
 0x2d3 PF: > { %p5438_p11 = scmp.ge.u32.totalorder %s7815_s14, 8 }
 0x2d4   : > { %s6429_s27 = smov (!%p5438_p11), 0  }
 0x2d5   : > { %4627 = sbr.rel (%p5438_p11) target bundleno = 732 (0x2dc), region = 48  ;;  %s4628_s20 = sshllo.u32 (!%p5438_p11), %s6429_s27, %s7815_s14 }
 0x2d6   : > { %v4637_v35 = vld [vmem:[%s6996_s24] sm:%s4628_s20] (!%p5438_p11)  ;;  %v4639_v36 = vld [vmem:[%s6996_s24 + $0x270] sm:%s4628_s20] (!%p5438_p11) }
 0x2d7   : > { %4638 = vst [vmem:[%s7813_s10] sm:%s4628_s20] (!%p5438_p11), %v4637_v35  ;;  %4640 = vst [vmem:[%s7813_s10 + $0x1328] sm:%s4628_s20] (!%p5438_p11), %v4639_v36 }
 0x2d8   : > { %v4641_v37 = vld [vmem:[%s6996_s24 + $0x4e0] sm:%s4628_s20] (!%p5438_p11)  ;;  %v4643_v38 = vld [vmem:[%s6996_s24 + $0x750] sm:%s4628_s20] (!%p5438_p11) }
 0x2d9   : > { %4642 = vst [vmem:[%s7813_s10 + $0x2650] sm:%s4628_s20] (!%p5438_p11), %v4641_v37  ;;  %4644 = vst [vmem:[%s7813_s10 + $0x3978] sm:%s4628_s20] (!%p5438_p11), %v4643_v38 }
 0x2dc PF: > { %p10_p12 = scmp.ge.s32.totalorder %s6465_s16, 10   ;;  %s8303_s12 = smov %s6356_s13 }
 0x2dd   : > { %s8304_s13 = smov %s6473_s19  ;;  %s8305_s14 = smov %s6465_s16 }
 0x2de   :  { %12 = sbr.rel (!%p10_p12) target bundleno = 2 (0x2), region = 190 }

</bundles_post_ra>
